<compile_context>
chip_gen: v5e
topology: v5e:2x2
jax: 0.10.0
libtpu: 0.0.40
codegen_flags: <defaults>
</compile_context>

<pallas_src>
import functools

import jax
import jax.numpy as jnp
from jax import lax
from jax.experimental import pallas as pl
from jax.experimental.pallas import tpu as pltpu


# ---------------------------------------------------------------------------
# Kernels
# ---------------------------------------------------------------------------

def _layernorm_f32(x, gamma, beta, eps):
    mu = jnp.mean(x, axis=-1, keepdims=True)
    xc = x - mu
    var = jnp.mean(xc * xc, axis=-1, keepdims=True)
    return xc * lax.rsqrt(var + eps) * gamma + beta


def _ff_resident_kernel(x_ref, g_ref, bt_ref, w1_ref, b1_ref, w2_ref, b2_ref,
                        o_ref, *, scale, eps, compute_dtype):
    """1-D grid over row tiles.  Weights/biases are VMEM-resident (DMA'd once)."""
    x = x_ref[...].astype(jnp.float32)                       # (tm, D)
    xn = _layernorm_f32(x, g_ref[...].astype(jnp.float32),
                        bt_ref[...].astype(jnp.float32), eps)

    # First matmul (MXU): feed in compute_dtype (bf16 on v6e/v7x), f32 accum.
    h = jnp.dot(xn.astype(compute_dtype), w1_ref[...].astype(compute_dtype),
                preferred_element_type=jnp.float32)
    h = h + b1_ref[...].astype(jnp.float32)
    # Swish in f32 (VPU + EUP); kept f32 so v5e (no bf16 VPU/EUP) stays exact.
    h = h * jax.nn.sigmoid(h)

    # Second matmul, f32 accumulation.
    y = jnp.dot(h.astype(compute_dtype), w2_ref[...].astype(compute_dtype),
                preferred_element_type=jnp.float32)
    y = y + b2_ref[...].astype(jnp.float32)

    # Scale(0.5, ...) + residual, all in f32, then cast to the output dtype.
    o_ref[...] = (y * scale + x).astype(o_ref.dtype)


def _ff_chunked_kernel(x_ref, g_ref, bt_ref, w1_ref, b1_ref, w2_ref, b2_ref,
                       o_ref, xn_ref, acc_ref, *, scale, eps, compute_dtype):
    """2-D grid (row tile, hidden chunk).  Hidden axis is the reduction axis."""
    k = pl.program_id(1)

    @pl.when(k == 0)
    def _init():
        x = x_ref[...].astype(jnp.float32)
        xn = _layernorm_f32(x, g_ref[...].astype(jnp.float32),
                            bt_ref[...].astype(jnp.float32), eps)
        xn_ref[...] = xn.astype(xn_ref.dtype)     # LN computed once per row tile
        acc_ref[...] = jnp.zeros_like(acc_ref)

    h = jnp.dot(xn_ref[...], w1_ref[...].astype(compute_dtype),
                preferred_element_type=jnp.float32)
    h = h + b1_ref[...].astype(jnp.float32)
    h = h * jax.nn.sigmoid(h)
    acc_ref[...] += jnp.dot(h.astype(compute_dtype),
                            w2_ref[...].astype(compute_dtype),
                            preferred_element_type=jnp.float32)

    @pl.when(k == pl.num_programs(1) - 1)
    def _finalize():
        y = acc_ref[...] + b2_ref[...].astype(jnp.float32)
        o_ref[...] = (y * scale + x_ref[...].astype(jnp.float32)).astype(o_ref.dtype)


# ---------------------------------------------------------------------------
# Wrapper
# ---------------------------------------------------------------------------

def _round_up(a, b):
    return (a + b - 1) // b * b


def _vmem_capacity_bytes():
    try:
        info = pltpu.get_tpu_info()
        cap = getattr(info, "vmem_capacity_bytes", None)
        if cap:
            return int(cap)
    except Exception:
        pass
    return 64 * 1024 * 1024   # conservative fallback (v7x has 64 MiB / TC)


def ff_half_step(x, ln_gamma, ln_beta, w1, b1, w2, b2, *,
                 scale=0.5, eps=1e-5, compute_dtype=jnp.bfloat16,
                 row_tile=512, hidden_tile=None):
    """x + scale * FF(LayerNorm(x)) as a fused, tiled Pallas TPU kernel.

    x: (B, S, D);  ln_gamma/ln_beta: (D,);  w1: (D, H), b1: (H,), w2: (H, D), b2: (D,)
    hidden_tile=None -> auto (resident weights if they fit VMEM, else chunked);
    an explicit hidden_tile forces the chunked path with that chunk size.
    """
    B, S, D = x.shape
    H = w1.shape[1]
    rows = B * S

    # Row tile: multiple of 8, and at least 2 row tiles whenever rows allow it
    # so the "parallel" axis shards across both v7x TensorCores.
    row_tile = max(8, _round_up(int(row_tile), 8))
    tm = max(8, min(row_tile, _round_up(pl.cdiv(rows, 2), 8)))

    x2 = x.reshape(rows, D)
    g2 = ln_gamma.reshape(1, D)
    bt2 = ln_beta.reshape(1, D)
    b2_2 = b2.reshape(1, D)

    xb = jnp.dtype(x.dtype).itemsize
    wb = jnp.dtype(w1.dtype).itemsize
    cb = jnp.dtype(compute_dtype).itemsize

    # Generation-aware VMEM budget (~48 MiB on v7x, ~96 MiB on v5e/v6e).
    budget = int(0.75 * _vmem_capacity_bytes())

    def est_resident(tm_):
        io = 2 * tm_ * D * (xb + xb)                       # x + out tiles (double-buffered)
        wt = 2 * (2 * D * H * wb + (H + 3 * D) * 4)        # resident weights / biases / LN params
        tmp = tm_ * (4 * D * 4 + H * (4 + cb))             # f32 temporaries + compute-dtype h
        return io + wt + tmp

    def est_chunked(tm_, th_):
        io = 2 * tm_ * D * (xb + xb)
        wt = 2 * (2 * D * th_ * wb + (th_ + 3 * D) * 4)
        tmp = tm_ * (2 * D * 4 + D * cb + th_ * (4 + cb))  # acc + xn scratch + h temporaries
        return io + wt + tmp

    use_resident = (hidden_tile is None) and (est_resident(tm) <= budget)

    kernel_kwargs = dict(scale=scale, eps=eps, compute_dtype=compute_dtype)

    if use_resident:
        grid = (pl.cdiv(rows, tm),)
        out2 = pl.pallas_call(
            functools.partial(_ff_resident_kernel, **kernel_kwargs),
            out_shape=jax.ShapeDtypeStruct((rows, D), x.dtype),
            grid=grid,
            in_specs=[
                pl.BlockSpec((tm, D), lambda i: (i, 0)),   # x row tile
                pl.BlockSpec((1, D), lambda i: (0, 0)),    # LN gamma (resident)
                pl.BlockSpec((1, D), lambda i: (0, 0)),    # LN beta  (resident)
                pl.BlockSpec((D, H), lambda i: (0, 0)),    # W1 (resident, DMA'd once)
                pl.BlockSpec((1, H), lambda i: (0, 0)),    # b1 (resident)
                pl.BlockSpec((H, D), lambda i: (0, 0)),    # W2 (resident, DMA'd once)
                pl.BlockSpec((1, D), lambda i: (0, 0)),    # b2 (resident)
            ],
            out_specs=pl.BlockSpec((tm, D), lambda i: (i, 0)),
            compiler_params=pltpu.CompilerParams(
                dimension_semantics=("parallel",),
                vmem_limit_bytes=budget),
        )(x2, g2, bt2, w1, b1.reshape(1, H), w2, b2_2)
        return out2.reshape(B, S, D)

    # ---- chunked fallback: hidden dim too large (or explicitly requested) ----
    th = int(hidden_tile) if hidden_tile is not None else 512
    th = max(128, (th // 128) * 128)
    th = min(th, max(128, _round_up(H, 128)))
    if hidden_tile is None:
        while th > 128 and est_chunked(tm, th) > budget:
            th = max(128, (th // 2) // 128 * 128)
        while tm > 8 and est_chunked(tm, th) > budget:
            tm = max(8, _round_up(tm // 2, 8))

    Hp = _round_up(H, th)
    w1c, b1c, w2c = w1, b1, w2
    if Hp != H:
        # Zero padding along H is exact: swish(0) = 0 and zero rows of W2
        # contribute nothing (weights only, cheap; activations are never padded).
        w1c = jnp.pad(w1, ((0, 0), (0, Hp - H)))
        b1c = jnp.pad(b1, ((0, Hp - H),))
        w2c = jnp.pad(w2, ((0, Hp - H), (0, 0)))

    grid = (pl.cdiv(rows, tm), Hp // th)
    out2 = pl.pallas_call(
        functools.partial(_ff_chunked_kernel, **kernel_kwargs),
        out_shape=jax.ShapeDtypeStruct((rows, D), x.dtype),
        grid=grid,
        in_specs=[
            pl.BlockSpec((tm, D), lambda i, k: (i, 0)),    # x tile (resident over k)
            pl.BlockSpec((1, D), lambda i, k: (0, 0)),     # LN gamma
            pl.BlockSpec((1, D), lambda i, k: (0, 0)),     # LN beta
            pl.BlockSpec((D, th), lambda i, k: (0, k)),    # W1 hidden chunk
            pl.BlockSpec((1, th), lambda i, k: (0, k)),    # b1 hidden chunk (tiny)
            pl.BlockSpec((th, D), lambda i, k: (k, 0)),    # W2 hidden chunk
            pl.BlockSpec((1, D), lambda i, k: (0, 0)),     # b2
        ],
        out_specs=pl.BlockSpec((tm, D), lambda i, k: (i, 0)),
        scratch_shapes=[
            pltpu.VMEM((tm, D), compute_dtype),            # LayerNorm(x), computed once
            pltpu.VMEM((tm, D), jnp.float32),              # f32 accumulator
        ],
        compiler_params=pltpu.CompilerParams(
            dimension_semantics=("parallel", "arbitrary"),
            vmem_limit_bytes=budget),
    )(x2, g2, bt2, w1c, b1c.reshape(1, Hp), w2c, b2_2)
    return out2.reshape(B, S, D)


# ---------------------------------------------------------------------------
# Reference + demo
# ---------------------------------------------------------------------------

def _reference(x, gamma, beta, w1, b1, w2, b2, *, scale, eps):
    hp = jax.lax.Precision.HIGHEST
    xf = x.astype(jnp.float32)
    mu = jnp.mean(xf, axis=-1, keepdims=True)
    var = jnp.mean((xf - mu) ** 2, axis=-1, keepdims=True)
    xn = (xf - mu) * lax.rsqrt(var + eps) * gamma.astype(jnp.float32) \
        + beta.astype(jnp.float32)
    h = jnp.dot(xn, w1.astype(jnp.float32), precision=hp) + b1.astype(jnp.float32)
    h = h * jax.nn.sigmoid(h)
    y = jnp.dot(h, w2.astype(jnp.float32), precision=hp) + b2.astype(jnp.float32)
    return (y * scale + xf).astype(x.dtype)


if __name__ == "__main__":
    key = jax.random.PRNGKey(0)
    k_x1, k_x2, k_g, k_b, k_w1, k_b1, k_w2, k_b2 = jax.random.split(key, 8)

    D, H = 128, 512   # dim=128, ff_mult=4
    gamma = 1.0 + 0.1 * jax.random.normal(k_g, (D,), jnp.float32)
    beta = 0.1 * jax.random.normal(k_b, (D,), jnp.float32)
    # bf16 weights: engages the bf16 MXU path and halves weight HBM bytes.
    w1 = (0.05 * jax.random.normal(k_w1, (D, H), jnp.float32)).astype(jnp.bfloat16)
    b1 = 0.05 * jax.random.normal(k_b1, (H,), jnp.float32)
    w2 = (0.05 * jax.random.normal(k_w2, (H, D), jnp.float32)).astype(jnp.bfloat16)
    b2 = 0.05 * jax.random.normal(k_b2, (D,), jnp.float32)

    # 1) Resident-weight fast path: rows=512 -> two row tiles of 256, 1-D grid,
    #    weights DMA'd once, no accumulator.
    B1, S1 = 4, 128
    x1 = jax.random.normal(k_x1, (B1, S1, D), jnp.float32)
    out1 = jax.block_until_ready(ff_half_step(x1, gamma, beta, w1, b1, w2, b2))
    ref1 = _reference(x1, gamma, beta, w1, b1, w2, b2, scale=0.5, eps=1e-5)
    assert out1.shape == x1.shape and out1.dtype == x1.dtype
    assert jnp.allclose(out1, ref1, atol=3e-2, rtol=3e-2), \
        float(jnp.max(jnp.abs(out1 - ref1)))

    # 2) Hidden-chunked fallback (forced via hidden_tile=256) with a partial
    #    edge row tile (rows=300 not a multiple of the row tile, no host pad).
    B2, S2 = 3, 100
    x2 = jax.random.normal(k_x2, (B2, S2, D), jnp.float32)
    out2 = jax.block_until_ready(
        ff_half_step(x2, gamma, beta, w1, b1, w2, b2, hidden_tile=256))
    ref2 = _reference(x2, gamma, beta, w1, b1, w2, b2, scale=0.5, eps=1e-5)
    assert out2.shape == x2.shape and out2.dtype == x2.dtype
    assert jnp.allclose(out2, ref2, atol=3e-2, rtol=3e-2), \
        float(jnp.max(jnp.abs(out2 - ref2)))

    print("KERNEL_OK")
</pallas_src>

<mosaic_0001>
module attributes {stable_mosaic.version = 11 : i64} {
  func.func @_ff_resident_kernel(%arg0: i32, %arg1: memref<256x128xf32, #tpu.memory_space<vmem>>, %arg2: memref<1x128xf32, #tpu.memory_space<vmem>>, %arg3: memref<1x128xf32, #tpu.memory_space<vmem>>, %arg4: memref<128x512xbf16, #tpu.memory_space<vmem>>, %arg5: memref<1x512xf32, #tpu.memory_space<vmem>>, %arg6: memref<512x128xbf16, #tpu.memory_space<vmem>>, %arg7: memref<1x128xf32, #tpu.memory_space<vmem>>, %arg8: memref<256x128xf32, #tpu.memory_space<vmem>>) attributes {dimension_semantics = [#tpu.dimension_semantics<parallel>], iteration_bounds = array<i64: 2>, scalar_prefetch = 0 : i64, scratch_operands = 0 : i64, tpu.core_type = #tpu.core_type<tc>, window_params = [{transform_indices = @transform_0, window_bounds = array<i64: 256, 128>}, {pipeline_mode = #tpu.pipeline_mode<synchronous>, transform_indices = @transform_1, window_bounds = array<i64: 1, 128>}, {pipeline_mode = #tpu.pipeline_mode<synchronous>, transform_indices = @transform_2, window_bounds = array<i64: 1, 128>}, {pipeline_mode = #tpu.pipeline_mode<synchronous>, transform_indices = @transform_3, window_bounds = array<i64: 128, 512>}, {pipeline_mode = #tpu.pipeline_mode<synchronous>, transform_indices = @transform_4, window_bounds = array<i64: 1, 512>}, {pipeline_mode = #tpu.pipeline_mode<synchronous>, transform_indices = @transform_5, window_bounds = array<i64: 512, 128>}, {pipeline_mode = #tpu.pipeline_mode<synchronous>, transform_indices = @transform_6, window_bounds = array<i64: 1, 128>}, {transform_indices = @transform_7, window_bounds = array<i64: 256, 128>}]} {
    %c0 = arith.constant 0 : index
    %c0_0 = arith.constant 0 : index
    %0 = vector.load %arg1[%c0, %c0_0] : memref<256x128xf32, #tpu.memory_space<vmem>>, vector<256x128xf32>
    %c0_1 = arith.constant 0 : index
    %c0_2 = arith.constant 0 : index
    %1 = vector.load %arg2[%c0_1, %c0_2] : memref<1x128xf32, #tpu.memory_space<vmem>>, vector<1x128xf32>
    %c0_3 = arith.constant 0 : index
    %c0_4 = arith.constant 0 : index
    %2 = vector.load %arg3[%c0_3, %c0_4] : memref<1x128xf32, #tpu.memory_space<vmem>>, vector<1x128xf32>
    %cst = arith.constant dense<0.000000e+00> : vector<256xf32>
    %3 = vector.multi_reduction <add>, %0, %cst [1] : vector<256x128xf32> to vector<256xf32>
    %4 = vector.shape_cast %3 : vector<256xf32> to vector<256x1xf32>
    %cst_5 = arith.constant 1.280000e+02 : f32
    %5 = vector.broadcast %cst_5 : f32 to vector<256x1xf32>
    %6 = arith.divf %4, %5 : vector<256x1xf32>
    %7 = vector.broadcast %6 : vector<256x1xf32> to vector<256x128xf32>
    %8 = arith.subf %0, %7 : vector<256x128xf32>
    %9 = arith.mulf %8, %8 : vector<256x128xf32>
    %cst_6 = arith.constant dense<0.000000e+00> : vector<256xf32>
    %10 = vector.multi_reduction <add>, %9, %cst_6 [1] : vector<256x128xf32> to vector<256xf32>
    %11 = vector.shape_cast %10 : vector<256xf32> to vector<256x1xf32>
    %cst_7 = arith.constant 1.280000e+02 : f32
    %12 = vector.broadcast %cst_7 : f32 to vector<256x1xf32>
    %13 = arith.divf %11, %12 : vector<256x1xf32>
    %cst_8 = arith.constant 9.99999974E-6 : f32
    %14 = vector.broadcast %cst_8 : f32 to vector<256x1xf32>
    %15 = arith.addf %13, %14 : vector<256x1xf32>
    %16 = math.rsqrt %15 : vector<256x1xf32>
    %17 = vector.broadcast %16 : vector<256x1xf32> to vector<256x128xf32>
    %18 = arith.mulf %8, %17 : vector<256x128xf32>
    %19 = vector.broadcast %1 : vector<1x128xf32> to vector<256x128xf32>
    %20 = arith.mulf %18, %19 : vector<256x128xf32>
    %21 = vector.broadcast %2 : vector<1x128xf32> to vector<256x128xf32>
    %22 = arith.addf %20, %21 : vector<256x128xf32>
    %23 = arith.truncf %22 : vector<256x128xf32> to vector<256x128xbf16>
    %c0_9 = arith.constant 0 : index
    %c0_10 = arith.constant 0 : index
    %24 = vector.load %arg4[%c0_9, %c0_10] : memref<128x512xbf16, #tpu.memory_space<vmem>>, vector<128x512xbf16>
    %cst_11 = arith.constant dense<0.000000e+00> : vector<256x512xf32>
    %25 = tpu.matmul %23, %24, %cst_11 {dimension_numbers = #tpu.dot_dimension_numbers<[1], [0], [0], [1], [0, 0, 1, 1], [], []>} : vector<256x128xbf16>, vector<128x512xbf16>, vector<256x512xf32> -> vector<256x512xf32>
    %c0_12 = arith.constant 0 : index
    %c0_13 = arith.constant 0 : index
    %26 = vector.load %arg5[%c0_12, %c0_13] : memref<1x512xf32, #tpu.memory_space<vmem>>, vector<1x512xf32>
    %27 = vector.broadcast %26 : vector<1x512xf32> to vector<256x512xf32>
    %28 = arith.addf %25, %27 : vector<256x512xf32>
    %29 = arith.negf %28 : vector<256x512xf32>
    %30 = math.exp %29 : vector<256x512xf32>
    %cst_14 = arith.constant 1.000000e+00 : f32
    %31 = vector.broadcast %cst_14 : f32 to vector<256x512xf32>
    %32 = arith.addf %31, %30 : vector<256x512xf32>
    %33 = arith.divf %31, %32 : vector<256x512xf32>
    %34 = arith.mulf %28, %33 : vector<256x512xf32>
    %35 = arith.truncf %34 : vector<256x512xf32> to vector<256x512xbf16>
    %c0_15 = arith.constant 0 : index
    %c0_16 = arith.constant 0 : index
    %36 = vector.load %arg6[%c0_15, %c0_16] : memref<512x128xbf16, #tpu.memory_space<vmem>>, vector<512x128xbf16>
    %cst_17 = arith.constant dense<0.000000e+00> : vector<256x128xf32>
    %37 = tpu.matmul %35, %36, %cst_17 {dimension_numbers = #tpu.dot_dimension_numbers<[1], [0], [0], [1], [0, 0, 1, 1], [], []>} : vector<256x512xbf16>, vector<512x128xbf16>, vector<256x128xf32> -> vector<256x128xf32>
    %c0_18 = arith.constant 0 : index
    %c0_19 = arith.constant 0 : index
    %38 = vector.load %arg7[%c0_18, %c0_19] : memref<1x128xf32, #tpu.memory_space<vmem>>, vector<1x128xf32>
    %39 = vector.broadcast %38 : vector<1x128xf32> to vector<256x128xf32>
    %40 = arith.addf %37, %39 : vector<256x128xf32>
    %cst_20 = arith.constant 5.000000e-01 : f32
    %41 = vector.broadcast %cst_20 : f32 to vector<256x128xf32>
    %42 = arith.mulf %40, %41 : vector<256x128xf32>
    %43 = arith.addf %42, %0 : vector<256x128xf32>
    %c0_21 = arith.constant 0 : index
    %c0_22 = arith.constant 0 : index
    %44 = vector.load %arg8[%c0_21, %c0_22] : memref<256x128xf32, #tpu.memory_space<vmem>>, vector<256x128xf32>
    tpu.vector_store %arg8[%c0_21, %c0_22], %43 {strides = array<i32>} : memref<256x128xf32, #tpu.memory_space<vmem>>, vector<256x128xf32>,
    return
  }
  func.func @transform_0(%arg0: i32) -> (i32, i32) {
    %c0_i32 = arith.constant 0 : i32
    %c0_i32_0 = arith.constant 0 : i32
    return %arg0, %c0_i32 : i32, i32
  }
  func.func @transform_1(%arg0: i32) -> (i32, i32) {
    %c0_i32 = arith.constant 0 : i32
    %c0_i32_0 = arith.constant 0 : i32
    %c0_i32_1 = arith.constant 0 : i32
    return %c0_i32, %c0_i32_0 : i32, i32
  }
  func.func @transform_2(%arg0: i32) -> (i32, i32) {
    %c0_i32 = arith.constant 0 : i32
    %c0_i32_0 = arith.constant 0 : i32
    %c0_i32_1 = arith.constant 0 : i32
    return %c0_i32, %c0_i32_0 : i32, i32
  }
  func.func @transform_3(%arg0: i32) -> (i32, i32) {
    %c0_i32 = arith.constant 0 : i32
    %c0_i32_0 = arith.constant 0 : i32
    %c0_i32_1 = arith.constant 0 : i32
    return %c0_i32, %c0_i32_0 : i32, i32
  }
  func.func @transform_4(%arg0: i32) -> (i32, i32) {
    %c0_i32 = arith.constant 0 : i32
    %c0_i32_0 = arith.constant 0 : i32
    %c0_i32_1 = arith.constant 0 : i32
    return %c0_i32, %c0_i32_0 : i32, i32
  }
  func.func @transform_5(%arg0: i32) -> (i32, i32) {
    %c0_i32 = arith.constant 0 : i32
    %c0_i32_0 = arith.constant 0 : i32
    %c0_i32_1 = arith.constant 0 : i32
    return %c0_i32, %c0_i32_0 : i32, i32
  }
  func.func @transform_6(%arg0: i32) -> (i32, i32) {
    %c0_i32 = arith.constant 0 : i32
    %c0_i32_0 = arith.constant 0 : i32
    %c0_i32_1 = arith.constant 0 : i32
    return %c0_i32, %c0_i32_0 : i32, i32
  }
  func.func @transform_7(%arg0: i32) -> (i32, i32) {
    %c0_i32 = arith.constant 0 : i32
    %c0_i32_0 = arith.constant 0 : i32
    return %arg0, %c0_i32 : i32, i32
  }
}

</mosaic_0001>

<bundles_post_ra>
// kernel: tpu_custom_call.1
= control target key start
LH: loop header
LB: loop body
LE: loop exit
PB: predicated region body
PF: predicated region fallthrough
CT: control target
= control target key end

     0   :  { %s12997_s0 = inlined_call_operand.hbm [shape: f32[512,128], index: 0, kind: input, shape index: {}]   ;;  %s12998_s1 = inlined_call_operand.hbm [shape: f32[1,128], index: 1, kind: input, shape index: {}]   ;;  %s12999_s2 = inlined_call_operand.vmem [shape: f32[1,128], index: 2, kind: input, shape index: {}]   ;;  %s13000_s3 = inlined_call_operand.hbm [shape: bf16[128,512], index: 3, kind: input, shape index: {}]   ;;  %s13001_s4 = inlined_call_operand.hbm [shape: f32[1,512], index: 4, kind: input, shape index: {}]   ;;  %s13002_s5 = inlined_call_operand.hbm [shape: bf16[512,128], index: 5, kind: input, shape index: {}]   ;;  %s13003_s6 = inlined_call_operand.vmem [shape: f32[1,128], index: 6, kind: input, shape index: {}]   ;;  %s13004_s7 = inlined_call_operand.hbm [shape: f32[512,128], index: 7, kind: output, shape index: {}]  }
   0x1   :  { %13134 = sst [smem:[#allocation86_spill]] %s12998_s1 }
   0x2   :  { %12 = vsyncpa [#allocation3], 0 }
   0x3   :  { %14 = vsyncpa [#allocation3 + $0x1], 0 }
   0x4   :  { %15 = vsyncpa [#allocation6], 0 }
   0x5   :  { %16 = vsyncpa [#allocation9], 0 }
   0x6   :  { %17 = vsyncpa [#allocation4], 0 }
   0x7   :  { %19 = vsyncpa [#allocation4 + $0x1], 0  ;;  %s6625_s24 = smov 0   ;;  %s6627_s25 = smov 0  }
   0x8   :  { %s6629_s26 = smov 0   ;;  %s6631_s27 = smov 0  }
   0x9 LB: > { %s6646_s28 = sadd.s32 4294967295, %s6570_s27   ;;  %s5151_s29 = sadd.s32 4294967294, %s6570_s27   ;;  %s6570_s27 = sphi %s6631_s27, %s14054_s27   ;;  %s6566_s26 = sphi %s6629_s26, %s14053_s26   ;;  %s6562_s25 = sphi %s6627_s25, %s14052_s25   ;;  %s6558_s24 = sphi %s6625_s24, %s14051_s24  }
   0xa   : > { %p45_p0 = scmp.ne.s32.totalorder %s6562_s25, %s6558_s24  ;;  %p46_p1 = scmp.eq.s32.totalorder %s6646_s28, 0 }
   0xb   : > { %p195_p2 = scmp.eq.s32.totalorder %s6646_s28, 1  ;;  %p201_p3 = scmp.eq.s32.totalorder %s5151_s29, 1 }
   0xc   : > { %p6655_p4 = por %p46_p1, %p45_p0  ;;  %p5152_p5 = scmp.ge.s32.totalorder %s6570_s27, 1 }
   0xd   : > { %p6660_p6 = por %p201_p3, %p45_p0  ;;  %p208_p7 = scmp.lt.s32.totalorder %s6570_s27, 3 }
   0xe   : > { %s13137_s1 = sld [smem:[#allocation86_spill]]  ;;  %s6572_s13 = smov [#allocation5]  }
   0xf   : > { %p6668_p8 = pnand %p5152_p5, %p208_p7  ;;  %s222_s14 = sshll.u32 %s6572_s13, 4  ;;  %s223_s14 = int_to_ptr.vmem [resolvable:$true] %s222_s14 }
  0x10   : > { %s249_s17 = sshll.u32 %s13001_s4, 4  ;;  %s234_s21 = sshll.u32 %s13000_s3, 4  ;;  %s250_s17 = int_to_ptr.hbm [resolvable:$true] %s249_s17  ;;  %s235_s21 = int_to_ptr.hbm [resolvable:$true] %s234_s21 }
  0x11   : > { %p5643_p10 = pneg %p6668_p8  ;;  %s6573_s22 = smov [#allocation8]  }
  0x12   : > { %s251_s23 = sshll.u32 %s6573_s22, 4  ;;  %s6574_s29 = smov [#allocation7]   ;;  %s252_s23 = int_to_ptr.vmem [resolvable:$true] %s251_s23 }
  0x13   : > { %p6680_p11 = pnand %p5643_p10, %p46_p1  ;;  %s236_s9 = sshll.u32 %s6574_s29, 4  ;;  %s237_s9 = int_to_ptr.vmem [resolvable:$true] %s236_s9 }
  0x14   : > { %s220_s11 = sshll.u32 %s13137_s1, 4  ;;  %s260_s15 = sshll.u32 %s13002_s5, 4  ;;  %s221_s11 = int_to_ptr.hbm [resolvable:$true] %s220_s11  ;;  %s261_s15 = int_to_ptr.hbm [resolvable:$true] %s260_s15 }
  0x15   : > { %5646 = dma.hbm_to_vmem [thread:$0]  (!%p6680_p11), %s221_s11, 16, %s223_s14, [#allocation6]  }
  0x16   : > { %5652 = dma.hbm_to_vmem [thread:$0]  (!%p6680_p11), %s250_s17, 64, %s252_s23, [#allocation9]  }
  0x17   : > { %s6575_s16 = smov 256   ;;  %s6576_s11 = smov 16  }
  0x18   : > { %5649 = dma.hbm_to_vmem [thread:$0]  (!%p6680_p11), %s235_s21, 4096, %s237_s9, [#allocation6], %s6575_s16, %s6575_s16, %s6576_s11  }
  0x19   : > { %s6577_s14 = smov [#allocation10]   ;;  %s6578_s19 = smov 64  }
  0x1a   : > { %s262_s17 = sshll.u32 %s6577_s14, 4  ;;  %s6579_s20 = smov 4   ;;  %s263_s17 = int_to_ptr.vmem [resolvable:$true] %s262_s17 }
  0x1b   : > { %5655 = dma.hbm_to_vmem [thread:$0]  (!%p6680_p11), %s261_s15, 4096, %s263_s17, [#allocation9], %s6578_s19, %s6578_s19, %s6579_s20  }
  0x1c   : > { %s6699_s22 = sadd.s32 1, %s6570_s27   ;;  %s32_s29 = sadd.s32 1, %s6566_s26 }
  0x1d   : > { %s29_s23 = ssub.s32 %s6570_s27, %s6699_s22  ;;  %p39_p13 = scmp.ne.s32.totalorder %s6566_s26, %s6562_s25 }
  0x1e   : > { %p30_p12 = scmp.eq.s32.totalorder %s29_s23, 0  ;;  %p40_p0 = scmp.eq.s32.totalorder %s6570_s27, 0 }
  0x1f   : > { %p6712_p5 = por %p195_p2, %p39_p13  ;;  %p5668_p7 = scmp.lt.s32.totalorder %s6570_s27, 2 }
  0x20   : > { %s6708_s21 = scalar_select %p30_p12, %s6566_s26, %s32_s29  }
  0x21   : > { %p41_p3 = por %p40_p0, %p39_p13  ;;  %s279_s10 = sand.u32 1, %s6566_s26  }
  0x22   : > { %s5158_s18 = sshll.u32 %s279_s10, 8  ;;  %s5557_s13 = sshll.u32 %s6570_s27, 8 }
  0x23   : > { %s288_s11 = scalar_lea.hbm %s12997_s0, %s5557_s13  ;;  %s283_s14 = scalar_lea.vmem [#allocation2], %s5158_s18 }
  0x24   : > { %s291_s17 = sshll.u32 %s283_s14, 4  ;;  %s289_s19 = sshll.u32 %s288_s11, 4  ;;  %s292_s17 = int_to_ptr.vmem [resolvable:$true] %s291_s17  ;;  %s290_s19 = int_to_ptr.hbm [resolvable:$true] %s289_s19 }
  0x25   : > { %p6722_p10 = pnand %p5668_p7, %p41_p3  ;;  %s280_s23 = scalar_lea.sflag [#allocation3], %s279_s10 }
  0x26   : > { %s6466_s29 = sshra.s32 %s290_s19, 4  ;;  %s6473_s15 = scalar_lea.hbm %s12997_s0, 512  ;;  %s6467_s29 = int_to_ptr.hbm [resolvable:$true] %s6466_s29 }
  0x27   : > { %s6468_s1 = scalar_lea.hbm %s6467_s29, 256  ;;  %p6470_p11 = pneg %p6722_p10 }
  0x28   : > { %p6469_p2 = scmp.ne.s32.totalorder %s6467_s29, %s6468_s1  ;;  %p6474_p0 = scmp.lt.s32.totalorder %s6467_s29, %s12997_s0 }
  0x29   : > { %p6475_p3 = scmp.lt.s32.totalorder %s6473_s15, %s6468_s1 }
  0x2a   : > { %p6471_p12 = pnand %p6470_p11, %p6469_p2 }
  0x2b   : > { %p6476_p7 = por %p6475_p3, %p6474_p0 }
  0x2c   : > { %p6472_p13 = pneg %p6471_p12 }
  0x2e   : > { %p6477_p9 = pnand %p6476_p7, %p6472_p13 }
  0x30   : > { %6480 = shalt.err (!%p6477_p9)
}
  0x31   : > { %s6580_s10 = smov 128   ;;  %s6581_s14 = smov 8  }
  0x32   : > { %5659 = dma.hbm_to_vmem [thread:$0]  (!%p6722_p10), %s290_s19, 4096, %s292_s17, %s280_s23, %s6580_s10, %s6580_s10, %s6581_s14  }
  0x33   : > { %303 = sbr.rel (%p6668_p8) target bundleno = 1423 (0x58f), region = 48 }
  0x38   : > { %s6739_s13 = sand.u32 1, %s6562_s25  }
  0x39   : > { %s5162_s29 = sshll.u32 %s6739_s13, 8  ;;  %s306_s1 = scalar_lea.sflag [#allocation3], %s6739_s13 }
  0x3a   : > { %s6745_s18 = scalar_lea.vmem [#allocation2], %s5162_s29 }
  0x3b   : > { %6541 = dma.done.wait (%p6655_p4), %s306_s1, 4096  }
  0x3c   : > { %6543 = vsyncadd (%p6655_p4), %s306_s1, 4294963200 }
  0x3d   : > { %6545 = dma.done.wait (%p46_p1), [#allocation6], 4112  }
  0x3e   : > { %6547 = vsyncadd (%p46_p1), [#allocation6], 4294963184 }
  0x3f   : > { %6549 = dma.done.wait (%p46_p1), [#allocation9], 4160  }
  0x40   : > { %6551 = vsyncadd (%p46_p1), [#allocation9], 4294963136  ;;  %v365_v0 = vld [vmem:[%s6745_s18 + $0x10] sm:$0xff]  ;;  %v363_v1 = vld [vmem:[%s6745_s18] sm:$0xff]  ;;  %v6582_v7 = vmov 128.0   ;;  %s12365_s30 = scalar_lea.vmem [#allocation11], %s5162_s29 }
  0x41   : > { %401 = vadd.xlane.f32.xlu1 %v365_v0  ;;  %397 = vadd.xlane.f32.xlu0 %v363_v1  ;;  %v367_v2 = vld [vmem:[%s6745_s18 + $0x20] sm:$0xff]  ;;  %v366_v3 = vld [vmem:[%s6745_s18 + $0x18] sm:$0xff]  ;;  %v364_v4 = vld [vmem:[%s6745_s18 + $0x8] sm:$0xff]  ;;  %5722 = vrcp.f32 %v6582_v7  ;;  %s5622_s17 = sshll.u32 %s6646_s28, 8  ;;  %s5037_s15 = sshll.u32 %s12365_s30, 4  ;;  %s5038_s15 = int_to_ptr.vmem [resolvable:$true] %s5037_s15 }
  0x42   : > { %405 = vadd.xlane.f32.xlu2 %v367_v2  ;;  %v368_v5 = vld [vmem:[%s6745_s18 + $0x28] sm:$0xff]  ;;  %v369_v6 = vld [vmem:[%s6745_s18 + $0x30] sm:$0xff]  ;;  %v6782_v28 = vld [vmem:[%s6745_s18 + $0x38] sm:$0xff]  ;;  %s5036_s23 = scalar_lea.hbm %s13004_s7, %s5622_s17  ;;  %s5025_s28 = scalar_lea.sflag [#allocation4], %s6739_s13 }
  0x43   : > { %v6797_v36 = vld [vmem:[%s6745_s18 + $0x40] sm:$0xff]  ;;  %v6808_v42 = vld [vmem:[%s6745_s18 + $0x58] sm:$0xff]  ;;  %v6811_v43 = vld [vmem:[%s6745_s18 + $0x48] sm:$0xff]  ;;  %s5039_s16 = sshll.u32 %s5036_s23, 4  ;;  %s6516_s29 = scalar_lea.hbm %s13004_s7, 512  ;;  %s5040_s16 = int_to_ptr.hbm [resolvable:$true] %s5039_s16 }
  0x44   : > { %v6820_v46 = vld [vmem:[%s6745_s18 + $0x60] sm:$0xff]  ;;  %v6823_v47 = vld [vmem:[%s6745_s18 + $0x50] sm:$0xff]  ;;  %v6828_v48 = vld [vmem:[%s6745_s18 + $0x68] sm:$0xff]  ;;  %s6510_s11 = sshra.s32 %s5040_s16, 4  ;;  %s6511_s11 = int_to_ptr.hbm [resolvable:$true] %s6510_s11 }
  0x45   : > { %v6832_v49 = vld [vmem:[%s6745_s18 + $0x70] sm:$0xff]  ;;  %v5282_v50 = vld [vmem:[#allocation7 + $0xe0] sm:$0xf]  ;;  %v5586_v52 = vld [vmem:[#allocation7 + $0xe4] sm:$0xf]  ;;  %s6512_s10 = scalar_lea.hbm %s6511_s11, 256  ;;  %p6517_p9 = scmp.lt.s32.totalorder %s6511_s11, %s13004_s7 }
  0x46   : > { %v5588_v51 = vld [vmem:[#allocation7 + $0xec] sm:$0xf0]  ;;  %v5284_v54 = vld [vmem:[#allocation7 + $0xf0] sm:$0xf0]  ;;  %v5290_v55 = vld [vmem:[#allocation7 + $0xe8] sm:$0xf]  ;;  %p6513_p1 = scmp.ne.s32.totalorder %s6511_s11, %s6512_s10  ;;  %p6518_p10 = scmp.lt.s32.totalorder %s6516_s29, %s6512_s10 }
  0x47   : > { %v5723_v8 = vpop.eup %5722  ;;  %v5283_v53 = vor.u32 %v5588_v51, %v5282_v50  ;;  %v5589_v56 = vld [vmem:[#allocation7 + $0xf4] sm:$0xf0]  ;;  %v5287_v57 = vor.u32 %v5586_v52, %v5284_v54  ;;  %v5587_v59 = vld [vmem:[#allocation7 + $0xec] sm:$0xf]  ;;  %v5292_v60 = vld [vmem:[#allocation7 + $0xf8] sm:$0xf0] }
  0x48   : > { %v462_v9 = vmul.f32 128.0, %v5723_v8  ;;  %vm466_vm0 = vweird.f32 %v5723_v8  ;;  %v5291_v58 = vor.u32 %v5589_v56, %v5290_v55  ;;  %v5295_v61 = vor.u32 %v5587_v59, %v5292_v60  ;;  %v5266_v62 = vld [vmem:[#allocation7 + $0xc0] sm:$0xf]  ;;  %v5584_v63 = vld [vmem:[#allocation7 + $0xcc] sm:$0xf0]  ;;  %p6514_p4 = pnand %p6513_p1, %p6712_p5  ;;  %p6519_p2 = por %p6518_p10, %p6517_p9 }
  0x49   : > { %403 = vadd.xlane.f32.xlu1 %v366_v3  ;;  %399 = vadd.xlane.f32.xlu0 %v364_v4  ;;  %v5583_v7 = vld [vmem:[#allocation7 + $0xcc] sm:$0xf]  ;;  %v5218_v50 = vld [vmem:[#allocation7 + $0x60] sm:$0xf]  ;;  %v5572_v51 = vld [vmem:[#allocation7 + $0x6c] sm:$0xf0] }
  0x4a   : > { %407 = vadd.xlane.f32.xlu2 %v368_v5  ;;  %v463_v10 = vsub.f32 1.0, %v462_v9  ;;  %1332 = vmatpush.bf16.msra.mxu0 %v5283_v53  ;;  %v5570_v52 = vld [vmem:[#allocation7 + $0x64] sm:$0xf]  ;;  %v5219_v53 = vor.u32 %v5572_v51, %v5218_v50  ;;  %v5220_v54 = vld [vmem:[#allocation7 + $0x70] sm:$0xf0]  ;;  %p6515_p8 = pneg %p6514_p4 }
  0x4b   : > { %1421 = vmatpush.bf16.msra.mxu1 %v5287_v57  ;;  %1510 = vmatpush.bf16.msra.mxu2 %v5291_v58  ;;  %v5226_v55 = vld [vmem:[#allocation7 + $0x68] sm:$0xf]  ;;  %v5573_v56 = vld [vmem:[#allocation7 + $0x74] sm:$0xf0]  ;;  %v5223_v57 = vor.u32 %v5570_v52, %v5220_v54  ;;  %v5571_v59 = vld [vmem:[#allocation7 + $0x6c] sm:$0xf] }
  0x4c   : > { %v464_v11 = vmul.f32 %v5723_v8, %v463_v10  ;;  %1599 = vmatpush.bf16.msra.mxu3 %v5295_v61  ;;  %v5250_v10 = vld [vmem:[#allocation7 + $0xa0] sm:$0xf]  ;;  %v5227_v58 = vor.u32 %v5573_v56, %v5226_v55  ;;  %v5228_v60 = vld [vmem:[#allocation7 + $0x78] sm:$0xf0]  ;;  %p6520_p11 = pnand %p6519_p2, %p6515_p8 }
  0x4d   : > { %v5231_v61 = vor.u32 %v5571_v59, %v5228_v60  ;;  %v5180_v50 = vld [vmem:[#allocation7 + $0x18] sm:$0xf0] }
  0x4e   : > { %v465_v12 = vadd.f32 %v5723_v8, %v464_v11  ;;  %v5580_v11 = vld [vmem:[#allocation7 + $0xac] sm:$0xf0] }
  0x50   : > { %v6766_v13 = vsel %vm466_vm0, %v5723_v8, %v465_v12  ;;  %v5276_v8 = vld [vmem:[#allocation7 + $0xd8] sm:$0xf0]  ;;  %v5578_v12 = vld [vmem:[#allocation7 + $0xa4] sm:$0xf] }
  0x51   : > { %v5279_v9 = vor.u32 %v5583_v7, %v5276_v8  ;;  %v5567_v7 = vld [vmem:[#allocation7 + $0x4c] sm:$0xf]  ;;  %v5212_v8 = vld [vmem:[#allocation7 + $0x58] sm:$0xf0] }
  0x52   : > { %409 = vadd.xlane.f32.xlu2 %v369_v6 }
  0x53   : > { %1600 = vmatpush.bf16.msra.mxu3 %v5279_v9  ;;  %v5215_v9 = vor.u32 %v5567_v7, %v5212_v8 }
  0xb4   : > { %v402_v14 = vpop.xlane.xlu1 %401  ;;  %v398_v15 = vpop.xlane.xlu0 %397 }
  0xb5   : > { %v468_v16 = vmul.f32 %v6766_v13, %v398_v15  ;;  %v406_v18 = vpop.xlane.xlu2 %405  ;;  %v470_v27 = vmul.f32 %v6766_v13, %v402_v14  ;;  %v5251_v14 = vor.u32 %v5580_v11, %v5250_v10  ;;  %v5252_v15 = vld [vmem:[#allocation7 + $0xb0] sm:$0xf0]  ;;  %v5186_v10 = vld [vmem:[#allocation7 + $0x20] sm:$0xf]  ;;  %v5564_v11 = vld [vmem:[#allocation7 + $0x2c] sm:$0xf0] }
  0xb6   : > { %v472_v26 = vmul.f32 %v6766_v13, %v406_v18  ;;  %v5581_v18 = vld [vmem:[#allocation7 + $0xb4] sm:$0xf0] }
  0xb7   : > { %v6769_v17 = vsub.f32 %v363_v1, %v468_v16  ;;  %v6791_v33 = vsub.f32 %v365_v0, %v470_v27  ;;  %v5582_v0 = vld [vmem:[#allocation7 + $0xc4] sm:$0xf]  ;;  %v5267_v1 = vor.u32 %v5584_v63, %v5266_v62  ;;  %v5258_v16 = vld [vmem:[#allocation7 + $0xa8] sm:$0xf]  ;;  %v5576_v27 = vld [vmem:[#allocation7 + $0x8c] sm:$0xf0] }
  0xb8   : > { %v6789_v32 = vsub.f32 %v367_v2, %v472_v26  ;;  %v5268_v2 = vld [vmem:[#allocation7 + $0xd0] sm:$0xf0]  ;;  %v5234_v26 = vld [vmem:[#allocation7 + $0x80] sm:$0xf]  ;;  %v5568_v63 = vld [vmem:[#allocation7 + $0x4c] sm:$0xf0] }
  0xb9   : > { %v532_v19 = vmul.f32 %v6769_v17, %v6769_v17  ;;  %v534_v37 = vmul.f32 %v6791_v33, %v6791_v33  ;;  %1333 = vmatpush.bf16.msra.mxu0 %v5267_v1  ;;  %v5202_v62 = vld [vmem:[#allocation7 + $0x40] sm:$0xf] }
  0xba   : > { %v536_v34 = vmul.f32 %v6789_v32, %v6789_v32  ;;  %v5203_v1 = vor.u32 %v5568_v63, %v5202_v62 }
  0xbb   : > { %564 = vadd.xlane.f32.xlu0 %v532_v19  ;;  %v5255_v19 = vor.u32 %v5578_v12, %v5252_v15  ;;  %v5562_v12 = vld [vmem:[#allocation7 + $0x24] sm:$0xf]  ;;  %v5187_v15 = vor.u32 %v5564_v11, %v5186_v10 }
  0xbc   : > { %v404_v20 = vpop.xlane.xlu1 %403  ;;  %v400_v21 = vpop.xlane.xlu0 %399 }
  0xbd   : > { %v471_v22 = vmul.f32 %v6766_v13, %v404_v20  ;;  %v469_v23 = vmul.f32 %v6766_v13, %v400_v21  ;;  %v408_v31 = vpop.xlane.xlu2 %407  ;;  %v5259_v20 = vor.u32 %v5581_v18, %v5258_v16  ;;  %v5579_v21 = vld [vmem:[#allocation7 + $0xac] sm:$0xf]  ;;  %1334 = vmatpush.bf16.msra.mxu0 %v5251_v14  ;;  %v5188_v16 = vld [vmem:[#allocation7 + $0x30] sm:$0xf0]  ;;  %v5194_v18 = vld [vmem:[#allocation7 + $0x28] sm:$0xf] }
  0xbe   : > { %v473_v35 = vmul.f32 %v6766_v13, %v408_v31  ;;  %v5236_v31 = vld [vmem:[#allocation7 + $0x90] sm:$0xf0] }
  0xbf   : > { %v6775_v24 = vsub.f32 %v366_v3, %v471_v22  ;;  %v6777_v25 = vsub.f32 %v364_v4, %v469_v23  ;;  %v5274_v3 = vld [vmem:[#allocation7 + $0xc8] sm:$0xf]  ;;  %v5585_v4 = vld [vmem:[#allocation7 + $0xd4] sm:$0xf0]  ;;  %v5260_v22 = vld [vmem:[#allocation7 + $0xb8] sm:$0xf0] }
  0xc0   : > { %v6802_v38 = vsub.f32 %v368_v5, %v473_v35  ;;  %v5271_v5 = vor.u32 %v5582_v0, %v5268_v2  ;;  %v5263_v23 = vor.u32 %v5579_v21, %v5260_v22  ;;  %v5577_v35 = vld [vmem:[#allocation7 + $0x94] sm:$0xf0]  ;;  %v5566_v0 = vld [vmem:[#allocation7 + $0x44] sm:$0xf]  ;;  %v5204_v2 = vld [vmem:[#allocation7 + $0x50] sm:$0xf0] }
  0xc1   : > { %v535_v29 = vmul.f32 %v6775_v24, %v6775_v24  ;;  %v533_v30 = vmul.f32 %v6777_v25, %v6777_v25  ;;  %v5565_v21 = vld [vmem:[#allocation7 + $0x34] sm:$0xf0]  ;;  %v5563_v22 = vld [vmem:[#allocation7 + $0x2c] sm:$0xf] }
  0xc2   : > { %v537_v40 = vmul.f32 %v6802_v38, %v6802_v38  ;;  %1422 = vmatpush.bf16.msra.mxu1 %v5271_v5  ;;  %1601 = vmatpush.bf16.msra.mxu3 %v5263_v23  ;;  %v5207_v5 = vor.u32 %v5566_v0, %v5204_v2  ;;  %v5196_v23 = vld [vmem:[#allocation7 + $0x38] sm:$0xf0] }
  0xc3   : > { %570 = vadd.xlane.f32.xlu2 %v535_v29  ;;  %411 = vadd.xlane.f32.xlu0 %v6782_v28  ;;  %v5574_v29 = vld [vmem:[#allocation7 + $0x84] sm:$0xf] }
  0xc4   : > { %566 = vadd.xlane.f32.xlu1 %v533_v30  ;;  %v5235_v30 = vor.u32 %v5576_v27, %v5234_v26  ;;  %v5195_v26 = vor.u32 %v5565_v21, %v5194_v18  ;;  %v5199_v27 = vor.u32 %v5563_v22, %v5196_v23 }
  0xc5   : > { %v410_v39 = vpop.xlane.xlu2 %409 }
  0xc6   : > { %v474_v41 = vmul.f32 %v6766_v13, %v410_v39  ;;  %1423 = vmatpush.bf16.msra.mxu1 %v5255_v19  ;;  %1335 = vmatpush.bf16.msra.mxu0 %v5235_v30  ;;  %v5170_v30 = vld [vmem:[#allocation7] sm:$0xf] }
  0xc8   : > { %v6814_v44 = vsub.f32 %v369_v6, %v474_v41  ;;  %v5275_v6 = vor.u32 %v5585_v4, %v5274_v3  ;;  %v5244_v41 = vld [vmem:[#allocation7 + $0x98] sm:$0xf0]  ;;  %v5210_v3 = vld [vmem:[#allocation7 + $0x48] sm:$0xf]  ;;  %v5569_v4 = vld [vmem:[#allocation7 + $0x54] sm:$0xf0] }
  0xca   : > { %v538_v45 = vmul.f32 %v6814_v44, %v6814_v44  ;;  %1511 = vmatpush.bf16.msra.mxu2 %v5275_v6  ;;  %1336 = vmatpush.bf16.msra.mxu0 %v5219_v53  ;;  %v5211_v6 = vor.u32 %v5569_v4, %v5210_v3 }
  0xcb   : > { %572 = vadd.xlane.f32.xlu2 %v536_v34  ;;  %413 = vadd.xlane.f32.xlu0 %v6797_v36  ;;  %v5242_v34 = vld [vmem:[#allocation7 + $0x88] sm:$0xf] }
  0xcc   : > { %568 = vadd.xlane.f32.xlu1 %v534_v37  ;;  %v5239_v37 = vor.u32 %v5574_v29, %v5236_v31  ;;  %v5243_v39 = vor.u32 %v5577_v35, %v5242_v34  ;;  %v5560_v31 = vld [vmem:[#allocation7 + $0xc] sm:$0xf0]  ;;  %v5558_v35 = vld [vmem:[#allocation7 + $0x4] sm:$0xf] }
  0xcd   : > { %v5171_v34 = vor.u32 %v5560_v31, %v5170_v30 }
  0xce   : > { %1512 = vmatpush.bf16.msra.mxu2 %v5259_v20  ;;  %1424 = vmatpush.bf16.msra.mxu1 %v5239_v37  ;;  %v5191_v20 = vor.u32 %v5562_v12, %v5188_v16  ;;  %v5172_v37 = vld [vmem:[#allocation7 + $0x10] sm:$0xf0] }
  0xcf   : > { %1337 = vmatpush.bf16.msra.mxu0 %v5203_v1 }
  0xd2   : > { %1513 = vmatpush.bf16.msra.mxu2 %v5243_v39  ;;  %1425 = vmatpush.bf16.msra.mxu1 %v5223_v57  ;;  %v5178_v39 = vld [vmem:[#allocation7 + $0x8] sm:$0xf] }
  0xd3   : > { %419 = vadd.xlane.f32.xlu2 %v6808_v42  ;;  %574 = vadd.xlane.f32.xlu0 %v537_v40  ;;  %v5575_v40 = vld [vmem:[#allocation7 + $0x8c] sm:$0xf] }
  0xd4   : > { %415 = vadd.xlane.f32.xlu1 %v6811_v43  ;;  %1338 = vmatpush.bf16.msra.mxu0 %v5187_v15 }
  0xd6   : > { %1514 = vmatpush.bf16.msra.mxu2 %v5227_v58  ;;  %1426 = vmatpush.bf16.msra.mxu1 %v5207_v5 }
  0xd8   : > { %1339 = vmatpush.bf16.msra.mxu0 %v5171_v34 }
  0xda   : > { %1515 = vmatpush.bf16.msra.mxu2 %v5211_v6  ;;  %1427 = vmatpush.bf16.msra.mxu1 %v5191_v20 }
  0xdb   : > { %421 = vadd.xlane.f32.xlu2 %v6820_v46  ;;  %576 = vadd.xlane.f32.xlu0 %v538_v45  ;;  %v5247_v45 = vor.u32 %v5575_v40, %v5244_v41  ;;  %v5175_v40 = vor.u32 %v5558_v35, %v5172_v37  ;;  %v5561_v41 = vld [vmem:[#allocation7 + $0x14] sm:$0xf0] }
  0xdc   : > { %417 = vadd.xlane.f32.xlu1 %v6823_v47  ;;  %v5179_v51 = vor.u32 %v5561_v41, %v5178_v39 }
  0xdd   : > { %1602 = vmatpush.bf16.msra.mxu3 %v5247_v45  ;;  %v5559_v45 = vld [vmem:[#allocation7 + $0xc] sm:$0xf] }
  0xde   : > { %1516 = vmatpush.bf16.msra.mxu2 %v5195_v26  ;;  %v5183_v52 = vor.u32 %v5559_v45, %v5180_v50  ;;  %1428 = vmatpush.bf16.msra.mxu1 %v5175_v40 }
  0xe1   : > { %1603 = vmatpush.bf16.msra.mxu3 %v5231_v61 }
  0xe2   : > { %1517 = vmatpush.bf16.msra.mxu2 %v5179_v51 }
  0xe3   : > { %423 = vadd.xlane.f32.xlu0 %v6828_v48 }
  0xe5   : > { %1604 = vmatpush.bf16.msra.mxu3 %v5215_v9 }
  0xe9   : > { %1605 = vmatpush.bf16.msra.mxu3 %v5199_v27 }
  0xeb   : > { %425 = vadd.xlane.f32.xlu0 %v6832_v49 }
  0xed   : > { %1606 = vmatpush.bf16.msra.mxu3 %v5183_v52  ;;  %v6893_v52 = vld [vmem:[%s6745_s18 + $0x78] sm:$0xff] }
 0x12e   : > { %v565_v14 = vpop.xlane.xlu0 %564 }
 0x12f   : > { %v628_v19 = vmul.f32 %v565_v14, %v6766_v13 }
 0x131   : > { %v660_v29 = vadd.f32 1e-05, %v628_v19 }
 0x133   : > { %5724 = vrsqrt.f32 %v660_v29  ;;  %vm698_vm2 = vweird.f32 %v660_v29 }
 0x136   : > { %v571_v53 = vpop.xlane.xlu2 %570  ;;  %v412_v54 = vpop.xlane.xlu0 %411 }
 0x137   : > { %v631_v55 = vmul.f32 %v571_v53, %v6766_v13  ;;  %v567_v56 = vpop.xlane.xlu1 %566  ;;  %v475_v57 = vmul.f32 %v6766_v13, %v412_v54  ;;  %v6895_v53 = vld [vmem:[#allocation5] ss:$0 sm:$0xff] }
 0x138   : > { %v629_v58 = vmul.f32 %v567_v56, %v6766_v13 }
 0x139   : > { %v5725_v59 = vpop.eup %5724  ;;  %v6839_v60 = vadd.f32 1e-05, %v631_v55  ;;  %v6842_v61 = vsub.f32 %v6782_v28, %v475_v57 }
 0x13a   : > { %v693_v62 = vmul.f32 %v5725_v59, %v660_v29  ;;  %v661_v63 = vadd.f32 1e-05, %v629_v58  ;;  %vm699_vm1 = vweird.f32 %v5725_v59 }
 0x13b   : > { %5726 = vrsqrt.f32 %v6839_v60  ;;  %v539_v0 = vmul.f32 %v6842_v61, %v6842_v61  ;;  %vm6862_vm4 = vmor %vm698_vm2, %vm699_vm1  ;;  %vm728_vm9 = vweird.f32 %v6839_v60 }
 0x13c   : > { %v694_v1 = vmul.f32 %v5725_v59, %v693_v62  ;;  %5728 = vrsqrt.f32 %v661_v63  ;;  %vm708_vm3 = vweird.f32 %v661_v63 }
 0x13d   : > { %578 = vadd.xlane.f32.xlu1 %v539_v0 }
 0x13e   : > { %v695_v2 = vmul.f32 0.5, %v694_v1  ;;  %v573_v3 = vpop.xlane.xlu2 %572  ;;  %v414_v4 = vpop.xlane.xlu0 %413 }
 0x13f   : > { %v569_v5 = vpop.xlane.xlu1 %568  ;;  %v476_v6 = vmul.f32 %v6766_v13, %v414_v4  ;;  %v632_v15 = vmul.f32 %v573_v3, %v6766_v13 }
 0x140   : > { %v696_v7 = vsub.f32 1.5, %v695_v2  ;;  %v630_v28 = vmul.f32 %v569_v5, %v6766_v13 }
 0x141   : > { %v6849_v8 = vpop.eup %5726  ;;  %v6852_v9 = vsub.f32 %v6797_v36, %v476_v6  ;;  %v6870_v29 = vadd.f32 1e-05, %v632_v15 }
 0x142   : > { %v5729_v10 = vpop.eup %5728  ;;  %v6854_v11 = vadd.f32 1e-05, %v630_v28  ;;  %v697_v14 = vmul.f32 %v5725_v59, %v696_v7  ;;  %v723_v16 = vmul.f32 %v6849_v8, %v6839_v60  ;;  %vm729_vm10 = vweird.f32 %v6849_v8 }
 0x143   : > { %v703_v12 = vmul.f32 %v5729_v10, %v661_v63  ;;  %v540_v19 = vmul.f32 %v6852_v9, %v6852_v9  ;;  %vm709_vm5 = vweird.f32 %v5729_v10  ;;  %vm6948_vm12 = vmor %vm728_vm9, %vm729_vm10  ;;  %vm738_vm15 = vweird.f32 %v6870_v29 }
 0x144   : > { %5730 = vrsqrt.f32 %v6854_v11  ;;  %v701_v30 = vsel %vm6862_vm4, %v5725_v59, %v697_v14  ;;  %v724_v34 = vmul.f32 %v6849_v8, %v723_v16  ;;  %vm710_vm6 = vmor %vm708_vm3, %vm709_vm5  ;;  %vm718_vm7 = vweird.f32 %v6854_v11  ;;  %v6943_v16 = vld [vmem:[%s6745_s18 + $0x80] sm:$0xff] }
 0x145   : > { %v704_v18 = vmul.f32 %v5729_v10, %v703_v12  ;;  %580 = vadd.xlane.f32.xlu1 %v540_v19  ;;  %v1012_v51 = vmul.f32 %v701_v30, %v6769_v17 }
 0x146   : > { %v420_v36 = vpop.xlane.xlu2 %419  ;;  %v575_v20 = vpop.xlane.xlu0 %574  ;;  %v725_v54 = vmul.f32 0.5, %v724_v34 }
 0x147   : > { %v705_v22 = vmul.f32 0.5, %v704_v18  ;;  %v479_v23 = vmul.f32 %v6766_v13, %v420_v36  ;;  %v416_v26 = vpop.xlane.xlu1 %415  ;;  %v633_v27 = vmul.f32 %v575_v20, %v6766_v13  ;;  %v1047_v1 = vmul.f32 %v6895_v53, %v1012_v51 }
 0x148   : > { %v477_v31 = vmul.f32 %v6766_v13, %v416_v26  ;;  %v726_v4 = vsub.f32 1.5, %v725_v54 }
 0x149   : > { %v706_v35 = vsub.f32 1.5, %v705_v22  ;;  %v6875_v37 = vsub.f32 %v6808_v42, %v479_v23  ;;  %v6877_v39 = vadd.f32 1e-05, %v633_v27 }
 0x14a   : > { %v6879_v40 = vpop.eup %5730  ;;  %v6883_v41 = vsub.f32 %v6811_v43, %v477_v31  ;;  %v727_v18 = vmul.f32 %v6849_v8, %v726_v4 }
 0x14b   : > { %v707_v45 = vmul.f32 %v5729_v10, %v706_v35  ;;  %v713_v50 = vmul.f32 %v6879_v40, %v6854_v11  ;;  %5732 = vrsqrt.f32 %v6877_v39  ;;  %v543_v42 = vmul.f32 %v6875_v37, %v6875_v37  ;;  %v6967_v35 = vld [vmem:[%s6745_s18 + $0x98] sm:$0xff] }
 0x14c   : > { %5734 = vrsqrt.f32 %v6870_v29  ;;  %v541_v56 = vmul.f32 %v6883_v41, %v6883_v41  ;;  %vm719_vm8 = vweird.f32 %v6879_v40  ;;  %v731_v26 = vsel %vm6948_vm12, %v6849_v8, %v727_v18 }
 0x14d   : > { %v711_v43 = vsel %vm710_vm6, %v5729_v10, %v707_v45  ;;  %v714_v55 = vmul.f32 %v6879_v40, %v713_v50  ;;  %586 = vadd.xlane.f32.xlu0 %v543_v42  ;;  %427 = vadd.xlane.f32.xlu1 %v6893_v52  ;;  %vm6934_vm11 = vmor %vm718_vm7, %vm719_vm8  ;;  %v1015_v45 = vmul.f32 %v731_v26, %v6775_v24  ;;  %v6973_v50 = vld [vmem:[%s6745_s18 + $0x88] sm:$0xff]  ;;  %vm748_vm13 = vweird.f32 %v6877_v39 }
 0x14e   : > { %v1013_v57 = vmul.f32 %v711_v43, %v6777_v25  ;;  %v422_v17 = vpop.xlane.xlu2 %421  ;;  %v6901_v58 = vpop.xlane.xlu0 %576  ;;  %582 = vadd.xlane.f32.xlu2 %v541_v56  ;;  %v6912_v25 = vld [vmem:[%s12999_s2] ss:$0 sm:$0xff] }
 0x14f   : > { %v715_v59 = vmul.f32 0.5, %v714_v55  ;;  %v480_v62 = vmul.f32 %v6766_v13, %v422_v17  ;;  %v418_v63 = vpop.xlane.xlu1 %417  ;;  %v1082_v60 = vadd.f32 %v6912_v25, %v1047_v1  ;;  %v1050_v54 = vmul.f32 %v6895_v53, %v1015_v45 }
 0x150   : > { %v478_v0 = vmul.f32 %v6766_v13, %v418_v63  ;;  %v1048_v2 = vmul.f32 %v6895_v53, %v1013_v57  ;;  %v6990_v57 = vld [vmem:[%s6745_s18 + $0xa0] sm:$0xff] }
 0x151   : > { %v6914_v3 = vpop.eup %5732  ;;  %v716_v5 = vsub.f32 1.5, %v715_v59  ;;  %v6918_v6 = vsub.f32 %v6820_v46, %v480_v62 }
 0x152   : > { %v6920_v7 = vpop.eup %5734  ;;  %v6924_v28 = vsub.f32 %v6823_v47, %v478_v0  ;;  %v743_v12 = vmul.f32 %v6914_v3, %v6877_v39  ;;  %v1083_v15 = vadd.f32 %v6912_v25, %v1048_v2  ;;  %vm749_vm14 = vweird.f32 %v6914_v3  ;;  %v6995_v39 = vld [vmem:[%s6745_s18 + $0x90] sm:$0xff]  ;;  %v7006_v2 = vld [vmem:[%s6745_s18 + $0xa8] sm:$0xff] }
 0x153   : > { %v717_v10 = vmul.f32 %v6879_v40, %v716_v5  ;;  %v544_v14 = vmul.f32 %v6918_v6, %v6918_v6  ;;  %v733_v19 = vmul.f32 %v6920_v7, %v6870_v29  ;;  %vm739_vm0 = vweird.f32 %v6920_v7  ;;  %vm750_vm1 = vmor %vm748_vm13, %vm749_vm14 }
 0x154   : > { %v542_v47 = vmul.f32 %v6924_v28, %v6924_v28  ;;  %v1114_v36 = vpack.c.bf16 %v1083_v15, %v1082_v60  ;;  %v744_v22 = vmul.f32 %v6914_v3, %v743_v12  ;;  %vm740_vm2 = vmor %vm738_vm15, %vm739_vm0  ;;  %v7014_v12 = vld [vmem:[%s6745_s18 + $0xb0] sm:$0xff] }
 0x155   : > { %588 = vadd.xlane.f32.xlu0 %v544_v14  ;;  %v721_v21 = vsel %vm6934_vm11, %v6879_v40, %v717_v10  ;;  %429 = vadd.xlane.f32.xlu1 %v6943_v16  ;;  %v734_v27 = vmul.f32 %v6920_v7, %v733_v19 }
 0x156   : > { %v424_v20 = vpop.xlane.xlu0 %423  ;;  %584 = vadd.xlane.f32.xlu2 %v542_v47  ;;  %1340 = vmatmul.bf16.vlgmr.msra.gmra.mxu0 %v1114_v36  ;;  %v1014_v31 = vmul.f32 %v721_v21, %v6791_v33  ;;  %v745_v34 = vmul.f32 0.5, %v744_v22 }
 0x157   : > { %v481_v23 = vmul.f32 %v6766_v13, %v424_v20  ;;  %1429 = vmatmul.bf16.vlgmr.msra.gmra.mxu1 %v1114_v36  ;;  %1518 = vmatmul.bf16.vlgmr.msra.gmra.mxu2 %v1114_v36  ;;  %v735_v8 = vmul.f32 0.5, %v734_v27 }
 0x158   : > { %1607 = vmatmul.bf16.vlgmr.msra.gmra.mxu3 %v1114_v36  ;;  %v746_v42 = vsub.f32 1.5, %v745_v34 }
 0x159   : > { %v6963_v30 = vsub.f32 %v6828_v48, %v481_v23  ;;  %v1049_v48 = vmul.f32 %v6895_v53, %v1014_v31  ;;  %v736_v43 = vsub.f32 1.5, %v735_v8 }
 0x15a   : > { %v747_v56 = vmul.f32 %v6914_v3, %v746_v42 }
 0x15b   : > { %v545_v40 = vmul.f32 %v6963_v30, %v6963_v30  ;;  %v1084_v55 = vadd.f32 %v6912_v25, %v1049_v48  ;;  %v737_v59 = vmul.f32 %v6920_v7, %v736_v43 }
 0x15c   : > { %v751_v62 = vsel %vm750_vm1, %v6914_v3, %v747_v56 }
 0x15d   : > { %435 = vadd.xlane.f32.xlu0 %v6967_v35  ;;  %590 = vadd.xlane.f32.xlu1 %v545_v40  ;;  %v741_v63 = vsel %vm740_vm2, %v6920_v7, %v737_v59  ;;  %v1017_v0 = vmul.f32 %v751_v62, %v6802_v38 }
 0x15e   : > { %v426_v51 = vpop.xlane.xlu0 %425  ;;  %431 = vadd.xlane.f32.xlu2 %v6973_v50  ;;  %v1016_v1 = vmul.f32 %v741_v63, %v6789_v32  ;;  %v634_v32 = vmul.f32 %v6901_v58, %v6766_v13 }
 0x15f   : > { %v482_v33 = vmul.f32 %v6766_v13, %v426_v51  ;;  %v1052_v4 = vmul.f32 %v6895_v53, %v1017_v0 }
 0x160   : > { %v1051_v3 = vmul.f32 %v6895_v53, %v1016_v1  ;;  %v666_v38 = vadd.f32 1e-05, %v634_v32 }
 0x161   : > { %v6983_v24 = vsub.f32 %v6832_v49, %v482_v33  ;;  %v1085_v49 = vadd.f32 %v6912_v25, %v1050_v54  ;;  %v1087_v5 = vadd.f32 %v6912_v25, %v1052_v4 }
 0x162   : > { %v1086_v10 = vadd.f32 %v6912_v25, %v1051_v3  ;;  %5736 = vrsqrt.f32 %v666_v38  ;;  %vm758_vm3 = vweird.f32 %v666_v38 }
 0x163   : > { %v546_v17 = vmul.f32 %v6983_v24, %v6983_v24  ;;  %v1115_v29 = vpack.c.bf16 %v1085_v49, %v1084_v55 }
 0x164   : > { %v1116_v7 = vpack.c.bf16 %v1087_v5, %v1086_v10 }
 0x165   : > { %437 = vadd.xlane.f32.xlu0 %v6990_v57  ;;  %592 = vadd.xlane.f32.xlu1 %v546_v17 }
 0x166   : > { %433 = vadd.xlane.f32.xlu2 %v6995_v39  ;;  %1345 = vmatmul.bf16.gmra.mxu0 %v1115_v29 }
 0x167   : > { %1434 = vmatmul.bf16.gmra.mxu1 %v1115_v29  ;;  %1523 = vmatmul.bf16.gmra.mxu2 %v1115_v29 }
 0x168   : > { %1612 = vmatmul.bf16.gmra.mxu3 %v1115_v29  ;;  %v5737_v14 = vpop.eup %5736 }
 0x169   : > { %v753_v46 = vmul.f32 %v5737_v14, %v666_v38  ;;  %vm759_vm4 = vweird.f32 %v5737_v14 }
 0x16a   : > { %vm7021_vm5 = vmor %vm758_vm3, %vm759_vm4 }
 0x16b   : > { %v754_v15 = vmul.f32 %v5737_v14, %v753_v46 }
 0x16d   : > { %439 = vadd.xlane.f32.xlu1 %v7006_v2  ;;  %v755_v19 = vmul.f32 0.5, %v754_v15 }
 0x16f   : > { %v756_v20 = vsub.f32 1.5, %v755_v19 }
 0x171   : > { %v757_v23 = vmul.f32 %v5737_v14, %v756_v20 }
 0x173   : > { %v761_v51 = vsel %vm7021_vm5, %v5737_v14, %v757_v23 }
 0x174   : > { %v1018_v55 = vmul.f32 %v761_v51, %v6814_v44 }
 0x175   : > { %441 = vadd.xlane.f32.xlu1 %v7014_v12 }
 0x176   : > { %1350 = vmatmul.bf16.gmra.mxu0 %v1116_v7 }
 0x177   : > { %1439 = vmatmul.bf16.gmra.mxu1 %v1116_v7  ;;  %1528 = vmatmul.bf16.gmra.mxu2 %v1116_v7 }
 0x178   : > { %1617 = vmatmul.bf16.gmra.mxu3 %v1116_v7 }
 0x1b0   : > { %v579_v47 = vpop.xlane.xlu1 %578 }
 0x1b1   : > { %v635_v60 = vmul.f32 %v579_v47, %v6766_v13 }
 0x1b3   : > { %v667_v18 = vadd.f32 1e-05, %v635_v60 }
 0x1b5   : > { %5738 = vrsqrt.f32 %v667_v18  ;;  %vm768_vm7 = vweird.f32 %v667_v18 }
 0x1b8   : > { %v581_v11 = vpop.xlane.xlu1 %580 }
 0x1b9   : > { %v636_v22 = vmul.f32 %v581_v11, %v6766_v13 }
 0x1bb   : > { %v5739_v36 = vpop.eup %5738  ;;  %v7025_v31 = vadd.f32 1e-05, %v636_v22 }
 0x1bc   : > { %v763_v21 = vmul.f32 %v5739_v36, %v667_v18  ;;  %vm769_vm6 = vweird.f32 %v5739_v36 }
 0x1bd   : > { %vm770_vm8 = vmor %vm768_vm7, %vm769_vm6  ;;  %5740 = vrsqrt.f32 %v7025_v31  ;;  %vm778_vm13 = vweird.f32 %v7025_v31 }
 0x1be   : > { %v764_v58 = vmul.f32 %v5739_v36, %v763_v21 }
 0x1c0   : > { %v765_v27 = vmul.f32 0.5, %v764_v58  ;;  %v7027_v34 = vpop.xlane.xlu0 %586  ;;  %v428_v8 = vpop.xlane.xlu1 %427 }
 0x1c1   : > { %v583_v45 = vpop.xlane.xlu2 %582  ;;  %v483_v42 = vmul.f32 %v6766_v13, %v428_v8  ;;  %v7077_v8 = vld [vmem:[%s6745_s18 + $0xc0] sm:$0xff] }
 0x1c2   : > { %v766_v40 = vsub.f32 1.5, %v765_v27  ;;  %v637_v48 = vmul.f32 %v583_v45, %v6766_v13 }
 0x1c3   : > { %v7035_v43 = vsub.f32 %v6893_v52, %v483_v42  ;;  %v1053_v52 = vmul.f32 %v6895_v53, %v1018_v55  ;;  %v5741_v0 = vpop.eup %5740 }
 0x1c4   : > { %v767_v33 = vmul.f32 %v5739_v36, %v766_v40  ;;  %v669_v54 = vadd.f32 1e-05, %v637_v48  ;;  %v773_v3 = vmul.f32 %v5741_v0, %v7025_v31  ;;  %vm779_vm12 = vweird.f32 %v5741_v0 }
 0x1c5   : > { %v547_v49 = vmul.f32 %v7035_v43, %v7035_v43  ;;  %v1088_v10 = vadd.f32 %v6912_v25, %v1053_v52  ;;  %vm780_vm14 = vmor %vm778_vm13, %vm779_vm12 }
 0x1c6   : > { %v771_v56 = vsel %vm770_vm8, %v5739_v36, %v767_v33  ;;  %5742 = vrsqrt.f32 %v669_v54  ;;  %v774_v46 = vmul.f32 %v5741_v0, %v773_v3  ;;  %v7065_v36 = vld [vmem:[%s6745_s18 + $0xb8] sm:$0xff]  ;;  %vm788_vm9 = vweird.f32 %v669_v54 }
 0x1c7   : > { %v1019_v17 = vmul.f32 %v771_v56, %v6842_v61  ;;  %594 = vadd.xlane.f32.xlu2 %v547_v49 }
 0x1c8   : > { %v7041_v59 = vpop.xlane.xlu0 %588  ;;  %v430_v63 = vpop.xlane.xlu1 %429  ;;  %v775_v18 = vmul.f32 0.5, %v774_v46 }
 0x1c9   : > { %v1054_v29 = vmul.f32 %v6895_v53, %v1019_v17  ;;  %v7044_v62 = vpop.xlane.xlu2 %584  ;;  %v484_v44 = vmul.f32 %v6766_v13, %v430_v63  ;;  %v639_v63 = vmul.f32 %v7027_v34, %v6766_v13 }
 0x1ca   : > { %v776_v21 = vsub.f32 1.5, %v775_v18 }
 0x1cb   : > { %v1089_v1 = vadd.f32 %v6912_v25, %v1054_v29  ;;  %v7050_v4 = vsub.f32 %v6943_v16, %v484_v44 }
 0x1cc   : > { %v5743_v61 = vpop.eup %5742  ;;  %v777_v27 = vmul.f32 %v5741_v0, %v776_v21 }
 0x1cd   : > { %13150 = vst [vmem:[#allocation16_spill] sm:$0xff] %v7050_v4  ;;  %v783_v5 = vmul.f32 %v5743_v61, %v669_v54  ;;  %v548_v32 = vmul.f32 %v7050_v4, %v7050_v4  ;;  %v1117_v38 = vpack.c.bf16 %v1089_v1, %v1088_v10  ;;  %vm789_vm10 = vweird.f32 %v5743_v61 }
 0x1ce   : > { %vm790_vm11 = vmor %vm788_vm9, %vm789_vm10  ;;  %v781_v42 = vsel %vm780_vm14, %v5741_v0, %v777_v27  ;;  %v7106_v0 = vld [vmem:[%s6745_s18 + $0xd8] sm:$0xff] }
 0x1cf   : > { %v784_v7 = vmul.f32 %v5743_v61, %v783_v5  ;;  %596 = vadd.xlane.f32.xlu2 %v548_v32  ;;  %1355 = vmatmul.bf16.gmra.mxu0 %v1117_v38 }
 0x1d0   : > { %v436_v14 = vpop.xlane.xlu0 %435  ;;  %1444 = vmatmul.bf16.gmra.mxu1 %v1117_v38  ;;  %1533 = vmatmul.bf16.gmra.mxu2 %v1117_v38  ;;  %v591_v26 = vpop.xlane.xlu1 %590 }
 0x1d1   : > { %v432_v47 = vpop.xlane.xlu2 %431  ;;  %v487_v60 = vmul.f32 %v6766_v13, %v436_v14  ;;  %v785_v15 = vmul.f32 0.5, %v784_v7  ;;  %1622 = vmatmul.bf16.gmra.mxu3 %v1117_v38  ;;  %v641_v32 = vmul.f32 %v591_v26, %v6766_v13 }
 0x1d2   : > { %v485_v16 = vmul.f32 %v6766_v13, %v432_v47  ;;  %v640_v47 = vmul.f32 %v7041_v59, %v6766_v13  ;;  %v391_v59 = vld [vmem:[%s6745_s18 + $0xe0] sm:$0xff] }
 0x1d3   : > { %v7062_v11 = vsub.f32 %v6967_v35, %v487_v60  ;;  %v786_v20 = vsub.f32 1.5, %v785_v15  ;;  %v673_v15 = vadd.f32 1e-05, %v641_v32 }
 0x1d4   : > { %v7059_v19 = vsub.f32 %v6973_v50, %v485_v16  ;;  %v672_v21 = vadd.f32 1e-05, %v640_v47  ;;  %v1341_v47 = vpop.f32.mrf.mxu0 }
 0x1d5   : > { %13152 = vst [vmem:[#allocation18_spill] sm:$0xff] %v7062_v11  ;;  %v551_v58 = vmul.f32 %v7062_v11, %v7062_v11  ;;  %v787_v35 = vmul.f32 %v5743_v61, %v786_v20  ;;  %vm828_vm5 = vweird.f32 %v673_v15 }
 0x1d6   : > { %13151 = vst [vmem:[#allocation17_spill] sm:$0xff] %v7059_v19  ;;  %v549_v22 = vmul.f32 %v7059_v19, %v7059_v19  ;;  %vm818_vm7 = vweird.f32 %v672_v21 }
 0x1d7   : > { %443 = vadd.xlane.f32.xlu2 %v7065_v36  ;;  %602 = vadd.xlane.f32.xlu1 %v551_v58  ;;  %v791_v51 = vsel %vm790_vm11, %v5743_v61, %v787_v35  ;;  %v671_v61 = vadd.f32 1e-05, %v639_v63 }
 0x1d8   : > { %598 = vadd.xlane.f32.xlu0 %v549_v22  ;;  %v438_v40 = vpop.xlane.xlu0 %437  ;;  %v1021_v33 = vmul.f32 %v791_v51, %v6883_v41  ;;  %v7089_v31 = vpop.xlane.xlu1 %592  ;;  %v7096_v41 = vld [vmem:[%s6745_s18 + $0xc8] sm:$0xff] }
 0x1d9   : > { %v434_v50 = vpop.xlane.xlu2 %433  ;;  %v488_v48 = vmul.f32 %v6766_v13, %v438_v40  ;;  %vm808_vm1 = vweird.f32 %v671_v61 }
 0x1da   : > { %v486_v23 = vmul.f32 %v6766_v13, %v434_v50  ;;  %v1056_v56 = vmul.f32 %v6895_v53, %v1021_v33 }
 0x1db   : > { %v7087_v55 = vsub.f32 %v6990_v57, %v488_v48 }
 0x1dc   : > { %v7074_v45 = vsub.f32 %v6995_v39, %v486_v23  ;;  %v1020_v39 = vmul.f32 %v781_v42, %v6852_v9  ;;  %v1091_v29 = vadd.f32 %v6912_v25, %v1056_v56  ;;  %v638_v9 = vmul.f32 %v7044_v62, %v6766_v13  ;;  %v389_v62 = vld [vmem:[%s6745_s18 + $0xd0] sm:$0xff]  ;;  %v392_v42 = vld [vmem:[%s6745_s18 + $0xe8] sm:$0xff] }
 0x1dd   : > { %13154 = vst [vmem:[#allocation20_spill] sm:$0xff] %v7087_v55  ;;  %v552_v49 = vmul.f32 %v7087_v55, %v7087_v55 }
 0x1de   : > { %13153 = vst [vmem:[#allocation19_spill] sm:$0xff] %v7074_v45  ;;  %v550_v54 = vmul.f32 %v7074_v45, %v7074_v45  ;;  %v1055_v17 = vmul.f32 %v6895_v53, %v1020_v39  ;;  %v670_v44 = vadd.f32 1e-05, %v638_v9 }
 0x1df   : > { %445 = vadd.xlane.f32.xlu2 %v7077_v8  ;;  %604 = vadd.xlane.f32.xlu1 %v552_v49 }
 0x1e0   : > { %600 = vadd.xlane.f32.xlu0 %v550_v54  ;;  %v1090_v57 = vadd.f32 %v6912_v25, %v1055_v17  ;;  %v440_v1 = vpop.xlane.xlu1 %439  ;;  %5744 = vrsqrt.f32 %v670_v44  ;;  %vm798_vm15 = vweird.f32 %v670_v44 }
 0x1e1   : > { %5746 = vrsqrt.f32 %v671_v61  ;;  %v489_v34 = vmul.f32 %v6766_v13, %v440_v1  ;;  %v393_v1 = vld [vmem:[%s6745_s18 + $0xf0] sm:$0xff] }
 0x1e2   : > { %v1118_v52 = vpack.c.bf16 %v1091_v29, %v1090_v57  ;;  %5748 = vrsqrt.f32 %v673_v15 }
 0x1e3   : > { %v7113_v38 = vsub.f32 %v7006_v2, %v489_v34  ;;  %5750 = vrsqrt.f32 %v672_v21 }
 0x1e4   : > { %1360 = vmatmul.bf16.gmra.mxu0 %v1118_v52  ;;  %1449 = vmatmul.bf16.gmra.mxu1 %v1118_v52 }
 0x1e5   : > { %1538 = vmatmul.bf16.gmra.mxu2 %v1118_v52  ;;  %1627 = vmatmul.bf16.gmra.mxu3 %v1118_v52  ;;  %13155 = vst [vmem:[#allocation21_spill] sm:$0xff] %v7113_v38  ;;  %v553_v60 = vmul.f32 %v7113_v38, %v7113_v38 }
 0x1e6   : > { %v5745_v3 = vpop.eup %5744 }
 0x1e7   : > { %451 = vadd.xlane.f32.xlu1 %v7106_v0  ;;  %v5747_v10 = vpop.eup %5746  ;;  %v793_v7 = vmul.f32 %v5745_v3, %v670_v44  ;;  %606 = vadd.xlane.f32.xlu2 %v553_v60  ;;  %vm799_vm0 = vweird.f32 %v5745_v3 }
 0x1e8   : > { %447 = vadd.xlane.f32.xlu0 %v7096_v41  ;;  %v442_v5 = vpop.xlane.xlu1 %441  ;;  %v803_v46 = vmul.f32 %v5747_v10, %v671_v61  ;;  %v5749_v23 = vpop.eup %5748  ;;  %vm809_vm2 = vweird.f32 %v5747_v10  ;;  %vm800_vm3 = vmor %vm798_vm15, %vm799_vm0 }
 0x1e9   : > { %v490_v14 = vmul.f32 %v6766_v13, %v442_v5  ;;  %v794_v16 = vmul.f32 %v5745_v3, %v793_v7  ;;  %v823_v27 = vmul.f32 %v5749_v23, %v673_v15  ;;  %vm810_vm4 = vmor %vm808_vm1, %vm809_vm2  ;;  %vm829_vm6 = vweird.f32 %v5749_v23 }
 0x1ea   : > { %v804_v20 = vmul.f32 %v5747_v10, %v803_v46  ;;  %vm830_vm9 = vmor %vm828_vm5, %vm829_vm6  ;;  %v1162_v46 = vld [vmem:[#allocation8] sm:$0xf] }
 0x1eb   : > { %v7121_v18 = vsub.f32 %v7014_v12, %v490_v14  ;;  %v795_v2 = vmul.f32 0.5, %v794_v16  ;;  %v5751_v12 = vpop.eup %5750  ;;  %v824_v33 = vmul.f32 %v5749_v23, %v823_v27  ;;  %v1430_v16 = vpop.f32.mrf.mxu1  ;;  %v7140_v15 = vperm.slane %v1162_v46, 0 }
 0x1ec   : > { %v805_v58 = vmul.f32 0.5, %v804_v20  ;;  %v813_v51 = vmul.f32 %v5751_v12, %v672_v21  ;;  %vm819_vm8 = vweird.f32 %v5751_v12  ;;  %v7142_v21 = vperm.slane %v1162_v46, 1 }
 0x1ed   : > { %13156 = vst [vmem:[#allocation22_spill] sm:$0xff] %v7121_v18  ;;  %v554_v22 = vmul.f32 %v7121_v18, %v7121_v18  ;;  %v796_v50 = vsub.f32 1.5, %v795_v2  ;;  %v825_v49 = vmul.f32 0.5, %v824_v33  ;;  %vm820_vm10 = vmor %vm818_vm7, %vm819_vm8  ;;  %v1519_v2 = vpop.f32.mrf.mxu2 }
 0x1ee   : > { %v806_v35 = vsub.f32 1.5, %v805_v58  ;;  %v814_v56 = vmul.f32 %v5751_v12, %v813_v51 }
 0x1ef   : > { %608 = vadd.xlane.f32.xlu2 %v554_v22  ;;  %453 = vadd.xlane.f32.xlu1 %v391_v59  ;;  %v797_v26 = vmul.f32 %v5745_v3, %v796_v50  ;;  %v826_v57 = vsub.f32 1.5, %v825_v49  ;;  %v1343_v22 = vpop.f32.mrf.mxu0  ;;  %v1608_v50 = vpop.f32.mrf.mxu3 }
 0x1f0   : > { %449 = vadd.xlane.f32.xlu0 %v389_v62  ;;  %v807_v40 = vmul.f32 %v5747_v10, %v806_v35  ;;  %v815_v29 = vmul.f32 0.5, %v814_v56 }
 0x1f1   : > { %v801_v48 = vsel %vm800_vm3, %v5745_v3, %v797_v26 }
 0x1f2   : > { %v811_v54 = vsel %vm810_vm4, %v5747_v10, %v807_v40  ;;  %v1022_v39 = vmul.f32 %v801_v48, %v6924_v28  ;;  %v816_v52 = vsub.f32 1.5, %v815_v29  ;;  %v827_v28 = vmul.f32 %v5749_v23, %v826_v57 }
 0x1f3   : > { %v1023_v17 = vmul.f32 %v811_v54, %v6875_v37  ;;  %v1432_v35 = vpop.f32.mrf.mxu1 }
 0x1f4   : > { %v1057_v9 = vmul.f32 %v6895_v53, %v1022_v39  ;;  %v817_v37 = vmul.f32 %v5751_v12, %v816_v52  ;;  %v831_v3 = vsel %vm830_vm9, %v5749_v23, %v827_v28  ;;  %v7166_v27 = vadd.f32 %v1432_v35, %v7142_v21 }
 0x1f5   : > { %v1058_v63 = vmul.f32 %v6895_v53, %v1023_v17  ;;  %v1025_v34 = vmul.f32 %v831_v3, %v6963_v30  ;;  %v7150_v30 = vperm.slane %v1162_v46, 2  ;;  %v1521_v28 = vpop.f32.mrf.mxu2 }
 0x1f6   : > { %v1092_v44 = vadd.f32 %v6912_v25, %v1057_v9  ;;  %v821_v5 = vsel %vm820_vm10, %v5751_v12, %v817_v37  ;;  %v7160_v12 = vadd.f32 %v1343_v22, %v7140_v15  ;;  %v5301_v33 = vmul.f32 -1.442695, %v7166_v27 }
 0x1f7   : > { %455 = vadd.xlane.f32.xlu2 %v392_v42  ;;  %v1093_v61 = vadd.f32 %v6912_v25, %v1058_v63  ;;  %v1024_v10 = vmul.f32 %v821_v5, %v6918_v6  ;;  %v1060_v7 = vmul.f32 %v6895_v53, %v1025_v34  ;;  %v7145_v6 = vadd.f32 %v1341_v47, %v7140_v15  ;;  %v1610_v37 = vpop.f32.mrf.mxu3 }
 0x1f8   : > { %v7157_v23 = vadd.f32 %v1519_v2, %v7150_v30  ;;  %v5300_v51 = vmul.f32 -1.442695, %v7160_v12  ;;  %v642_v42 = vmul.f32 %v7089_v31, %v6766_v13  ;;  %v7197_v5 = vadd.f32 %v1521_v28, %v7150_v30 }
 0x1f9   : > { %v1119_v62 = vpack.c.bf16 %v1093_v61, %v1092_v44  ;;  %v1059_v32 = vmul.f32 %v6895_v53, %v1024_v10  ;;  %v1095_v14 = vadd.f32 %v6912_v25, %v1060_v7  ;;  %v7148_v53 = vadd.f32 %v1430_v16, %v7142_v21 }
 0x1fa   : > { %v5296_v58 = vmul.f32 -1.442695, %v7145_v6  ;;  %v5298_v40 = vmul.f32 -1.442695, %v7157_v23  ;;  %v7174_v17 = vadd.f32 1e-05, %v642_v42 }
 0x1fb   : > { %1365 = vmatmul.bf16.gmra.mxu0 %v1119_v62  ;;  %1454 = vmatmul.bf16.gmra.mxu1 %v1119_v62  ;;  %v1094_v60 = vadd.f32 %v6912_v25, %v1059_v32  ;;  %v7152_v25 = vperm.slane %v1162_v46, 3  ;;  %v5297_v59 = vmul.f32 -1.442695, %v7148_v53  ;;  %v5302_v16 = vmul.f32 -1.442695, %v7197_v5 }
 0x1fc   : > { %1543 = vmatmul.bf16.gmra.mxu2 %v1119_v62  ;;  %1632 = vmatmul.bf16.gmra.mxu3 %v1119_v62  ;;  %5752 = vpow2.f32 %v5296_v58  ;;  %v1346_v58 = vpop.f32.mrf.mxu0  ;;  %vm838_vm12 = vweird.f32 %v7174_v17 }
 0x1fd   : > { %v1120_v20 = vpack.c.bf16 %v1095_v14, %v1094_v60  ;;  %13157 = vst [vmem:[#allocation23_spill] sm:$0xff] %v7152_v25  ;;  %v7163_v26 = vadd.f32 %v1608_v50, %v7152_v25  ;;  %5754 = vpow2.f32 %v5297_v59  ;;  %v7203_v10 = vadd.f32 %v1610_v37, %v7152_v25 }
 0x1fe   : > { %5756 = vpow2.f32 %v5298_v40 }
 0x1ff   : > { %457 = vadd.xlane.f32.xlu2 %v393_v1  ;;  %v5299_v48 = vmul.f32 -1.442695, %v7163_v26  ;;  %5758 = vpow2.f32 %v5300_v51  ;;  %v5303_v22 = vmul.f32 -1.442695, %v7203_v10 }
 0x201   : > { %5760 = vpow2.f32 %v5299_v48 }
 0x202   : > { %v5753_v39 = vpop.eup %5752  ;;  %5762 = vpow2.f32 %v5301_v33 }
 0x203   : > { %v5755_v56 = vpop.eup %5754  ;;  %v7176_v49 = vadd.f32 1.0, %v5753_v39  ;;  %5764 = vrsqrt.f32 %v7174_v17 }
 0x204   : > { %v7178_v29 = vadd.f32 1.0, %v5755_v56  ;;  %v5757_v9 = vpop.eup %5756  ;;  %v7236_v56 = vadd.f32 %v1346_v58, %v7140_v15 }
 0x205   : > { %v5759_v57 = vpop.eup %5758  ;;  %5766 = vrcp.f32 %v7176_v49  ;;  %v7185_v44 = vadd.f32 1.0, %v5757_v9  ;;  %v2209_v51 = vand.u32 2147483647, %v7176_v49  ;;  %vm2205_vm11 = vweird.f32 %v7176_v49 }
 0x206   : > { %5768 = vrcp.f32 %v7178_v29  ;;  %v7187_v1 = vadd.f32 1.0, %v5759_v57  ;;  %v2226_v48 = vand.u32 2147483648, %v7178_v29  ;;  %v2224_v39 = vand.u32 2147483647, %v7178_v29  ;;  %13159 = vst [vmem:[#allocation25_spill] sm:$0xff] %v7236_v56 }
 0x207   : > { %v5761_v63 = vpop.eup %5760  ;;  %5770 = vrcp.f32 %v7185_v44  ;;  %vm2220_vm0 = vweird.f32 %v7178_v29  ;;  %vm7275_vm1 = vcmp.eq.f32.partialorder %v2209_v51, 8.507059e+37  ;;  %vm2235_vm2 = vweird.f32 %v7185_v44 }
 0x208   : > { %v5763_v52 = vpop.eup %5762  ;;  %v7189_v61 = vadd.f32 1.0, %v5761_v63  ;;  %5772 = vrcp.f32 %v7187_v1  ;;  %v2241_v63 = vand.u32 2147483648, %v7185_v44  ;;  %vm2265_vm3 = vweird.f32 %v7187_v1 }
 0x209   : > { %v7191_v62 = vadd.f32 1.0, %v5763_v52  ;;  %v7193_v3 = vpop.eup %5764  ;;  %v1435_v52 = vpop.f32.mrf.mxu1  ;;  %vm7300_vm7 = vcmp.eq.f32.partialorder %v2224_v39, 8.507059e+37 }
 0x20a   : > { %5774 = vrcp.f32 %v7189_v61  ;;  %v833_v46 = vmul.f32 %v7193_v3, %v7174_v17  ;;  %vm839_vm13 = vweird.f32 %v7193_v3  ;;  %v7263_v58 = vadd.f32 %v1435_v52, %v7142_v21 }
 0x20b   : > { %1370 = vmatmul.bf16.gmra.mxu0 %v1120_v20  ;;  %1459 = vmatmul.bf16.gmra.mxu1 %v1120_v20  ;;  %v7199_v34 = vpop.eup %5766  ;;  %5776 = vrcp.f32 %v7191_v62  ;;  %v7270_v18 = vor.u32 1.1754944e-38, %v2241_v63  ;;  %v2254_v11 = vand.u32 2147483647, %v7189_v61 }
 0x20c   : > { %1548 = vmatmul.bf16.gmra.mxu2 %v1120_v20  ;;  %1637 = vmatmul.bf16.gmra.mxu3 %v1120_v20  ;;  %v7205_v7 = vpop.eup %5768  ;;  %v2201_v60 = vmul.f32 %v7199_v34, %v7176_v49  ;;  %v2211_v20 = vand.u32 2147483648, %v7176_v49  ;;  %v834_v42 = vmul.f32 %v7193_v3, %v833_v46  ;;  %5778 = vpow2.f32 %v5302_v16  ;;  %v1524_v16 = vpop.f32.mrf.mxu2  ;;  %13160 = vst [vmem:[#allocation26_spill] sm:$0xff] %v7263_v58 }
 0x20d   : > { %v2216_v2 = vmul.f32 %v7205_v7, %v7178_v29  ;;  %v7220_v50 = vpop.eup %5770  ;;  %5780 = vpow2.f32 %v5303_v22  ;;  %v5304_v22 = vmul.f32 -1.442695, %v7236_v56  ;;  %vm2206_vm14 = vweird.f32 %v7199_v34 }
 0x20e   : > { %v7227_v40 = vpop.eup %5772  ;;  %v2231_v28 = vmul.f32 %v7220_v50, %v7185_v44  ;;  %vm2221_vm15 = vweird.f32 %v7205_v7  ;;  %v7273_v55 = vadd.f32 %v1524_v16, %v7150_v30  ;;  %v5305_v51 = vmul.f32 -1.442695, %v7263_v58  ;;  %v1613_v16 = vpop.f32.mrf.mxu3  ;;  %vm7316_vm8 = vmor %vm2205_vm11, %vm2206_vm14 }
 0x20f   : > { %v2217_v57 = vsub.f32 1.0, %v2216_v2  ;;  %v2261_v37 = vmul.f32 %v7227_v40, %v7187_v1  ;;  %vm2236_vm4 = vweird.f32 %v7220_v50  ;;  %vm7334_vm10 = vcmp.eq.f32.partialorder %v2254_v11, 8.507059e+37  ;;  %vm7349_vm14 = vmor %vm838_vm12, %vm839_vm13 }
 0x210   : > { %v7232_v33 = vpop.eup %5774  ;;  %13161 = vst [vmem:[#allocation27_spill] sm:$0xff] %v7273_v55  ;;  %vm7359_vm5 = vmor %vm2220_vm0, %vm2221_vm15  ;;  %vm2280_vm0 = vweird.f32 %v7191_v62 }
 0x211   : > { %v7238_v9 = vpop.eup %5776  ;;  %v2246_v46 = vmul.f32 %v7232_v33, %v7189_v61  ;;  %v2262_v38 = vsub.f32 1.0, %v2261_v37  ;;  %vm2251_vm6 = vweird.f32 %v7232_v33  ;;  %vm7374_vm12 = vmor %vm2235_vm2, %vm2236_vm4 }
 0x212   : > { %v2276_v2 = vmul.f32 %v7238_v9, %v7191_v62  ;;  %vm2281_vm13 = vweird.f32 %v7238_v9 }
 0x214   : > { %v2277_v37 = vsub.f32 1.0, %v2276_v2  ;;  %v2263_v2 = vmul.f32 %v7227_v40, %v2262_v38 }
 0x23a   : > { %v595_v54 = vpop.xlane.xlu2 %594 }
 0x23b   : > { %v643_v32 = vmul.f32 %v595_v54, %v6766_v13  ;;  %v2202_v54 = vsub.f32 1.0, %v2201_v60  ;;  %v835_v60 = vmul.f32 0.5, %v834_v42  ;;  %v2239_v42 = vand.u32 2147483647, %v7185_v44 }
 0x23c   : > { %v2286_v44 = vand.u32 2147483648, %v7191_v62 }
 0x23d   : > { %v7222_v59 = vadd.f32 1e-05, %v643_v32  ;;  %v836_v19 = vsub.f32 1.5, %v835_v60  ;;  %v1348_v60 = vpop.f32.mrf.mxu0  ;;  %vm7320_vm9 = vcmp.eq.f32.partialorder %v2239_v42, 8.507059e+37 }
 0x23f   : > { %5782 = vrsqrt.f32 %v7222_v59 }
 0x240   : > { %5784 = vpow2.f32 %v5304_v22  ;;  %v5306_v22 = vmul.f32 -1.442695, %v7273_v55 }
 0x241   : > { %5786 = vpow2.f32 %v5305_v51 }
 0x242   : > { %v7181_v31 = vpop.xlane.xlu2 %596 }
 0x24a   : > { %v444_v14 = vpop.xlane.xlu2 %443 }
 0x24b   : > { %v491_v47 = vmul.f32 %v6766_v13, %v444_v14  ;;  %v7251_v14 = vor.u32 1.1754944e-38, %v2226_v48  ;;  %v2218_v48 = vmul.f32 %v7205_v7, %v2217_v57  ;;  %v2247_v57 = vsub.f32 1.0, %v2246_v46  ;;  %v7450_v11 = vpop.xlane.xlu0 %598 }
 0x24c   : > { %v2269_v46 = vand.u32 2147483647, %v7187_v1 }
 0x24d   : > { %v7225_v35 = vsub.f32 %v7065_v36, %v491_v47  ;;  %v7240_v36 = vor.u32 1.1754944e-38, %v2211_v20  ;;  %v2256_v47 = vand.u32 2147483648, %v7189_v61  ;;  %v2203_v20 = vmul.f32 %v7199_v34, %v2202_v54 }
 0x24e   : > { %v2232_v54 = vsub.f32 1.0, %v2231_v28  ;;  %v7289_v4 = vadd.f32 %v7205_v7, %v2218_v48  ;;  %v2248_v58 = vmul.f32 %v7232_v33, %v2247_v57  ;;  %v2278_v57 = vmul.f32 %v7238_v9, %v2277_v37 }
 0x24f   : > { %13158 = vst [vmem:[#allocation24_spill] sm:$0xff] %v7225_v35  ;;  %v555_v32 = vmul.f32 %v7225_v35, %v7225_v35  ;;  %v5779_v35 = vpop.eup %5778  ;;  %v7281_v45 = vor.u32 1.1754944e-38, %v2256_v47  ;;  %v2204_v63 = vadd.f32 %v7199_v34, %v2203_v20  ;;  %vm7338_vm11 = vcmp.eq.f32.partialorder %v2269_v46, 8.507059e+37 }
 0x250   : > { %v5781_v52 = vpop.eup %5780  ;;  %v7294_v47 = vadd.f32 1.0, %v5779_v35  ;;  %v2233_v20 = vmul.f32 %v7220_v50, %v2232_v54  ;;  %v7308_v35 = vadd.f32 %v1613_v16, %v7152_v25  ;;  %v7329_v16 = vadd.f32 %v1348_v60, %v7140_v15  ;;  %v1437_v60 = vpop.f32.mrf.mxu1 }
 0x251   : > { %610 = vadd.xlane.f32.xlu0 %v555_v32  ;;  %v7283_v28 = vpop.eup %5782  ;;  %v7305_v56 = vadd.f32 1.0, %v5781_v52  ;;  %v7325_v52 = vmul.f32 %v7193_v3, %v836_v19  ;;  %v2208_v49 = vsel %vm7316_vm8, %v7199_v34, %v2204_v63  ;;  %v2271_v19 = vand.u32 2147483648, %v7187_v1 }
 0x252   : > { %v843_v54 = vmul.f32 %v7283_v28, %v7222_v59  ;;  %5788 = vrcp.f32 %v7294_v47  ;;  %v5785_v37 = vpop.eup %5784  ;;  %v2234_v51 = vadd.f32 %v7220_v50, %v2233_v20  ;;  %v2264_v34 = vadd.f32 %v7227_v40, %v2263_v2 }
 0x253   : > { %vm2266_vm8 = vweird.f32 %v7227_v40  ;;  %5790 = vpow2.f32 %v5306_v22  ;;  %v2249_v46 = vadd.f32 %v7232_v33, %v2248_v58  ;;  %v5307_v17 = vmul.f32 -1.442695, %v7308_v35  ;;  %v5787_v38 = vpop.eup %5786 }
 0x254   : > { %5792 = vrcp.f32 %v7305_v56  ;;  %v844_v20 = vmul.f32 %v7283_v28, %v843_v54  ;;  %v2213_v2 = vsel %vm7275_vm1, %v7240_v36, %v2208_v49  ;;  %v2279_v58 = vadd.f32 %v7238_v9, %v2278_v57  ;;  %vm7387_vm15 = vmor %vm2265_vm3, %vm2266_vm8 }
 0x255   : > { %v5308_v22 = vmul.f32 -1.442695, %v7329_v16  ;;  %v2223_v32 = vsel %vm7359_vm5, %v7205_v7, %v7289_v4  ;;  %v7393_v54 = vadd.f32 1.0, %v5785_v37  ;;  %v2238_v57 = vsel %vm7374_vm12, %v7220_v50, %v2234_v51  ;;  %vm7420_vm3 = vmor %vm2280_vm0, %vm2281_vm13 }
 0x256   : > { %vm13182_vm1 = vweird.f32 %v7189_v61  ;;  %v2268_v1 = vsel %vm7387_vm15, %v7227_v40, %v2264_v34  ;;  %v2284_v7 = vand.u32 2147483647, %v7191_v62  ;;  %v7411_v49 = vadd.f32 %v1437_v60, %v7142_v21  ;;  %v7424_v34 = vpop.xlane.xlu1 %602 }
 0x257   : > { %vm7402_vm2 = vmor %vm13182_vm1, %vm2251_vm6  ;;  %v2272_v61 = vor.u32 1.1754944e-38, %v2271_v19  ;;  %5794 = vpow2.f32 %v5307_v17  ;;  %v845_v40 = vmul.f32 0.5, %v844_v20  ;;  %v2228_v63 = vsel %vm7300_vm7, %v7251_v14, %v2223_v32 }
 0x258   : > { %v7413_v37 = vpop.eup %5788  ;;  %v2253_v50 = vsel %vm7402_vm2, %v7232_v33, %v2249_v46  ;;  %v841_v33 = vsel %vm7349_vm14, %v7193_v3, %v7325_v52  ;;  %v2283_v19 = vsel %vm7420_vm3, %v7238_v9, %v2279_v58  ;;  %5796 = vpow2.f32 %v5308_v22  ;;  %v446_v58 = vpop.xlane.xlu2 %445 }
 0x259   : > { %v5791_v62 = vpop.eup %5790  ;;  %v2243_v17 = vsel %vm7320_vm9, %v7270_v18, %v2238_v57  ;;  %v2273_v48 = vsel %vm7338_vm11, %v2272_v61, %v2268_v1  ;;  %v2287_v14 = vor.u32 1.1754944e-38, %v2286_v44  ;;  %5798 = vrcp.f32 %v7393_v54 }
 0x25a   : > { %v7436_v46 = vpop.eup %5792  ;;  %v2258_v3 = vsel %vm7334_vm10, %v7281_v45, %v2253_v50  ;;  %vm2285_vm4 = vcmp.eq.f32.partialorder %v2284_v7, 8.507059e+37  ;;  %v2291_v9 = vmul.f32 %v7413_v37, %v7294_v47  ;;  %v5309_v52 = vmul.f32 -1.442695, %v7411_v49 }
 0x25b   : > { %v7453_v18 = vmul.f32 %v2213_v2, %v7145_v6  ;;  %v2288_v39 = vsel %vm2285_vm4, %v2287_v14, %v2283_v19  ;;  %v7455_v42 = vadd.f32 1.0, %v5787_v38  ;;  %v846_v60 = vsub.f32 1.5, %v845_v40 }
 0x25c   : > { %v7458_v20 = vmul.f32 %v841_v33, %v6983_v24  ;;  %v7461_v45 = vmul.f32 %v2273_v48, %v7160_v12  ;;  %v2306_v55 = vmul.f32 %v7436_v46, %v7305_v56  ;;  %v7465_v29 = vadd.f32 1.0, %v5791_v62 }
 0x25d   : > { %13187 = vst [vmem:[#allocation28_spill] sm:$0xff] %v7453_v18  ;;  %v5795_v22 = vpop.eup %5794  ;;  %v7468_v6 = vmul.f32 %v2228_v63, %v7148_v53  ;;  %v7471_v2 = vmul.f32 %v2243_v17, %v7157_v23  ;;  %v7474_v32 = vmul.f32 %v2258_v3, %v7163_v26  ;;  %v2301_v24 = vand.u32 2147483648, %v7294_v47 }
 0x25e   : > { %13188 = vst [vmem:[#allocation29_spill] sm:$0xff] %v7461_v45  ;;  %v5797_v12 = vpop.eup %5796  ;;  %v7478_v36 = vmul.f32 %v2288_v39, %v7166_v27  ;;  %v2292_v44 = vsub.f32 1.0, %v2291_v9  ;;  %v2316_v38 = vand.u32 2147483648, %v7305_v56  ;;  %5800 = vpow2.f32 %v5309_v52  ;;  %v7497_v50 = vpop.xlane.xlu1 %604 }
 0x25f   : > { %13189 = vst [vmem:[#allocation30_spill] sm:$0xff] %v7468_v6  ;;  %v7481_v57 = vpop.eup %5798  ;;  %5802 = vrcp.f32 %v7455_v42  ;;  %v847_v53 = vmul.f32 %v7283_v28, %v846_v60  ;;  %vm849_vm5 = vweird.f32 %v7283_v28  ;;  %v492_v23 = vmul.f32 %v6766_v13, %v446_v58  ;;  %v7530_v39 = vpop.xlane.xlu0 %600 }
 0x260   : > { %13190 = vst [vmem:[#allocation31_spill] sm:$0xff] %v7471_v2  ;;  %v2299_v27 = vand.u32 2147483647, %v7294_v47  ;;  %v2307_v4 = vsub.f32 1.0, %v2306_v55  ;;  %5804 = vrcp.f32 %v7465_v29  ;;  %vm2295_vm6 = vweird.f32 %v7294_v47 }
 0x261   : > { %13191 = vst [vmem:[#allocation32_spill] sm:$0xff] %v7474_v32  ;;  %v7492_v1 = vor.u32 1.1754944e-38, %v2301_v24  ;;  %v7494_v7 = vadd.f32 1.0, %v5795_v22  ;;  %vm848_vm7 = vweird.f32 %v7222_v59  ;;  %v2293_v61 = vmul.f32 %v7413_v37, %v2292_v44  ;;  %v1351_v22 = vpop.f32.mrf.mxu0 }
 0x262   : > { %13192 = vst [vmem:[#allocation33_spill] sm:$0xff] %v7478_v36  ;;  %vm2310_vm9 = vweird.f32 %v7305_v56  ;;  %v2314_v51 = vand.u32 2147483647, %v7305_v56  ;;  %v2321_v40 = vmul.f32 %v7481_v57, %v7393_v54  ;;  %v7504_v62 = vadd.f32 1.0, %v5797_v12  ;;  %vm7508_vm10 = vmor %vm848_vm7, %vm849_vm5 }
 0x263   : > { %v7514_v33 = vor.u32 1.1754944e-38, %v2316_v38  ;;  %v851_v19 = vsel %vm7508_vm10, %v7283_v28, %v847_v53  ;;  %v7520_v17 = vsub.f32 %v7077_v8, %v492_v23  ;;  %vm2296_vm11 = vweird.f32 %v7413_v37 }
 0x264   : > { %v5801_v48 = vpop.eup %5800  ;;  %vm7523_vm14 = vcmp.eq.f32.partialorder %v2299_v27, 8.507059e+37  ;;  %v2308_v3 = vmul.f32 %v7436_v46, %v2307_v4  ;;  %v2331_v9 = vand.u32 2147483648, %v7393_v54  ;;  %v2346_v52 = vand.u32 2147483648, %v7455_v42  ;;  %vm7568_vm15 = vmor %vm2295_vm6, %vm2296_vm11 }
 0x265   : > { %13195 = vst [vmem:[#allocation34_spill] sm:$0xff] %v7520_v17  ;;  %v7532_v60 = vpop.eup %5802  ;;  %vm2311_vm8 = vweird.f32 %v7436_v46  ;;  %v2329_v8 = vand.u32 2147483647, %v7393_v54  ;;  %5806 = vrcp.f32 %v7494_v7  ;;  %v2294_v58 = vadd.f32 %v7413_v37, %v2293_v61 }
 0x266   : > { %v7538_v55 = vpop.eup %5804  ;;  %vm7541_vm12 = vcmp.eq.f32.partialorder %v2314_v51, 8.507059e+37  ;;  %v2322_v24 = vsub.f32 1.0, %v2321_v40  ;;  %5808 = vrcp.f32 %v7504_v62  ;;  %v1027_v12 = vmul.f32 %v851_v19, %v7035_v43  ;;  %v1526_v51 = vpop.f32.mrf.mxu2  ;;  %v7560_v43 = vld [vmem:[#allocation5] ss:$0 sm:$0xff]  ;;  %vm7591_vm1 = vmor %vm2310_vm9, %vm2311_vm8 }
 0x267   : > { %v2361_v44 = vand.u32 2147483648, %v7465_v29  ;;  %v7548_v38 = vadd.f32 1.0, %v5801_v48  ;;  %v644_v53 = vmul.f32 %v7181_v31, %v6766_v13  ;;  %v556_v23 = vmul.f32 %v7520_v17, %v7520_v17  ;;  %v448_v14 = vpop.xlane.xlu0 %447  ;;  %v5620_v17 = vld [vmem:[#allocation10 + $0xf0] sm:$0xff] }
 0x268   : > { %v2309_v27 = vadd.f32 %v7436_v46, %v2308_v3  ;;  %vm2325_vm13 = vweird.f32 %v7393_v54  ;;  %v7556_v4 = vor.u32 1.1754944e-38, %v2331_v9  ;;  %v7558_v61 = vor.u32 1.1754944e-38, %v2346_v52  ;;  %v1615_v3 = vpop.f32.mrf.mxu3 }
 0x269   : > { %v1061_v40 = vmul.f32 %v7560_v43, %v7458_v20  ;;  %v2336_v63 = vmul.f32 %v7532_v60, %v7455_v42  ;;  %v2351_v19 = vmul.f32 %v7538_v55, %v7465_v29  ;;  %v645_v20 = vmul.f32 %v7450_v11, %v6766_v13  ;;  %612 = vadd.xlane.f32.xlu0 %v556_v23 }
 0x26a   : > { %v2298_v47 = vsel %vm7568_vm15, %v7413_v37, %v2294_v58  ;;  %v2323_v9 = vmul.f32 %v7481_v57, %v2322_v24  ;;  %vm2326_vm0 = vweird.f32 %v7481_v57  ;;  %v1062_v52 = vmul.f32 %v7560_v43, %v1027_v12  ;;  %v452_v24 = vpop.xlane.xlu1 %451 }
 0x26b   : > { %v7585_v59 = vpop.eup %5806  ;;  %v7595_v11 = vor.u32 1.1754944e-38, %v2361_v44  ;;  %5810 = vrcp.f32 %v7548_v38  ;;  %v7599_v37 = vadd.f32 %v1526_v51, %v7150_v30  ;;  %v7601_v58 = vadd.f32 1e-05, %v644_v53  ;;  %v7614_v44 = vld [vmem:[%s12999_s2] ss:$0 sm:$0xff]  ;;  %vm7656_vm7 = vmor %vm2325_vm13, %vm2326_vm0 }
 0x26c   : > { %v7603_v12 = vpop.eup %5808  ;;  %v2313_v56 = vsel %vm7591_vm1, %v7436_v46, %v2309_v27  ;;  %v7609_v23 = vadd.f32 %v1615_v3, %v7152_v25  ;;  %v1096_v51 = vadd.f32 %v7614_v44, %v1061_v40  ;;  %v1097_v53 = vadd.f32 %v7614_v44, %v1062_v52 }
 0x26d   : > { %v2303_v31 = vsel %vm7523_vm14, %v7492_v1, %v2298_v47  ;;  %vm7621_vm2 = vcmp.eq.f32.partialorder %v2329_v8, 8.507059e+37  ;;  %v2337_v46 = vsub.f32 1.0, %v2336_v63  ;;  %vm2341_vm3 = vweird.f32 %v7532_v60 }
 0x26e   : > { %v2352_v26 = vsub.f32 1.0, %v2351_v19  ;;  %v7626_v27 = vadd.f32 1e-05, %v645_v20  ;;  %v2324_v3 = vadd.f32 %v7481_v57, %v2323_v9  ;;  %vm2356_vm4 = vweird.f32 %v7538_v55  ;;  %v1529_v28 = vpop.f32.mrf.mxu2 }
 0x26f   : > { %v2366_v40 = vmul.f32 %v7585_v59, %v7494_v7  ;;  %v1121_v52 = vpack.c.bf16 %v1097_v53, %v1096_v51  ;;  %v495_v1 = vmul.f32 %v6766_v13, %v452_v24  ;;  %v2318_v8 = vsel %vm7541_vm12, %v7514_v33, %v2313_v56  ;;  %v1440_v53 = vpop.f32.mrf.mxu1 }
 0x270   : > { %vm2340_vm5 = vweird.f32 %v7455_v42  ;;  %v2381_v63 = vmul.f32 %v7603_v12, %v7504_v62  ;;  %v5310_v19 = vmul.f32 -1.442695, %v7599_v37  ;;  %5812 = vrsqrt.f32 %v7601_v58  ;;  %v1618_v2 = vpop.f32.mrf.mxu3 }
 0x271   : > { %v7642_v20 = vmul.f32 %v2303_v31, %v7197_v5  ;;  %vm2355_vm6 = vweird.f32 %v7465_v29  ;;  %v2374_v47 = vand.u32 2147483647, %v7494_v7  ;;  %v5311_v9 = vmul.f32 -1.442695, %v7609_v23  ;;  %1375 = vmatmul.bf16.gmra.mxu0 %v1121_v52  ;;  %1464 = vmatmul.bf16.gmra.mxu1 %v1121_v52  ;;  %v7650_v24 = vpop.eup %5810  ;;  %vm7724_vm8 = vmor %vm2340_vm5, %vm2341_vm3 }
 0x272   : > { %v7648_v33 = vsub.f32 %v7106_v0, %v495_v1  ;;  %v2338_v56 = vmul.f32 %v7532_v60, %v2337_v46  ;;  %v2376_v51 = vand.u32 2147483648, %v7494_v7  ;;  %5814 = vrsqrt.f32 %v7626_v27  ;;  %1553 = vmatmul.bf16.gmra.mxu2 %v1121_v52  ;;  %1642 = vmatmul.bf16.gmra.mxu3 %v1121_v52  ;;  %vm7746_vm15 = vmor %vm2355_vm6, %vm2356_vm4 }
 0x273   : > { %13206 = vst [vmem:[#allocation35_spill] sm:$0xff] %v7642_v20  ;;  %v493_v0 = vmul.f32 %v6766_v13, %v448_v14  ;;  %v7665_v31 = vmul.f32 %v2318_v8, %v7203_v10  ;;  %v2328_v54 = vsel %vm7656_vm7, %v7481_v57, %v2324_v3  ;;  %v2353_v1 = vmul.f32 %v7538_v55, %v2352_v26  ;;  %v1353_v26 = vpop.f32.mrf.mxu0 }
 0x274   : > { %13207 = vst [vmem:[#allocation36_spill] sm:$0xff] %v7648_v33  ;;  %v2367_v46 = vsub.f32 1.0, %v2366_v40  ;;  %v2382_v6 = vsub.f32 1.0, %v2381_v63  ;;  %5816 = vpow2.f32 %v5310_v19  ;;  %v7672_v36 = vadd.f32 %v1351_v22, %v7140_v15  ;;  %v394_v40 = vld [vmem:[%s6745_s18 + $0xf8] sm:$0xff] }
 0x275   : > { %13210 = vst [vmem:[#allocation37_spill] sm:$0xff] %v7665_v31  ;;  %v7675_v52 = vsub.f32 %v7096_v41, %v493_v0  ;;  %v13212_v14 = vand.u32 2147483647, %v7455_v42  ;;  %v13215_v57 = vand.u32 2147483647, %v7465_v29  ;;  %vm2370_vm11 = vweird.f32 %v7494_v7  ;;  %459 = vadd.xlane.f32.xlu0 %v394_v40 }
 0x276   : > { %v2396_v3 = vmul.f32 %v7650_v24, %v7548_v38  ;;  %5818 = vpow2.f32 %v5311_v9  ;;  %v7693_v41 = vadd.f32 %v1440_v53, %v7142_v21  ;;  %v559_v8 = vmul.f32 %v7648_v33, %v7648_v33  ;;  %v7698_v63 = vpop.eup %5812 }
 0x277   : > { %13211 = vst [vmem:[#allocation38_spill] sm:$0xff] %v7675_v52  ;;  %vm7679_vm9 = vcmp.eq.f32.partialorder %v13212_v14, 8.507059e+37  ;;  %vm7685_vm10 = vcmp.eq.f32.partialorder %v13215_v57, 8.507059e+37  ;;  %v2339_v22 = vadd.f32 %v7532_v60, %v2338_v56  ;;  %v7704_v5 = vadd.f32 %v1529_v28, %v7150_v30 }
 0x278   : > { %v557_v9 = vmul.f32 %v7675_v52, %v7675_v52  ;;  %v2333_v53 = vsel %vm7621_vm2, %v7556_v4, %v2328_v54  ;;  %v2354_v0 = vadd.f32 %v7538_v55, %v2353_v1  ;;  %v2368_v14 = vmul.f32 %v7585_v59, %v2367_v46  ;;  %618 = vadd.xlane.f32.xlu2 %v559_v8  ;;  %v7713_v19 = vpop.eup %5814  ;;  %v13222_v46 = vld [vmem:[#allocation25_spill] sm:$0xff] }
 0x279   : > { %v2377_v57 = vor.u32 1.1754944e-38, %v2376_v51  ;;  %vm2371_vm14 = vweird.f32 %v7585_v59  ;;  %v2383_v56 = vmul.f32 %v7603_v12, %v2382_v6  ;;  %v5312_v40 = vmul.f32 -1.442695, %v7672_v36 }
 0x27a   : > { %614 = vadd.xlane.f32.xlu1 %v557_v9  ;;  %vm7728_vm12 = vcmp.eq.f32.partialorder %v2374_v47, 8.507059e+37  ;;  %vm2385_vm13 = vweird.f32 %v7504_v62  ;;  %v2397_v51 = vsub.f32 1.0, %v2396_v3  ;;  %v5313_v6 = vmul.f32 -1.442695, %v7693_v41  ;;  %v5817_v1 = vpop.eup %5816  ;;  %vm7778_vm1 = vmor %vm2370_vm11, %vm2371_vm14 }
 0x27b   : > { %v853_v54 = vmul.f32 %v7698_v63, %v7601_v58  ;;  %v7737_v8 = vmul.f32 %v2333_v53, %v13222_v46  ;;  %v2343_v42 = vsel %vm7724_vm8, %v7532_v60, %v2339_v22  ;;  %v2389_v3 = vand.u32 2147483647, %v7504_v62 }
 0x27c   : > { %v5314_v9 = vmul.f32 -1.442695, %v7704_v5  ;;  %v5819_v28 = vpop.eup %5818  ;;  %v2358_v53 = vsel %vm7746_vm15, %v7538_v55, %v2354_v0  ;;  %v2369_v4 = vadd.f32 %v7585_v59, %v2368_v14  ;;  %v7757_v60 = vadd.f32 %v1618_v2, %v7152_v25  ;;  %v450_v14 = vpop.xlane.xlu0 %449 }
 0x27d   : > { %13223 = vst [vmem:[#allocation25_spill] sm:$0xff] %v7737_v8  ;;  %v863_v29 = vmul.f32 %v7713_v19, %v7626_v27  ;;  %v2384_v22 = vadd.f32 %v7603_v12, %v2383_v56  ;;  %vm2386_vm0 = vweird.f32 %v7603_v12  ;;  %v2391_v46 = vand.u32 2147483648, %v7504_v62 }
 0x27e   : > { %5820 = vpow2.f32 %v5312_v40  ;;  %v2398_v32 = vmul.f32 %v7650_v24, %v2397_v51  ;;  %v7765_v31 = vadd.f32 1.0, %v5817_v1  ;;  %v854_v55 = vmul.f32 %v7698_v63, %v853_v54  ;;  %vm7789_vm2 = vmor %vm2385_vm13, %vm2386_vm0  ;;  %v1531_v1 = vpop.f32.mrf.mxu2 }
 0x27f   : > { %5822 = vpow2.f32 %v5313_v6  ;;  %v2348_v2 = vsel %vm7679_vm9, %v7558_v61, %v2343_v42  ;;  %v2363_v0 = vsel %vm7685_vm10, %v7595_v11, %v2358_v53  ;;  %v7782_v56 = vadd.f32 1.0, %v5819_v28  ;;  %v1442_v6 = vpop.f32.mrf.mxu1  ;;  %v1620_v61 = vpop.f32.mrf.mxu3 }
 0x280   : > { %5824 = vpow2.f32 %v5314_v9  ;;  %v2373_v10 = vsel %vm7778_vm1, %v7585_v59, %v2369_v4  ;;  %vm7793_vm3 = vcmp.eq.f32.partialorder %v2389_v3, 8.507059e+37  ;;  %v5315_v7 = vmul.f32 -1.442695, %v7757_v60  ;;  %v7814_v9 = vpop.xlane.xlu2 %606 }
 0x281   : > { %v864_v28 = vmul.f32 %v7713_v19, %v863_v29  ;;  %v2388_v40 = vsel %vm7789_vm2, %v7603_v12, %v2384_v22  ;;  %v2392_v59 = vor.u32 1.1754944e-38, %v2391_v46  ;;  %v2404_v62 = vand.u32 2147483647, %v7548_v38 }
 0x282   : > { %v2406_v51 = vand.u32 2147483648, %v7548_v38  ;;  %v2399_v54 = vadd.f32 %v7650_v24, %v2398_v32  ;;  %vm2401_vm4 = vweird.f32 %v7650_v24  ;;  %5826 = vrcp.f32 %v7765_v31 }
 0x283   : > { %v855_v42 = vmul.f32 0.5, %v854_v55  ;;  %v2378_v3 = vsel %vm7728_vm12, %v2377_v57, %v2373_v10  ;;  %vm2400_vm5 = vweird.f32 %v7548_v38  ;;  %5828 = vrcp.f32 %v7782_v56  ;;  %v13232_v57 = vld [vmem:[#allocation26_spill] sm:$0xff]  ;;  %v13234_v38 = vld [vmem:[#allocation27_spill] sm:$0xff] }
 0x284   : > { %v5821_v47 = vpop.eup %5820  ;;  %v7812_v12 = vadd.f32 %v1353_v26, %v7140_v15  ;;  %v2393_v53 = vsel %vm7793_vm3, %v2392_v59, %v2388_v40  ;;  %5830 = vpow2.f32 %v5315_v7  ;;  %v7819_v4 = vadd.f32 %v1442_v6, %v7142_v21  ;;  %vm7829_vm6 = vmor %vm2400_vm5, %vm2401_vm4 }
 0x285   : > { %v5823_v32 = vpop.eup %5822  ;;  %v865_v29 = vmul.f32 0.5, %v864_v28  ;;  %v7822_v22 = vmul.f32 %v2348_v2, %v13232_v57  ;;  %v7825_v46 = vmul.f32 %v2363_v0, %v13234_v38  ;;  %vm7833_vm7 = vcmp.eq.f32.partialorder %v2404_v62, 8.507059e+37 }
 0x286   : > { %v5825_v48 = vpop.eup %5824  ;;  %v7838_v10 = vadd.f32 %v1531_v1, %v7150_v30  ;;  %v2403_v2 = vsel %vm7829_vm6, %v7650_v24, %v2399_v54  ;;  %v2407_v0 = vor.u32 1.1754944e-38, %v2406_v51  ;;  %v7843_v11 = vadd.f32 1.0, %v5821_v47  ;;  %v454_v1 = vpop.xlane.xlu1 %453 }
 0x287   : > { %13233 = vst [vmem:[#allocation26_spill] sm:$0xff] %v7822_v22  ;;  %v856_v7 = vsub.f32 1.5, %v855_v42  ;;  %v7846_v26 = vmul.f32 %v2378_v3, %v7308_v35  ;;  %v7849_v28 = vmul.f32 %v2393_v53, %v7329_v16  ;;  %v7851_v40 = vadd.f32 1.0, %v5823_v32 }
 0x288   : > { %13235 = vst [vmem:[#allocation27_spill] sm:$0xff] %v7825_v46  ;;  %v5316_v59 = vmul.f32 -1.442695, %v7812_v12  ;;  %v7854_v62 = vpop.eup %5826  ;;  %v7856_v6 = vadd.f32 1.0, %v5825_v48  ;;  %v5317_v24 = vmul.f32 -1.442695, %v7819_v4  ;;  %v7860_v51 = vadd.f32 %v1620_v61, %v7152_v25 }
 0x289   : > { %13240 = vst [vmem:[#allocation39_spill] sm:$0xff] %v7846_v26  ;;  %v866_v54 = vsub.f32 1.5, %v865_v29  ;;  %v7862_v35 = vpop.eup %5828  ;;  %v2408_v16 = vsel %vm7833_vm7, %v2407_v0, %v2403_v2  ;;  %v2421_v42 = vand.u32 2147483648, %v7765_v31  ;;  %v5318_v47 = vmul.f32 -1.442695, %v7838_v10  ;;  %v7896_v0 = vpop.xlane.xlu2 %608  ;;  %v6303_v2 = vld [vmem:[%s6745_s18 + $0xd0] sm:$0xff] }
 0x28a   : > { %13241 = vst [vmem:[#allocation40_spill] sm:$0xff] %v7849_v28  ;;  %vm859_vm9 = vweird.f32 %v7698_v63  ;;  %v5831_v3 = vpop.eup %5830  ;;  %5832 = vrcp.f32 %v7843_v11  ;;  %v857_v32 = vmul.f32 %v7698_v63, %v856_v7  ;;  %vm868_vm10 = vweird.f32 %v7626_v27  ;;  %v6302_v7 = vld [vmem:[%s6745_s18 + $0xe0] sm:$0xff] }
 0x28b   : > { %vm869_vm11 = vweird.f32 %v7713_v19  ;;  %v2436_v53 = vand.u32 2147483648, %v7782_v56  ;;  %5834 = vrcp.f32 %v7851_v40  ;;  %vm858_vm14 = vweird.f32 %v7601_v58 }
 0x28c   : > { %v496_v29 = vmul.f32 %v6766_v13, %v454_v1  ;;  %v2411_v48 = vmul.f32 %v7854_v62, %v7765_v31  ;;  %v2426_v57 = vmul.f32 %v7862_v35, %v7782_v56  ;;  %5836 = vrcp.f32 %v7856_v6  ;;  %vm7882_vm8 = vmor %vm858_vm14, %vm859_vm9 }
 0x28d   : > { %v867_v55 = vmul.f32 %v7713_v19, %v866_v54  ;;  %v7887_v61 = vadd.f32 1.0, %v5831_v3  ;;  %5838 = vpow2.f32 %v5316_v59  ;;  %v5319_v58 = vmul.f32 -1.442695, %v7860_v51  ;;  %vm7892_vm12 = vmor %vm868_vm10, %vm869_vm11 }
 0x28e   : > { %v7899_v1 = vsub.f32 %v6302_v7, %v496_v29  ;;  %v2419_v20 = vand.u32 2147483647, %v7765_v31  ;;  %v7902_v54 = vor.u32 1.1754944e-38, %v2421_v42  ;;  %v2434_v3 = vand.u32 2147483647, %v7782_v56 }
 0x28f   : > { %v861_v59 = vsel %vm7882_vm8, %v7698_v63, %v857_v32  ;;  %v7909_v27 = vmul.f32 %v2408_v16, %v7411_v49  ;;  %v7911_v18 = vor.u32 1.1754944e-38, %v2436_v53  ;;  %5840 = vpow2.f32 %v5317_v24  ;;  %v13248_v49 = vld [vmem:[#allocation16_spill] sm:$0xff] }
 0x290   : > { %13246 = vst [vmem:[#allocation41_spill] sm:$0xff] %v7899_v1  ;;  %v494_v45 = vmul.f32 %v6766_v13, %v450_v14  ;;  %v7914_v29 = vpop.eup %5832  ;;  %v2412_v7 = vsub.f32 1.0, %v2411_v48  ;;  %v2427_v33 = vsub.f32 1.0, %v2426_v57  ;;  %v871_v26 = vsel %vm7892_vm12, %v7713_v19, %v867_v55 }
 0x291   : > { %13247 = vst [vmem:[#allocation42_spill] sm:$0xff] %v7909_v27  ;;  %v7920_v38 = vpop.eup %5834  ;;  %5842 = vrcp.f32 %v7887_v61  ;;  %v1028_v63 = vmul.f32 %v861_v59, %v13248_v49  ;;  %v646_v24 = vmul.f32 %v7530_v39, %v6766_v13  ;;  %v560_v16 = vmul.f32 %v7899_v1, %v7899_v1  ;;  %v13249_v39 = vld [vmem:[#allocation17_spill] sm:$0xff]  ;;  %v456_v46 = vpop.xlane.xlu2 %455 }
 0x292   : > { %v7928_v32 = vpop.eup %5836  ;;  %vm2415_vm13 = vweird.f32 %v7765_v31  ;;  %v2451_v53 = vand.u32 2147483648, %v7843_v11  ;;  %v2466_v48 = vand.u32 2147483648, %v7851_v40  ;;  %v647_v57 = vmul.f32 %v7424_v34, %v6766_v13 }
 0x293   : > { %v5839_v55 = vpop.eup %5838  ;;  %vm2416_vm15 = vweird.f32 %v7854_v62  ;;  %vm2430_vm0 = vweird.f32 %v7782_v56  ;;  %5844 = vpow2.f32 %v5318_v47  ;;  %v1029_v14 = vmul.f32 %v871_v26, %v13249_v39  ;;  %620 = vadd.xlane.f32.xlu0 %v560_v16 }
 0x294   : > { %v7940_v59 = vsub.f32 %v6303_v2, %v494_v45  ;;  %v2413_v49 = vmul.f32 %v7854_v62, %v2412_v7  ;;  %v2428_v19 = vmul.f32 %v7862_v35, %v2427_v33  ;;  %v2441_v42 = vmul.f32 %v7914_v29, %v7843_v11  ;;  %vm7992_vm6 = vmor %vm2415_vm13, %vm2416_vm15 }
 0x295   : > { %v2456_v34 = vmul.f32 %v7920_v38, %v7851_v40  ;;  %v5841_v1 = vpop.eup %5840  ;;  %v2471_v47 = vmul.f32 %v7928_v32, %v7856_v6  ;;  %5846 = vpow2.f32 %v5319_v58  ;;  %v7950_v26 = vadd.f32 1e-05, %v646_v24  ;;  %v1534_v58 = vpop.f32.mrf.mxu2 }
 0x296   : > { %13250 = vst [vmem:[#allocation16_spill] sm:$0xff] %v7940_v59  ;;  %v1063_v45 = vmul.f32 %v7560_v43, %v1028_v63  ;;  %vm7953_vm1 = vcmp.eq.f32.partialorder %v2419_v20, 8.507059e+37  ;;  %vm2431_vm2 = vweird.f32 %v7862_v35  ;;  %v7958_v33 = vor.u32 1.1754944e-38, %v2451_v53 }
 0x297   : > { %v7960_v7 = vor.u32 1.1754944e-38, %v2466_v48  ;;  %v7962_v39 = vadd.f32 1e-05, %v647_v57  ;;  %v7964_v2 = vpop.eup %5842  ;;  %vm7966_vm3 = vcmp.eq.f32.partialorder %v2434_v3, 8.507059e+37  ;;  %v2481_v63 = vand.u32 2147483648, %v7856_v6  ;;  %vm8008_vm10 = vmor %vm2430_vm0, %vm2431_vm2 }
 0x298   : > { %v7971_v20 = vadd.f32 1.0, %v5839_v55  ;;  %v1064_v24 = vmul.f32 %v7560_v43, %v1029_v14  ;;  %v558_v53 = vmul.f32 %v7940_v59, %v7940_v59  ;;  %v2414_v48 = vadd.f32 %v7854_v62, %v2413_v49 }
 0x299   : > { %v2429_v57 = vadd.f32 %v7862_v35, %v2428_v19  ;;  %v2442_v27 = vsub.f32 1.0, %v2441_v42  ;;  %v2457_v22 = vsub.f32 1.0, %v2456_v34  ;;  %v5845_v3 = vpop.eup %5844  ;;  %vm2445_vm4 = vweird.f32 %v7843_v11  ;;  %v1356_v42 = vpop.f32.mrf.mxu0 }
 0x29a   : > { %v2472_v28 = vsub.f32 1.0, %v2471_v47  ;;  %5848 = vrsqrt.f32 %v7950_v26  ;;  %v1098_v55 = vadd.f32 %v7614_v44, %v1063_v45  ;;  %v1099_v14 = vadd.f32 %v7614_v44, %v1064_v24  ;;  %616 = vadd.xlane.f32.xlu1 %v558_v53 }
 0x29b   : > { %vm2460_vm5 = vweird.f32 %v7851_v40  ;;  %v2479_v59 = vand.u32 2147483647, %v7856_v6  ;;  %v2486_v19 = vmul.f32 %v7964_v2, %v7887_v61  ;;  %5850 = vrsqrt.f32 %v7962_v39  ;;  %v5847_v34 = vpop.eup %5846 }
 0x29c   : > { %v497_v49 = vmul.f32 %v6766_v13, %v456_v46  ;;  %vm2446_vm7 = vweird.f32 %v7914_v29  ;;  %vm2475_vm9 = vweird.f32 %v7856_v6  ;;  %5852 = vrcp.f32 %v7971_v20 }
 0x29d   : > { %v7999_v45 = vadd.f32 1.0, %v5841_v1  ;;  %v1122_v24 = vpack.c.bf16 %v1099_v14, %v1098_v55  ;;  %v2418_v46 = vsel %vm7992_vm6, %v7854_v62, %v2414_v48  ;;  %v2443_v53 = vmul.f32 %v7914_v29, %v2442_v27  ;;  %v6304_v14 = vld [vmem:[%s6745_s18 + $0xe8] sm:$0xff]  ;;  %vm8075_vm15 = vmor %vm2445_vm4, %vm2446_vm7 }
 0x29e   : > { %v2458_v8 = vmul.f32 %v7920_v38, %v2457_v22  ;;  %v8014_v1 = vadd.f32 1.0, %v5845_v3  ;;  %v2433_v55 = vsel %vm8008_vm10, %v7862_v35, %v2429_v57  ;;  %v2473_v62 = vmul.f32 %v7928_v32, %v2472_v28  ;;  %v1445_v57 = vpop.f32.mrf.mxu1 }
 0x29f   : > { %v8020_v48 = vor.u32 1.1754944e-38, %v2481_v63  ;;  %v8023_v56 = vadd.f32 %v1356_v42, %v7140_v15  ;;  %1380 = vmatmul.bf16.gmra.mxu0 %v1122_v24  ;;  %1469 = vmatmul.bf16.gmra.mxu1 %v1122_v24  ;;  %v13259_v27 = vand.u32 2147483647, %v7843_v11  ;;  %vm2461_vm14 = vweird.f32 %v7920_v38 }
 0x2a0   : > { %v13262_v3 = vand.u32 2147483647, %v7851_v40  ;;  %v2487_v28 = vsub.f32 1.0, %v2486_v19  ;;  %v8038_v63 = vadd.f32 1.0, %v5847_v34  ;;  %1558 = vmatmul.bf16.gmra.mxu2 %v1122_v24  ;;  %1647 = vmatmul.bf16.gmra.mxu3 %v1122_v24  ;;  %v8041_v42 = vsub.f32 %v6304_v14, %v497_v49  ;;  %v8043_v47 = vpop.eup %5848  ;;  %vm8095_vm0 = vmor %vm2460_vm5, %vm2461_vm14 }
 0x2a1   : > { %vm8027_vm11 = vcmp.eq.f32.partialorder %v13259_v27, 8.507059e+37  ;;  %v2423_v31 = vsel %vm7953_vm1, %v7902_v54, %v2418_v46  ;;  %vm8048_vm12 = vcmp.eq.f32.partialorder %v2479_v59, 8.507059e+37  ;;  %v2494_v19 = vand.u32 2147483647, %v7887_v61  ;;  %v8055_v24 = vpop.eup %5850  ;;  %v1358_v22 = vpop.f32.mrf.mxu0 }
 0x2a2   : > { %vm8034_vm8 = vcmp.eq.f32.partialorder %v13262_v3, 8.507059e+37  ;;  %13265 = vst [vmem:[#allocation17_spill] sm:$0xff] %v8041_v42  ;;  %v2496_v34 = vand.u32 2147483648, %v7887_v61  ;;  %5854 = vrcp.f32 %v7999_v45  ;;  %v2438_v49 = vsel %vm7966_vm3, %v7911_v18, %v2433_v55  ;;  %v8063_v59 = vpop.eup %5852 }
 0x2a3   : > { %v2444_v3 = vadd.f32 %v7914_v29, %v2443_v53  ;;  %v2459_v54 = vadd.f32 %v7920_v38, %v2458_v8  ;;  %5856 = vrcp.f32 %v8014_v1  ;;  %v2474_v16 = vadd.f32 %v7928_v32, %v2473_v62 }
 0x2a4   : > { %vm2476_vm13 = vweird.f32 %v7928_v32  ;;  %v5320_v46 = vmul.f32 -1.442695, %v8023_v56  ;;  %v8069_v14 = vadd.f32 %v1445_v57, %v7142_v21  ;;  %v2488_v8 = vmul.f32 %v7964_v2, %v2487_v28 }
 0x2a5   : > { %5858 = vrcp.f32 %v8038_v63  ;;  %v873_v53 = vmul.f32 %v8043_v47, %v7950_v26  ;;  %v561_v55 = vmul.f32 %v8041_v42, %v8041_v42  ;;  %v8086_v62 = vmul.f32 %v2423_v31, %v7599_v37  ;;  %vm8112_vm2 = vmor %vm2475_vm9, %vm2476_vm13  ;;  %v1623_v42 = vpop.f32.mrf.mxu3 }
 0x2a6   : > { %v8089_v11 = vmul.f32 %v2438_v49, %v7609_v23  ;;  %vm2490_vm1 = vweird.f32 %v7887_v61  ;;  %v883_v57 = vmul.f32 %v8055_v24, %v7962_v39  ;;  %v2448_v37 = vsel %vm8075_vm15, %v7914_v29, %v2444_v3 }
 0x2a7   : > { %13270 = vst [vmem:[#allocation43_spill] sm:$0xff] %v8086_v62  ;;  %v2463_v23 = vsel %vm8095_vm0, %v7920_v38, %v2459_v54  ;;  %v2497_v31 = vor.u32 1.1754944e-38, %v2496_v34  ;;  %v2501_v49 = vmul.f32 %v8063_v59, %v7971_v20  ;;  %622 = vadd.xlane.f32.xlu1 %v561_v55  ;;  %v2478_v29 = vsel %vm8112_vm2, %v7928_v32, %v2474_v16 }
 0x2a8   : > { %13271 = vst [vmem:[#allocation44_spill] sm:$0xff] %v8089_v11  ;;  %v8118_v18 = vpop.eup %5854  ;;  %vm8123_vm3 = vcmp.eq.f32.partialorder %v2494_v19, 8.507059e+37  ;;  %5860 = vpow2.f32 %v5320_v46  ;;  %v5321_v6 = vmul.f32 -1.442695, %v8069_v14  ;;  %v8129_v34 = vadd.f32 %v1534_v58, %v7150_v30 }
 0x2a9   : > { %v8131_v3 = vpop.eup %5856  ;;  %v2489_v54 = vadd.f32 %v7964_v2, %v2488_v8  ;;  %vm2491_vm4 = vweird.f32 %v7964_v2  ;;  %v874_v32 = vmul.f32 %v8043_v47, %v873_v53  ;;  %v2453_v19 = vsel %vm8027_vm11, %v7958_v33, %v2448_v37 }
 0x2aa   : > { %v2468_v16 = vsel %vm8034_vm8, %v7960_v7, %v2463_v23  ;;  %v884_v46 = vmul.f32 %v8055_v24, %v883_v57  ;;  %v8145_v58 = vadd.f32 %v1623_v42, %v7152_v25  ;;  %v2483_v28 = vsel %vm8048_vm12, %v8020_v48, %v2478_v29  ;;  %vm8157_vm5 = vmor %vm2490_vm1, %vm2491_vm4 }
 0x2ab   : > { %v8147_v8 = vpop.eup %5858  ;;  %v2502_v53 = vsub.f32 1.0, %v2501_v49  ;;  %v2511_v40 = vand.u32 2147483648, %v7971_v20  ;;  %v2516_v33 = vmul.f32 %v8118_v18, %v7999_v45  ;;  %v2526_v35 = vand.u32 2147483648, %v7999_v45 }
 0x2ac   : > { %v2531_v42 = vmul.f32 %v8131_v3, %v8014_v1  ;;  %5862 = vpow2.f32 %v5321_v6  ;;  %v5322_v48 = vmul.f32 -1.442695, %v8129_v34  ;;  %v8166_v27 = vmul.f32 %v2453_v19, %v7672_v36 }
 0x2ad   : > { %v8169_v57 = vmul.f32 %v2468_v16, %v7693_v41  ;;  %v2493_v61 = vsel %vm8157_vm5, %v7964_v2, %v2489_v54  ;;  %v875_v37 = vmul.f32 0.5, %v874_v32  ;;  %v2546_v49 = vmul.f32 %v8147_v8, %v8038_v63 }
 0x2ae   : > { %13280 = vst [vmem:[#allocation45_spill] sm:$0xff] %v8166_v27  ;;  %v5861_v23 = vpop.eup %5860  ;;  %v885_v29 = vmul.f32 0.5, %v884_v46  ;;  %v5323_v6 = vmul.f32 -1.442695, %v8145_v58  ;;  %v8178_v55 = vadd.f32 %v1358_v22, %v7140_v15  ;;  %v8181_v36 = vmul.f32 %v2483_v28, %v7704_v5  ;;  %v458_v46 = vpop.xlane.xlu2 %457 }
 0x2af   : > { %13281 = vst [vmem:[#allocation46_spill] sm:$0xff] %v8169_v57  ;;  %vm2506_vm6 = vweird.f32 %v8063_v59  ;;  %v8184_v41 = vor.u32 1.1754944e-38, %v2511_v40  ;;  %v2517_v19 = vsub.f32 1.0, %v2516_v33  ;;  %v2524_v2 = vand.u32 2147483647, %v7999_v45 }
 0x2b0   : > { %13282 = vst [vmem:[#allocation47_spill] sm:$0xff] %v8181_v36  ;;  %v2503_v54 = vmul.f32 %v8063_v59, %v2502_v53  ;;  %v8188_v32 = vor.u32 1.1754944e-38, %v2526_v35  ;;  %v2532_v16 = vsub.f32 1.0, %v2531_v42  ;;  %5864 = vpow2.f32 %v5322_v48 }
 0x2b1   : > { %v2498_v22 = vsel %vm8123_vm3, %v2497_v31, %v2493_v61  ;;  %vm2505_vm7 = vweird.f32 %v7971_v20  ;;  %v2539_v5 = vand.u32 2147483647, %v8014_v1  ;;  %v8194_v28 = vadd.f32 1.0, %v5861_v23  ;;  %v1447_v31 = vpop.f32.mrf.mxu1 }
 0x2b2   : > { %v876_v40 = vsub.f32 1.5, %v875_v37  ;;  %v5863_v33 = vpop.eup %5862  ;;  %vm2520_vm9 = vweird.f32 %v7999_v45  ;;  %v2547_v7 = vsub.f32 1.0, %v2546_v49  ;;  %v886_v53 = vsub.f32 1.5, %v885_v29 }
 0x2b3   : > { %5866 = vpow2.f32 %v5323_v6  ;;  %v5324_v35 = vmul.f32 -1.442695, %v8178_v55  ;;  %v2518_v42 = vmul.f32 %v8118_v18, %v2517_v19  ;;  %vm2535_vm10 = vweird.f32 %v8014_v1 }
 0x2b4   : > { %vm878_vm11 = vweird.f32 %v7950_v26  ;;  %vm879_vm14 = vweird.f32 %v8043_v47  ;;  %v498_v38 = vmul.f32 %v6766_v13, %v458_v46  ;;  %v2533_v48 = vmul.f32 %v8131_v3, %v2532_v16  ;;  %v1361_v26 = vpop.f32.mrf.mxu0 }
 0x2b5   : > { %vm888_vm8 = vweird.f32 %v7962_v39  ;;  %vm889_vm12 = vweird.f32 %v8055_v24  ;;  %v648_v61 = vmul.f32 %v7497_v50, %v6766_v13  ;;  %v8209_v37 = vadd.f32 %v8063_v59, %v2503_v54  ;;  %vm8219_vm13 = vmor %vm878_vm11, %vm879_vm14 }
 0x2b6   : > { %5868 = vrcp.f32 %v8194_v28  ;;  %v8212_v23 = vadd.f32 1.0, %v5863_v33  ;;  %v877_v49 = vmul.f32 %v8043_v47, %v876_v40  ;;  %v5865_v29 = vpop.eup %5864  ;;  %v2548_v6 = vmul.f32 %v8147_v8, %v2547_v7  ;;  %vm8245_vm2 = vmor %vm888_vm8, %vm889_vm12 }
 0x2b7   : > { %v887_v19 = vmul.f32 %v8055_v24, %v886_v53  ;;  %5870 = vpow2.f32 %v5324_v35  ;;  %v8224_v50 = vadd.f32 %v1447_v31, %v7142_v21  ;;  %v8227_v54 = vmul.f32 %v2498_v22, %v7757_v60  ;;  %v6305_v22 = vld [vmem:[%s6745_s18 + $0xf0] sm:$0xff]  ;;  %vm8272_vm11 = vmor %vm2505_vm7, %vm2506_vm6 }
 0x2b8   : > { %v13286_v46 = vand.u32 2147483647, %v7971_v20  ;;  %vm2521_vm0 = vweird.f32 %v8118_v18  ;;  %vm8236_vm1 = vcmp.eq.f32.partialorder %v2524_v2, 8.507059e+37  ;;  %v2541_v33 = vand.u32 2147483648, %v8014_v1 }
 0x2b9   : > { %13285 = vst [vmem:[#allocation48_spill] sm:$0xff] %v8227_v54  ;;  %v8250_v7 = vsub.f32 %v6305_v22, %v498_v38  ;;  %v5867_v53 = vpop.eup %5866  ;;  %v2519_v35 = vadd.f32 %v8118_v18, %v2518_v42  ;;  %v2534_v2 = vadd.f32 %v8131_v3, %v2533_v48  ;;  %vm2536_vm3 = vweird.f32 %v8131_v3  ;;  %vm8293_vm6 = vmor %vm2520_vm9, %vm2521_vm0 }
 0x2ba   : > { %vm8231_vm15 = vcmp.eq.f32.partialorder %v13286_v46, 8.507059e+37  ;;  %vm8255_vm4 = vcmp.eq.f32.partialorder %v2539_v5, 8.507059e+37  ;;  %v8259_v46 = vadd.f32 1e-05, %v648_v61  ;;  %vm2551_vm5 = vweird.f32 %v8147_v8  ;;  %vm8306_vm7 = vmor %vm2535_vm10, %vm2536_vm3 }
 0x2bb   : > { %13293 = vst [vmem:[#allocation49_spill] sm:$0xff] %v8250_v7  ;;  %5872 = vrcp.f32 %v8212_v23  ;;  %v8263_v39 = vadd.f32 1.0, %v5865_v29  ;;  %v881_v42 = vsel %vm8219_vm13, %v8043_v47, %v877_v49  ;;  %v2549_v38 = vadd.f32 %v8147_v8, %v2548_v6 }
 0x2bc   : > { %v891_v48 = vsel %vm8245_vm2, %v8055_v24, %v887_v19  ;;  %v5325_v61 = vmul.f32 -1.442695, %v8224_v50  ;;  %v649_v29 = vmul.f32 %v7814_v9, %v6766_v13  ;;  %v8283_v47 = vpop.eup %5868  ;;  %v2508_v20 = vsel %vm8272_vm11, %v8063_v59, %v8209_v37  ;;  %v13302_v37 = vld [vmem:[#allocation19_spill] sm:$0xff] }
 0x2bd   : > { %v2556_v24 = vand.u32 2147483648, %v8038_v63  ;;  %v8298_v6 = vadd.f32 1.0, %v5867_v53  ;;  %v562_v9 = vmul.f32 %v8250_v7, %v8250_v7  ;;  %v5871_v19 = vpop.eup %5870  ;;  %vm2550_vm9 = vweird.f32 %v8038_v63  ;;  %v13305_v53 = vld [vmem:[#allocation18_spill] sm:$0xff]  ;;  %v5597_v7 = vld [vmem:[#allocation10 + $0x38] sm:$0xff] }
 0x2be   : > { %v2554_v45 = vand.u32 2147483647, %v8038_v63  ;;  %5874 = vrsqrt.f32 %v8259_v46  ;;  %v1030_v16 = vmul.f32 %v881_v42, %v13302_v37  ;;  %v2523_v60 = vsel %vm8293_vm6, %v8118_v18, %v2519_v35  ;;  %vm8322_vm10 = vmor %vm2550_vm9, %vm2551_vm5  ;;  %4572 = vmatpush.bf16.msrb.mxu0 %v5597_v7 }
 0x2bf   : > { %v2538_v1 = vsel %vm8306_vm7, %v8131_v3, %v2534_v2  ;;  %v1031_v63 = vmul.f32 %v891_v48, %v13305_v53  ;;  %5876 = vrcp.f32 %v8263_v39  ;;  %624 = vadd.xlane.f32.xlu2 %v562_v9  ;;  %v2553_v42 = vsel %vm8322_vm10, %v8147_v8, %v2549_v38  ;;  %v1536_v3 = vpop.f32.mrf.mxu2  ;;  %v1625_v9 = vpop.f32.mrf.mxu3 }
 0x2c0   : > { %v2561_v18 = vmul.f32 %v8283_v47, %v8194_v28  ;;  %5878 = vpow2.f32 %v5325_v61  ;;  %v8333_v35 = vadd.f32 1e-05, %v649_v29  ;;  %v2542_v5 = vor.u32 1.1754944e-38, %v2541_v33 }
 0x2c1   : > { %v8335_v2 = vpop.eup %5872  ;;  %v2557_v49 = vor.u32 1.1754944e-38, %v2556_v24  ;;  %5880 = vrcp.f32 %v8298_v6  ;;  %v8338_v48 = vadd.f32 1.0, %v5871_v19  ;;  %v2513_v8 = vsel %vm8231_vm15, %v8184_v41, %v2508_v20 }
 0x2c2   : > { %v2528_v38 = vsel %vm8236_vm1, %v8188_v32, %v2523_v60  ;;  %vm2555_vm14 = vcmp.eq.f32.partialorder %v2554_v45, 8.507059e+37  ;;  %v1065_v61 = vmul.f32 %v7560_v43, %v1030_v16  ;;  %v2543_v33 = vsel %vm8255_vm4, %v2542_v5, %v2538_v1 }
 0x2c3   : > { %v2558_v29 = vsel %vm2555_vm14, %v2557_v49, %v2553_v42  ;;  %v8350_v24 = vadd.f32 %v1536_v3, %v7150_v30  ;;  %v1066_v19 = vmul.f32 %v7560_v43, %v1031_v63  ;;  %v2562_v40 = vsub.f32 1.0, %v2561_v18 }
 0x2c4   : > { %v8353_v59 = vpop.eup %5874  ;;  %v2576_v41 = vmul.f32 %v8335_v2, %v8212_v23  ;;  %v8358_v32 = vadd.f32 %v1625_v9, %v7152_v25  ;;  %5882 = vrsqrt.f32 %v8333_v35  ;;  %v8364_v20 = vmul.f32 %v2513_v8, %v7812_v12 }
 0x2c5   : > { %v8361_v31 = vpop.eup %5876  ;;  %v8367_v45 = vmul.f32 %v2528_v38, %v7819_v4  ;;  %v2571_v43 = vand.u32 2147483648, %v8194_v28  ;;  %5884 = vrcp.f32 %v8338_v48  ;;  %v8372_v16 = vmul.f32 %v2543_v33, %v7838_v10 }
 0x2c6   : > { %13306 = vst [vmem:[#allocation19_spill] sm:$0xff] %v8364_v20  ;;  %v5879_v37 = vpop.eup %5878  ;;  %v8375_v60 = vmul.f32 %v2558_v29, %v7860_v51  ;;  %v2569_v1 = vand.u32 2147483647, %v8194_v28  ;;  %v1100_v22 = vadd.f32 %v7614_v44, %v1065_v61  ;;  %v893_v4 = vmul.f32 %v8353_v59, %v8259_v46  ;;  %v1450_v29 = vpop.f32.mrf.mxu1  ;;  %v5621_v20 = vld [vmem:[#allocation10 + $0xf8] sm:$0xff] }
 0x2c7   : > { %13307 = vst [vmem:[#allocation18_spill] sm:$0xff] %v8367_v45  ;;  %v8379_v12 = vpop.eup %5880  ;;  %v5326_v53 = vmul.f32 -1.442695, %v8350_v24  ;;  %v8385_v63 = vadd.f32 %v1361_v26, %v7140_v15  ;;  %v1101_v10 = vadd.f32 %v7614_v44, %v1066_v19  ;;  %v2563_v42 = vmul.f32 %v8283_v47, %v2562_v40  ;;  %v1539_v26 = vpop.f32.mrf.mxu2  ;;  %4839 = vmatpush.bf16.msrb.mxu3 %v5621_v20 }
 0x2c8   : > { %13308 = vst [vmem:[#allocation50_spill] sm:$0xff] %v8372_v16  ;;  %v2577_v51 = vsub.f32 1.0, %v2576_v41  ;;  %v2591_v18 = vmul.f32 %v8361_v31, %v8263_v39  ;;  %v5327_v3 = vmul.f32 -1.442695, %v8358_v32  ;;  %vm2565_vm8 = vweird.f32 %v8194_v28 }
 0x2c9   : > { %13309 = vst [vmem:[#allocation51_spill] sm:$0xff] %v8375_v60  ;;  %v8393_v5 = vor.u32 1.1754944e-38, %v2571_v43  ;;  %v8395_v49 = vadd.f32 1.0, %v5879_v37  ;;  %v1123_v9 = vpack.c.bf16 %v1101_v10, %v1100_v22  ;;  %vm8399_vm12 = vcmp.eq.f32.partialorder %v2569_v1, 8.507059e+37 }
 0x2ca   : > { %v8397_v8 = vpop.eup %5882  ;;  %vm2580_vm13 = vweird.f32 %v8212_v23  ;;  %v2584_v44 = vand.u32 2147483647, %v8212_v23  ;;  %v2586_v61 = vand.u32 2147483648, %v8212_v23  ;;  %v2606_v33 = vmul.f32 %v8379_v12, %v8298_v6 }
 0x2cb   : > { %v8408_v19 = vpop.eup %5884  ;;  %vm2566_vm15 = vweird.f32 %v8283_v47  ;;  %v894_v40 = vmul.f32 %v8353_v59, %v893_v4  ;;  %5886 = vpow2.f32 %v5326_v53  ;;  %v5328_v41 = vmul.f32 -1.442695, %v8385_v63  ;;  %1385 = vmatmul.bf16.gmra.mxu0 %v1123_v9  ;;  %1474 = vmatmul.bf16.gmra.mxu1 %v1123_v9 }
 0x2cc   : > { %v2564_v43 = vadd.f32 %v8283_v47, %v2563_v42  ;;  %v2578_v37 = vmul.f32 %v8335_v2, %v2577_v51  ;;  %v2592_v1 = vsub.f32 1.0, %v2591_v18  ;;  %vm898_vm0 = vweird.f32 %v8259_v46  ;;  %1563 = vmatmul.bf16.gmra.mxu2 %v1123_v9  ;;  %1652 = vmatmul.bf16.gmra.mxu3 %v1123_v9  ;;  %v5613_v9 = vld [vmem:[#allocation10 + $0xb8] sm:$0xff]  ;;  %vm8436_vm2 = vmor %vm2565_vm8, %vm2566_vm15 }
 0x2cd   : > { %5888 = vpow2.f32 %v5327_v3  ;;  %v2601_v22 = vand.u32 2147483648, %v8263_v39  ;;  %v903_v4 = vmul.f32 %v8397_v8, %v8333_v35  ;;  %v8421_v53 = vadd.f32 %v1450_v29, %v7142_v21  ;;  %v5605_v29 = vld [vmem:[#allocation10 + $0x78] sm:$0xff]  ;;  %4750 = vmatpush.bf16.msrb.mxu2 %v5613_v9  ;;  %v1628_v9 = vpop.f32.mrf.mxu3  ;;  %4840 = vmatpush.bf16.msrb.mxu3 %v5620_v17 }
 0x2ce   : > { %5890 = vrcp.f32 %v8395_v49  ;;  %vm8423_vm1 = vcmp.eq.f32.partialorder %v2584_v44, 8.507059e+37  ;;  %v2587_v42 = vor.u32 1.1754944e-38, %v2586_v61  ;;  %v2607_v51 = vsub.f32 1.0, %v2606_v33  ;;  %4661 = vmatpush.bf16.msrb.mxu1 %v5605_v29 }
 0x2cf   : > { %v2621_v18 = vmul.f32 %v8408_v19, %v8338_v48  ;;  %v8430_v3 = vadd.f32 %v1539_v26, %v7150_v30  ;;  %vm2581_vm3 = vweird.f32 %v8335_v2  ;;  %vm2595_vm4 = vweird.f32 %v8263_v39 }
 0x2d0   : > { %v2599_v61 = vand.u32 2147483647, %v8263_v39  ;;  %v895_v33 = vmul.f32 0.5, %v894_v40  ;;  %5892 = vpow2.f32 %v5328_v41  ;;  %v2568_v26 = vsel %vm8436_vm2, %v8283_v47, %v2564_v43  ;;  %vm8464_vm11 = vmor %vm2580_vm13, %vm2581_vm3 }
 0x2d1   : > { %v2579_v27 = vadd.f32 %v8335_v2, %v2578_v37  ;;  %v2593_v28 = vmul.f32 %v8361_v31, %v2592_v1  ;;  %v2614_v11 = vand.u32 2147483647, %v8298_v6  ;;  %v5887_v62 = vpop.eup %5886  ;;  %v2602_v52 = vor.u32 1.1754944e-38, %v2601_v22 }
 0x2d2   : > { %vm2610_vm5 = vweird.f32 %v8298_v6  ;;  %v904_v40 = vmul.f32 %v8397_v8, %v903_v4  ;;  %v5329_v41 = vmul.f32 -1.442695, %v8421_v53  ;;  %v2608_v47 = vmul.f32 %v8379_v12, %v2607_v51 }
 0x2d3   : > { %v5889_v44 = vpop.eup %5888  ;;  %v2616_v43 = vand.u32 2147483648, %v8298_v6  ;;  %v2622_v37 = vsub.f32 1.0, %v2621_v18  ;;  %v5330_v1 = vmul.f32 -1.442695, %v8430_v3  ;;  %v2573_v22 = vsel %vm8399_vm12, %v8393_v5, %v2568_v26 }
 0x2d4   : > { %v8455_v7 = vpop.eup %5890  ;;  %vm2596_vm6 = vweird.f32 %v8361_v31  ;;  %vm8469_vm7 = vcmp.eq.f32.partialorder %v2599_v61, 8.507059e+37  ;;  %v896_v51 = vsub.f32 1.5, %v895_v33  ;;  %vm899_vm9 = vweird.f32 %v8353_v59 }
 0x2d5   : > { %v2583_v5 = vsel %vm8464_vm11, %v8335_v2, %v2579_v27  ;;  %v2594_v38 = vadd.f32 %v8361_v31, %v2593_v28  ;;  %vm2611_vm10 = vweird.f32 %v8379_v12  ;;  %vm8479_vm14 = vcmp.eq.f32.partialorder %v2614_v11, 8.507059e+37  ;;  %vm8504_vm8 = vmor %vm898_vm0, %vm899_vm9 }
 0x2d6   : > { %v8483_v18 = vadd.f32 1.0, %v5887_v62  ;;  %v5893_v61 = vpop.eup %5892  ;;  %v8485_v29 = vadd.f32 1.0, %v5889_v44  ;;  %v905_v33 = vmul.f32 0.5, %v904_v40  ;;  %5894 = vpow2.f32 %v5329_v41  ;;  %vm8512_vm12 = vmor %vm2595_vm4, %vm2596_vm6 }
 0x2d7   : > { %v8488_v26 = vadd.f32 %v1628_v9, %v7152_v25  ;;  %v2609_v27 = vadd.f32 %v8379_v12, %v2608_v47  ;;  %v2623_v2 = vmul.f32 %v8408_v19, %v2622_v37  ;;  %v2636_v11 = vmul.f32 %v8455_v7, %v8395_v49  ;;  %vm8528_vm13 = vmor %vm2610_vm5, %vm2611_vm10 }
 0x2d8   : > { %5896 = vpow2.f32 %v5330_v1  ;;  %v8495_v28 = vmul.f32 %v2573_v22, %v8023_v56  ;;  %v2588_v62 = vsel %vm8423_vm1, %v2587_v42, %v2583_v5  ;;  %v2617_v44 = vor.u32 1.1754944e-38, %v2616_v43 }
 0x2d9   : > { %v897_v40 = vmul.f32 %v8353_v59, %v896_v51  ;;  %v2629_v10 = vand.u32 2147483647, %v8338_v48  ;;  %v2631_v42 = vand.u32 2147483648, %v8338_v48  ;;  %5898 = vrcp.f32 %v8483_v18 }
 0x2da   : > { %13322 = vst [vmem:[#allocation52_spill] sm:$0xff] %v8495_v28  ;;  %v8519_v47 = vadd.f32 1.0, %v5893_v61  ;;  %v2598_v46 = vsel %vm8512_vm12, %v8361_v31, %v2594_v38  ;;  %5900 = vrcp.f32 %v8485_v29  ;;  %v906_v43 = vsub.f32 1.5, %v905_v33 }
 0x2db   : > { %v5331_v37 = vmul.f32 -1.442695, %v8488_v26  ;;  %v2613_v1 = vsel %vm8528_vm13, %v8379_v12, %v2609_v27  ;;  %v2624_v9 = vadd.f32 %v8408_v19, %v2623_v2  ;;  %vm2626_vm15 = vweird.f32 %v8408_v19 }
 0x2dc   : > { %v2637_v31 = vsub.f32 1.0, %v2636_v11  ;;  %v5895_v22 = vpop.eup %5894  ;;  %v901_v6 = vsel %vm8504_vm8, %v8353_v59, %v897_v40  ;;  %vm2625_vm0 = vweird.f32 %v8338_v48  ;;  %vm908_vm1 = vweird.f32 %v8333_v35  ;;  %v1363_v59 = vpop.f32.mrf.mxu0 }
 0x2dd   : > { %vm909_vm2 = vweird.f32 %v8397_v8  ;;  %v8546_v51 = vmul.f32 %v2588_v62, %v8069_v14  ;;  %v2603_v12 = vsel %vm8469_vm7, %v2602_v52, %v2598_v46  ;;  %vm8550_vm3 = vcmp.eq.f32.partialorder %v2629_v10, 8.507059e+37  ;;  %vm8557_vm4 = vmor %vm2625_vm0, %vm2626_vm15  ;;  %v13334_v52 = vld [vmem:[#allocation20_spill] sm:$0xff]  ;;  %v1452_v62 = vpop.f32.mrf.mxu1 }
 0x2de   : > { %v5897_v20 = vpop.eup %5896  ;;  %5902 = vrcp.f32 %v8519_v47  ;;  %v2618_v48 = vsel %vm8479_vm14, %v2617_v44, %v2613_v1  ;;  %v2632_v61 = vor.u32 1.1754944e-38, %v2631_v42  ;;  %v907_v14 = vmul.f32 %v8397_v8, %v906_v43  ;;  %vm8575_vm5 = vmor %vm908_vm1, %vm909_vm2 }
 0x2df   : > { %13329 = vst [vmem:[#allocation53_spill] sm:$0xff] %v8546_v51  ;;  %5904 = vpow2.f32 %v5331_v37  ;;  %v8562_v4 = vpop.eup %5898  ;;  %v8565_v33 = vmul.f32 %v901_v6, %v13334_v52  ;;  %v2628_v27 = vsel %vm8557_vm4, %v8408_v19, %v2624_v9  ;;  %v2638_v23 = vmul.f32 %v8455_v7, %v2637_v31 }
 0x2e0   : > { %v8579_v11 = vadd.f32 1.0, %v5895_v22  ;;  %v8581_v44 = vpop.eup %5900  ;;  %v8584_v40 = vmul.f32 %v2603_v12, %v8129_v34  ;;  %v2644_v19 = vand.u32 2147483647, %v8395_v49  ;;  %v8587_v41 = vadd.f32 1.0, %v5897_v20  ;;  %v13341_v20 = vld [vmem:[#allocation21_spill] sm:$0xff] }
 0x2e1   : > { %v8590_v56 = vadd.f32 %v1363_v59, %v7140_v15  ;;  %v8593_v35 = vmul.f32 %v2618_v48, %v8145_v58  ;;  %vm2640_vm11 = vweird.f32 %v8395_v49  ;;  %v2646_v10 = vand.u32 2147483648, %v8395_v49  ;;  %v1541_v59 = vpop.f32.mrf.mxu2 }
 0x2e2   : > { %13337 = vst [vmem:[#allocation20_spill] sm:$0xff] %v8584_v40  ;;  %v650_v42 = vmul.f32 %v7896_v0, %v6766_v13  ;;  %v2633_v34 = vsel %vm8550_vm3, %v2632_v61, %v2628_v27  ;;  %v2651_v46 = vmul.f32 %v8562_v4, %v8483_v18  ;;  %v911_v39 = vsel %vm8575_vm5, %v8397_v8, %v907_v14  ;;  %v1630_v27 = vpop.f32.mrf.mxu3 }
 0x2e3   : > { %13338 = vst [vmem:[#allocation54_spill] sm:$0xff] %v8593_v35  ;;  %v8607_v58 = vadd.f32 %v1452_v62, %v7142_v21  ;;  %v2639_v37 = vadd.f32 %v8455_v7, %v2638_v23  ;;  %vm2641_vm6 = vweird.f32 %v8455_v7  ;;  %v2666_v0 = vmul.f32 %v8581_v44, %v8485_v29 }
 0x2e4   : > { %v8609_v43 = vpop.eup %5902  ;;  %5906 = vrcp.f32 %v8579_v11  ;;  %vm8616_vm7 = vcmp.eq.f32.partialorder %v2644_v19, 8.507059e+37  ;;  %v2661_v8 = vand.u32 2147483648, %v8483_v18  ;;  %v5332_v31 = vmul.f32 -1.442695, %v8590_v56  ;;  %vm8632_vm9 = vmor %vm2640_vm11, %vm2641_vm6 }
 0x2e5   : > { %v5905_v1 = vpop.eup %5904  ;;  %5908 = vrcp.f32 %v8587_v41  ;;  %v2647_v22 = vor.u32 1.1754944e-38, %v2646_v10  ;;  %v2676_v6 = vand.u32 2147483648, %v8485_v29  ;;  %v1033_v12 = vmul.f32 %v911_v39, %v13341_v20 }
 0x2e6   : > { %v8625_v5 = vadd.f32 1e-05, %v650_v42  ;;  %v8628_v48 = vmul.f32 %v2633_v34, %v8178_v55  ;;  %v2652_v61 = vsub.f32 1.0, %v2651_v46  ;;  %v2681_v14 = vmul.f32 %v8609_v43, %v8519_v47  ;;  %v8661_v46 = vld [vmem:[#allocation5] ss:$0 sm:$0xff] }
 0x2e7   : > { %v5333_v52 = vmul.f32 -1.442695, %v8607_v58  ;;  %v2643_v23 = vsel %vm8632_vm9, %v8455_v7, %v2639_v37  ;;  %v2659_v55 = vand.u32 2147483647, %v8483_v18  ;;  %v2667_v2 = vsub.f32 1.0, %v2666_v0 }
 0x2e8   : > { %13342 = vst [vmem:[#allocation21_spill] sm:$0xff] %v8628_v48  ;;  %v8643_v62 = vadd.f32 1.0, %v5905_v1  ;;  %vm2655_vm10 = vweird.f32 %v8483_v18  ;;  %v8646_v49 = vor.u32 1.1754944e-38, %v2661_v8  ;;  %v2674_v19 = vand.u32 2147483647, %v8485_v29 }
 0x2e9   : > { %5910 = vpow2.f32 %v5332_v31  ;;  %v8650_v10 = vadd.f32 %v1541_v59, %v7150_v30  ;;  %vm2670_vm14 = vweird.f32 %v8485_v29  ;;  %v8655_v7 = vor.u32 1.1754944e-38, %v2676_v6 }
 0x2ea   : > { %v8652_v42 = vpop.eup %5906  ;;  %5912 = vrsqrt.f32 %v8625_v5  ;;  %v8659_v34 = vadd.f32 %v1630_v27, %v7152_v25  ;;  %v1068_v39 = vmul.f32 %v8661_v46, %v1033_v12  ;;  %v2648_v0 = vsel %vm8616_vm7, %v2647_v22, %v2643_v23 }
 0x2eb   : > { %v8664_v37 = vpop.eup %5908  ;;  %v2653_v1 = vmul.f32 %v8562_v4, %v2652_v61  ;;  %v2682_v8 = vsub.f32 1.0, %v2681_v14  ;;  %5914 = vpow2.f32 %v5333_v52  ;;  %v2668_v31 = vmul.f32 %v8581_v44, %v2667_v2  ;;  %v1366_v14 = vpop.f32.mrf.mxu0  ;;  %v8694_v52 = vld [vmem:[%s12999_s2] ss:$0 sm:$0xff] }
 0x2ec   : > { %13345 = vst [vmem:[#allocation55_spill] sm:$0xff] %v8659_v34  ;;  %v2691_v6 = vand.u32 2147483648, %v8519_v47  ;;  %5916 = vrcp.f32 %v8643_v62  ;;  %v1067_v20 = vmul.f32 %v8661_v46, %v8565_v33  ;;  %vm2656_vm8 = vweird.f32 %v8562_v4 }
 0x2ed   : > { %vm8675_vm12 = vcmp.eq.f32.partialorder %v2659_v55, 8.507059e+37  ;;  %v2689_v9 = vand.u32 2147483647, %v8519_v47  ;;  %v2696_v22 = vmul.f32 %v8652_v42, %v8579_v11  ;;  %v5334_v59 = vmul.f32 -1.442695, %v8650_v10  ;;  %13350 = vst [vmem:[#allocation56_spill] sm:$0xff] %v8694_v52  ;;  %vm8724_vm2 = vmor %vm2655_vm10, %vm2656_vm8 }
 0x2ee   : > { %vm8683_vm13 = vcmp.eq.f32.partialorder %v2674_v19, 8.507059e+37  ;;  %vm2685_vm15 = vweird.f32 %v8519_v47  ;;  %v2711_v33 = vmul.f32 %v8664_v37, %v8587_v41  ;;  %v5335_v61 = vmul.f32 -1.442695, %v8659_v34  ;;  %v611_v34 = vpop.xlane.xlu0 %610 }
 0x2ef   : > { %v1103_v27 = vadd.f32 %v8694_v52, %v1068_v39  ;;  %v5911_v23 = vpop.eup %5910  ;;  %v8698_v55 = vmul.f32 %v2648_v0, %v8224_v50  ;;  %v2654_v2 = vadd.f32 %v8562_v4, %v2653_v1  ;;  %vm2671_vm0 = vweird.f32 %v8581_v44 }
 0x2f0   : > { %v2683_v19 = vmul.f32 %v8609_v43, %v2682_v8  ;;  %v8703_v48 = vpop.eup %5912  ;;  %v2669_v28 = vadd.f32 %v8581_v44, %v2668_v31  ;;  %v8706_v35 = vor.u32 1.1754944e-38, %v2691_v6  ;;  %v2704_v40 = vand.u32 2147483647, %v8579_v11  ;;  %v5596_v31 = vld [vmem:[#allocation10 + $0x30] sm:$0xff]  ;;  %vm8737_vm3 = vmor %vm2670_vm14, %vm2671_vm0 }
 0x2f1   : > { %13351 = vst [vmem:[#allocation57_spill] sm:$0xff] %v8698_v55  ;;  %v1102_v39 = vadd.f32 %v8694_v52, %v1067_v20  ;;  %v5915_v51 = vpop.eup %5914  ;;  %vm8710_vm1 = vcmp.eq.f32.partialorder %v2689_v9, 8.507059e+37  ;;  %v2697_v0 = vsub.f32 1.0, %v2696_v22  ;;  %v2706_v1 = vand.u32 2147483648, %v8579_v11  ;;  %v5612_v55 = vld [vmem:[#allocation10 + $0xb0] sm:$0xff]  ;;  %4573 = vmatpush.bf16.msrb.mxu0 %v5596_v31  ;;  %v1455_v31 = vpop.f32.mrf.mxu1 }
 0x2f2   : > { %5918 = vpow2.f32 %v5334_v59  ;;  %v8716_v8 = vadd.f32 %v1366_v14, %v7140_v15  ;;  %v8718_v6 = vpop.eup %5916  ;;  %v2712_v9 = vsub.f32 1.0, %v2711_v33  ;;  %v8728_v22 = vadd.f32 1.0, %v5911_v23  ;;  %v5604_v14 = vld [vmem:[#allocation10 + $0x70] sm:$0xff]  ;;  %4751 = vmatpush.bf16.msrb.mxu2 %v5612_v55 }
 0x2f3   : > { %5920 = vpow2.f32 %v5335_v61  ;;  %v1124_v59 = vpack.c.bf16 %v1103_v27, %v1102_v39  ;;  %v2658_v52 = vsel %vm8724_vm2, %v8562_v4, %v2654_v2  ;;  %v2684_v33 = vadd.f32 %v8609_v43, %v2683_v19  ;;  %v5611_v4 = vld [vmem:[#allocation10 + $0xa8] sm:$0xff]  ;;  %4662 = vmatpush.bf16.msrb.mxu1 %v5604_v14  ;;  %v1544_v14 = vpop.f32.mrf.mxu2 }
 0x2f4   : > { %vm2686_vm4 = vweird.f32 %v8609_v43  ;;  %vm2700_vm5 = vweird.f32 %v8579_v11  ;;  %v913_v61 = vmul.f32 %v8703_v48, %v8625_v5  ;;  %v5595_v27 = vld [vmem:[#allocation10 + $0x28] sm:$0xff]  ;;  %v2673_v29 = vsel %vm8737_vm3, %v8581_v44, %v2669_v28 }
 0x2f5   : > { %vm2715_vm11 = vweird.f32 %v8587_v41  ;;  %v2719_v23 = vand.u32 2147483647, %v8587_v41  ;;  %v8751_v2 = vadd.f32 1.0, %v5915_v51  ;;  %1390 = vmatmul.bf16.gmra.mxu0 %v1124_v59  ;;  %1479 = vmatmul.bf16.gmra.mxu1 %v1124_v59  ;;  %v2698_v19 = vmul.f32 %v8652_v42, %v2697_v0  ;;  %vm8765_vm6 = vmor %vm2685_vm15, %vm2686_vm4 }
 0x2f6   : > { %v2726_v55 = vmul.f32 %v8718_v6, %v8643_v62  ;;  %v5336_v39 = vmul.f32 -1.442695, %v8716_v8  ;;  %1568 = vmatmul.bf16.gmra.mxu2 %v1124_v59  ;;  %1657 = vmatmul.bf16.gmra.mxu3 %v1124_v59  ;;  %v651_v28 = vmul.f32 %v611_v34, %v6766_v13  ;;  %v2663_v44 = vsel %vm8675_vm12, %v8646_v49, %v2658_v52  ;;  %v5619_v34 = vld [vmem:[#allocation10 + $0xe8] sm:$0xff] }
 0x2f7   : > { %v2707_v0 = vor.u32 1.1754944e-38, %v2706_v1  ;;  %v2713_v20 = vmul.f32 %v8664_v37, %v2712_v9  ;;  %5922 = vrcp.f32 %v8728_v22  ;;  %v5603_v59 = vld [vmem:[#allocation10 + $0x68] sm:$0xff]  ;;  %v2678_v49 = vsel %vm8683_vm13, %v8655_v7, %v2673_v29  ;;  %4752 = vmatpush.bf16.msrb.mxu2 %v5611_v4  ;;  %4574 = vmatpush.bf16.msrb.mxu0 %v5595_v27 }
 0x2f8   : > { %v5919_v18 = vpop.eup %5918  ;;  %v2688_v47 = vsel %vm8765_vm6, %v8609_v43, %v2684_v33  ;;  %vm8777_vm7 = vcmp.eq.f32.partialorder %v2704_v40, 8.507059e+37  ;;  %v2721_v52 = vand.u32 2147483648, %v8587_v41  ;;  %v914_v17 = vmul.f32 %v8703_v48, %v913_v61  ;;  %4841 = vmatpush.bf16.msrb.mxu3 %v5619_v34  ;;  %4663 = vmatpush.bf16.msrb.mxu1 %v5603_v59  ;;  %v1368_v41 = vpop.f32.mrf.mxu0 }
 0x2f9   : > { %v5921_v1 = vpop.eup %5920  ;;  %vm2701_vm9 = vweird.f32 %v8652_v42  ;;  %vm8784_vm10 = vcmp.eq.f32.partialorder %v2719_v23, 8.507059e+37  ;;  %5924 = vrcp.f32 %v8751_v2  ;;  %v8790_v40 = vadd.f32 %v1455_v31, %v7142_v21  ;;  %v8826_v31 = vpop.xlane.xlu0 %612 }
 0x2fa   : > { %v8792_v43 = vadd.f32 1e-05, %v651_v28  ;;  %v2699_v7 = vadd.f32 %v8652_v42, %v2698_v19  ;;  %vm2716_vm14 = vweird.f32 %v8664_v37  ;;  %v2727_v9 = vsub.f32 1.0, %v2726_v55  ;;  %vm8817_vm8 = vmor %vm2700_vm5, %vm2701_vm9 }
 0x2fb   : > { %5926 = vpow2.f32 %v5336_v39  ;;  %v2693_v33 = vsel %vm8710_vm1, %v8706_v35, %v2688_v47  ;;  %v2714_v61 = vadd.f32 %v8664_v37, %v2713_v20  ;;  %v8800_v4 = vadd.f32 1.0, %v5919_v18  ;;  %v1633_v39 = vpop.f32.mrf.mxu3  ;;  %vm8838_vm13 = vmor %vm2715_vm11, %vm2716_vm14 }
 0x2fc   : > { %5928 = vrsqrt.f32 %v8792_v43  ;;  %v8804_v27 = vmul.f32 %v2663_v44, %v8350_v24  ;;  %v8807_v29 = vmul.f32 %v2678_v49, %v8358_v32  ;;  %v915_v23 = vmul.f32 0.5, %v914_v17 }
 0x2fd   : > { %v8809_v19 = vadd.f32 1.0, %v5921_v1  ;;  %v8811_v55 = vpop.eup %5922  ;;  %v2722_v50 = vor.u32 1.1754944e-38, %v2721_v52  ;;  %vm918_vm12 = vweird.f32 %v8625_v5  ;;  %v5337_v24 = vmul.f32 -1.442695, %v8790_v40 }
 0x2fe   : > { %v8824_v32 = vadd.f32 %v1544_v14, %v7150_v30  ;;  %v8829_v28 = vmul.f32 %v2693_v33, %v8385_v63  ;;  %v2703_v11 = vsel %vm8817_vm8, %v8652_v42, %v2699_v7  ;;  %v2728_v51 = vmul.f32 %v8718_v6, %v2727_v9  ;;  %v1457_v14 = vpop.f32.mrf.mxu1 }
 0x2ff   : > { %vm2730_vm15 = vweird.f32 %v8643_v62  ;;  %v8844_v20 = vpop.eup %5924  ;;  %v2718_v63 = vsel %vm8838_vm13, %v8664_v37, %v2714_v61  ;;  %v2734_v42 = vand.u32 2147483647, %v8643_v62  ;;  %v2736_v34 = vand.u32 2147483648, %v8643_v62 }
 0x300   : > { %13366 = vst [vmem:[#allocation58_spill] sm:$0xff] %v8829_v28  ;;  %5930 = vrcp.f32 %v8800_v4  ;;  %v916_v18 = vsub.f32 1.5, %v915_v23  ;;  %v2741_v49 = vmul.f32 %v8811_v55, %v8728_v22  ;;  %v8856_v47 = vadd.f32 %v1633_v39, %v7152_v25  ;;  %v13379_v23 = vld [vmem:[#allocation22_spill] sm:$0xff] }
 0x301   : > { %v5927_v59 = vpop.eup %5926  ;;  %5932 = vrcp.f32 %v8809_v19  ;;  %v2708_v37 = vsel %vm8777_vm7, %v2707_v0, %v2703_v11  ;;  %vm919_vm0 = vweird.f32 %v8703_v48  ;;  %v5338_v17 = vmul.f32 -1.442695, %v8824_v32  ;;  %v6308_v28 = vld [vmem:[%s6745_s18 + $0xf8] sm:$0xff] }
 0x302   : > { %v8858_v52 = vpop.eup %5928  ;;  %5934 = vpow2.f32 %v5337_v24  ;;  %v2723_v1 = vsel %vm8784_vm10, %v2722_v50, %v2718_v63  ;;  %v2729_v7 = vadd.f32 %v8718_v6, %v2728_v51  ;;  %vm2731_vm1 = vweird.f32 %v8718_v6  ;;  %vm8882_vm3 = vmor %vm918_vm12, %vm919_vm0 }
 0x303   : > { %v8869_v9 = vadd.f32 %v1368_v41, %v7140_v15  ;;  %vm8871_vm2 = vcmp.eq.f32.partialorder %v2734_v42, 8.507059e+37  ;;  %v2737_v0 = vor.u32 1.1754944e-38, %v2736_v34  ;;  %v8875_v12 = vadd.f32 1.0, %v5927_v59  ;;  %vm8901_vm4 = vmor %vm2730_vm15, %vm2731_vm1 }
 0x304   : > { %v923_v61 = vmul.f32 %v8858_v52, %v8792_v43  ;;  %v917_v38 = vmul.f32 %v8703_v48, %v916_v18  ;;  %v2742_v35 = vsub.f32 1.0, %v2741_v49  ;;  %v2756_v50 = vmul.f32 %v8844_v20, %v8751_v2  ;;  %v460_v18 = vpop.xlane.xlu0 %459 }
 0x305   : > { %v5339_v24 = vmul.f32 -1.442695, %v8856_v47  ;;  %v8892_v11 = vmul.f32 %v2708_v37, %v8421_v53  ;;  %v8895_v44 = vmul.f32 %v2723_v1, %v8430_v3  ;;  %5936 = vpow2.f32 %v5338_v17 }
 0x306   : > { %v8889_v39 = vpop.eup %5930  ;;  %v8906_v51 = vadd.f32 %v1457_v14, %v7142_v21  ;;  %v2733_v53 = vsel %vm8901_vm4, %v8718_v6, %v2729_v7  ;;  %v2749_v3 = vand.u32 2147483647, %v8728_v22  ;;  %v5340_v42 = vmul.f32 -1.442695, %v8869_v9 }
 0x307   : > { %13373 = vst [vmem:[#allocation59_spill] sm:$0xff] %v8892_v11  ;;  %v8908_v63 = vpop.eup %5932  ;;  %v924_v62 = vmul.f32 %v8858_v52, %v923_v61  ;;  %vm2745_vm5 = vweird.f32 %v8728_v22  ;;  %v2751_v41 = vand.u32 2147483648, %v8728_v22  ;;  %v2766_v59 = vand.u32 2147483648, %v8751_v2 }
 0x308   : > { %13374 = vst [vmem:[#allocation60_spill] sm:$0xff] %v8895_v44  ;;  %v5935_v34 = vpop.eup %5934  ;;  %5938 = vrcp.f32 %v8875_v12  ;;  %v921_v6 = vsel %vm8882_vm3, %v8703_v48, %v917_v38  ;;  %v2743_v49 = vmul.f32 %v8811_v55, %v2742_v35  ;;  %v2757_v37 = vsub.f32 1.0, %v2756_v50 }
 0x309   : > { %5940 = vpow2.f32 %v5339_v24  ;;  %v2738_v17 = vsel %vm8871_vm2, %v2737_v0, %v2733_v53  ;;  %v2771_v1 = vmul.f32 %v8889_v39, %v8800_v4  ;;  %v2786_v7 = vmul.f32 %v8908_v63, %v8809_v19 }
 0x30a   : > { %v5341_v14 = vmul.f32 -1.442695, %v8906_v51  ;;  %vm8931_vm11 = vcmp.eq.f32.partialorder %v2749_v3, 8.507059e+37  ;;  %vm2760_vm6 = vweird.f32 %v8751_v2  ;;  %v8936_v48 = vadd.f32 1.0, %v5935_v34 }
 0x30b   : > { %5942 = vpow2.f32 %v5340_v42  ;;  %v925_v38 = vmul.f32 0.5, %v924_v62  ;;  %v499_v33 = vmul.f32 %v6766_v13, %v460_v18  ;;  %v5937_v0 = vpop.eup %5936  ;;  %v8940_v35 = vmul.f32 %v921_v6, %v13379_v23 }
 0x30c   : > { %v2752_v50 = vor.u32 1.1754944e-38, %v2751_v41  ;;  %v2764_v24 = vand.u32 2147483647, %v8751_v2  ;;  %v2781_v5 = vand.u32 2147483648, %v8800_v4  ;;  %v2744_v53 = vadd.f32 %v8811_v55, %v2743_v49  ;;  %v1635_v2 = vpop.f32.mrf.mxu3 }
 0x30d   : > { %vm2746_vm7 = vweird.f32 %v8811_v55  ;;  %v2758_v3 = vmul.f32 %v8844_v20, %v2757_v37  ;;  %v8947_v42 = vor.u32 1.1754944e-38, %v2766_v59  ;;  %v8952_v34 = vmul.f32 %v2738_v17, %v8488_v26 }
 0x30e   : > { %v8949_v62 = vpop.eup %5938  ;;  %v2772_v18 = vsub.f32 1.0, %v2771_v1  ;;  %v2787_v41 = vsub.f32 1.0, %v2786_v7  ;;  %5944 = vpow2.f32 %v5341_v14  ;;  %v8955_v23 = vadd.f32 1.0, %v5937_v0  ;;  %vm8962_vm9 = vmor %vm2745_vm5, %vm2746_vm7 }
 0x30f   : > { %13380 = vst [vmem:[#allocation22_spill] sm:$0xff] %v8952_v34  ;;  %v5941_v6 = vpop.eup %5940  ;;  %5946 = vrcp.f32 %v8936_v48  ;;  %v926_v49 = vsub.f32 1.5, %v925_v38  ;;  %v8958_v44 = vsub.f32 %v6308_v28, %v499_v33  ;;  %vm2761_vm10 = vweird.f32 %v8844_v20  ;;  %v1546_v38 = vpop.f32.mrf.mxu2 }
 0x310   : > { %vm2775_vm14 = vweird.f32 %v8800_v4  ;;  %v2779_v26 = vand.u32 2147483647, %v8800_v4  ;;  %v8969_v37 = vor.u32 1.1754944e-38, %v2781_v5  ;;  %v2748_v28 = vsel %vm8962_vm9, %v8811_v55, %v2744_v53  ;;  %vm8999_vm15 = vmor %vm2760_vm6, %vm2761_vm10 }
 0x311   : > { %13381 = vst [vmem:[#allocation61_spill] sm:$0xff] %v8958_v44  ;;  %v5943_v17 = vpop.eup %5942  ;;  %v2759_v1 = vadd.f32 %v8844_v20, %v2758_v3  ;;  %vm8975_vm8 = vcmp.eq.f32.partialorder %v2764_v24, 8.507059e+37  ;;  %vm2790_vm12 = vweird.f32 %v8809_v19  ;;  %v2794_v7 = vand.u32 2147483647, %v8809_v19  ;;  %v5610_v3 = vld [vmem:[#allocation10 + $0xa0] sm:$0xff] }
 0x312   : > { %v2796_v14 = vand.u32 2147483648, %v8809_v19  ;;  %v2773_v33 = vmul.f32 %v8889_v39, %v2772_v18  ;;  %v2788_v0 = vmul.f32 %v8908_v63, %v2787_v41  ;;  %v2801_v55 = vmul.f32 %v8949_v62, %v8875_v12  ;;  %4753 = vmatpush.bf16.msrb.mxu2 %v5610_v3 }
 0x313   : > { %v8986_v5 = vadd.f32 1.0, %v5941_v6  ;;  %5948 = vrcp.f32 %v8955_v23  ;;  %v927_v24 = vmul.f32 %v8858_v52, %v926_v49  ;;  %vm929_vm13 = vweird.f32 %v8858_v52 }
 0x314   : > { %v563_v53 = vmul.f32 %v8958_v44, %v8958_v44  ;;  %v5945_v59 = vpop.eup %5944  ;;  %v2753_v18 = vsel %vm8931_vm11, %v2752_v50, %v2748_v28  ;;  %vm2776_vm0 = vweird.f32 %v8889_v39  ;;  %v9004_v6 = vadd.f32 1.0, %v5943_v17  ;;  %v13399_v17 = vld [vmem:[#allocation24_spill] sm:$0xff] }
 0x315   : > { %v9007_v49 = vadd.f32 %v1546_v38, %v7150_v30  ;;  %v9009_v34 = vpop.eup %5946  ;;  %v2763_v61 = vsel %vm8999_vm15, %v8844_v20, %v2759_v1  ;;  %vm9014_vm1 = vcmp.eq.f32.partialorder %v2779_v26, 8.507059e+37  ;;  %vm2791_vm2 = vweird.f32 %v8908_v63  ;;  %vm9057_vm11 = vmor %vm2775_vm14, %vm2776_vm0 }
 0x316   : > { %vm928_vm3 = vweird.f32 %v8792_v43  ;;  %626 = vadd.xlane.f32.xlu0 %v563_v53  ;;  %v2774_v28 = vadd.f32 %v8889_v39, %v2773_v33  ;;  %v2789_v38 = vadd.f32 %v8908_v63, %v2788_v0  ;;  %vm9024_vm4 = vcmp.eq.f32.partialorder %v2794_v7, 8.507059e+37  ;;  %v1371_v0 = vpop.f32.mrf.mxu0  ;;  %vm9074_vm7 = vmor %vm2790_vm12, %vm2791_vm2 }
 0x317   : > { %v2802_v26 = vsub.f32 1.0, %v2801_v55  ;;  %5950 = vrcp.f32 %v8986_v5  ;;  %vm9031_vm5 = vmor %vm928_vm3, %vm929_vm13  ;;  %v9035_v1 = vadd.f32 1.0, %v5945_v59  ;;  %v2816_v55 = vmul.f32 %v9009_v34, %v8936_v48 }
 0x318   : > { %v931_v33 = vsel %vm9031_vm5, %v8858_v52, %v927_v24  ;;  %5952 = vrcp.f32 %v9004_v6  ;;  %v5342_v53 = vmul.f32 -1.442695, %v9007_v49  ;;  %v9049_v3 = vadd.f32 %v1635_v2, %v7152_v25  ;;  %v5618_v52 = vld [vmem:[#allocation10 + $0xe0] sm:$0xff] }
 0x319   : > { %v9051_v59 = vpop.eup %5948  ;;  %v2797_v24 = vor.u32 1.1754944e-38, %v2796_v14  ;;  %vm2805_vm6 = vweird.f32 %v8875_v12  ;;  %v2811_v41 = vand.u32 2147483648, %v8875_v12  ;;  %v2826_v43 = vand.u32 2147483648, %v8936_v48  ;;  %4842 = vmatpush.bf16.msrb.mxu3 %v5618_v52  ;;  %v13408_v52 = vld [vmem:[#allocation56_spill] sm:$0xff] }
 0x31a   : > { %v9065_v2 = vmul.f32 %v2753_v18, %v8590_v56  ;;  %v2768_v7 = vsel %vm8975_vm8, %v8947_v42, %v2763_v61  ;;  %v2809_v14 = vand.u32 2147483647, %v8875_v12  ;;  %v1035_v54 = vmul.f32 %v931_v33, %v13399_v17  ;;  %v5594_v33 = vld [vmem:[#allocation10 + $0x20] sm:$0xff]  ;;  %v13409_v12 = vld [vmem:[#allocation55_spill] sm:$0xff] }
 0x31b   : > { %v2778_v56 = vsel %vm9057_vm11, %v8889_v39, %v2774_v28  ;;  %v2793_v42 = vsel %vm9074_vm7, %v8908_v63, %v2789_v38  ;;  %v2803_v22 = vmul.f32 %v8949_v62, %v2802_v26  ;;  %5954 = vrcp.f32 %v9035_v1  ;;  %v5602_v39 = vld [vmem:[#allocation10 + $0x60] sm:$0xff]  ;;  %4575 = vmatpush.bf16.msrb.mxu0 %v5594_v33 }
 0x31c   : > { %13396 = vst [vmem:[#allocation62_spill] sm:$0xff] %v9065_v2  ;;  %v2817_v18 = vsub.f32 1.0, %v2816_v55  ;;  %v2831_v61 = vmul.f32 %v9051_v59, %v8955_v23  ;;  %5956 = vpow2.f32 %v5342_v53  ;;  %v5343_v17 = vmul.f32 -1.442695, %v9049_v3  ;;  %4664 = vmatpush.bf16.msrb.mxu1 %v5602_v39 }
 0x31d   : > { %v9088_v19 = vpop.eup %5950  ;;  %v9094_v28 = vmul.f32 %v2768_v7, %v8607_v58  ;;  %v2812_v63 = vor.u32 1.1754944e-38, %v2811_v41  ;;  %v2824_v38 = vand.u32 2147483647, %v8936_v48  ;;  %v9097_v26 = vor.u32 1.1754944e-38, %v2826_v43  ;;  %v1460_v43 = vpop.f32.mrf.mxu1 }
 0x31e   : > { %v9099_v4 = vpop.eup %5952  ;;  %v2783_v55 = vsel %vm9014_vm1, %v8969_v37, %v2778_v56  ;;  %vm2820_vm9 = vweird.f32 %v8936_v48  ;;  %v2841_v53 = vand.u32 2147483648, %v8955_v23  ;;  %v9107_v2 = vadd.f32 %v1371_v0, %v7140_v15  ;;  %v615_v37 = vpop.xlane.xlu1 %614 }
 0x31f   : > { %13400 = vst [vmem:[#allocation24_spill] sm:$0xff] %v9094_v28  ;;  %v1070_v58 = vmul.f32 %v8661_v46, %v1035_v54  ;;  %v2798_v7 = vsel %vm9024_vm4, %v2797_v24, %v2793_v42  ;;  %v2804_v41 = vadd.f32 %v8949_v62, %v2803_v22  ;;  %vm2806_vm10 = vweird.f32 %v8949_v62  ;;  %v1549_v54 = vpop.f32.mrf.mxu2 }
 0x320   : > { %vm9114_vm14 = vcmp.eq.f32.partialorder %v2809_v14, 8.507059e+37  ;;  %v2839_v50 = vand.u32 2147483647, %v8955_v23  ;;  %v2818_v0 = vmul.f32 %v9009_v34, %v2817_v18  ;;  %v2832_v56 = vsub.f32 1.0, %v2831_v61  ;;  %v1638_v18 = vpop.f32.mrf.mxu3  ;;  %vm9136_vm12 = vmor %vm2805_vm6, %vm2806_vm10 }
 0x321   : > { %5958 = vpow2.f32 %v5343_v17  ;;  %v1069_v20 = vmul.f32 %v8661_v46, %v8940_v35  ;;  %v9122_v24 = vpop.eup %5954  ;;  %v9125_v42 = vmul.f32 %v2783_v55, %v8650_v10  ;;  %vm2821_vm8 = vweird.f32 %v9009_v34 }
 0x322   : > { %v2846_v14 = vmul.f32 %v9088_v19, %v8986_v5  ;;  %v2861_v22 = vmul.f32 %v9099_v4, %v9004_v6  ;;  %v5957_v61 = vpop.eup %5956  ;;  %vm9140_vm13 = vcmp.eq.f32.partialorder %v2824_v38, 8.507059e+37  ;;  %vm2835_vm15 = vweird.f32 %v8955_v23  ;;  %vm9180_vm1 = vmor %vm2820_vm9, %vm2821_vm8 }
 0x323   : > { %13403 = vst [vmem:[#allocation63_spill] sm:$0xff] %v9125_v42  ;;  %v9145_v35 = vor.u32 1.1754944e-38, %v2841_v53  ;;  %v5344_v17 = vmul.f32 -1.442695, %v9107_v2  ;;  %v9149_v33 = vadd.f32 %v1460_v43, %v7142_v21  ;;  %v1105_v39 = vadd.f32 %v13408_v52, %v1070_v58  ;;  %v1373_v53 = vpop.f32.mrf.mxu0  ;;  %v619_v42 = vpop.xlane.xlu2 %618 }
 0x324   : > { %v9153_v55 = vmul.f32 %v2798_v7, %v13409_v12  ;;  %v2808_v38 = vsel %vm9136_vm12, %v8949_v62, %v2804_v41  ;;  %vm2836_vm0 = vweird.f32 %v9051_v59  ;;  %v9160_v60 = vadd.f32 %v1549_v54, %v7150_v30 }
 0x325   : > { %v2819_v36 = vadd.f32 %v9009_v34, %v2818_v0  ;;  %v2833_v43 = vmul.f32 %v9051_v59, %v2832_v56  ;;  %v9165_v16 = vadd.f32 %v1638_v18, %v7152_v25  ;;  %v1104_v58 = vadd.f32 %v13408_v52, %v1069_v20  ;;  %vm9217_vm4 = vmor %vm2835_vm15, %vm2836_vm0  ;;  %v1462_v23 = vpop.f32.mrf.mxu1 }
 0x326   : > { %13410 = vst [vmem:[#allocation56_spill] sm:$0xff] %v9153_v55  ;;  %v2847_v7 = vsub.f32 1.0, %v2846_v14  ;;  %v2862_v12 = vsub.f32 1.0, %v2861_v22  ;;  %v2876_v62 = vmul.f32 %v9122_v24, %v9035_v1  ;;  %v9170_v41 = vadd.f32 1.0, %v5957_v61 }
 0x327   : > { %v5959_v46 = vpop.eup %5958  ;;  %5960 = vpow2.f32 %v5344_v17  ;;  %v5345_v54 = vmul.f32 -1.442695, %v9149_v33  ;;  %v9174_v0 = vadd.f32 %v1373_v53, %v7140_v15  ;;  %v1125_v56 = vpack.c.bf16 %v1105_v39, %v1104_v58 }
 0x328   : > { %vm2850_vm2 = vweird.f32 %v8986_v5  ;;  %v2854_v14 = vand.u32 2147483647, %v8986_v5  ;;  %v2856_v22 = vand.u32 2147483648, %v8986_v5  ;;  %v5346_v18 = vmul.f32 -1.442695, %v9160_v60  ;;  %v1640_v5 = vpop.f32.mrf.mxu3 }
 0x329   : > { %v2813_v61 = vsel %vm9114_vm14, %v2812_v63, %v2808_v38  ;;  %v2823_v17 = vsel %vm9180_vm1, %v9009_v34, %v2819_v36  ;;  %v2834_v48 = vadd.f32 %v9051_v59, %v2833_v43  ;;  %vm9194_vm3 = vcmp.eq.f32.partialorder %v2839_v50, 8.507059e+37  ;;  %1395 = vmatmul.bf16.gmra.mxu0 %v1125_v56  ;;  %1484 = vmatmul.bf16.gmra.mxu1 %v1125_v56 }
 0x32a   : > { %v5347_v39 = vmul.f32 -1.442695, %v9165_v16  ;;  %v2848_v53 = vmul.f32 %v9088_v19, %v2847_v7  ;;  %v2877_v58 = vsub.f32 1.0, %v2876_v62  ;;  %5962 = vrcp.f32 %v9170_v41  ;;  %1573 = vmatmul.bf16.gmra.mxu2 %v1125_v56  ;;  %1662 = vmatmul.bf16.gmra.mxu3 %v1125_v56 }
 0x32b   : > { %v9201_v63 = vadd.f32 1.0, %v5959_v46  ;;  %v2863_v36 = vmul.f32 %v9099_v4, %v2862_v12  ;;  %5964 = vpow2.f32 %v5345_v54  ;;  %v5348_v34 = vmul.f32 -1.442695, %v9174_v0 }
 0x32c   : > { %v652_v50 = vmul.f32 %v8826_v31, %v6766_v13  ;;  %v9208_v38 = vmul.f32 %v2813_v61, %v8716_v8  ;;  %v2828_v43 = vsel %vm9140_vm13, %v9097_v26, %v2823_v17  ;;  %vm9221_vm5 = vcmp.eq.f32.partialorder %v2854_v14, 8.507059e+37 }
 0x32d   : > { %v2869_v31 = vand.u32 2147483647, %v9004_v6  ;;  %5966 = vpow2.f32 %v5346_v18  ;;  %v5961_v8 = vpop.eup %5960  ;;  %v2838_v26 = vsel %vm9217_vm4, %v9051_v59, %v2834_v48  ;;  %v2871_v10 = vand.u32 2147483648, %v9004_v6 }
 0x32e   : > { %13415 = vst [vmem:[#allocation55_spill] sm:$0xff] %v9208_v38  ;;  %5968 = vpow2.f32 %v5347_v39  ;;  %v653_v62 = vmul.f32 %v615_v37, %v6766_v13  ;;  %v2849_v46 = vadd.f32 %v9088_v19, %v2848_v53  ;;  %vm2851_vm11 = vweird.f32 %v9088_v19 }
 0x32f   : > { %v2878_v54 = vmul.f32 %v9122_v24, %v2877_v58  ;;  %5970 = vrcp.f32 %v9201_v63  ;;  %v2864_v56 = vadd.f32 %v9099_v4, %v2863_v36  ;;  %vm2866_vm6 = vweird.f32 %v9099_v4  ;;  %vm9252_vm9 = vmor %vm2850_vm2, %vm2851_vm11 }
 0x330   : > { %5972 = vpow2.f32 %v5348_v34  ;;  %v9237_v59 = vadd.f32 1e-05, %v652_v50  ;;  %v9239_v20 = vpop.eup %5962  ;;  %v2857_v14 = vor.u32 1.1754944e-38, %v2856_v22  ;;  %vm2865_vm7 = vweird.f32 %v9004_v6 }
 0x331   : > { %v9242_v18 = vadd.f32 1.0, %v5961_v8  ;;  %v9245_v61 = vadd.f32 %v1462_v23, %v7142_v21  ;;  %v5965_v17 = vpop.eup %5964  ;;  %v9248_v48 = vmul.f32 %v2828_v43, %v8790_v40  ;;  %vm9256_vm10 = vcmp.eq.f32.partialorder %v2869_v31, 8.507059e+37  ;;  %vm9270_vm14 = vmor %vm2865_vm7, %vm2866_vm6 }
 0x332   : > { %v2872_v6 = vor.u32 1.1754944e-38, %v2871_v10  ;;  %v9260_v22 = vadd.f32 1e-05, %v653_v62  ;;  %v2843_v37 = vsel %vm9194_vm3, %v9145_v35, %v2838_v26  ;;  %v2853_v40 = vsel %vm9252_vm9, %v9088_v19, %v2849_v46 }
 0x333   : > { %13420 = vst [vmem:[#allocation64_spill] sm:$0xff] %v9248_v48  ;;  %v5967_v58 = vpop.eup %5966  ;;  %v2879_v36 = vadd.f32 %v9122_v24, %v2878_v54  ;;  %vm2881_vm8 = vweird.f32 %v9122_v24  ;;  %v2868_v52 = vsel %vm9270_vm14, %v9099_v4, %v2864_v56  ;;  %v2886_v35 = vand.u32 2147483648, %v9035_v1 }
 0x334   : > { %v5969_v34 = vpop.eup %5968  ;;  %v2891_v19 = vmul.f32 %v9239_v20, %v9170_v41  ;;  %5974 = vrsqrt.f32 %v9237_v59  ;;  %vm2880_vm12 = vweird.f32 %v9035_v1  ;;  %v2884_v43 = vand.u32 2147483647, %v9035_v1 }
 0x335   : > { %v9283_v50 = vpop.eup %5970  ;;  %5976 = vrcp.f32 %v9242_v18  ;;  %v5349_v7 = vmul.f32 -1.442695, %v9245_v61  ;;  %v9290_v4 = vmul.f32 %v2843_v37, %v8824_v32  ;;  %v2858_v8 = vsel %vm9221_vm5, %v2857_v14, %v2853_v40  ;;  %vm9294_vm13 = vmor %vm2880_vm12, %vm2881_vm8 }
 0x336   : > { %v5973_v31 = vpop.eup %5972  ;;  %v9298_v10 = vadd.f32 1.0, %v5965_v17  ;;  %5978 = vrsqrt.f32 %v9260_v22  ;;  %v2873_v1 = vsel %vm9256_vm10, %v2872_v6, %v2868_v52  ;;  %v2883_v23 = vsel %vm9294_vm13, %v9122_v24, %v2879_v36 }
 0x337   : > { %13427 = vst [vmem:[#allocation65_spill] sm:$0xff] %v9290_v4  ;;  %v2901_v32 = vand.u32 2147483648, %v9170_v41  ;;  %v9307_v62 = vadd.f32 1.0, %v5967_v58  ;;  %v2887_v12 = vor.u32 1.1754944e-38, %v2886_v35  ;;  %v2892_v46 = vsub.f32 1.0, %v2891_v19  ;;  %v1551_v58 = vpop.f32.mrf.mxu2  ;;  %v1376_v35 = vpop.f32.mrf.mxu0 }
 0x338   : > { %v2906_v54 = vmul.f32 %v9283_v50, %v9201_v63  ;;  %v9311_v56 = vadd.f32 1.0, %v5969_v34  ;;  %v9314_v14 = vmul.f32 %v2858_v8, %v8856_v47  ;;  %vm2885_vm15 = vcmp.eq.f32.partialorder %v2884_v43, 8.507059e+37 }
 0x339   : > { %v9316_v17 = vadd.f32 1.0, %v5973_v31  ;;  %5980 = vpow2.f32 %v5349_v7  ;;  %v9321_v24 = vmul.f32 %v2873_v1, %v8869_v9  ;;  %v2888_v53 = vsel %vm2885_vm15, %v2887_v12, %v2883_v23 }
 0x33a   : > { %13430 = vst [vmem:[#allocation66_spill] sm:$0xff] %v9314_v14  ;;  %v9318_v39 = vpop.eup %5974  ;;  %v2899_v6 = vand.u32 2147483647, %v9170_v41  ;;  %5982 = vrcp.f32 %v9298_v10  ;;  %vm2895_vm0 = vweird.f32 %v9170_v41  ;;  %v2902_v47 = vor.u32 1.1754944e-38, %v2901_v32 }
 0x33b   : > { %13431 = vst [vmem:[#allocation67_spill] sm:$0xff] %v9321_v24  ;;  %v9325_v37 = vpop.eup %5976  ;;  %v2916_v40 = vand.u32 2147483648, %v9201_v63  ;;  %5984 = vrcp.f32 %v9307_v62  ;;  %v2893_v9 = vmul.f32 %v9239_v20, %v2892_v46  ;;  %v2907_v34 = vsub.f32 1.0, %v2906_v54 }
 0x33c   : > { %v9330_v36 = vpop.eup %5978  ;;  %v2931_v52 = vand.u32 2147483648, %v9242_v18  ;;  %5986 = vrcp.f32 %v9311_v56  ;;  %v9336_v19 = vmul.f32 %v2888_v53, %v8906_v51  ;;  %v9340_v43 = vadd.f32 %v1551_v58, %v7150_v30 }
 0x33d   : > { %5988 = vrcp.f32 %v9316_v17  ;;  %v933_v7 = vmul.f32 %v9318_v39, %v9237_v59  ;;  %vm9344_vm1 = vcmp.eq.f32.partialorder %v2899_v6, 8.507059e+37  ;;  %vm2910_vm2 = vweird.f32 %v9201_v63 }
 0x33e   : > { %13432 = vst [vmem:[#allocation68_spill] sm:$0xff] %v9336_v19  ;;  %v2914_v8 = vand.u32 2147483647, %v9201_v63  ;;  %v2921_v51 = vmul.f32 %v9325_v37, %v9242_v18  ;;  %v9354_v1 = vadd.f32 %v1640_v5, %v7152_v25  ;;  %v9356_v32 = vor.u32 1.1754944e-38, %v2916_v40 }
 0x33f   : > { %v5981_v23 = vpop.eup %5980  ;;  %v2946_v12 = vand.u32 2147483648, %v9298_v10  ;;  %v943_v46 = vmul.f32 %v9330_v36, %v9260_v22  ;;  %v9362_v54 = vadd.f32 %v1376_v35, %v7140_v15  ;;  %v2894_v6 = vadd.f32 %v9239_v20, %v2893_v9 }
 0x340   : > { %v9364_v53 = vpop.eup %5982  ;;  %vm2896_vm3 = vweird.f32 %v9239_v20  ;;  %v2908_v58 = vmul.f32 %v9283_v50, %v2907_v34  ;;  %v9369_v5 = vor.u32 1.1754944e-38, %v2931_v52  ;;  %v2961_v24 = vand.u32 2147483648, %v9307_v62 }
 0x341   : > { %v9371_v40 = vpop.eup %5984  ;;  %v5350_v38 = vmul.f32 -1.442695, %v9340_v43  ;;  %v934_v35 = vmul.f32 %v9318_v39, %v933_v7  ;;  %vm2911_vm4 = vweird.f32 %v9283_v50  ;;  %vm9380_vm5 = vcmp.eq.f32.partialorder %v2914_v8, 8.507059e+37  ;;  %vm9392_vm11 = vmor %vm2895_vm0, %vm2896_vm3 }
 0x342   : > { %v9377_v57 = vpop.eup %5986  ;;  %v2922_v34 = vsub.f32 1.0, %v2921_v51  ;;  %v5351_v45 = vmul.f32 -1.442695, %v9354_v1  ;;  %v2936_v8 = vmul.f32 %v9364_v53, %v9298_v10  ;;  %v9398_v14 = vor.u32 1.1754944e-38, %v2946_v12  ;;  %vm9425_vm7 = vmor %vm2910_vm2, %vm2911_vm4 }
 0x343   : > { %v9386_v26 = vpop.eup %5988  ;;  %v944_v51 = vmul.f32 %v9330_v36, %v943_v46  ;;  %v5352_v52 = vmul.f32 -1.442695, %v9362_v54  ;;  %v2898_v4 = vsel %vm9392_vm11, %v9239_v20, %v2894_v6  ;;  %v2909_v19 = vadd.f32 %v9283_v50, %v2908_v58 }
 0x344   : > { %v2951_v41 = vmul.f32 %v9371_v40, %v9307_v62  ;;  %v9408_v48 = vadd.f32 1.0, %v5981_v23  ;;  %v9410_v55 = vor.u32 1.1754944e-38, %v2961_v24  ;;  %v2966_v12 = vmul.f32 %v9377_v57, %v9311_v56 }
 0x345   : > { %5990 = vpow2.f32 %v5350_v38  ;;  %v935_v46 = vmul.f32 0.5, %v934_v35  ;;  %v2923_v44 = vmul.f32 %v9325_v37, %v2922_v34  ;;  %vm2926_vm6 = vweird.f32 %v9325_v37 }
 0x346   : > { %v2976_v20 = vand.u32 2147483648, %v9311_v56  ;;  %v2981_v6 = vmul.f32 %v9386_v26, %v9316_v17  ;;  %5992 = vpow2.f32 %v5351_v45  ;;  %v2903_v24 = vsel %vm9344_vm1, %v2902_v47, %v2898_v4 }
 0x347   : > { %v2937_v23 = vsub.f32 1.0, %v2936_v8  ;;  %v945_v58 = vmul.f32 0.5, %v944_v51  ;;  %5994 = vpow2.f32 %v5352_v52  ;;  %v2913_v35 = vsel %vm9425_vm7, %v9283_v50, %v2909_v19 }
 0x348   : > { %vm2925_vm9 = vweird.f32 %v9242_v18  ;;  %v2952_v45 = vsub.f32 1.0, %v2951_v41  ;;  %5996 = vrcp.f32 %v9408_v48  ;;  %v655_v4 = vmul.f32 %v619_v42, %v6766_v13  ;;  %v1465_v42 = vpop.f32.mrf.mxu1 }
 0x349   : > { %vm2940_vm10 = vweird.f32 %v9298_v10  ;;  %vm2941_vm14 = vweird.f32 %v9364_v53  ;;  %v2967_v63 = vsub.f32 1.0, %v2966_v12  ;;  %v2974_v47 = vand.u32 2147483647, %v9311_v56 }
 0x34a   : > { %v936_v31 = vsub.f32 1.5, %v935_v46  ;;  %v9439_v34 = vmul.f32 %v2903_v24, %v9007_v49  ;;  %v9442_v50 = vadd.f32 %v9325_v37, %v2923_v44  ;;  %vm2956_vm12 = vweird.f32 %v9371_v40  ;;  %v617_v44 = vpop.xlane.xlu1 %616 }
 0x34b   : > { %v2982_v19 = vsub.f32 1.0, %v2981_v6  ;;  %v5991_v52 = vpop.eup %5990  ;;  %v2918_v7 = vsel %vm9380_vm5, %v9356_v32, %v2913_v35  ;;  %v2938_v8 = vmul.f32 %v9364_v53, %v2937_v23  ;;  %v9451_v49 = vor.u32 1.1754944e-38, %v2976_v20 }
 0x34c   : > { %13441 = vst [vmem:[#allocation69_spill] sm:$0xff] %v9439_v34  ;;  %v946_v51 = vsub.f32 1.5, %v945_v58  ;;  %v5993_v41 = vpop.eup %5992  ;;  %v2953_v12 = vmul.f32 %v9371_v40, %v2952_v45  ;;  %v9455_v46 = vadd.f32 1e-05, %v655_v4  ;;  %vm948_vm0 = vweird.f32 %v9260_v22  ;;  %v1643_v22 = vpop.f32.mrf.mxu3 }
 0x34d   : > { %vm949_vm1 = vweird.f32 %v9330_v36  ;;  %v5995_v32 = vpop.eup %5994  ;;  %v13442_v9 = vand.u32 2147483647, %v9242_v18  ;;  %v2968_v20 = vmul.f32 %v9377_v57, %v2967_v63  ;;  %v937_v24 = vmul.f32 %v9318_v39, %v936_v31 }
 0x34e   : > { %vm939_vm3 = vweird.f32 %v9318_v39  ;;  %v9469_v38 = vadd.f32 %v1465_v42, %v7142_v21  ;;  %v9471_v23 = vpop.eup %5996  ;;  %v13445_v58 = vand.u32 2147483647, %v9298_v10  ;;  %v2983_v45 = vmul.f32 %v9386_v26, %v2982_v19  ;;  %vm9503_vm15 = vmor %vm948_vm0, %vm949_vm1 }
 0x34f   : > { %vm9461_vm2 = vcmp.eq.f32.partialorder %v13442_v9, 8.507059e+37  ;;  %v2989_v4 = vand.u32 2147483647, %v9316_v17  ;;  %v9481_v63 = vadd.f32 1.0, %v5991_v52  ;;  %v654_v31 = vmul.f32 %v617_v44, %v6766_v13  ;;  %vm9522_vm0 = vmor %vm2925_vm9, %vm2926_vm6 }
 0x350   : > { %vm9475_vm4 = vcmp.eq.f32.partialorder %v13445_v58, 8.507059e+37  ;;  %v2939_v9 = vadd.f32 %v9364_v53, %v2938_v8  ;;  %v13448_v42 = vand.u32 2147483647, %v9307_v62  ;;  %vm9491_vm11 = vcmp.eq.f32.partialorder %v2974_v47, 8.507059e+37  ;;  %vm9537_vm1 = vmor %vm2940_vm10, %vm2941_vm14 }
 0x351   : > { %v9495_v28 = vadd.f32 1.0, %v5993_v41  ;;  %vm938_vm7 = vweird.f32 %v9237_v59  ;;  %v947_v19 = vmul.f32 %v9330_v36, %v946_v51  ;;  %v2954_v8 = vadd.f32 %v9371_v40, %v2953_v12 }
 0x352   : > { %vm9487_vm5 = vcmp.eq.f32.partialorder %v13448_v42, 8.507059e+37  ;;  %vm2971_vm13 = vweird.f32 %v9377_v57  ;;  %vm9511_vm8 = vmor %vm938_vm7, %vm939_vm3  ;;  %5998 = vrsqrt.f32 %v9455_v46  ;;  %v9516_v59 = vadd.f32 1.0, %v5995_v32 }
 0x353   : > { %v2969_v51 = vadd.f32 %v9377_v57, %v2968_v20  ;;  %v2996_v44 = vmul.f32 %v9471_v23, %v9408_v48  ;;  %v941_v41 = vsel %vm9511_vm8, %v9318_v39, %v937_v24  ;;  %v5353_v12 = vmul.f32 -1.442695, %v9469_v38 }
 0x354   : > { %v2984_v32 = vadd.f32 %v9386_v26, %v2983_v45  ;;  %vm2986_vm6 = vweird.f32 %v9386_v26  ;;  %6000 = vrcp.f32 %v9481_v63  ;;  %v9544_v20 = vadd.f32 1e-05, %v654_v31 }
 0x355   : > { %v2928_v39 = vsel %vm9522_vm0, %v9325_v37, %v9442_v50  ;;  %vm13461_vm9 = vweird.f32 %v9307_v62  ;;  %v2991_v24 = vand.u32 2147483648, %v9316_v17  ;;  %6002 = vrcp.f32 %v9495_v28  ;;  %v13468_v50 = vld [vmem:[#allocation34_spill] sm:$0xff] }
 0x356   : > { %vm9554_vm10 = vmor %vm13461_vm9, %vm2956_vm12  ;;  %v951_v45 = vsel %vm9503_vm15, %v9330_v36, %v947_v19  ;;  %v9564_v31 = vmul.f32 %v2918_v7, %v9049_v3  ;;  %v2943_v37 = vsel %vm9537_vm1, %v9364_v53, %v2939_v9  ;;  %vm13465_vm14 = vweird.f32 %v9311_v56  ;;  %v1554_v7 = vpop.f32.mrf.mxu2  ;;  %v13472_v19 = vld [vmem:[#allocation38_spill] sm:$0xff]  ;;  %v621_v56 = vpop.xlane.xlu0 %620 }
 0x357   : > { %vm9573_vm8 = vmor %vm13465_vm14, %vm2971_vm13  ;;  %v1036_v42 = vmul.f32 %v941_v41, %v13468_v50  ;;  %6004 = vrcp.f32 %v9516_v59  ;;  %v2958_v3 = vsel %vm9554_vm10, %v9371_v40, %v2954_v8  ;;  %vm13469_vm12 = vweird.f32 %v9316_v17  ;;  %v1467_v50 = vpop.f32.mrf.mxu1 }
 0x358   : > { %13464 = vst [vmem:[#allocation70_spill] sm:$0xff] %v9564_v31  ;;  %v2973_v36 = vsel %vm9573_vm8, %v9377_v57, %v2969_v51  ;;  %vm9589_vm13 = vmor %vm13469_vm12, %vm2986_vm6  ;;  %v2997_v53 = vsub.f32 1.0, %v2996_v44  ;;  %6006 = vpow2.f32 %v5353_v12  ;;  %v9593_v9 = vpop.eup %5998  ;;  %v2933_v40 = vsel %vm9461_vm2, %v9369_v5, %v2928_v39  ;;  %v9616_v44 = vld [vmem:[#allocation5] ss:$0 sm:$0xff]  ;;  %v13652_v31 = vld [vmem:[#allocation37_spill] sm:$0xff] }
 0x359   : > { %v2988_v57 = vsel %vm9589_vm13, %v9386_v26, %v2984_v32  ;;  %v1037_v52 = vmul.f32 %v951_v45, %v13472_v19  ;;  %6008 = vrsqrt.f32 %v9544_v20  ;;  %v2948_v17 = vsel %vm9475_vm4, %v9398_v14, %v2943_v37  ;;  %v1378_v32 = vpop.f32.mrf.mxu0 }
 0x35a   : > { %vm2990_vm15 = vcmp.eq.f32.partialorder %v2989_v4, 8.507059e+37  ;;  %v2992_v8 = vor.u32 1.1754944e-38, %v2991_v24  ;;  %v3006_v47 = vand.u32 2147483648, %v9408_v48  ;;  %v9607_v51 = vpop.eup %6000  ;;  %v2963_v5 = vsel %vm9487_vm5, %v9410_v55, %v2958_v3 }
 0x35b   : > { %v2978_v26 = vsel %vm9491_vm11, %v9451_v49, %v2973_v36  ;;  %v3004_v6 = vand.u32 2147483647, %v9408_v48  ;;  %v1071_v14 = vmul.f32 %v9616_v44, %v1036_v42  ;;  %v9619_v35 = vpop.eup %6002  ;;  %v2998_v41 = vmul.f32 %v9471_v23, %v2997_v53 }
 0x35c   : > { %v2993_v4 = vsel %vm2990_vm15, %v2992_v8, %v2988_v57  ;;  %v963_v12 = vmul.f32 %v9593_v9, %v9455_v46  ;;  %v9625_v55 = vadd.f32 %v1554_v7, %v7150_v30  ;;  %v9630_v49 = vmul.f32 %v2933_v40, %v9107_v2 }
 0x35d   : > { %v9627_v34 = vpop.eup %6004  ;;  %v9633_v58 = vmul.f32 %v2948_v17, %v9149_v33  ;;  %v9636_v18 = vadd.f32 %v1643_v22, %v7152_v25  ;;  %v1072_v39 = vmul.f32 %v9616_v44, %v1037_v52  ;;  %v9640_v24 = vmul.f32 %v2963_v5, %v9160_v60 }
 0x35e   : > { %13473 = vst [vmem:[#allocation34_spill] sm:$0xff] %v9630_v49  ;;  %v6007_v10 = vpop.eup %6006  ;;  %v9643_v45 = vmul.f32 %v2978_v26, %v9165_v16  ;;  %vm3000_vm2 = vweird.f32 %v9408_v48  ;;  %v3007_v2 = vor.u32 1.1754944e-38, %v3006_v47  ;;  %v9649_v33 = vmul.f32 %v2993_v4, %v9174_v0  ;;  %v9659_v16 = vld [vmem:[%s12999_s2] ss:$0 sm:$0xff]  ;;  %v1556_v22 = vpop.f32.mrf.mxu2 }
 0x35f   : > { %13474 = vst [vmem:[#allocation38_spill] sm:$0xff] %v9633_v58  ;;  %v9646_v37 = vpop.eup %6008  ;;  %vm3001_vm3 = vweird.f32 %v9471_v23  ;;  %vm9652_vm4 = vcmp.eq.f32.partialorder %v3004_v6, 8.507059e+37  ;;  %v1106_v60 = vadd.f32 %v9659_v16, %v1071_v14  ;;  %v1107_v42 = vadd.f32 %v9659_v16, %v1072_v39  ;;  %v13649_v58 = vld [vmem:[#allocation35_spill] sm:$0xff] }
 0x360   : > { %13475 = vst [vmem:[#allocation71_spill] sm:$0xff] %v9640_v24  ;;  %v2999_v3 = vadd.f32 %v9471_v23, %v2998_v41  ;;  %v964_v0 = vmul.f32 %v9593_v9, %v963_v12  ;;  %v5354_v36 = vmul.f32 -1.442695, %v9625_v55  ;;  %v9667_v53 = vadd.f32 %v1378_v32, %v7140_v15  ;;  %vm9687_vm5 = vmor %vm3000_vm2, %vm3001_vm3 }
 0x361   : > { %13476 = vst [vmem:[#allocation72_spill] sm:$0xff] %v9643_v45  ;;  %v3011_v7 = vmul.f32 %v9607_v51, %v9481_v63  ;;  %v3026_v40 = vmul.f32 %v9619_v35, %v9495_v28  ;;  %v5355_v57 = vmul.f32 -1.442695, %v9636_v18  ;;  %v1126_v19 = vpack.c.bf16 %v1107_v42, %v1106_v60 }
 0x362   : > { %13477 = vst [vmem:[#allocation73_spill] sm:$0xff] %v9649_v33  ;;  %v3041_v52 = vmul.f32 %v9627_v34, %v9516_v59  ;;  %v9676_v17 = vadd.f32 1.0, %v6007_v10  ;;  %v953_v8 = vmul.f32 %v9646_v37, %v9544_v20  ;;  %v9681_v47 = vadd.f32 %v1467_v50, %v7142_v21 }
 0x363   : > { %vm968_vm11 = vweird.f32 %v9455_v46  ;;  %v656_v26 = vmul.f32 %v621_v56, %v6766_v13  ;;  %1400 = vmatmul.bf16.gmra.mxu0 %v1126_v19  ;;  %1489 = vmatmul.bf16.gmra.mxu1 %v1126_v19  ;;  %v3003_v48 = vsel %vm9687_vm5, %v9471_v23, %v2999_v3  ;;  %v965_v39 = vmul.f32 0.5, %v964_v0  ;;  %v1645_v0 = vpop.f32.mrf.mxu3 }
 0x364   : > { %6010 = vpow2.f32 %v5354_v36  ;;  %v5356_v10 = vmul.f32 -1.442695, %v9667_v53  ;;  %1578 = vmatmul.bf16.gmra.mxu2 %v1126_v19  ;;  %1667 = vmatmul.bf16.gmra.mxu3 %v1126_v19  ;;  %v3012_v50 = vsub.f32 1.0, %v3011_v7  ;;  %v3027_v60 = vsub.f32 1.0, %v3026_v40 }
 0x365   : > { %6012 = vpow2.f32 %v5355_v57  ;;  %v9702_v42 = vadd.f32 %v1556_v22, %v7150_v30  ;;  %v3042_v56 = vsub.f32 1.0, %v3041_v52  ;;  %v954_v32 = vmul.f32 %v9646_v37, %v953_v8 }
 0x366   : > { %6014 = vrcp.f32 %v9676_v17  ;;  %v5357_v5 = vmul.f32 -1.442695, %v9681_v47  ;;  %v3019_v23 = vand.u32 2147483647, %v9481_v63  ;;  %v9708_v3 = vadd.f32 1e-05, %v656_v26 }
 0x367   : > { %v3008_v22 = vsel %vm9652_vm4, %v3007_v2, %v3003_v48  ;;  %vm3015_vm7 = vweird.f32 %v9481_v63  ;;  %v3021_v52 = vand.u32 2147483648, %v9481_v63  ;;  %6016 = vpow2.f32 %v5356_v10 }
 0x368   : > { %v3013_v8 = vmul.f32 %v9607_v51, %v3012_v50  ;;  %v3028_v4 = vmul.f32 %v9619_v35, %v3027_v60  ;;  %v966_v26 = vsub.f32 1.5, %v965_v39  ;;  %v5358_v33 = vmul.f32 -1.442695, %v9702_v42 }
 0x369   : > { %vm3030_vm0 = vweird.f32 %v9495_v28  ;;  %v3043_v57 = vmul.f32 %v9627_v34, %v3042_v56  ;;  %v955_v19 = vmul.f32 0.5, %v954_v32  ;;  %6018 = vpow2.f32 %v5357_v5  ;;  %v5609_v56 = vld [vmem:[#allocation10 + $0x98] sm:$0xff] }
 0x36a   : > { %v6011_v49 = vpop.eup %6010  ;;  %v9724_v62 = vmul.f32 %v3008_v22, %v9245_v61  ;;  %vm9726_vm1 = vcmp.eq.f32.partialorder %v3019_v23, 8.507059e+37  ;;  %vm969_vm6 = vweird.f32 %v9593_v9  ;;  %6020 = vrsqrt.f32 %v9708_v3  ;;  %4754 = vmatpush.bf16.msrb.mxu2 %v5609_v56 }
 0x36b   : > { %v6013_v2 = vpop.eup %6012  ;;  %vm3016_vm9 = vweird.f32 %v9607_v51  ;;  %vm3031_vm10 = vweird.f32 %v9619_v35  ;;  %v3034_v32 = vand.u32 2147483647, %v9495_v28  ;;  %v3036_v10 = vand.u32 2147483648, %v9495_v28  ;;  %vm9743_vm14 = vmor %vm968_vm11, %vm969_vm6 }
 0x36c   : > { %13490 = vst [vmem:[#allocation74_spill] sm:$0xff] %v9724_v62  ;;  %v9732_v39 = vpop.eup %6014  ;;  %v3014_v61 = vadd.f32 %v9607_v51, %v3013_v8  ;;  %v3029_v50 = vadd.f32 %v9619_v35, %v3028_v4  ;;  %v967_v60 = vmul.f32 %v9593_v9, %v966_v26  ;;  %6022 = vpow2.f32 %v5358_v33  ;;  %vm9755_vm12 = vmor %vm3015_vm7, %vm3016_vm9 }
 0x36d   : > { %v6017_v5 = vpop.eup %6016  ;;  %v3044_v22 = vadd.f32 %v9627_v34, %v3043_v57  ;;  %vm3046_vm8 = vweird.f32 %v9627_v34  ;;  %v9749_v7 = vadd.f32 1.0, %v6011_v49  ;;  %v956_v8 = vsub.f32 1.5, %v955_v19  ;;  %vm9768_vm13 = vmor %vm3030_vm0, %vm3031_vm10 }
 0x36e   : > { %v3022_v46 = vor.u32 1.1754944e-38, %v3021_v52  ;;  %v3051_v4 = vand.u32 2147483648, %v9516_v59  ;;  %v3056_v26 = vmul.f32 %v9732_v39, %v9676_v17  ;;  %v9762_v57 = vadd.f32 1.0, %v6013_v2 }
 0x36f   : > { %v6019_v49 = vpop.eup %6018  ;;  %vm3045_vm15 = vweird.f32 %v9516_v59  ;;  %v3049_v19 = vand.u32 2147483647, %v9516_v59  ;;  %vm958_vm2 = vweird.f32 %v9544_v20  ;;  %vm959_vm3 = vweird.f32 %v9646_v37  ;;  %v13503_v20 = vld [vmem:[#allocation36_spill] sm:$0xff] }
 0x370   : > { %v9776_v52 = vpop.eup %6020  ;;  %v3018_v2 = vsel %vm9755_vm12, %v9607_v51, %v3014_v61  ;;  %v3037_v56 = vor.u32 1.1754944e-38, %v3036_v10  ;;  %v971_v28 = vsel %vm9743_vm14, %v9593_v9, %v967_v60  ;;  %vm9786_vm4 = vmor %vm3045_vm15, %vm3046_vm8  ;;  %v9790_v59 = vadd.f32 1.0, %v6017_v5 }
 0x371   : > { %v3033_v36 = vsel %vm9768_vm13, %v9619_v35, %v3029_v50  ;;  %v3048_v51 = vsel %vm9786_vm4, %v9627_v34, %v3044_v22  ;;  %6024 = vrcp.f32 %v9749_v7  ;;  %v957_v9 = vmul.f32 %v9646_v37, %v956_v8  ;;  %vm9805_vm5 = vmor %vm958_vm2, %vm959_vm3 }
 0x372   : > { %v6023_v10 = vpop.eup %6022  ;;  %v3052_v61 = vor.u32 1.1754944e-38, %v3051_v4  ;;  %v3057_v60 = vsub.f32 1.0, %v3056_v26  ;;  %6026 = vrcp.f32 %v9762_v57  ;;  %v9809_v35 = vadd.f32 1.0, %v6019_v49  ;;  %v1381_v49 = vpop.f32.mrf.mxu0 }
 0x373   : > { %v3023_v34 = vsel %vm9726_vm1, %v3022_v46, %v3018_v2  ;;  %vm3035_vm11 = vcmp.eq.f32.partialorder %v3034_v32, 8.507059e+37  ;;  %vm3050_vm7 = vcmp.eq.f32.partialorder %v3049_v19, 8.507059e+37  ;;  %v973_v40 = vmul.f32 %v9776_v52, %v9708_v3  ;;  %v623_v46 = vpop.xlane.xlu1 %622 }
 0x374   : > { %v3038_v50 = vsel %vm3035_vm11, %v3037_v56, %v3033_v36  ;;  %v3053_v23 = vsel %vm3050_vm7, %v3052_v61, %v3048_v51  ;;  %v3066_v22 = vand.u32 2147483648, %v9676_v17  ;;  %6028 = vrcp.f32 %v9790_v59 }
 0x375   : > { %v9818_v8 = vmul.f32 %v971_v28, %v13503_v20  ;;  %v961_v33 = vsel %vm9805_vm5, %v9646_v37, %v957_v9  ;;  %v9823_v48 = vadd.f32 1.0, %v6023_v10  ;;  %v9826_v32 = vadd.f32 %v1645_v0, %v7152_v25  ;;  %v13509_v9 = vld [vmem:[#allocation16_spill] sm:$0xff] }
 0x376   : > { %v9829_v36 = vmul.f32 %v3023_v34, %v9340_v43  ;;  %v3058_v4 = vmul.f32 %v9732_v39, %v3057_v60  ;;  %v3064_v26 = vand.u32 2147483647, %v9676_v17  ;;  %6030 = vrcp.f32 %v9809_v35  ;;  %v1559_v34 = vpop.f32.mrf.mxu2 }
 0x377   : > { %v9834_v63 = vpop.eup %6024  ;;  %v9837_v37 = vmul.f32 %v3038_v50, %v9354_v1  ;;  %v9840_v19 = vmul.f32 %v3053_v23, %v9362_v54  ;;  %v974_v0 = vmul.f32 %v9776_v52, %v973_v40  ;;  %vm3060_vm0 = vweird.f32 %v9676_v17  ;;  %v1470_v1 = vpop.f32.mrf.mxu1 }
 0x378   : > { %13504 = vst [vmem:[#allocation36_spill] sm:$0xff] %v9829_v36  ;;  %v9845_v28 = vpop.eup %6026  ;;  %v9848_v51 = vor.u32 1.1754944e-38, %v3066_v22  ;;  %v1038_v10 = vmul.f32 %v961_v33, %v13509_v9  ;;  %v657_v61 = vmul.f32 %v623_v46, %v6766_v13  ;;  %6032 = vrcp.f32 %v9823_v48  ;;  %v1648_v33 = vpop.f32.mrf.mxu3  ;;  %v5593_v46 = vld [vmem:[#allocation10 + $0x18] sm:$0xff] }
 0x379   : > { %13505 = vst [vmem:[#allocation75_spill] sm:$0xff] %v9837_v37  ;;  %v5359_v54 = vmul.f32 -1.442695, %v9826_v32  ;;  %v9856_v5 = vadd.f32 %v1381_v49, %v7140_v15  ;;  %v3059_v50 = vadd.f32 %v9732_v39, %v3058_v4  ;;  %vm3061_vm1 = vweird.f32 %v9732_v39  ;;  %v5617_v49 = vld [vmem:[#allocation10 + $0xd8] sm:$0xff]  ;;  %4576 = vmatpush.bf16.msrb.mxu0 %v5593_v46 }
 0x37a   : > { %13506 = vst [vmem:[#allocation76_spill] sm:$0xff] %v9840_v19  ;;  %v9858_v40 = vpop.eup %6028  ;;  %vm9862_vm6 = vcmp.eq.f32.partialorder %v3064_v26, 8.507059e+37  ;;  %v3071_v22 = vmul.f32 %v9834_v63, %v9749_v7  ;;  %v3081_v20 = vand.u32 2147483648, %v9749_v7  ;;  %vm978_vm9 = vweird.f32 %v9708_v3  ;;  %v5601_v9 = vld [vmem:[#allocation10 + $0x58] sm:$0xff]  ;;  %4843 = vmatpush.bf16.msrb.mxu3 %v5617_v49  ;;  %vm9889_vm10 = vmor %vm3060_vm0, %vm3061_vm1  ;;  %v625_v49 = vpop.xlane.xlu2 %624 }
 0x37b   : > { %v3086_v4 = vmul.f32 %v9845_v28, %v9762_v57  ;;  %v975_v26 = vmul.f32 0.5, %v974_v0  ;;  %v9874_v60 = vadd.f32 %v1470_v1, %v7142_v21  ;;  %v3096_v2 = vand.u32 2147483648, %v9762_v57  ;;  %4665 = vmatpush.bf16.msrb.mxu1 %v5601_v9 }
 0x37c   : > { %v9876_v19 = vpop.eup %6030  ;;  %v9879_v43 = vadd.f32 1e-05, %v657_v61  ;;  %v9882_v41 = vadd.f32 %v1559_v34, %v7150_v30  ;;  %v1073_v12 = vmul.f32 %v9616_v44, %v1038_v10  ;;  %v3101_v1 = vmul.f32 %v9858_v40, %v9790_v59 }
 0x37d   : > { %6034 = vpow2.f32 %v5359_v54  ;;  %v5360_v61 = vmul.f32 -1.442695, %v9856_v5  ;;  %v9897_v34 = vadd.f32 %v1648_v33, %v7152_v25  ;;  %v3063_v10 = vsel %vm9889_vm10, %v9732_v39, %v3059_v50 }
 0x37e   : > { %v3072_v46 = vsub.f32 1.0, %v3071_v22  ;;  %v9902_v17 = vor.u32 1.1754944e-38, %v3081_v20  ;;  %vm979_vm14 = vweird.f32 %v9776_v52  ;;  %v9905_v56 = vpop.eup %6032  ;;  %v3087_v6 = vsub.f32 1.0, %v3086_v4 }
 0x37f   : > { %v976_v54 = vsub.f32 1.5, %v975_v26  ;;  %v3116_v14 = vmul.f32 %v9876_v19, %v9809_v35  ;;  %v5361_v33 = vmul.f32 -1.442695, %v9874_v60  ;;  %6036 = vrsqrt.f32 %v9879_v43  ;;  %vm9936_vm13 = vmor %vm978_vm9, %vm979_vm14 }
 0x380   : > { %v5362_v9 = vmul.f32 -1.442695, %v9882_v41  ;;  %v1074_v39 = vmul.f32 %v9616_v44, %v9818_v8  ;;  %v1108_v50 = vadd.f32 %v9659_v16, %v1073_v12  ;;  %vm3075_vm8 = vweird.f32 %v9749_v7 }
 0x381   : > { %v3102_v22 = vsub.f32 1.0, %v3101_v1  ;;  %6038 = vpow2.f32 %v5360_v61  ;;  %v658_v20 = vmul.f32 %v625_v49, %v6766_v13  ;;  %v5363_v4 = vmul.f32 -1.442695, %v9897_v34 }
 0x382   : > { %vm3090_vm12 = vweird.f32 %v9762_v57  ;;  %v3109_v26 = vand.u32 2147483647, %v9790_v59  ;;  %v3111_v0 = vand.u32 2147483648, %v9790_v59  ;;  %v3131_v37 = vmul.f32 %v9905_v56, %v9823_v48 }
 0x383   : > { %v1109_v8 = vadd.f32 %v9659_v16, %v1074_v39  ;;  %v6035_v12 = vpop.eup %6034  ;;  %v3068_v1 = vsel %vm9862_vm6, %v9848_v51, %v3063_v10  ;;  %v3073_v61 = vmul.f32 %v9834_v63, %v3072_v46  ;;  %v3088_v49 = vmul.f32 %v9845_v28, %v3087_v6  ;;  %v13529_v39 = vld [vmem:[#allocation41_spill] sm:$0xff] }
 0x384   : > { %6040 = vpow2.f32 %v5361_v33  ;;  %v977_v45 = vmul.f32 %v9776_v52, %v976_v54  ;;  %v3117_v36 = vsub.f32 1.0, %v3116_v14  ;;  %v9930_v62 = vor.u32 1.1754944e-38, %v3096_v2 }
 0x385   : > { %6042 = vpow2.f32 %v5362_v9  ;;  %v1127_v24 = vpack.c.bf16 %v1109_v8, %v1108_v50  ;;  %v3103_v51 = vmul.f32 %v9858_v40, %v3102_v22  ;;  %v9941_v23 = vadd.f32 1e-05, %v658_v20  ;;  %v9943_v6 = vpop.eup %6036 }
 0x386   : > { %6044 = vpow2.f32 %v5363_v4  ;;  %vm3076_vm15 = vweird.f32 %v9834_v63  ;;  %v13516_v14 = vand.u32 2147483647, %v9749_v7  ;;  %vm3105_vm3 = vweird.f32 %v9790_v59  ;;  %v1472_v59 = vpop.f32.mrf.mxu1 }
 0x387   : > { %v3132_v3 = vsub.f32 1.0, %v3131_v37  ;;  %v9953_v10 = vadd.f32 1.0, %v6035_v12  ;;  %1405 = vmatmul.bf16.gmra.mxu0 %v1127_v24  ;;  %1494 = vmatmul.bf16.gmra.mxu1 %v1127_v24  ;;  %v6039_v46 = vpop.eup %6038  ;;  %v9956_v54 = vmul.f32 %v3068_v1, %v9469_v38  ;;  %v3074_v33 = vadd.f32 %v9834_v63, %v3073_v61  ;;  %vm9984_vm1 = vmor %vm3075_vm8, %vm3076_vm15 }
 0x388   : > { %vm9948_vm2 = vcmp.eq.f32.partialorder %v13516_v14, 8.507059e+37  ;;  %vm3091_vm4 = vweird.f32 %v9845_v28  ;;  %v3112_v9 = vor.u32 1.1754944e-38, %v3111_v0  ;;  %1583 = vmatmul.bf16.gmra.mxu2 %v1127_v24  ;;  %1672 = vmatmul.bf16.gmra.mxu3 %v1127_v24  ;;  %v3089_v50 = vadd.f32 %v9845_v28, %v3088_v49  ;;  %v1383_v24 = vpop.f32.mrf.mxu0 }
 0x389   : > { %13519 = vst [vmem:[#allocation16_spill] sm:$0xff] %v9956_v54  ;;  %v13520_v22 = vand.u32 2147483647, %v9762_v57  ;;  %v981_v38 = vsel %vm9936_vm13, %v9776_v52, %v977_v45  ;;  %vm9970_vm11 = vcmp.eq.f32.partialorder %v3109_v26, 8.507059e+37  ;;  %v3118_v4 = vmul.f32 %v9876_v19, %v3117_v36  ;;  %vm10001_vm6 = vmor %vm3090_vm12, %vm3091_vm4 }
 0x38a   : > { %vm3120_vm7 = vweird.f32 %v9809_v35  ;;  %v6041_v0 = vpop.eup %6040  ;;  %v3104_v8 = vadd.f32 %v9858_v40, %v3103_v51  ;;  %vm3106_vm0 = vweird.f32 %v9858_v40  ;;  %v3124_v12 = vand.u32 2147483647, %v9809_v35 }
 0x38b   : > { %vm9963_vm5 = vcmp.eq.f32.partialorder %v13520_v22, 8.507059e+37  ;;  %6046 = vrsqrt.f32 %v9941_v23  ;;  %v6043_v1 = vpop.eup %6042  ;;  %v3133_v52 = vmul.f32 %v9905_v56, %v3132_v3  ;;  %v983_v36 = vmul.f32 %v9943_v6, %v9879_v43  ;;  %vm10019_vm9 = vmor %vm3105_vm3, %vm3106_vm0 }
 0x38c   : > { %6048 = vrcp.f32 %v9953_v10  ;;  %v9992_v26 = vadd.f32 1.0, %v6039_v46  ;;  %v6045_v61 = vpop.eup %6044  ;;  %v3078_v49 = vsel %vm9984_vm1, %v9834_v63, %v3074_v33  ;;  %v10006_v51 = vmul.f32 %v981_v38, %v13529_v39 }
 0x38d   : > { %v3126_v14 = vand.u32 2147483648, %v9809_v35  ;;  %v10010_v3 = vadd.f32 %v1383_v24, %v7140_v15  ;;  %v3093_v63 = vsel %vm10001_vm6, %v9845_v28, %v3089_v50  ;;  %v3119_v46 = vadd.f32 %v9876_v19, %v3118_v4 }
 0x38e   : > { %vm3121_vm10 = vweird.f32 %v9876_v19  ;;  %v10025_v33 = vadd.f32 1.0, %v6041_v0  ;;  %v3108_v22 = vsel %vm10019_vm9, %v9858_v40, %v3104_v8  ;;  %vm3136_vm14 = vweird.f32 %v9905_v56 }
 0x38f   : > { %v3141_v28 = vand.u32 2147483648, %v9823_v48  ;;  %v10032_v50 = vadd.f32 1.0, %v6043_v1  ;;  %v3134_v38 = vadd.f32 %v9905_v56, %v3133_v52  ;;  %v984_v24 = vmul.f32 %v9943_v6, %v983_v36  ;;  %vm10046_vm8 = vmor %vm3120_vm7, %vm3121_vm10  ;;  %v1650_v1 = vpop.f32.mrf.mxu3 }
 0x390   : > { %6050 = vrcp.f32 %v9992_v26  ;;  %v10037_v4 = vadd.f32 1.0, %v6045_v61  ;;  %v3083_v40 = vsel %vm9948_vm2, %v9902_v17, %v3078_v49  ;;  %vm10050_vm12 = vcmp.eq.f32.partialorder %v3124_v12, 8.507059e+37 }
 0x391   : > { %v10039_v0 = vpop.eup %6046  ;;  %vm3135_vm13 = vweird.f32 %v9823_v48  ;;  %v5364_v45 = vmul.f32 -1.442695, %v10010_v3  ;;  %v3123_v17 = vsel %vm10046_vm8, %v9876_v19, %v3119_v46  ;;  %v3139_v35 = vand.u32 2147483647, %v9823_v48 }
 0x392   : > { %v10056_v52 = vpop.eup %6048  ;;  %6052 = vrcp.f32 %v10025_v33  ;;  %v10064_v2 = vadd.f32 %v1472_v59, %v7142_v21  ;;  %v3098_v12 = vsel %vm9963_vm5, %v9930_v62, %v3093_v63  ;;  %v3113_v36 = vsel %vm9970_vm11, %v3112_v9, %v3108_v22  ;;  %vm10073_vm15 = vmor %vm3135_vm13, %vm3136_vm14  ;;  %v1561_v62 = vpop.f32.mrf.mxu2 }
 0x393   : > { %v3127_v61 = vor.u32 1.1754944e-38, %v3126_v14  ;;  %6054 = vrcp.f32 %v10032_v50  ;;  %v3138_v48 = vsel %vm10073_vm15, %v9905_v56, %v3134_v38  ;;  %v3142_v19 = vor.u32 1.1754944e-38, %v3141_v28 }
 0x394   : > { %v985_v7 = vmul.f32 0.5, %v984_v24  ;;  %6056 = vrcp.f32 %v10037_v4  ;;  %v3146_v37 = vmul.f32 %v10056_v52, %v9953_v10  ;;  %v993_v20 = vmul.f32 %v10039_v0, %v9941_v23 }
 0x395   : > { %v3128_v9 = vsel %vm10050_vm12, %v3127_v61, %v3123_v17  ;;  %6058 = vpow2.f32 %v5364_v45  ;;  %v10091_v14 = vmul.f32 %v3083_v40, %v9625_v55  ;;  %vm3140_vm2 = vcmp.eq.f32.partialorder %v3139_v35, 8.507059e+37 }
 0x396   : > { %v10088_v39 = vpop.eup %6050  ;;  %v3156_v56 = vand.u32 2147483648, %v9953_v10  ;;  %v5365_v63 = vmul.f32 -1.442695, %v10064_v2  ;;  %v10096_v57 = vmul.f32 %v3098_v12, %v9636_v18  ;;  %v10099_v46 = vmul.f32 %v3113_v36, %v9667_v53 }
 0x397   : > { %13538 = vst [vmem:[#allocation41_spill] sm:$0xff] %v10091_v14  ;;  %v3143_v22 = vsel %vm3140_vm2, %v3142_v19, %v3138_v48  ;;  %v10102_v28 = vadd.f32 %v1561_v62, %v7150_v30  ;;  %v10107_v55 = vmul.f32 %v3128_v9, %v9681_v47  ;;  %v986_v38 = vsub.f32 1.5, %v985_v7  ;;  %v1386_v19 = vpop.f32.mrf.mxu0 }
 0x398   : > { %13539 = vst [vmem:[#allocation77_spill] sm:$0xff] %v10096_v57  ;;  %v10104_v59 = vpop.eup %6052  ;;  %vm988_vm3 = vweird.f32 %v9879_v43  ;;  %vm989_vm4 = vweird.f32 %v9943_v6  ;;  %v3147_v18 = vsub.f32 1.0, %v3146_v37  ;;  %v3161_v53 = vmul.f32 %v10088_v39, %v9992_v26 }
 0x399   : > { %13540 = vst [vmem:[#allocation78_spill] sm:$0xff] %v10099_v46  ;;  %v10111_v24 = vpop.eup %6054  ;;  %v3171_v40 = vand.u32 2147483648, %v9992_v26  ;;  %v994_v8 = vmul.f32 %v10039_v0, %v993_v20  ;;  %v10120_v47 = vmul.f32 %v3143_v22, %v9702_v42  ;;  %v3154_v17 = vand.u32 2147483647, %v9953_v10  ;;  %vm10143_vm11 = vmor %vm988_vm3, %vm989_vm4 }
 0x39a   : > { %13541 = vst [vmem:[#allocation79_spill] sm:$0xff] %v10107_v55  ;;  %v10117_v45 = vpop.eup %6056  ;;  %v10123_v35 = vor.u32 1.1754944e-38, %v3156_v56  ;;  %6060 = vpow2.f32 %v5365_v63  ;;  %vm3150_vm5 = vweird.f32 %v9953_v10  ;;  %v3169_v36 = vand.u32 2147483647, %v9992_v26 }
 0x39b   : > { %13542 = vst [vmem:[#allocation80_spill] sm:$0xff] %v10120_v47  ;;  %v6059_v12 = vpop.eup %6058  ;;  %v3176_v61 = vmul.f32 %v10104_v59, %v10025_v33  ;;  %v3186_v49 = vand.u32 2147483648, %v10025_v33  ;;  %v5366_v48 = vmul.f32 -1.442695, %v10102_v28  ;;  %v987_v42 = vmul.f32 %v9943_v6, %v986_v38 }
 0x39c   : > { %v3184_v7 = vand.u32 2147483647, %v10025_v33  ;;  %v3191_v62 = vmul.f32 %v10111_v24, %v10032_v50  ;;  %v10136_v9 = vadd.f32 %v1650_v1, %v7152_v25  ;;  %v3148_v37 = vmul.f32 %v10056_v52, %v3147_v18 }
 0x39d   : > { %v3162_v56 = vsub.f32 1.0, %v3161_v53  ;;  %v10147_v63 = vor.u32 1.1754944e-38, %v3171_v40  ;;  %v995_v22 = vmul.f32 0.5, %v994_v8  ;;  %vm998_vm7 = vweird.f32 %v9941_v23  ;;  %v1475_v8 = vpop.f32.mrf.mxu1 }
 0x39e   : > { %vm999_vm0 = vweird.f32 %v10039_v0  ;;  %v3206_v38 = vmul.f32 %v10117_v45, %v10037_v4  ;;  %v10153_v18 = vadd.f32 1.0, %v6059_v12  ;;  %v10156_v1 = vadd.f32 %v1386_v19, %v7140_v15 }
 0x39f   : > { %vm3151_vm1 = vweird.f32 %v10056_v52  ;;  %vm10159_vm6 = vcmp.eq.f32.partialorder %v3154_v17, 8.507059e+37  ;;  %vm3165_vm9 = vweird.f32 %v9992_v26  ;;  %v3177_v53 = vsub.f32 1.0, %v3176_v61  ;;  %v5607_v26 = vld [vmem:[#allocation10 + $0x88] sm:$0xff] }
 0x3a0   : > { %13545 = vst [vmem:[#allocation81_spill] sm:$0xff] %v10156_v1  ;;  %v10164_v40 = vor.u32 1.1754944e-38, %v3186_v49  ;;  %6062 = vpow2.f32 %v5366_v48  ;;  %v6061_v46 = vpop.eup %6060  ;;  %v991_v12 = vsel %vm10143_vm11, %v9943_v6, %v987_v42  ;;  %v3192_v19 = vsub.f32 1.0, %v3191_v62  ;;  %v13548_v42 = vld [vmem:[#allocation17_spill] sm:$0xff]  ;;  %vm10189_vm8 = vmor %vm3150_vm5, %vm3151_vm1 }
 0x3a1   : > { %v3199_v57 = vand.u32 2147483647, %v10032_v50  ;;  %v5367_v17 = vmul.f32 -1.442695, %v10136_v9  ;;  %v3149_v47 = vadd.f32 %v10056_v52, %v3148_v37  ;;  %v3163_v14 = vmul.f32 %v10088_v39, %v3162_v56  ;;  %v1564_v56 = vpop.f32.mrf.mxu2  ;;  %vm10250_vm1 = vmor %vm998_vm7, %vm999_vm0 }
 0x3a2   : > { %vm3180_vm10 = vweird.f32 %v10025_v33  ;;  %v996_v61 = vsub.f32 1.5, %v995_v22  ;;  %v3201_v49 = vand.u32 2147483648, %v10032_v50  ;;  %v3207_v48 = vsub.f32 1.0, %v3206_v38  ;;  %v627_v38 = vpop.xlane.xlu0 %626 }
 0x3a3   : > { %6064 = vrcp.f32 %v10153_v18  ;;  %v5368_v20 = vmul.f32 -1.442695, %v10156_v1  ;;  %v10178_v6 = vadd.f32 %v1475_v8, %v7142_v21  ;;  %v1041_v62 = vmul.f32 %v991_v12, %v13548_v42  ;;  %v5615_v1 = vld [vmem:[#allocation10 + $0xc8] sm:$0xff] }
 0x3a4   : > { %v3178_v55 = vmul.f32 %v10104_v59, %v3177_v53  ;;  %vm3195_vm14 = vweird.f32 %v10032_v50  ;;  %v10183_v37 = vadd.f32 1.0, %v6061_v46  ;;  %vm3166_vm12 = vweird.f32 %v10088_v39  ;;  %v1653_v53 = vpop.f32.mrf.mxu3 }
 0x3a5   : > { %vm10194_vm13 = vcmp.eq.f32.partialorder %v3169_v36, 8.507059e+37  ;;  %vm3181_vm15 = vweird.f32 %v10104_v59  ;;  %v3193_v46 = vmul.f32 %v10111_v24, %v3192_v19  ;;  %6066 = vpow2.f32 %v5367_v17  ;;  %vm10235_vm5 = vmor %vm3165_vm9, %vm3166_vm12 }
 0x3a6   : > { %v6063_v8 = vpop.eup %6062  ;;  %v3153_v10 = vsel %vm10189_vm8, %v10056_v52, %v3149_v47  ;;  %v3164_v12 = vadd.f32 %v10088_v39, %v3163_v14  ;;  %vm10204_vm2 = vcmp.eq.f32.partialorder %v3184_v7, 8.507059e+37  ;;  %v10209_v36 = vmul.f32 %v10039_v0, %v996_v61  ;;  %vm10262_vm9 = vmor %vm3180_vm10, %vm3181_vm15  ;;  %v5616_v61 = vld [vmem:[#allocation10 + $0xd0] sm:$0xff] }
 0x3a7   : > { %v3202_v54 = vor.u32 1.1754944e-38, %v3201_v49  ;;  %vm10211_vm3 = vcmp.eq.f32.partialorder %v3199_v57, 8.507059e+37  ;;  %v3208_v19 = vmul.f32 %v10117_v45, %v3207_v48  ;;  %6068 = vpow2.f32 %v5368_v20  ;;  %4844 = vmatpush.bf16.msrb.mxu3 %v5616_v61 }
 0x3a8   : > { %v5369_v17 = vmul.f32 -1.442695, %v10178_v6  ;;  %v10218_v52 = vadd.f32 %v1564_v56, %v7150_v30  ;;  %v3179_v14 = vadd.f32 %v10104_v59, %v3178_v55  ;;  %vm3210_vm4 = vweird.f32 %v10037_v4 }
 0x3a9   : > { %6070 = vrcp.f32 %v10183_v37  ;;  %v10224_v47 = vadd.f32 %v1653_v53, %v7152_v25  ;;  %v10226_v57 = vpop.eup %6064  ;;  %v3158_v7 = vsel %vm10159_vm6, %v10123_v35, %v3153_v10  ;;  %v3194_v55 = vadd.f32 %v10111_v24, %v3193_v46 }
 0x3aa   : > { %vm3196_vm11 = vweird.f32 %v10111_v24  ;;  %v10241_v49 = vadd.f32 1.0, %v6063_v8  ;;  %v3168_v48 = vsel %vm10235_vm5, %v10088_v39, %v3164_v12  ;;  %vm3211_vm6 = vweird.f32 %v10117_v45 }
 0x3ab   : > { %v1075_v35 = vmul.f32 %v9616_v44, %v10006_v51  ;;  %v1076_v43 = vmul.f32 %v9616_v44, %v1041_v62  ;;  %v6067_v20 = vpop.eup %6066  ;;  %v3209_v23 = vadd.f32 %v10117_v45, %v3208_v19  ;;  %v3216_v56 = vand.u32 2147483648, %v10037_v4  ;;  %vm10274_vm7 = vmor %vm3195_vm14, %vm3196_vm11  ;;  %4845 = vmatpush.bf16.msrb.mxu3 %v5615_v1  ;;  %v13577_v1 = vld [vmem:[#allocation20_spill] sm:$0xff] }
 0x3ac   : > { %6072 = vpow2.f32 %v5369_v17  ;;  %v5370_v22 = vmul.f32 -1.442695, %v10218_v52  ;;  %v3183_v44 = vsel %vm10262_vm9, %v10104_v59, %v3179_v14  ;;  %v3221_v33 = vmul.f32 %v10226_v57, %v10153_v18  ;;  %vm10293_vm0 = vmor %vm3210_vm4, %vm3211_vm6  ;;  %v5608_v17 = vld [vmem:[#allocation10 + $0x90] sm:$0xff] }
 0x3ad   : > { %v5371_v62 = vmul.f32 -1.442695, %v10224_v47  ;;  %v1111_v46 = vadd.f32 %v9659_v16, %v1076_v43  ;;  %v6069_v53 = vpop.eup %6068  ;;  %v1001_v8 = vsel %vm10250_vm1, %v10039_v0, %v10209_v36  ;;  %v3198_v50 = vsel %vm10274_vm7, %v10111_v24, %v3194_v55  ;;  %v5592_v14 = vld [vmem:[#allocation10 + $0x10] sm:$0xff]  ;;  %4755 = vmatpush.bf16.msrb.mxu2 %v5608_v17  ;;  %v5598_v17 = vld [vmem:[#allocation10 + $0x40] sm:$0xff] }
 0x3ae   : > { %v3214_v10 = vand.u32 2147483647, %v10037_v4  ;;  %6074 = vrcp.f32 %v10241_v49  ;;  %v10302_v0 = vmul.f32 %v3158_v7, %v9826_v32  ;;  %v3173_v24 = vsel %vm10194_vm13, %v10147_v63, %v3168_v48  ;;  %v5600_v55 = vld [vmem:[#allocation10 + $0x50] sm:$0xff]  ;;  %4577 = vmatpush.bf16.msrb.mxu0 %v5592_v14 }
 0x3af   : > { %v10299_v12 = vpop.eup %6070  ;;  %v10307_v36 = vadd.f32 1.0, %v6067_v20  ;;  %v1110_v19 = vadd.f32 %v9659_v16, %v1075_v35  ;;  %v3188_v4 = vsel %vm10204_vm2, %v10164_v40, %v3183_v44  ;;  %v3213_v32 = vsel %vm10293_vm0, %v10117_v45, %v3209_v23  ;;  %v5591_v35 = vld [vmem:[#allocation10 + $0x8] sm:$0xff]  ;;  %4666 = vmatpush.bf16.msrb.mxu1 %v5600_v55 }
 0x3b0   : > { %13567 = vst [vmem:[#allocation17_spill] sm:$0xff] %v10302_v0  ;;  %v3217_v7 = vor.u32 1.1754944e-38, %v3216_v56  ;;  %6076 = vpow2.f32 %v5370_v22  ;;  %v3203_v63 = vsel %vm10211_vm3, %v3202_v54, %v3198_v50  ;;  %v3222_v48 = vsub.f32 1.0, %v3221_v33  ;;  %v5599_v54 = vld [vmem:[#allocation10 + $0x48] sm:$0xff]  ;;  %v5590_v50 = vld [vmem:[#allocation10] sm:$0xff] }
 0x3b1   : > { %6078 = vpow2.f32 %v5371_v62  ;;  %v1128_v16 = vpack.c.bf16 %v1111_v46, %v1110_v19  ;;  %vm3215_vm10 = vcmp.eq.f32.partialorder %v3214_v10, 8.507059e+37  ;;  %v3231_v40 = vand.u32 2147483648, %v10153_v18  ;;  %v13568_v20 = vld [vmem:[#allocation49_spill] sm:$0xff]  ;;  %v1388_v46 = vpop.f32.mrf.mxu0  ;;  %4756 = vmatpush.bf16.msrb.mxu2 %v5607_v26  ;;  %v5614_v19 = vld [vmem:[#allocation10 + $0xc0] sm:$0xff] }
 0x3b2   : > { %v6073_v42 = vpop.eup %6072  ;;  %v3236_v45 = vmul.f32 %v10299_v12, %v10183_v37  ;;  %v10321_v43 = vadd.f32 1.0, %v6069_v53  ;;  %v10324_v39 = vmul.f32 %v1001_v8, %v13568_v20  ;;  %v3218_v23 = vsel %vm3215_vm10, %v3217_v7, %v3213_v32  ;;  %v1477_v8 = vpop.f32.mrf.mxu1  ;;  %4578 = vmatpush.bf16.msrb.mxu0 %v5591_v35  ;;  %4846 = vmatpush.bf16.msrb.mxu3 %v5614_v19 }
 0x3b3   : > { %6080 = vrcp.f32 %v10307_v36  ;;  %1410 = vmatmul.bf16.gmra.mxu0 %v1128_v16  ;;  %1499 = vmatmul.bf16.gmra.mxu1 %v1128_v16  ;;  %v659_v56 = vmul.f32 %v627_v38, %v6766_v13  ;;  %v10331_v44 = vmul.f32 %v3173_v24, %v9856_v5  ;;  %v10334_v51 = vmul.f32 %v3188_v4, %v9874_v60  ;;  %v5606_v60 = vld [vmem:[#allocation10 + $0x80] sm:$0xff] }
 0x3b4   : > { %v10328_v22 = vpop.eup %6074  ;;  %v10337_v33 = vmul.f32 %v3203_v63, %v9882_v41  ;;  %v3229_v62 = vand.u32 2147483647, %v10153_v18  ;;  %1588 = vmatmul.bf16.gmra.mxu2 %v1128_v16  ;;  %1677 = vmatmul.bf16.gmra.mxu3 %v1128_v16  ;;  %v3223_v53 = vmul.f32 %v10226_v57, %v3222_v48  ;;  %vm3225_vm14 = vweird.f32 %v10153_v18 }
 0x3b5   : > { %13569 = vst [vmem:[#allocation49_spill] sm:$0xff] %v10331_v44  ;;  %v10342_v13 = vadd.f32 1.0, %v6073_v42  ;;  %v10344_v5 = vadd.f32 1e-05, %v659_v56  ;;  %v10347_v59 = vmul.f32 %v3218_v23, %v9897_v34  ;;  %v10349_v10 = vor.u32 1.1754944e-38, %v3231_v40  ;;  %4667 = vmatpush.bf16.msrb.mxu1 %v5599_v54  ;;  %4757 = vmatpush.bf16.msrb.mxu2 %v5606_v60  ;;  %v13575_v42 = vld [vmem:[#allocation53_spill] sm:$0xff] }
 0x3b6   : > { %13570 = vst [vmem:[#allocation82_spill] sm:$0xff] %v10334_v51  ;;  %v6077_v41 = vpop.eup %6076  ;;  %v3237_v24 = vsub.f32 1.0, %v3236_v45  ;;  %6082 = vrcp.f32 %v10321_v43  ;;  %v3246_v61 = vand.u32 2147483648, %v10183_v37  ;;  %v3251_v4 = vmul.f32 %v10328_v22, %v10241_v49  ;;  %4579 = vmatpush.bf16.msrb.mxu0 %v5590_v50  ;;  %v13576_v40 = vld [vmem:[#allocation57_spill] sm:$0xff]  ;;  %v13578_v50 = vld [vmem:[#allocation54_spill] sm:$0xff] }
 0x3b7   : > { %13571 = vst [vmem:[#allocation83_spill] sm:$0xff] %v10337_v33  ;;  %v6079_v14 = vpop.eup %6078  ;;  %v10356_v32 = vadd.f32 %v1388_v46, %v7140_v15  ;;  %6084 = vrsqrt.f32 %v10344_v5  ;;  %vm10359_vm8 = vcmp.eq.f32.partialorder %v3229_v62, 8.507059e+37  ;;  %vm3240_vm12 = vweird.f32 %v10183_v37 }
 0x3b8   : > { %13572 = vst [vmem:[#allocation84_spill] sm:$0xff] %v10347_v59  ;;  %v3244_v7 = vand.u32 2147483647, %v10183_v37  ;;  %v3261_v55 = vand.u32 2147483648, %v10241_v49  ;;  %v10367_v38 = vadd.f32 %v1477_v8, %v7142_v21  ;;  %v3224_v48 = vadd.f32 %v10226_v57, %v3223_v53 }
 0x3b9   : > { %v10369_v63 = vpop.eup %6080  ;;  %vm3226_vm13 = vweird.f32 %v10226_v57  ;;  %6086 = vrcp.f32 %v10342_v13  ;;  %v10374_v16 = vadd.f32 1.0, %v6077_v41  ;;  %v3238_v26 = vmul.f32 %v10299_v12, %v3237_v24  ;;  %4668 = vmatpush.bf16.msrb.mxu1 %v5598_v17  ;;  %v1566_v41 = vpop.f32.mrf.mxu2 }
 0x3ba   : > { %v10377_v35 = vadd.f32 1.0, %v6079_v14  ;;  %v3247_v20 = vor.u32 1.1754944e-38, %v3246_v61  ;;  %v3252_v23 = vsub.f32 1.0, %v3251_v4  ;;  %v3259_v56 = vand.u32 2147483647, %v10241_v49  ;;  %vm10400_vm15 = vmor %vm3225_vm14, %vm3226_vm13  ;;  %v1655_v4 = vpop.f32.mrf.mxu3 }
 0x3bb   : > { %v5372_v62 = vmul.f32 -1.442695, %v10356_v32  ;;  %v10387_v53 = vor.u32 1.1754944e-38, %v3261_v55  ;;  %v3266_v8 = vmul.f32 %v10369_v63, %v10307_v36  ;;  %v5373_v60 = vmul.f32 -1.442695, %v10367_v38 }
 0x3bc   : > { %v10385_v46 = vpop.eup %6082  ;;  %vm3241_vm2 = vweird.f32 %v10299_v12  ;;  %vm10405_vm3 = vcmp.eq.f32.partialorder %v3244_v7, 8.507059e+37  ;;  %vm3255_vm4 = vweird.f32 %v10241_v49  ;;  %v3276_v14 = vand.u32 2147483648, %v10307_v36 }
 0x3bd   : > { %v10394_v24 = vpop.eup %6084  ;;  %6088 = vrcp.f32 %v10374_v16  ;;  %v3228_v18 = vsel %vm10400_vm15, %v10226_v57, %v3224_v48  ;;  %v3239_v55 = vadd.f32 %v10299_v12, %v3238_v26  ;;  %v3291_v7 = vand.u32 2147483648, %v10321_v43  ;;  %vm10436_vm5 = vmor %vm3240_vm12, %vm3241_vm2 }
 0x3be   : > { %6090 = vrcp.f32 %v10377_v35  ;;  %v3253_v45 = vmul.f32 %v10328_v22, %v3252_v23  ;;  %v3281_v44 = vmul.f32 %v10385_v46, %v10321_v43  ;;  %v1003_v19 = vmul.f32 %v10394_v24, %v10344_v5 }
 0x3bf   : > { %v10420_v54 = vpop.eup %6086  ;;  %6092 = vpow2.f32 %v5372_v62  ;;  %v3267_v57 = vsub.f32 1.0, %v3266_v8  ;;  %v3274_v48 = vand.u32 2147483647, %v10307_v36  ;;  %v3289_v26 = vand.u32 2147483647, %v10321_v43 }
 0x3c0   : > { %6094 = vpow2.f32 %v5373_v60  ;;  %v3233_v59 = vsel %vm10359_vm8, %v10349_v10, %v3228_v18  ;;  %v10440_v62 = vor.u32 1.1754944e-38, %v3276_v14  ;;  %v10443_v8 = vadd.f32 %v1566_v41, %v7150_v30 }
 0x3c1   : > { %v1004_v33 = vmul.f32 %v10394_v24, %v1003_v19  ;;  %v3243_v34 = vsel %vm10436_vm5, %v10299_v12, %v3239_v55  ;;  %vm3256_vm11 = vweird.f32 %v10328_v22  ;;  %vm10450_vm1 = vcmp.eq.f32.partialorder %v3259_v56, 8.507059e+37  ;;  %v1391_v55 = vpop.f32.mrf.mxu0 }
 0x3c2   : > { %vm3270_vm6 = vweird.f32 %v10307_v36  ;;  %v10455_v37 = vor.u32 1.1754944e-38, %v3291_v7  ;;  %v10458_v60 = vadd.f32 %v1655_v4, %v7152_v25  ;;  %v3254_v14 = vadd.f32 %v10328_v22, %v3253_v45  ;;  %vm10483_vm10 = vmor %vm3255_vm4, %vm3256_vm11 }
 0x3c3   : > { %v10460_v41 = vpop.eup %6088  ;;  %v3282_v18 = vsub.f32 1.0, %v3281_v44  ;;  %v3296_v12 = vmul.f32 %v10420_v54, %v10342_v13  ;;  %v1005_v56 = vmul.f32 0.5, %v1004_v33  ;;  %v10468_v23 = vmul.f32 %v3233_v59, %v10010_v3 }
 0x3c4   : > { %v10465_v19 = vpop.eup %6090  ;;  %v3268_v7 = vmul.f32 %v10369_v63, %v3267_v57  ;;  %vm3271_vm9 = vweird.f32 %v10369_v63  ;;  %vm3285_vm7 = vweird.f32 %v10321_v43  ;;  %vm3286_vm0 = vweird.f32 %v10385_v46  ;;  %v1658_v57 = vpop.f32.mrf.mxu3 }
 0x3c5   : > { %13588 = vst [vmem:[#allocation53_spill] sm:$0xff] %v10468_v23  ;;  %v6093_v51 = vpop.eup %6092  ;;  %v3306_v44 = vand.u32 2147483648, %v10342_v13  ;;  %v5374_v33 = vmul.f32 -1.442695, %v10443_v8  ;;  %v1006_v45 = vsub.f32 1.5, %v1005_v56  ;;  %v3248_v3 = vsel %vm10405_vm3, %v3247_v20, %v3243_v34  ;;  %vm10537_vm2 = vmor %vm3270_vm6, %vm3271_vm9 }
 0x3c6   : > { %v6095_v0 = vpop.eup %6094  ;;  %vm10487_vm14 = vcmp.eq.f32.partialorder %v3274_v48, 8.507059e+37  ;;  %v5375_v4 = vmul.f32 -1.442695, %v10458_v60  ;;  %v10493_v56 = vadd.f32 %v1391_v55, %v7140_v15  ;;  %vm1009_vm8 = vweird.f32 %v10394_v24  ;;  %v1480_v55 = vpop.f32.mrf.mxu1  ;;  %vm10562_vm5 = vmor %vm3285_vm7, %vm3286_vm0 }
 0x3c7   : > { %v3258_v20 = vsel %vm10483_vm10, %v10328_v22, %v3254_v14  ;;  %v3283_v49 = vmul.f32 %v10385_v46, %v3282_v18  ;;  %v3297_v17 = vsub.f32 1.0, %v3296_v12  ;;  %v1007_v34 = vmul.f32 %v10394_v24, %v1006_v45  ;;  %v13600_v45 = vld [vmem:[#allocation61_spill] sm:$0xff] }
 0x3c8   : > { %v3269_v48 = vadd.f32 %v10369_v63, %v3268_v7  ;;  %v3311_v23 = vmul.f32 %v10460_v41, %v10374_v16  ;;  %v10504_v11 = vadd.f32 1.0, %v6093_v51  ;;  %vm1008_vm12 = vweird.f32 %v10344_v5  ;;  %v6311_v51 = vld [vmem:[#allocation5] ss:$0 sm:$0xff] }
 0x3c9   : > { %vm10507_vm13 = vcmp.eq.f32.partialorder %v3289_v26, 8.507059e+37  ;;  %v10511_v22 = vor.u32 1.1754944e-38, %v3306_v44  ;;  %v3326_v14 = vmul.f32 %v10465_v19, %v10377_v35  ;;  %v10515_v18 = vadd.f32 1.0, %v6095_v0  ;;  %vm10519_vm15 = vmor %vm1008_vm12, %vm1009_vm8 }
 0x3ca   : > { %6096 = vpow2.f32 %v5374_v33  ;;  %v10524_v5 = vmul.f32 %v3248_v3, %v10064_v2  ;;  %v5376_v26 = vmul.f32 -1.442695, %v10493_v56  ;;  %v1011_v12 = vsel %vm10519_vm15, %v10394_v24, %v1007_v34  ;;  %v1569_v33 = vpop.f32.mrf.mxu2 }
 0x3cb   : > { %6098 = vpow2.f32 %v5375_v4  ;;  %v3263_v0 = vsel %vm10450_vm1, %v10387_v53, %v3258_v20  ;;  %v3284_v2 = vadd.f32 %v10385_v46, %v3283_v49  ;;  %v3321_v4 = vand.u32 2147483648, %v10374_v16 }
 0x3cc   : > { %13597 = vst [vmem:[#allocation57_spill] sm:$0xff] %v10524_v5  ;;  %v10544_v44 = vadd.f32 %v1480_v55, %v7142_v21  ;;  %v3273_v24 = vsel %vm10537_vm2, %v10369_v63, %v3269_v48  ;;  %v3298_v53 = vmul.f32 %v10420_v54, %v3297_v17  ;;  %v3312_v10 = vsub.f32 1.0, %v3311_v23 }
 0x3cd   : > { %6100 = vrcp.f32 %v10504_v11  ;;  %vm3300_vm3 = vweird.f32 %v10342_v13  ;;  %vm3301_vm4 = vweird.f32 %v10420_v54  ;;  %v3327_v36 = vsub.f32 1.0, %v3326_v14 }
 0x3ce   : > { %6102 = vrcp.f32 %v10515_v18  ;;  %v1043_v3 = vmul.f32 %v1011_v12, %v13600_v45  ;;  %v10556_v59 = vmul.f32 %v3263_v0, %v10102_v28  ;;  %vm3315_vm11 = vweird.f32 %v10374_v16  ;;  %v13605_v0 = vld [vmem:[#allocation63_spill] sm:$0xff]  ;;  %vm10633_vm10 = vmor %vm3300_vm3, %vm3301_vm4 }
 0x3cf   : > { %v3319_v23 = vand.u32 2147483647, %v10374_v16  ;;  %6104 = vpow2.f32 %v5376_v26  ;;  %v3278_v49 = vsel %vm10487_vm14, %v10440_v62, %v3273_v24  ;;  %v3288_v28 = vsel %vm10562_vm5, %v10385_v46, %v3284_v2 }
 0x3d0   : > { %13601 = vst [vmem:[#allocation20_spill] sm:$0xff] %v10556_v59  ;;  %v6097_v20 = vpop.eup %6096  ;;  %v10574_v17 = vor.u32 1.1754944e-38, %v3321_v4  ;;  %v5377_v43 = vmul.f32 -1.442695, %v10544_v44  ;;  %v10578_v48 = vadd.f32 %v10420_v54, %v3298_v53  ;;  %v3313_v55 = vmul.f32 %v10460_v41, %v3312_v10 }
 0x3d1   : > { %v6099_v34 = vpop.eup %6098  ;;  %vm3330_vm1 = vweird.f32 %v10377_v35  ;;  %v10583_v14 = vadd.f32 %v1569_v33, %v7150_v30  ;;  %v3328_v62 = vmul.f32 %v10465_v19, %v3327_v36  ;;  %v1077_v46 = vmul.f32 %v6311_v51, %v10324_v39  ;;  %v1393_v36 = vpop.f32.mrf.mxu0 }
 0x3d2   : > { %v1078_v26 = vmul.f32 %v6311_v51, %v1043_v3  ;;  %v10592_v4 = vmul.f32 %v3278_v49, %v10136_v9  ;;  %v3293_v24 = vsel %vm10507_vm13, %v10455_v37, %v3288_v28  ;;  %v3334_v53 = vand.u32 2147483647, %v10377_v35  ;;  %v1482_v9 = vpop.f32.mrf.mxu1 }
 0x3d3   : > { %v10589_v2 = vpop.eup %6100  ;;  %v10598_v10 = vadd.f32 1.0, %v6097_v20  ;;  %vm3316_vm6 = vweird.f32 %v10460_v41  ;;  %v3336_v39 = vand.u32 2147483648, %v10377_v35  ;;  %v10604_v45 = vadd.f32 1.0, %v6099_v34 }
 0x3d4   : > { %13606 = vst [vmem:[#allocation54_spill] sm:$0xff] %v10592_v4  ;;  %v10600_v33 = vpop.eup %6102  ;;  %6106 = vpow2.f32 %v5377_v43  ;;  %v13607_v63 = vand.u32 2147483647, %v10342_v13  ;;  %v3314_v37 = vadd.f32 %v10460_v41, %v3313_v55  ;;  %vm3331_vm7 = vweird.f32 %v10465_v19  ;;  %v6312_v55 = vld [vmem:[%s12999_s2] ss:$0 sm:$0xff]  ;;  %vm10649_vm14 = vmor %vm3315_vm11, %vm3316_vm6 }
 0x3d5   : > { %v6105_v3 = vpop.eup %6104  ;;  %v5378_v20 = vmul.f32 -1.442695, %v10583_v14  ;;  %v10616_v49 = vadd.f32 %v1658_v57, %v7152_v25  ;;  %vm10618_vm0 = vcmp.eq.f32.partialorder %v3319_v23, 8.507059e+37  ;;  %v3329_v43 = vadd.f32 %v10465_v19, %v3328_v62  ;;  %vm10666_vm8 = vmor %vm3330_vm1, %vm3331_vm7 }
 0x3d6   : > { %vm10608_vm9 = vcmp.eq.f32.partialorder %v13607_v63, 8.507059e+37  ;;  %v10624_v34 = vadd.f32 %v1393_v36, %v7140_v15  ;;  %v1112_v51 = vadd.f32 %v6312_v55, %v1077_v46  ;;  %v1113_v63 = vadd.f32 %v6312_v55, %v1078_v26 }
 0x3d7   : > { %v3341_v62 = vmul.f32 %v10589_v2, %v10504_v11  ;;  %6108 = vrcp.f32 %v10598_v10  ;;  %v10641_v57 = vadd.f32 %v1482_v9, %v7142_v21  ;;  %v3356_v26 = vmul.f32 %v10600_v33, %v10515_v18 }
 0x3d8   : > { %6110 = vrcp.f32 %v10604_v45  ;;  %v10656_v55 = vadd.f32 1.0, %v6105_v3  ;;  %v1129_v9 = vpack.c.bf16 %v1113_v63, %v1112_v51  ;;  %v3303_v46 = vsel %vm10633_vm10, %v10420_v54, %v10578_v48 }
 0x3d9   : > { %v5379_v4 = vmul.f32 -1.442695, %v10616_v49  ;;  %v3318_v54 = vsel %vm10649_vm14, %v10460_v41, %v3314_v37  ;;  %v3333_v35 = vsel %vm10666_vm8, %v10465_v19, %v3329_v43  ;;  %v5380_v48 = vmul.f32 -1.442695, %v10624_v34 }
 0x3da   : > { %v6107_v7 = vpop.eup %6106  ;;  %1415 = vmatmul.bf16.gmra.mxu0 %v1129_v9  ;;  %1504 = vmatmul.bf16.gmra.mxu1 %v1129_v9  ;;  %6112 = vpow2.f32 %v5378_v20  ;;  %v3342_v19 = vsub.f32 1.0, %v3341_v62  ;;  %v3357_v43 = vsub.f32 1.0, %v3356_v26  ;;  %v5381_v59 = vmul.f32 -1.442695, %v10641_v57  ;;  %v13630_v20 = vld [vmem:[#allocation81_spill] sm:$0xff]  ;;  %v1485_v13 = vpop.f32.mrf.mxu1 }
 0x3db   : > { %1593 = vmatmul.bf16.gmra.mxu2 %v1129_v9  ;;  %1682 = vmatmul.bf16.gmra.mxu3 %v1129_v9  ;;  %6114 = vrcp.f32 %v10656_v55  ;;  %v10695_v12 = vmul.f32 %v3293_v24, %v13630_v20  ;;  %v3337_v9 = vor.u32 1.1754944e-38, %v3336_v39  ;;  %v10697_v23 = vadd.f32 1.0, %v6107_v7 }
 0x3dc   : > { %6116 = vpow2.f32 %v5379_v4  ;;  %v3308_v62 = vsel %vm10608_vm9, %v10511_v22, %v3303_v46  ;;  %vm3335_vm12 = vcmp.eq.f32.partialorder %v3334_v53, 8.507059e+37  ;;  %v3351_v26 = vand.u32 2147483648, %v10504_v11 }
 0x3dd   : > { %v10692_v5 = vpop.eup %6108  ;;  %13631 = vst [vmem:[#allocation61_spill] sm:$0xff] %v10695_v12  ;;  %6118 = vpow2.f32 %v5380_v48  ;;  %v3323_v16 = vsel %vm10618_vm0, %v10574_v17, %v3318_v54  ;;  %v3338_v24 = vsel %vm3335_vm12, %v3337_v9, %v3333_v35  ;;  %v3349_v39 = vand.u32 2147483647, %v10504_v11 }
 0x3de   : > { %v10699_v3 = vpop.eup %6110  ;;  %v3364_v7 = vand.u32 2147483647, %v10515_v18  ;;  %v3343_v4 = vmul.f32 %v10589_v2, %v3342_v19  ;;  %v3358_v20 = vmul.f32 %v10600_v33, %v3357_v43  ;;  %v3371_v22 = vmul.f32 %v10692_v5, %v10598_v10 }
 0x3df   : > { %6120 = vpow2.f32 %v5381_v59  ;;  %v10715_v61 = vmul.f32 %v3308_v62, %v10178_v6  ;;  %v3366_v28 = vand.u32 2147483648, %v10515_v18  ;;  %v3386_v17 = vmul.f32 %v10699_v3, %v10604_v45 }
 0x3e0   : > { %v6113_v53 = vpop.eup %6112  ;;  %6122 = vrcp.f32 %v10697_v23  ;;  %v10724_v54 = vmul.f32 %v3323_v16, %v10218_v52  ;;  %vm3345_vm13 = vweird.f32 %v10504_v11  ;;  %v3352_v35 = vor.u32 1.1754944e-38, %v3351_v26  ;;  %v1571_v16 = vpop.f32.mrf.mxu2 }
 0x3e1   : > { %13632 = vst [vmem:[#allocation63_spill] sm:$0xff] %v10715_v61  ;;  %v10721_v46 = vpop.eup %6114  ;;  %vm3360_vm15 = vweird.f32 %v10515_v18  ;;  %v10729_v6 = vmul.f32 %v3338_v24, %v10224_v47  ;;  %vm3346_vm2 = vweird.f32 %v10589_v2  ;;  %vm10732_vm3 = vcmp.eq.f32.partialorder %v3349_v39, 8.507059e+37 }
 0x3e2   : > { %13633 = vst [vmem:[#allocation81_spill] sm:$0xff] %v10724_v54  ;;  %v6117_v59 = vpop.eup %6116  ;;  %vm3361_vm4 = vweird.f32 %v10600_v33  ;;  %v3381_v52 = vand.u32 2147483648, %v10598_v10  ;;  %v3344_v43 = vadd.f32 %v10589_v2, %v3343_v4  ;;  %v3359_v9 = vadd.f32 %v10600_v33, %v3358_v20  ;;  %vm10753_vm11 = vmor %vm3345_vm13, %vm3346_vm2 }
 0x3e3   : > { %13634 = vst [vmem:[#allocation85_spill] sm:$0xff] %v10729_v6  ;;  %v6119_v19 = vpop.eup %6118  ;;  %vm10740_vm5 = vcmp.eq.f32.partialorder %v3364_v7, 8.507059e+37  ;;  %v3372_v47 = vsub.f32 1.0, %v3371_v22  ;;  %v3396_v26 = vand.u32 2147483648, %v10604_v45  ;;  %v3367_v24 = vor.u32 1.1754944e-38, %v3366_v28  ;;  %v1660_v6 = vpop.f32.mrf.mxu3  ;;  %vm10770_vm6 = vmor %vm3360_vm15, %vm3361_vm4 }
 0x3e4   : > { %v3387_v39 = vsub.f32 1.0, %v3386_v17  ;;  %v3401_v41 = vmul.f32 %v10721_v46, %v10656_v55  ;;  %v10747_v12 = vadd.f32 1.0, %v6113_v53  ;;  %vm3375_vm1 = vweird.f32 %v10598_v10 }
 0x3e5   : > { %v6121_v54 = vpop.eup %6120  ;;  %v3379_v4 = vand.u32 2147483647, %v10598_v10  ;;  %v10759_v20 = vadd.f32 1.0, %v6117_v59  ;;  %v10762_v22 = vadd.f32 %v1571_v16, %v7150_v30  ;;  %v10774_v28 = vor.u32 1.1754944e-38, %v3381_v52  ;;  %v1396_v52 = vpop.f32.mrf.mxu0 }
 0x3e6   : > { %v10764_v53 = vpop.eup %6122  ;;  %vm3390_vm9 = vweird.f32 %v10604_v45  ;;  %v3394_v17 = vand.u32 2147483647, %v10604_v45  ;;  %v10778_v59 = vadd.f32 1.0, %v6119_v19  ;;  %v3348_v16 = vsel %vm10753_vm11, %v10589_v2, %v3344_v43 }
 0x3e7   : > { %v3363_v18 = vsel %vm10770_vm6, %v10600_v33, %v3359_v9  ;;  %v3373_v61 = vmul.f32 %v10692_v5, %v3372_v47  ;;  %v10787_v37 = vor.u32 1.1754944e-38, %v3396_v26  ;;  %v3388_v51 = vmul.f32 %v10699_v3, %v3387_v39  ;;  %v13643_v9 = vld [vmem:[#allocation29_spill] sm:$0xff]  ;;  %v13644_v47 = vld [vmem:[#allocation28_spill] sm:$0xff]  ;;  %v13647_v39 = vld [vmem:[#allocation30_spill] sm:$0xff] }
 0x3e8   : > { %v3402_v36 = vsub.f32 1.0, %v3401_v41  ;;  %6124 = vrcp.f32 %v10747_v12  ;;  %v10791_v19 = vadd.f32 1.0, %v6121_v54  ;;  %v3416_v2 = vmul.f32 %v10764_v53, %v10697_v23  ;;  %v13646_v41 = vld [vmem:[#allocation33_spill] sm:$0xff] }
 0x3e9   : > { %6126 = vrcp.f32 %v10759_v20  ;;  %v5382_v33 = vmul.f32 -1.442695, %v10762_v22  ;;  %v10798_v43 = vadd.f32 %v1660_v6, %v7152_v25  ;;  %v13645_v26 = vpack.c.bf16 %v13643_v9, %v13644_v47  ;;  %v13650_v6 = vld [vmem:[#allocation31_spill] sm:$0xff]  ;;  %v13653_v9 = vld [vmem:[#allocation32_spill] sm:$0xff] }
 0x3ea   : > { %v13648_v7 = vpack.c.bf16 %v13646_v41, %v13647_v39  ;;  %vm3376_vm7 = vweird.f32 %v10692_v5  ;;  %v3409_v54 = vand.u32 2147483647, %v10656_v55  ;;  %6128 = vrcp.f32 %v10778_v59 }
 0x3eb   : > { %4580 = vmatmul.bf16.vlgmr.msrb.gmra.mxu0 %v13645_v26  ;;  %v10810_v11 = vadd.f32 %v1396_v52, %v7140_v15  ;;  %v13651_v63 = vpack.c.bf16 %v13649_v58, %v13650_v6  ;;  %v13654_v47 = vpack.c.bf16 %v13652_v31, %v13653_v9  ;;  %v3353_v26 = vsel %vm10732_vm3, %v3352_v35, %v3348_v16  ;;  %vm10850_vm12 = vmor %vm3375_vm1, %vm3376_vm7 }
 0x3ec   : > { %4669 = vmatmul.bf16.vlgmr.msrb.gmra.mxu1 %v13648_v7  ;;  %vm10820_vm0 = vcmp.eq.f32.partialorder %v3379_v4, 8.507059e+37  ;;  %vm3391_vm10 = vweird.f32 %v10699_v3  ;;  %vm10825_vm14 = vcmp.eq.f32.partialorder %v3394_v17, 8.507059e+37  ;;  %vm3405_vm8 = vweird.f32 %v10656_v55  ;;  %v1663_v17 = vpop.f32.mrf.mxu3 }
 0x3ed   : > { %4758 = vmatmul.bf16.vlgmr.msrb.gmra.mxu2 %v13651_v63  ;;  %4847 = vmatmul.bf16.vlgmr.msrb.gmra.mxu3 %v13654_v47  ;;  %v3411_v58 = vand.u32 2147483648, %v10656_v55  ;;  %v10832_v31 = vadd.f32 %v1485_v13, %v7142_v21  ;;  %v1574_v63 = vpop.f32.mrf.mxu2  ;;  %v3368_v35 = vsel %vm10740_vm5, %v3367_v24, %v3363_v18  ;;  %v3374_v48 = vadd.f32 %v10692_v5, %v3373_v61  ;;  %vm10865_vm13 = vmor %vm3390_vm9, %vm3391_vm10 }
 0x3ee   : > { %v3389_v4 = vadd.f32 %v10699_v3, %v3388_v51  ;;  %6130 = vrcp.f32 %v10791_v19  ;;  %v3403_v16 = vmul.f32 %v10721_v46, %v3402_v36  ;;  %v3417_v39 = vsub.f32 1.0, %v3416_v2  ;;  %v10841_v6 = vpop.eup %6124 }
 0x3ef   : > { %6132 = vpow2.f32 %v5382_v33  ;;  %v5383_v7 = vmul.f32 -1.442695, %v10798_v43  ;;  %v10844_v13 = vmul.f32 %v3353_v26, %v10356_v32  ;;  %v3426_v61 = vand.u32 2147483648, %v10697_v23  ;;  %v10859_v24 = vpop.eup %6126 }
 0x3f0   : > { %v5384_v36 = vmul.f32 -1.442695, %v10810_v11  ;;  %v10857_v62 = vadd.f32 %v1574_v63, %v7150_v30  ;;  %vm10869_vm15 = vcmp.eq.f32.partialorder %v3409_v54, 8.507059e+37  ;;  %v3412_v18 = vor.u32 1.1754944e-38, %v3411_v58  ;;  %v10879_v47 = vpop.eup %6128 }
 0x3f1   : > { %13659 = vst [vmem:[#allocation29_spill] sm:$0xff] %v10844_v13  ;;  %vm3420_vm2 = vweird.f32 %v10697_v23  ;;  %v3424_v2 = vand.u32 2147483647, %v10697_v23  ;;  %v5385_v33 = vmul.f32 -1.442695, %v10832_v31  ;;  %v10877_v9 = vadd.f32 %v1663_v17, %v7152_v25  ;;  %v13675_v23 = vld [vmem:[#allocation40_spill] sm:$0xff] }
 0x3f2   : > { %v10882_v45 = vmul.f32 %v3368_v35, %v10367_v38  ;;  %v3378_v54 = vsel %vm10850_vm12, %v10692_v5, %v3374_v48  ;;  %v3393_v26 = vsel %vm10865_vm13, %v10699_v3, %v3389_v4  ;;  %vm3406_vm3 = vweird.f32 %v10721_v46  ;;  %v13684_v13 = vld [vmem:[#allocation44_spill] sm:$0xff] }
 0x3f3   : > { %v3404_v58 = vadd.f32 %v10721_v46, %v3403_v16  ;;  %v3418_v63 = vmul.f32 %v10764_v53, %v3417_v39  ;;  %v3431_v17 = vmul.f32 %v10841_v6, %v10747_v12  ;;  %6134 = vpow2.f32 %v5383_v7  ;;  %vm10918_vm5 = vmor %vm3405_vm8, %vm3406_vm3 }
 0x3f4   : > { %13666 = vst [vmem:[#allocation28_spill] sm:$0xff] %v10882_v45  ;;  %v10895_v38 = vpop.eup %6130  ;;  %v3427_v35 = vor.u32 1.1754944e-38, %v3426_v61  ;;  %v3446_v5 = vmul.f32 %v10859_v24, %v10759_v20  ;;  %6136 = vpow2.f32 %v5384_v36  ;;  %v5386_v48 = vmul.f32 -1.442695, %v10857_v62 }
 0x3f5   : > { %v6133_v3 = vpop.eup %6132  ;;  %vm10900_vm4 = vcmp.eq.f32.partialorder %v3424_v2, 8.507059e+37  ;;  %v3441_v16 = vand.u32 2147483648, %v10747_v12  ;;  %v3461_v39 = vmul.f32 %v10879_v47, %v10778_v59  ;;  %6138 = vpow2.f32 %v5385_v33 }
 0x3f6   : > { %v5387_v7 = vmul.f32 -1.442695, %v10877_v9  ;;  %v3383_v51 = vsel %vm10820_vm0, %v10774_v28, %v3378_v54  ;;  %v3398_v61 = vsel %vm10825_vm14, %v10787_v37, %v3393_v26  ;;  %vm3421_vm11 = vweird.f32 %v10764_v53 }
 0x3f7   : > { %v3439_v32 = vand.u32 2147483647, %v10747_v12  ;;  %v3408_v28 = vsel %vm10918_vm5, %v10721_v46, %v3404_v58  ;;  %v3419_v41 = vadd.f32 %v10764_v53, %v3418_v63  ;;  %v3432_v52 = vsub.f32 1.0, %v3431_v17  ;;  %vm10948_vm6 = vmor %vm3420_vm2, %vm3421_vm11 }
 0x3f8   : > { %v3456_v37 = vand.u32 2147483648, %v10759_v20  ;;  %v3447_v2 = vsub.f32 1.0, %v3446_v5  ;;  %v3476_v55 = vmul.f32 %v10895_v38, %v10791_v19  ;;  %v10931_v33 = vadd.f32 1.0, %v6133_v3  ;;  %v13676_v3 = vld [vmem:[#allocation25_spill] sm:$0xff] }
 0x3f9   : > { %6140 = vpow2.f32 %v5386_v48  ;;  %v6135_v54 = vpop.eup %6134  ;;  %v10934_v26 = vmul.f32 %v3383_v51, %v10443_v8  ;;  %vm3435_vm1 = vweird.f32 %v10747_v12  ;;  %v10937_v36 = vor.u32 1.1754944e-38, %v3441_v16  ;;  %v13682_v8 = vld [vmem:[#allocation27_spill] sm:$0xff] }
 0x3fa   : > { %v3462_v46 = vsub.f32 1.0, %v3461_v39  ;;  %6142 = vpow2.f32 %v5387_v7  ;;  %v6137_v58 = vpop.eup %6136  ;;  %v10940_v63 = vmul.f32 %v3398_v61, %v10458_v60  ;;  %v3413_v17 = vsel %vm10869_vm15, %v3412_v18, %v3408_v28  ;;  %v13678_v39 = vld [vmem:[#allocation42_spill] sm:$0xff] }
 0x3fb   : > { %13671 = vst [vmem:[#allocation33_spill] sm:$0xff] %v10934_v26  ;;  %vm3450_vm9 = vweird.f32 %v10759_v20  ;;  %v3454_v5 = vand.u32 2147483647, %v10759_v20  ;;  %v6139_v48 = vpop.eup %6138  ;;  %v3423_v60 = vsel %vm10948_vm6, %v10764_v53, %v3419_v41  ;;  %v3433_v10 = vmul.f32 %v10841_v6, %v3432_v52  ;;  %v13679_v7 = vld [vmem:[#allocation26_spill] sm:$0xff]  ;;  %v1398_v41 = vpop.f32.mrf.mxu0  ;;  %v13681_v52 = vld [vmem:[#allocation43_spill] sm:$0xff] }
 0x3fc   : > { %13672 = vst [vmem:[#allocation30_spill] sm:$0xff] %v10940_v63  ;;  %vm3436_vm7 = vweird.f32 %v10841_v6  ;;  %v10959_v18 = vor.u32 1.1754944e-38, %v3456_v37  ;;  %v13677_v16 = vpack.c.bf16 %v13675_v23, %v13676_v3  ;;  %v13680_v51 = vpack.c.bf16 %v13678_v39, %v13679_v7  ;;  %v13685_v63 = vld [vmem:[#allocation39_spill] sm:$0xff] }
 0x3fd   : > { %v3448_v61 = vmul.f32 %v10859_v24, %v3447_v2  ;;  %v3477_v28 = vsub.f32 1.0, %v3476_v55  ;;  %6144 = vrcp.f32 %v10931_v33  ;;  %v10969_v53 = vadd.f32 1.0, %v6135_v54  ;;  %v1487_v55 = vpop.f32.mrf.mxu1  ;;  %vm11026_vm13 = vmor %vm3435_vm1, %vm3436_vm7 }
 0x3fe   : > { %4585 = vmatmul.bf16.gmra.mxu0 %v13677_v16  ;;  %4674 = vmatmul.bf16.gmra.mxu1 %v13680_v51  ;;  %v13683_v37 = vpack.c.bf16 %v13681_v52, %v13682_v8  ;;  %v13686_v23 = vpack.c.bf16 %v13684_v13, %v13685_v63  ;;  %v10978_v3 = vmul.f32 %v3413_v17, %v10493_v56  ;;  %vm3465_vm0 = vweird.f32 %v10778_v59 }
 0x3ff   : > { %v3463_v16 = vmul.f32 %v10879_v47, %v3462_v46  ;;  %v10982_v2 = vadd.f32 1.0, %v6137_v58  ;;  %v6141_v54 = vpop.eup %6140  ;;  %v3428_v39 = vsel %vm10900_vm4, %v3427_v35, %v3423_v60  ;;  %vm10986_vm10 = vcmp.eq.f32.partialorder %v3439_v32, 8.507059e+37  ;;  %v1576_v58 = vpop.f32.mrf.mxu2 }
 0x400   : > { %4763 = vmatmul.bf16.gmra.mxu2 %v13683_v37  ;;  %4852 = vmatmul.bf16.gmra.mxu3 %v13686_v23  ;;  %13687 = vst [vmem:[#allocation35_spill] sm:$0xff] %v10978_v3  ;;  %vm3451_vm14 = vweird.f32 %v10859_v24  ;;  %vm10991_vm8 = vcmp.eq.f32.partialorder %v3454_v5, 8.507059e+37  ;;  %v3469_v13 = vand.u32 2147483647, %v10778_v59  ;;  %v10996_v46 = vadd.f32 1.0, %v6139_v48  ;;  %v6143_v63 = vpop.eup %6142  ;;  %v1665_v32 = vpop.f32.mrf.mxu3 }
 0x401   : > { %v3434_v17 = vadd.f32 %v10841_v6, %v3433_v10  ;;  %vm3466_vm12 = vweird.f32 %v10879_v47  ;;  %v3471_v35 = vand.u32 2147483648, %v10778_v59  ;;  %v11002_v4 = vadd.f32 %v1398_v41, %v7140_v15  ;;  %vm11043_vm15 = vmor %vm3450_vm9, %vm3451_vm14 }
 0x402   : > { %v3449_v5 = vadd.f32 %v10859_v24, %v3448_v61  ;;  %v3478_v60 = vmul.f32 %v10895_v38, %v3477_v28  ;;  %6146 = vrcp.f32 %v10969_v53  ;;  %v11008_v48 = vadd.f32 %v1487_v55, %v7142_v21  ;;  %vm11056_vm2 = vmor %vm3465_vm0, %vm3466_vm12 }
 0x403   : > { %v3464_v51 = vadd.f32 %v10879_v47, %v3463_v16  ;;  %6148 = vrcp.f32 %v10982_v2  ;;  %v11012_v10 = vadd.f32 1.0, %v6141_v54  ;;  %v11015_v52 = vadd.f32 %v1576_v58, %v7150_v30  ;;  %v11017_v41 = vpop.eup %6144 }
 0x404   : > { %v11020_v61 = vmul.f32 %v3428_v39, %v10544_v44  ;;  %6150 = vrcp.f32 %v10996_v46  ;;  %v11031_v8 = vadd.f32 1.0, %v6143_v63  ;;  %v11034_v37 = vadd.f32 %v1665_v32, %v7152_v25 }
 0x405   : > { %v3438_v44 = vsel %vm11026_vm13, %v10841_v6, %v3434_v17  ;;  %v3472_v23 = vor.u32 1.1754944e-38, %v3471_v35  ;;  %v3486_v16 = vand.u32 2147483648, %v10791_v19  ;;  %v5388_v55 = vmul.f32 -1.442695, %v11002_v4  ;;  %v13705_v6 = vld [vmem:[#allocation45_spill] sm:$0xff] }
 0x406   : > { %13692 = vst [vmem:[#allocation31_spill] sm:$0xff] %v11020_v61  ;;  %v3453_v54 = vsel %vm11043_vm15, %v10859_v24, %v3449_v5  ;;  %v3479_v20 = vadd.f32 %v10895_v38, %v3478_v60  ;;  %vm3481_vm3 = vweird.f32 %v10895_v38  ;;  %v5389_v39 = vmul.f32 -1.442695, %v11008_v48  ;;  %v13715_v60 = vld [vmem:[#allocation48_spill] sm:$0xff] }
 0x407   : > { %13695 = vst [vmem:[#allocation37_spill] sm:$0xff] %v11034_v37  ;;  %v3468_v58 = vsel %vm11056_vm2, %v10879_v47, %v3464_v51  ;;  %v3491_v24 = vmul.f32 %v11017_v41, %v10931_v33  ;;  %6152 = vrcp.f32 %v11012_v10  ;;  %v5390_v59 = vmul.f32 -1.442695, %v11015_v52 }
 0x408   : > { %v11070_v63 = vpop.eup %6146  ;;  %vm3480_vm4 = vweird.f32 %v10791_v19  ;;  %v3484_v17 = vand.u32 2147483647, %v10791_v19  ;;  %6154 = vrcp.f32 %v11031_v8  ;;  %v5391_v35 = vmul.f32 -1.442695, %v11034_v37  ;;  %v1490_v37 = vpop.f32.mrf.mxu1 }
 0x409   : > { %v11076_v32 = vpop.eup %6148  ;;  %v3443_v47 = vsel %vm10986_vm10, %v10937_v36, %v3438_v44  ;;  %v3458_v5 = vsel %vm10991_vm8, %v10959_v18, %v3453_v54  ;;  %vm3470_vm5 = vcmp.eq.f32.partialorder %v3469_v13, 8.507059e+37  ;;  %vm11086_vm11 = vmor %vm3480_vm4, %vm3481_vm3  ;;  %6156 = vpow2.f32 %v5388_v55  ;;  %v13704_v54 = vld [vmem:[#allocation19_spill] sm:$0xff] }
 0x40a   : > { %v11090_v19 = vpop.eup %6150  ;;  %v3473_v51 = vsel %vm3470_vm5, %v3472_v23, %v3468_v58  ;;  %v3483_v7 = vsel %vm11086_vm11, %v10895_v38, %v3479_v20  ;;  %v3487_v36 = vor.u32 1.1754944e-38, %v3486_v16  ;;  %6158 = vpow2.f32 %v5389_v39  ;;  %v13707_v20 = vld [vmem:[#allocation18_spill] sm:$0xff] }
 0x40b   : > { %v3492_v28 = vsub.f32 1.0, %v3491_v24  ;;  %v3501_v18 = vand.u32 2147483648, %v10931_v33  ;;  %v3506_v56 = vmul.f32 %v11070_v63, %v10969_v53  ;;  %6160 = vpow2.f32 %v5390_v59  ;;  %v13708_v39 = vld [vmem:[#allocation46_spill] sm:$0xff] }
 0x40c   : > { %v11099_v13 = vmul.f32 %v3443_v47, %v10583_v14  ;;  %vm3485_vm1 = vcmp.eq.f32.partialorder %v3484_v17, 8.507059e+37  ;;  %v3521_v44 = vmul.f32 %v11076_v32, %v10982_v2  ;;  %6162 = vpow2.f32 %v5391_v35  ;;  %v13711_v17 = vld [vmem:[#allocation50_spill] sm:$0xff]  ;;  %v13712_v35 = vld [vmem:[#allocation47_spill] sm:$0xff] }
 0x40d   : > { %v11103_v12 = vpop.eup %6152  ;;  %v11106_v38 = vmul.f32 %v3458_v5, %v10616_v49  ;;  %v3488_v23 = vsel %vm3485_vm1, %v3487_v36, %v3483_v7  ;;  %v3516_v16 = vand.u32 2147483648, %v10969_v53  ;;  %v3536_v55 = vmul.f32 %v11090_v19, %v10996_v46  ;;  %v13714_v5 = vld [vmem:[#allocation51_spill] sm:$0xff]  ;;  %v13717_v36 = vld [vmem:[#allocation52_spill] sm:$0xff] }
 0x40e   : > { %13702 = vst [vmem:[#allocation32_spill] sm:$0xff] %v11099_v13  ;;  %v13706_v14 = vpack.c.bf16 %v13704_v54, %v13705_v6  ;;  %v13709_v58 = vpack.c.bf16 %v13707_v20, %v13708_v39  ;;  %v11117_v24 = vpop.eup %6154  ;;  %v11120_v59 = vmul.f32 %v3473_v51, %v10624_v34  ;;  %vm3495_vm6 = vweird.f32 %v10931_v33  ;;  %v13718_v54 = vld [vmem:[#allocation21_spill] sm:$0xff]  ;;  %v13719_v39 = vld [vmem:[#allocation58_spill] sm:$0xff] }
 0x40f   : > { %13703 = vst [vmem:[#allocation40_spill] sm:$0xff] %v11106_v38  ;;  %v3499_v49 = vand.u32 2147483647, %v10931_v33  ;;  %v13713_v47 = vpack.c.bf16 %v13711_v17, %v13712_v35  ;;  %v13716_v7 = vpack.c.bf16 %v13714_v5, %v13715_v60  ;;  %v3493_v20 = vmul.f32 %v11017_v41, %v3492_v28  ;;  %v1401_v60 = vpop.f32.mrf.mxu0 }
 0x410   : > { %4590 = vmatmul.bf16.gmra.mxu0 %v13706_v14  ;;  %4679 = vmatmul.bf16.gmra.mxu1 %v13709_v58  ;;  %13710 = vst [vmem:[#allocation25_spill] sm:$0xff] %v11120_v59  ;;  %v6157_v14 = vpop.eup %6156  ;;  %v3502_v34 = vor.u32 1.1754944e-38, %v3501_v18  ;;  %v3507_v51 = vsub.f32 1.0, %v3506_v56  ;;  %v13720_v58 = vld [vmem:[#allocation62_spill] sm:$0xff]  ;;  %v11136_v38 = vmul.f32 %v3488_v23, %v10641_v57  ;;  %v3514_v17 = vand.u32 2147483647, %v10969_v53 }
 0x411   : > { %4768 = vmatmul.bf16.gmra.mxu2 %v13713_v47  ;;  %4857 = vmatmul.bf16.gmra.mxu3 %v13716_v7  ;;  %v6159_v3 = vpop.eup %6158  ;;  %v3522_v35 = vsub.f32 1.0, %v3521_v44  ;;  %v3551_v47 = vmul.f32 %v11103_v12, %v11012_v10  ;;  %vm3496_vm9 = vweird.f32 %v11017_v41  ;;  %vm3510_vm7 = vweird.f32 %v10969_v53 }
 0x412   : > { %13721 = vst [vmem:[#allocation42_spill] sm:$0xff] %v11136_v38  ;;  %v6161_v5 = vpop.eup %6160  ;;  %v11143_v28 = vor.u32 1.1754944e-38, %v3516_v16  ;;  %v3537_v18 = vsub.f32 1.0, %v3536_v55  ;;  %v3566_v56 = vmul.f32 %v11117_v24, %v11031_v8  ;;  %vm11147_vm0 = vcmp.eq.f32.partialorder %v3499_v49, 8.507059e+37  ;;  %vm11177_vm12 = vmor %vm3495_vm6, %vm3496_vm9 }
 0x413   : > { %v6163_v57 = vpop.eup %6162  ;;  %vm3525_vm10 = vweird.f32 %v10982_v2  ;;  %v3529_v44 = vand.u32 2147483647, %v10982_v2  ;;  %v3531_v7 = vand.u32 2147483648, %v10982_v2  ;;  %v3544_v59 = vand.u32 2147483647, %v10996_v46 }
 0x414   : > { %v11155_v16 = vadd.f32 1.0, %v6157_v14  ;;  %v3494_v55 = vadd.f32 %v11017_v41, %v3493_v20  ;;  %v3508_v6 = vmul.f32 %v11070_v63, %v3507_v51  ;;  %vm3540_vm14 = vweird.f32 %v10996_v46 }
 0x415   : > { %v3546_v49 = vand.u32 2147483648, %v10996_v46  ;;  %v11161_v13 = vadd.f32 1.0, %v6159_v3  ;;  %v3523_v38 = vmul.f32 %v11076_v32, %v3522_v35  ;;  %v3552_v61 = vsub.f32 1.0, %v3551_v47 }
 0x416   : > { %v11164_v26 = vadd.f32 1.0, %v6161_v5  ;;  %v11167_v45 = vadd.f32 %v1401_v60, %v7140_v15  ;;  %vm3511_vm8 = vweird.f32 %v11070_v63  ;;  %v3538_v14 = vmul.f32 %v11090_v19, %v3537_v18 }
 0x417   : > { %v3567_v20 = vsub.f32 1.0, %v3566_v56  ;;  %v11171_v51 = vadd.f32 1.0, %v6163_v57  ;;  %vm3526_vm13 = vweird.f32 %v11076_v32  ;;  %v3532_v35 = vor.u32 1.1754944e-38, %v3531_v7  ;;  %vm11212_vm4 = vmor %vm3510_vm7, %vm3511_vm8 }
 0x418   : > { %v3559_v47 = vand.u32 2147483647, %v11012_v10  ;;  %6164 = vrcp.f32 %v11155_v16  ;;  %v3498_v5 = vsel %vm11177_vm12, %v11017_v41, %v3494_v55  ;;  %v3509_v18 = vadd.f32 %v11070_v63, %v3508_v6  ;;  %v1579_v6 = vpop.f32.mrf.mxu2  ;;  %vm11231_vm1 = vmor %vm3525_vm10, %vm3526_vm13 }
 0x419   : > { %vm11188_vm15 = vcmp.eq.f32.partialorder %v3514_v17, 8.507059e+37  ;;  %vm11192_vm2 = vcmp.eq.f32.partialorder %v3529_v44, 8.507059e+37  ;;  %vm3541_vm3 = vweird.f32 %v11090_v19  ;;  %6166 = vrcp.f32 %v11161_v13 }
 0x41a   : > { %v3524_v60 = vadd.f32 %v11076_v32, %v3523_v38  ;;  %v3553_v57 = vmul.f32 %v11103_v12, %v3552_v61  ;;  %6168 = vrcp.f32 %v11164_v26  ;;  %v5392_v41 = vmul.f32 -1.442695, %v11167_v45  ;;  %vm11251_vm9 = vmor %vm3540_vm14, %vm3541_vm3 }
 0x41b   : > { %v3539_v17 = vadd.f32 %v11090_v19, %v3538_v14  ;;  %v3568_v44 = vmul.f32 %v11117_v24, %v3567_v20  ;;  %6170 = vrcp.f32 %v11171_v51  ;;  %v11206_v7 = vadd.f32 %v1490_v37, %v7142_v21 }
 0x41c   : > { %vm11216_vm5 = vcmp.eq.f32.partialorder %v3544_v59, 8.507059e+37  ;;  %v3547_v55 = vor.u32 1.1754944e-38, %v3546_v49  ;;  %vm3555_vm11 = vweird.f32 %v11012_v10  ;;  %v3561_v14 = vand.u32 2147483648, %v11012_v10  ;;  %v13751_v49 = vld [vmem:[#allocation55_spill] sm:$0xff] }
 0x41d   : > { %v3503_v37 = vsel %vm11147_vm0, %v3502_v34, %v3498_v5  ;;  %v3513_v53 = vsel %vm11212_vm4, %v11070_v63, %v3509_v18  ;;  %vm11235_vm6 = vcmp.eq.f32.partialorder %v3559_v47, 8.507059e+37  ;;  %v11240_v20 = vadd.f32 %v1579_v6, %v7150_v30  ;;  %v1668_v34 = vpop.f32.mrf.mxu3  ;;  %v1403_v47 = vpop.f32.mrf.mxu0 }
 0x41e   : > { %v11242_v23 = vpop.eup %6164  ;;  %v3528_v63 = vsel %vm11231_vm1, %v11076_v32, %v3524_v60  ;;  %v3554_v3 = vadd.f32 %v11103_v12, %v3553_v57  ;;  %vm3556_vm7 = vweird.f32 %v11103_v12  ;;  %6172 = vpow2.f32 %v5392_v41 }
 0x41f   : > { %v11257_v5 = vpop.eup %6166  ;;  %v3543_v32 = vsel %vm11251_vm9, %v11090_v19, %v3539_v17  ;;  %v3569_v18 = vadd.f32 %v11117_v24, %v3568_v44  ;;  %vm3571_vm0 = vweird.f32 %v11117_v24  ;;  %v5393_v46 = vmul.f32 -1.442695, %v11206_v7  ;;  %vm11292_vm14 = vmor %vm3555_vm11, %vm3556_vm7 }
 0x420   : > { %v13740_v60 = vpack.c.bf16 %v13718_v54, %v13717_v36  ;;  %v13741_v57 = vpack.c.bf16 %v13576_v40, %v13575_v42  ;;  %v11271_v41 = vpop.eup %6168  ;;  %v11274_v6 = vmul.f32 %v3503_v37, %v10762_v22  ;;  %v3562_v19 = vor.u32 1.1754944e-38, %v3561_v14 }
 0x421   : > { %vm3570_vm10 = vweird.f32 %v11031_v8  ;;  %v11278_v17 = vadd.f32 %v1668_v34, %v7152_v25  ;;  %v13742_v44 = vpack.c.bf16 %v8804_v27, %v13577_v1  ;;  %v13743_v36 = vpack.c.bf16 %v8807_v29, %v13578_v50  ;;  %v11286_v42 = vpop.eup %6170  ;;  %v1492_v29 = vpop.f32.mrf.mxu1 }
 0x422   : > { %4595 = vmatmul.bf16.gmra.mxu0 %v13740_v60  ;;  %4684 = vmatmul.bf16.gmra.mxu1 %v13741_v57  ;;  %v3574_v22 = vand.u32 2147483647, %v11031_v8  ;;  %v3576_v54 = vand.u32 2147483648, %v11031_v8  ;;  %v5394_v27 = vmul.f32 -1.442695, %v11240_v20  ;;  %v11300_v1 = vadd.f32 %v1403_v47, %v7140_v15  ;;  %vm11316_vm8 = vmor %vm3570_vm10, %vm3571_vm0 }
 0x423   : > { %4773 = vmatmul.bf16.gmra.mxu2 %v13742_v44  ;;  %4862 = vmatmul.bf16.gmra.mxu3 %v13743_v36  ;;  %v3518_v50 = vsel %vm11188_vm15, %v11143_v28, %v3513_v53  ;;  %v3533_v10 = vsel %vm11192_vm2, %v3532_v35, %v3528_v63  ;;  %v3548_v61 = vsel %vm11216_vm5, %v3547_v55, %v3543_v32  ;;  %6174 = vpow2.f32 %v5393_v46 }
 0x424   : > { %v3558_v14 = vsel %vm11292_vm14, %v11103_v12, %v3554_v3  ;;  %v3573_v28 = vsel %vm11316_vm8, %v11117_v24, %v3569_v18  ;;  %v3581_v35 = vmul.f32 %v11242_v23, %v11155_v16  ;;  %v3596_v56 = vmul.f32 %v11257_v5, %v11161_v13  ;;  %v6173_v12 = vpop.eup %6172  ;;  %v1581_v3 = vpop.f32.mrf.mxu2 }
 0x425   : > { %v3611_v33 = vmul.f32 %v11271_v41, %v11164_v26  ;;  %v3626_v8 = vmul.f32 %v11286_v42, %v11171_v51  ;;  %v5395_v38 = vmul.f32 -1.442695, %v11278_v17  ;;  %v11333_v55 = vadd.f32 %v1492_v29, %v7142_v21  ;;  %v13756_v29 = vld [vmem:[#allocation73_spill] sm:$0xff] }
 0x426   : > { %v11336_v24 = vmul.f32 %v3518_v50, %v10798_v43  ;;  %v3577_v53 = vor.u32 1.1754944e-38, %v3576_v54  ;;  %6176 = vpow2.f32 %v5394_v27  ;;  %v5396_v59 = vmul.f32 -1.442695, %v11300_v1  ;;  %v13755_v27 = vld [vmem:[#allocation34_spill] sm:$0xff] }
 0x427   : > { %v11340_v34 = vmul.f32 %v3533_v10, %v10810_v11  ;;  %v11343_v63 = vmul.f32 %v3548_v61, %v10832_v31  ;;  %v3563_v2 = vsel %vm11235_vm6, %v3562_v19, %v3558_v14  ;;  %vm3575_vm12 = vcmp.eq.f32.partialorder %v3574_v22, 8.507059e+37  ;;  %v13752_v19 = vld [vmem:[#allocation67_spill] sm:$0xff] }
 0x428   : > { %13748 = vst [vmem:[#allocation26_spill] sm:$0xff] %v11336_v24  ;;  %v3578_v47 = vsel %vm3575_vm12, %v3577_v53, %v3573_v28  ;;  %v3582_v32 = vsub.f32 1.0, %v3581_v35  ;;  %v3597_v18 = vsub.f32 1.0, %v3596_v56  ;;  %v11347_v43 = vadd.f32 1.0, %v6173_v12 }
 0x429   : > { %13749 = vst [vmem:[#allocation43_spill] sm:$0xff] %v11340_v34  ;;  %v3612_v46 = vsub.f32 1.0, %v3611_v33  ;;  %v3627_v60 = vsub.f32 1.0, %v3626_v8  ;;  %6178 = vpow2.f32 %v5395_v38  ;;  %v5397_v57 = vmul.f32 -1.442695, %v11333_v55  ;;  %v6175_v11 = vpop.eup %6174  ;;  %v13793_v34 = vld [vmem:[#allocation68_spill] sm:$0xff] }
 0x42a   : > { %13750 = vst [vmem:[#allocation27_spill] sm:$0xff] %v11343_v63  ;;  %v3591_v44 = vand.u32 2147483648, %v11155_v16  ;;  %6180 = vpow2.f32 %v5396_v59  ;;  %v11352_v31 = vadd.f32 %v1581_v3, %v7150_v30  ;;  %v11357_v40 = vmul.f32 %v3563_v2, %v10857_v62  ;;  %v13760_v3 = vld [vmem:[#allocation24_spill] sm:$0xff] }
 0x42b   : > { %v11360_v22 = vmul.f32 %v3578_v47, %v10877_v9  ;;  %v3589_v54 = vand.u32 2147483647, %v11155_v16  ;;  %v3583_v61 = vmul.f32 %v11242_v23, %v3582_v32  ;;  %vm3585_vm13 = vweird.f32 %v11155_v16  ;;  %v13761_v47 = vld [vmem:[#allocation59_spill] sm:$0xff] }
 0x42c   : > { %13753 = vst [vmem:[#allocation44_spill] sm:$0xff] %v11357_v40  ;;  %v6177_v10 = vpop.eup %6176  ;;  %v3598_v14 = vmul.f32 %v11257_v5, %v3597_v18  ;;  %6182 = vrcp.f32 %v11347_v43  ;;  %v3613_v62 = vmul.f32 %v11271_v41, %v3612_v46  ;;  %v3628_v37 = vmul.f32 %v11286_v42, %v3627_v60 }
 0x42d   : > { %13754 = vst [vmem:[#allocation39_spill] sm:$0xff] %v11360_v22  ;;  %v11371_v9 = vadd.f32 1.0, %v6175_v11  ;;  %6184 = vpow2.f32 %v5397_v57  ;;  %vm3586_vm15 = vweird.f32 %v11242_v23  ;;  %v3592_v28 = vor.u32 1.1754944e-38, %v3591_v44  ;;  %v13767_v11 = vld [vmem:[#allocation56_spill] sm:$0xff]  ;;  %v13768_v44 = vld [vmem:[#allocation22_spill] sm:$0xff] }
 0x42e   : > { %vm3600_vm2 = vweird.f32 %v11161_v13  ;;  %v5398_v35 = vmul.f32 -1.442695, %v11352_v31  ;;  %vm11376_vm3 = vcmp.eq.f32.partialorder %v3589_v54, 8.507059e+37  ;;  %vm3601_vm4 = vweird.f32 %v11257_v5  ;;  %vm11399_vm6 = vmor %vm3585_vm13, %vm3586_vm15 }
 0x42f   : > { %v6179_v56 = vpop.eup %6178  ;;  %v3604_v33 = vand.u32 2147483647, %v11161_v13  ;;  %v3606_v8 = vand.u32 2147483648, %v11161_v13  ;;  %v11383_v38 = vadd.f32 1.0, %v6177_v10  ;;  %v3584_v59 = vadd.f32 %v11242_v23, %v3583_v61  ;;  %vm11419_vm9 = vmor %vm3600_vm2, %vm3601_vm4  ;;  %v1406_v10 = vpop.f32.mrf.mxu0 }
 0x430   : > { %v6181_v53 = vpop.eup %6180  ;;  %vm3615_vm5 = vweird.f32 %v11164_v26  ;;  %vm3616_vm11 = vweird.f32 %v11271_v41  ;;  %vm3631_vm1 = vweird.f32 %v11286_v42  ;;  %v13759_v2 = vpack.c.bf16 %v13720_v58, %v13719_v39  ;;  %v13765_v39 = vld [vmem:[#allocation60_spill] sm:$0xff] }
 0x431   : > { %v13762_v32 = vpack.c.bf16 %v13760_v3, %v13761_v47  ;;  %v3599_v46 = vadd.f32 %v11257_v5, %v3598_v14  ;;  %v3614_v60 = vadd.f32 %v11271_v41, %v3613_v62  ;;  %v3629_v57 = vadd.f32 %v11286_v42, %v3628_v37  ;;  %vm11431_vm0 = vmor %vm3615_vm5, %vm3616_vm11  ;;  %v13774_v3 = vld [vmem:[#allocation16_spill] sm:$0xff] }
 0x432   : > { %4600 = vmatmul.bf16.gmra.mxu0 %v13759_v2  ;;  %6186 = vrcp.f32 %v11371_v9  ;;  %v13766_v58 = vpack.c.bf16 %v13605_v0, %v13765_v39  ;;  %v13769_v54 = vpack.c.bf16 %v13767_v11, %v13768_v44  ;;  %v11413_v16 = vpop.eup %6182  ;;  %v3621_v61 = vand.u32 2147483648, %v11164_v26  ;;  %v1670_v2 = vpop.f32.mrf.mxu3 }
 0x433   : > { %4689 = vmatmul.bf16.gmra.mxu1 %v13762_v32  ;;  %vm3630_vm7 = vweird.f32 %v11171_v51  ;;  %v11425_v0 = vadd.f32 1.0, %v6179_v56  ;;  %6188 = vpow2.f32 %v5398_v35  ;;  %v6185_v14 = vpop.eup %6184  ;;  %v3636_v13 = vand.u32 2147483648, %v11171_v51  ;;  %v13775_v56 = vld [vmem:[#allocation79_spill] sm:$0xff] }
 0x434   : > { %4778 = vmatmul.bf16.gmra.mxu2 %v13766_v58  ;;  %4867 = vmatmul.bf16.gmra.mxu3 %v13769_v54  ;;  %6190 = vrcp.f32 %v11383_v38  ;;  %v11437_v37 = vadd.f32 1.0, %v6181_v53  ;;  %vm11441_vm10 = vcmp.eq.f32.partialorder %v3604_v33, 8.507059e+37  ;;  %v3607_v32 = vor.u32 1.1754944e-38, %v3606_v8  ;;  %vm11448_vm14 = vmor %vm3630_vm7, %vm3631_vm1  ;;  %v13783_v58 = vld [vmem:[#allocation17_spill] sm:$0xff] }
 0x435   : > { %v3619_v39 = vand.u32 2147483647, %v11164_v26  ;;  %v3634_v53 = vand.u32 2147483647, %v11171_v51  ;;  %v3588_v11 = vsel %vm11399_vm6, %v11242_v23, %v3584_v59  ;;  %v3603_v33 = vsel %vm11419_vm9, %v11257_v5, %v3599_v46  ;;  %v13781_v46 = vld [vmem:[#allocation80_spill] sm:$0xff] }
 0x436   : > { %v3618_v26 = vsel %vm11431_vm0, %v11271_v41, %v3614_v60  ;;  %v3633_v8 = vsel %vm11448_vm14, %v11286_v42, %v3629_v57  ;;  %v3641_v44 = vmul.f32 %v11413_v16, %v11347_v43  ;;  %6192 = vrcp.f32 %v11425_v0  ;;  %v13780_v41 = vld [vmem:[#allocation41_spill] sm:$0xff] }
 0x437   : > { %v11468_v51 = vadd.f32 1.0, %v6185_v14  ;;  %v11471_v23 = vadd.f32 %v1670_v2, %v7152_v25  ;;  %v3622_v5 = vor.u32 1.1754944e-38, %v3621_v61  ;;  %v3637_v18 = vor.u32 1.1754944e-38, %v3636_v13  ;;  %v13782_v2 = vld [vmem:[#allocation77_spill] sm:$0xff] }
 0x438   : > { %v11473_v59 = vpop.eup %6186  ;;  %6194 = vrcp.f32 %v11437_v37  ;;  %v3593_v57 = vsel %vm11376_vm3, %v3592_v28, %v3588_v11  ;;  %v3608_v54 = vsel %vm11441_vm10, %v3607_v32, %v3603_v33  ;;  %vm3620_vm8 = vcmp.eq.f32.partialorder %v3619_v39, 8.507059e+37 }
 0x439   : > { %v6189_v42 = vpop.eup %6188  ;;  %vm3635_vm12 = vcmp.eq.f32.partialorder %v3634_v53, 8.507059e+37  ;;  %v3623_v62 = vsel %vm3620_vm8, %v3622_v5, %v3618_v26  ;;  %v3651_v13 = vand.u32 2147483648, %v11347_v43  ;;  %v3642_v60 = vsub.f32 1.0, %v3641_v44  ;;  %v13788_v44 = vld [vmem:[#allocation37_spill] sm:$0xff] }
 0x43a   : > { %v11482_v14 = vpop.eup %6190  ;;  %v3638_v61 = vsel %vm3635_vm12, %v3637_v18, %v3633_v8  ;;  %v3656_v12 = vmul.f32 %v11473_v59, %v11371_v9  ;;  %6196 = vrcp.f32 %v11468_v51  ;;  %v5399_v28 = vmul.f32 -1.442695, %v11471_v23  ;;  %v1495_v8 = vpop.f32.mrf.mxu1 }
 0x43b   : > { %v11492_v35 = vmul.f32 %v3593_v57, %v11002_v4  ;;  %v11495_v32 = vmul.f32 %v3608_v54, %v11008_v48  ;;  %v11497_v39 = vadd.f32 1.0, %v6189_v42  ;;  %v11500_v53 = vadd.f32 %v1406_v10, %v7140_v15  ;;  %v1584_v57 = vpop.f32.mrf.mxu2  ;;  %v1673_v47 = vpop.f32.mrf.mxu3 }
 0x43c   : > { %v11502_v11 = vpop.eup %6192  ;;  %v11505_v33 = vmul.f32 %v3623_v62, %v11015_v52  ;;  %vm3645_vm13 = vweird.f32 %v11347_v43  ;;  %v3666_v26 = vand.u32 2147483648, %v11371_v9  ;;  %v3671_v4 = vmul.f32 %v11482_v14, %v11383_v38 }
 0x43d   : > { %13784 = vst [vmem:[#allocation19_spill] sm:$0xff] %v11492_v35  ;;  %v11514_v5 = vmul.f32 %v3638_v61, %v13788_v44  ;;  %v3649_v18 = vand.u32 2147483647, %v11347_v43  ;;  %v11517_v42 = vor.u32 1.1754944e-38, %v3651_v13  ;;  %v3664_v52 = vand.u32 2147483647, %v11371_v9 }
 0x43e   : > { %13785 = vst [vmem:[#allocation45_spill] sm:$0xff] %v11495_v32  ;;  %v11511_v48 = vpop.eup %6194  ;;  %v3643_v54 = vmul.f32 %v11413_v16, %v3642_v60  ;;  %v3657_v10 = vsub.f32 1.0, %v3656_v12  ;;  %v3681_v62 = vand.u32 2147483648, %v11383_v38  ;;  %6198 = vpow2.f32 %v5399_v28 }
 0x43f   : > { %13786 = vst [vmem:[#allocation18_spill] sm:$0xff] %v11500_v53  ;;  %v3686_v50 = vmul.f32 %v11502_v11, %v11425_v0  ;;  %6200 = vrcp.f32 %v11497_v39  ;;  %v5400_v61 = vmul.f32 -1.442695, %v11500_v53  ;;  %v11527_v13 = vadd.f32 %v1495_v8, %v7142_v21  ;;  %v13794_v8 = vld [vmem:[#allocation64_spill] sm:$0xff] }
 0x440   : > { %13787 = vst [vmem:[#allocation46_spill] sm:$0xff] %v11505_v33  ;;  %v11529_v44 = vpop.eup %6196  ;;  %vm3660_vm15 = vweird.f32 %v11371_v9  ;;  %v11532_v60 = vor.u32 1.1754944e-38, %v3666_v26  ;;  %v3672_v12 = vsub.f32 1.0, %v3671_v4  ;;  %v3701_v28 = vmul.f32 %v11511_v48, %v11437_v37  ;;  %v13799_v33 = vld [vmem:[#allocation69_spill] sm:$0xff] }
 0x441   : > { %13789 = vst [vmem:[#allocation50_spill] sm:$0xff] %v11514_v5  ;;  %v11537_v36 = vadd.f32 %v1584_v57, %v7150_v30  ;;  %v13792_v35 = vpack.c.bf16 %v13752_v19, %v13751_v49  ;;  %v13795_v5 = vpack.c.bf16 %v13793_v34, %v13794_v8  ;;  %vm3646_vm2 = vweird.f32 %v11413_v16  ;;  %v13800_v49 = vld [vmem:[#allocation65_spill] sm:$0xff]  ;;  %v13803_v34 = vld [vmem:[#allocation66_spill] sm:$0xff] }
 0x442   : > { %13790 = vst [vmem:[#allocation47_spill] sm:$0xff] %v11527_v13  ;;  %vm11546_vm3 = vcmp.eq.f32.partialorder %v3649_v18, 8.507059e+37  ;;  %v3679_v4 = vand.u32 2147483647, %v11383_v38  ;;  %v3696_v22 = vand.u32 2147483648, %v11425_v0  ;;  %v11553_v57 = vadd.f32 %v1673_v47, %v7152_v25  ;;  %vm11579_vm11 = vmor %vm3645_vm13, %vm3646_vm2 }
 0x443   : > { %13791 = vst [vmem:[#allocation51_spill] sm:$0xff] %v11537_v36  ;;  %4605 = vmatmul.bf16.gmra.mxu0 %v13792_v35  ;;  %4694 = vmatmul.bf16.gmra.mxu1 %v13795_v5  ;;  %v13801_v19 = vpack.c.bf16 %v13799_v33, %v13800_v49  ;;  %v13802_v35 = vld [vmem:[#allocation70_spill] sm:$0xff]  ;;  %v3644_v18 = vadd.f32 %v11413_v16, %v3643_v54  ;;  %vm3675_vm4 = vweird.f32 %v11383_v38  ;;  %v11564_v40 = vor.u32 1.1754944e-38, %v3681_v62  ;;  %v1408_v49 = vpop.f32.mrf.mxu0 }
 0x444   : > { %13798 = vst [vmem:[#allocation48_spill] sm:$0xff] %v11553_v57  ;;  %v13804_v5 = vpack.c.bf16 %v13802_v35, %v13803_v34  ;;  %v3658_v8 = vmul.f32 %v11473_v59, %v3657_v10  ;;  %v3694_v32 = vand.u32 2147483647, %v11425_v0  ;;  %v3687_v47 = vsub.f32 1.0, %v3686_v50 }
 0x445   : > { %4783 = vmatmul.bf16.gmra.mxu2 %v13801_v19  ;;  %v3716_v63 = vmul.f32 %v11529_v44, %v11468_v51  ;;  %6202 = vpow2.f32 %v5400_v61  ;;  %v5401_v33 = vmul.f32 -1.442695, %v11527_v13  ;;  %v6199_v19 = vpop.eup %6198  ;;  %vm3661_vm5 = vweird.f32 %v11473_v59  ;;  %v1497_v13 = vpop.f32.mrf.mxu1 }
 0x446   : > { %4872 = vmatmul.bf16.gmra.mxu3 %v13804_v5  ;;  %v3673_v54 = vmul.f32 %v11482_v14, %v3672_v12  ;;  %v3702_v10 = vsub.f32 1.0, %v3701_v28  ;;  %v5402_v35 = vmul.f32 -1.442695, %v11537_v36  ;;  %v11573_v62 = vpop.eup %6200  ;;  %vm11583_vm1 = vcmp.eq.f32.partialorder %v3664_v52, 8.507059e+37  ;;  %vm11617_vm10 = vmor %vm3660_vm15, %vm3661_vm5 }
 0x447   : > { %vm3690_vm6 = vweird.f32 %v11425_v0  ;;  %v11588_v12 = vor.u32 1.1754944e-38, %v3696_v22  ;;  %v3709_v28 = vand.u32 2147483647, %v11437_v37  ;;  %v3711_v34 = vand.u32 2147483648, %v11437_v37 }
 0x448   : > { %v5403_v5 = vmul.f32 -1.442695, %v11553_v57  ;;  %v3648_v43 = vsel %vm11579_vm11, %v11413_v16, %v3644_v18  ;;  %v3659_v36 = vadd.f32 %v11473_v59, %v3658_v8  ;;  %vm3676_vm9 = vweird.f32 %v11482_v14 }
 0x449   : > { %vm11598_vm7 = vcmp.eq.f32.partialorder %v3679_v4, 8.507059e+37  ;;  %vm3705_vm0 = vweird.f32 %v11437_v37  ;;  %v11604_v22 = vadd.f32 %v1408_v49, %v7140_v15  ;;  %v3688_v57 = vmul.f32 %v11502_v11, %v3687_v47  ;;  %vm11643_vm13 = vmor %vm3675_vm4, %vm3676_vm9 }
 0x44a   : > { %v3717_v24 = vsub.f32 1.0, %v3716_v63  ;;  %v11607_v53 = vadd.f32 1.0, %v6199_v19  ;;  %6204 = vpow2.f32 %v5401_v33  ;;  %v3674_v16 = vadd.f32 %v11482_v14, %v3673_v54  ;;  %v13816_v54 = vld [vmem:[#allocation57_spill] sm:$0xff] }
 0x44b   : > { %v3703_v18 = vmul.f32 %v11511_v48, %v3702_v10  ;;  %v3731_v4 = vmul.f32 %v11573_v62, %v11497_v39  ;;  %6206 = vpow2.f32 %v5402_v35  ;;  %v6203_v8 = vpop.eup %6202  ;;  %vm3691_vm14 = vweird.f32 %v11502_v11 }
 0x44c   : > { %vm11622_vm8 = vcmp.eq.f32.partialorder %v3694_v32, 8.507059e+37  ;;  %vm3720_vm12 = vweird.f32 %v11468_v51  ;;  %6208 = vpow2.f32 %v5403_v5  ;;  %v11628_v47 = vadd.f32 %v1497_v13, %v7142_v21  ;;  %v13815_v32 = vld [vmem:[#allocation82_spill] sm:$0xff] }
 0x44d   : > { %v3653_v9 = vsel %vm11546_vm3, %v11517_v42, %v3648_v43  ;;  %v3663_v33 = vsel %vm11617_vm10, %v11473_v59, %v3659_v36  ;;  %v5404_v19 = vmul.f32 -1.442695, %v11604_v22  ;;  %v3689_v26 = vadd.f32 %v11502_v11, %v3688_v57  ;;  %vm11673_vm3 = vmor %vm3690_vm6, %vm3691_vm14 }
 0x44e   : > { %vm3706_vm15 = vweird.f32 %v11511_v48  ;;  %v3718_v42 = vmul.f32 %v11529_v44, %v3717_v24  ;;  %6210 = vrcp.f32 %v11607_v53  ;;  %v3678_v36 = vsel %vm11643_vm13, %v11482_v14, %v3674_v16  ;;  %v1586_v16 = vpop.f32.mrf.mxu2 }
 0x44f   : > { %v3704_v59 = vadd.f32 %v11511_v48, %v3703_v18  ;;  %v3732_v35 = vsub.f32 1.0, %v3731_v4  ;;  %v11655_v38 = vadd.f32 1.0, %v6203_v8  ;;  %vm11657_vm2 = vcmp.eq.f32.partialorder %v3709_v28, 8.507059e+37  ;;  %vm11688_vm4 = vmor %vm3705_vm0, %vm3706_vm15  ;;  %v13827_v4 = vld [vmem:[#allocation74_spill] sm:$0xff]  ;;  %v1675_v28 = vpop.f32.mrf.mxu3 }
 0x450   : > { %v6205_v50 = vpop.eup %6204  ;;  %v3712_v57 = vor.u32 1.1754944e-38, %v3711_v34  ;;  %v3724_v43 = vand.u32 2147483647, %v11468_v51  ;;  %v5405_v24 = vmul.f32 -1.442695, %v11628_v47  ;;  %v11664_v10 = vmul.f32 %v3653_v9, %v11167_v45  ;;  %v13828_v8 = vld [vmem:[#allocation38_spill] sm:$0xff] }
 0x451   : > { %v6207_v49 = vpop.eup %6206  ;;  %v3668_v14 = vsel %vm11583_vm1, %v11532_v60, %v3663_v33  ;;  %v3726_v34 = vand.u32 2147483648, %v11468_v51  ;;  %6212 = vpow2.f32 %v5404_v19  ;;  %v3683_v45 = vsel %vm11598_vm7, %v11564_v40, %v3678_v36  ;;  %v13837_v36 = vld [vmem:[#allocation72_spill] sm:$0xff] }
 0x452   : > { %13821 = vst [vmem:[#allocation52_spill] sm:$0xff] %v11664_v10  ;;  %v6209_v18 = vpop.eup %6208  ;;  %v3693_v60 = vsel %vm11673_vm3, %v11502_v11, %v3689_v26  ;;  %v3719_v61 = vadd.f32 %v11529_v44, %v3718_v42  ;;  %vm3721_vm5 = vweird.f32 %v11529_v44  ;;  %v3708_v40 = vsel %vm11688_vm4, %v11511_v48, %v3704_v59  ;;  %v13833_v26 = vld [vmem:[#allocation36_spill] sm:$0xff]  ;;  %v13834_v42 = vld [vmem:[#allocation71_spill] sm:$0xff] }
 0x453   : > { %v3733_v52 = vmul.f32 %v11573_v62, %v3732_v35  ;;  %6214 = vrcp.f32 %v11655_v38  ;;  %v11699_v11 = vadd.f32 1.0, %v6205_v50  ;;  %v13826_v37 = vpack.c.bf16 %v13756_v29, %v13755_v27  ;;  %v13836_v29 = vld [vmem:[#allocation75_spill] sm:$0xff]  ;;  %vm11734_vm1 = vmor %vm3720_vm12, %vm3721_vm5  ;;  %v13851_v19 = vld [vmem:[#allocation20_spill] sm:$0xff] }
 0x454   : > { %v13829_v9 = vpack.c.bf16 %v13827_v4, %v13828_v8  ;;  %v11707_v33 = vpop.eup %6210  ;;  %vm11709_vm11 = vcmp.eq.f32.partialorder %v3724_v43, 8.507059e+37  ;;  %v11713_v48 = vadd.f32 1.0, %v6207_v49  ;;  %6216 = vpow2.f32 %v5405_v24 }
 0x455   : > { %4610 = vmatmul.bf16.gmra.mxu0 %v13826_v37  ;;  %v11716_v13 = vadd.f32 %v1586_v16, %v7150_v30  ;;  %v13835_v27 = vpack.c.bf16 %v13833_v26, %v13834_v42  ;;  %v13838_v59 = vpack.c.bf16 %v13836_v29, %v13837_v36  ;;  %v11725_v35 = vmul.f32 %v3668_v14, %v11206_v7  ;;  %v13852_v42 = vld [vmem:[#allocation84_spill] sm:$0xff] }
 0x456   : > { %4699 = vmatmul.bf16.gmra.mxu1 %v13829_v9  ;;  %v3698_v50 = vsel %vm11622_vm8, %v11588_v12, %v3693_v60  ;;  %v3739_v24 = vand.u32 2147483647, %v11497_v39  ;;  %v11739_v49 = vadd.f32 1.0, %v6209_v18  ;;  %v11742_v7 = vmul.f32 %v3683_v45, %v11240_v20  ;;  %v1500_v60 = vpop.f32.mrf.mxu1  ;;  %v13850_v9 = vld [vmem:[#allocation83_spill] sm:$0xff] }
 0x457   : > { %13832 = vst [vmem:[#allocation21_spill] sm:$0xff] %v11716_v13  ;;  %4788 = vmatmul.bf16.gmra.mxu2 %v13835_v27  ;;  %4877 = vmatmul.bf16.gmra.mxu3 %v13838_v59  ;;  %v3713_v63 = vsel %vm11657_vm2, %v3712_v57, %v3708_v40  ;;  %v3723_v12 = vsel %vm11734_vm1, %v11529_v44, %v3719_v61  ;;  %v3727_v51 = vor.u32 1.1754944e-38, %v3726_v34  ;;  %v6213_v14 = vpop.eup %6212  ;;  %vm3736_vm6 = vweird.f32 %v11573_v62  ;;  %v13853_v27 = vld [vmem:[#allocation54_spill] sm:$0xff] }
 0x458   : > { %13839 = vst [vmem:[#allocation58_spill] sm:$0xff] %v11725_v35  ;;  %v3734_v16 = vadd.f32 %v11573_v62, %v3733_v52  ;;  %v3746_v18 = vmul.f32 %v11707_v33, %v11607_v53  ;;  %6218 = vrcp.f32 %v11699_v11  ;;  %v11755_v20 = vmul.f32 %v3698_v50, %v11278_v17  ;;  %v1411_v17 = vpop.f32.mrf.mxu0  ;;  %v13866_v35 = vld [vmem:[#allocation33_spill] sm:$0xff] }
 0x459   : > { %13842 = vst [vmem:[#allocation62_spill] sm:$0xff] %v11742_v7  ;;  %6220 = vrcp.f32 %v11713_v48  ;;  %v5406_v5 = vmul.f32 -1.442695, %v11716_v13  ;;  %v11760_v44 = vadd.f32 %v1675_v28, %v7152_v25  ;;  %v11762_v57 = vpop.eup %6214  ;;  %vm3735_vm9 = vweird.f32 %v11497_v39 }
 0x45a   : > { %13843 = vst [vmem:[#allocation55_spill] sm:$0xff] %v11755_v20  ;;  %vm11765_vm7 = vcmp.eq.f32.partialorder %v3739_v24, 8.507059e+37  ;;  %v3741_v45 = vand.u32 2147483648, %v11497_v39  ;;  %6222 = vrcp.f32 %v11739_v49  ;;  %v6217_v0 = vpop.eup %6216  ;;  %v11772_v61 = vmul.f32 %v3713_v63, %v11300_v1  ;;  %vm11778_vm0 = vmor %vm3735_vm9, %vm3736_vm6  ;;  %v11788_v1 = vpop.f32.mrf.mxu2  ;;  %v13856_v63 = vld [vmem:[#allocation63_spill] sm:$0xff] }
 0x45b   : > { %13844 = vst [vmem:[#allocation67_spill] sm:$0xff] %v11760_v44  ;;  %v3728_v40 = vsel %vm11709_vm11, %v3727_v51, %v3723_v12  ;;  %v3756_v37 = vand.u32 2147483648, %v11607_v53  ;;  %v11783_v39 = vadd.f32 1.0, %v6213_v14  ;;  %v3738_v4 = vsel %vm11778_vm0, %v11573_v62, %v3734_v16  ;;  %v13857_v12 = vld [vmem:[#allocation28_spill] sm:$0xff] }
 0x45c   : > { %13847 = vst [vmem:[#allocation34_spill] sm:$0xff] %v11772_v61  ;;  %v3747_v8 = vsub.f32 1.0, %v3746_v18  ;;  %v3761_v36 = vmul.f32 %v11762_v57, %v11655_v38  ;;  %6224 = vpow2.f32 %v5406_v5  ;;  %v5407_v59 = vmul.f32 -1.442695, %v11760_v44 }
 0x45d   : > { %v11798_v50 = vadd.f32 %v1411_v17, %v7140_v15  ;;  %v3742_v62 = vor.u32 1.1754944e-38, %v3741_v45  ;;  %v11802_v24 = vadd.f32 1.0, %v6217_v0  ;;  %v11805_v28 = vadd.f32 %v1500_v60, %v7142_v21 }
 0x45e   : > { %v11800_v43 = vpop.eup %6218  ;;  %v11812_v16 = vmul.f32 %v3728_v40, %v11333_v55  ;;  %v3754_v18 = vand.u32 2147483647, %v11607_v53  ;;  %v3771_v5 = vand.u32 2147483648, %v11655_v38  ;;  %6226 = vrcp.f32 %v11783_v39  ;;  %v1678_v40 = vpop.f32.mrf.mxu3 }
 0x45f   : > { %13854 = vst [vmem:[#allocation73_spill] sm:$0xff] %v11798_v50  ;;  %v11809_v14 = vpop.eup %6220  ;;  %v3743_v17 = vsel %vm11765_vm7, %v3742_v62, %v3738_v4  ;;  %v3748_v60 = vmul.f32 %v11707_v33, %v3747_v8  ;;  %vm3750_vm10 = vweird.f32 %v11607_v53  ;;  %v11823_v0 = vor.u32 1.1754944e-38, %v3756_v37  ;;  %v13859_v8 = vld [vmem:[#allocation76_spill] sm:$0xff]  ;;  %v13860_v37 = vld [vmem:[#allocation78_spill] sm:$0xff] }
 0x460   : > { %13855 = vst [vmem:[#allocation24_spill] sm:$0xff] %v11805_v28  ;;  %v11817_v45 = vpop.eup %6222  ;;  %v3769_v55 = vand.u32 2147483647, %v11655_v38  ;;  %v3762_v52 = vsub.f32 1.0, %v3761_v36  ;;  %v3776_v51 = vmul.f32 %v11800_v43, %v11699_v11  ;;  %6228 = vpow2.f32 %v5407_v59 }
 0x461   : > { %13858 = vst [vmem:[#allocation59_spill] sm:$0xff] %v11812_v16  ;;  %v5408_v29 = vmul.f32 -1.442695, %v11798_v50  ;;  %v3791_v34 = vmul.f32 %v11809_v14, %v11713_v48  ;;  %6230 = vrcp.f32 %v11802_v24  ;;  %v5409_v4 = vmul.f32 -1.442695, %v11805_v28  ;;  %v13865_v16 = vld [vmem:[#allocation81_spill] sm:$0xff] }
 0x462   : > { %v4276_v62 = vpack.c.bf16 %v13860_v37, %v13859_v8  ;;  %v6225_v26 = vpop.eup %6224  ;;  %vm3765_vm14 = vweird.f32 %v11655_v38  ;;  %v11836_v36 = vor.u32 1.1754944e-38, %v3771_v5  ;;  %v3784_v61 = vand.u32 2147483647, %v11699_v11  ;;  %v11850_v8 = vpop.f32.mrf.mxu0 }
 0x463   : > { %v3786_v59 = vand.u32 2147483648, %v11699_v11  ;;  %v3806_v10 = vmul.f32 %v11817_v45, %v11739_v49  ;;  %v11843_v20 = vmul.f32 %v3743_v17, %v11352_v31  ;;  %vm3751_vm8 = vweird.f32 %v11707_v33  ;;  %v11852_v5 = vpop.f32.mrf.mxu1 }
 0x464   : > { %vm11846_vm12 = vcmp.eq.f32.partialorder %v3754_v18, 8.507059e+37  ;;  %v13864_v37 = vpack.c.bf16 %v13775_v56, %v13774_v3  ;;  %v11861_v50 = vpop.eup %6226  ;;  %v3749_v18 = vadd.f32 %v11707_v33, %v3748_v60  ;;  %v3763_v44 = vmul.f32 %v11762_v57, %v3762_v52  ;;  %vm11901_vm4 = vmor %vm3750_vm10, %vm3751_vm8 }
 0x465   : > { %13861 = vst [vmem:[#allocation60_spill] sm:$0xff] %v11843_v20  ;;  %4615 = vmatmul.bf16.gmra.mxu0 %v4276_v62  ;;  %v3777_v13 = vsub.f32 1.0, %v3776_v51  ;;  %6232 = vpow2.f32 %v5408_v29  ;;  %v13869_v62 = vpack.c.bf16 %v13781_v46, %v13780_v41  ;;  %v13870_v3 = vpack.c.bf16 %v13783_v58, %v13782_v2  ;;  %v11873_v20 = vpop.f32.mrf.mxu2 }
 0x466   : > { %4704 = vmatmul.bf16.gmra.mxu1 %v13864_v37  ;;  %v3792_v56 = vsub.f32 1.0, %v3791_v34  ;;  %v11871_v37 = vadd.f32 1.0, %v6225_v26  ;;  %6234 = vpow2.f32 %v5409_v4  ;;  %v6229_v52 = vpop.eup %6228  ;;  %vm3766_vm13 = vweird.f32 %v11762_v57 }
 0x467   : > { %4793 = vmatmul.bf16.gmra.mxu2 %v13869_v62  ;;  %4882 = vmatmul.bf16.gmra.mxu3 %v13870_v3  ;;  %vm11878_vm15 = vcmp.eq.f32.partialorder %v3769_v55, 8.507059e+37  ;;  %vm3780_vm2 = vweird.f32 %v11699_v11  ;;  %v11883_v41 = vor.u32 1.1754944e-38, %v3786_v59  ;;  %v3801_v46 = vand.u32 2147483648, %v11713_v48  ;;  %v11886_v58 = vpop.eup %6230  ;;  %vm11931_vm1 = vmor %vm3765_vm14, %vm3766_vm13 }
 0x468   : > { %v3807_v2 = vsub.f32 1.0, %v3806_v10  ;;  %vm3795_vm3 = vweird.f32 %v11713_v48  ;;  %v3799_v26 = vand.u32 2147483647, %v11713_v48  ;;  %v3816_v51 = vand.u32 2147483648, %v11739_v49 }
 0x469   : > { %v3821_v55 = vmul.f32 %v11861_v50, %v11783_v39  ;;  %v11895_v34 = vadd.f32 %v11788_v1, %v7150_v30  ;;  %v3764_v4 = vadd.f32 %v11762_v57, %v3763_v44  ;;  %v3778_v59 = vmul.f32 %v11800_v43, %v3777_v13  ;;  %v11919_v44 = vpop.f32.mrf.mxu3 }
 0x46a   : > { %vm3810_vm5 = vweird.f32 %v11739_v49  ;;  %v3814_v62 = vand.u32 2147483647, %v11739_v49  ;;  %v11910_v3 = vadd.f32 %v1678_v40, %v7152_v25  ;;  %v3753_v1 = vsel %vm11901_vm4, %v11707_v33, %v3749_v18  ;;  %13878 = vst [vmem:[#allocation22_spill] sm:$0xff] %v11919_v44 }
 0x46b   : > { %13875 = vst [vmem:[#allocation56_spill] sm:$0xff] %v11895_v34  ;;  %v3793_v53 = vmul.f32 %v11809_v14, %v3792_v56  ;;  %6236 = vrcp.f32 %v11871_v37  ;;  %v11917_v31 = vadd.f32 1.0, %v6229_v52  ;;  %v6233_v13 = vpop.eup %6232  ;;  %vm3781_vm11 = vweird.f32 %v11800_v43  ;;  %v11942_v44 = vpop.f32.mrf.mxu1 }
 0x46c   : > { %v11922_v28 = vor.u32 1.1754944e-38, %v3801_v46  ;;  %v3808_v40 = vmul.f32 %v11817_v45, %v3807_v2  ;;  %v3836_v60 = vmul.f32 %v11886_v58, %v11802_v24  ;;  %v6235_v10 = vpop.eup %6234  ;;  %vm11935_vm6 = vcmp.eq.f32.partialorder %v3784_v61, 8.507059e+37  ;;  %v11940_v2 = vpop.f32.mrf.mxu0  ;;  %vm11985_vm14 = vmor %vm3780_vm2, %vm3781_vm11 }
 0x46d   : > { %v3817_v56 = vor.u32 1.1754944e-38, %v3816_v51  ;;  %v3822_v52 = vsub.f32 1.0, %v3821_v55  ;;  %v5410_v46 = vmul.f32 -1.442695, %v11895_v34  ;;  %v3758_v38 = vsel %vm11846_vm12, %v11823_v0, %v3753_v1 }
 0x46e   : > { %v3768_v61 = vsel %vm11931_vm1, %v11762_v57, %v3764_v4  ;;  %v3779_v51 = vadd.f32 %v11800_v43, %v3778_v59  ;;  %vm11953_vm9 = vcmp.eq.f32.partialorder %v3799_v26, 8.507059e+37  ;;  %vm11957_vm7 = vcmp.eq.f32.partialorder %v3814_v62, 8.507059e+37  ;;  %v11967_v57 = vpop.f32.mrf.mxu2 }
 0x46f   : > { %v5411_v17 = vmul.f32 -1.442695, %v11910_v3  ;;  %v3794_v25 = vadd.f32 %v11809_v14, %v3793_v53  ;;  %vm3796_vm0 = vweird.f32 %v11809_v14  ;;  %6238 = vrcp.f32 %v11917_v31 }
 0x470   : > { %v11965_v7 = vadd.f32 1.0, %v6233_v13  ;;  %v3809_v0 = vadd.f32 %v11817_v45, %v3808_v40  ;;  %vm3811_vm10 = vweird.f32 %v11817_v45  ;;  %v3837_v26 = vsub.f32 1.0, %v3836_v60  ;;  %vm11997_vm8 = vmor %vm3795_vm3, %vm3796_vm0  ;;  %v13895_v40 = vld [vmem:[#allocation53_spill] sm:$0xff] }
 0x471   : > { %v11971_v4 = vadd.f32 1.0, %v6235_v10  ;;  %v11973_v59 = vpop.eup %6236  ;;  %v11976_v62 = vmul.f32 %v3758_v38, %v11471_v23  ;;  %v3773_v1 = vsel %vm11878_vm15, %v11836_v36, %v3768_v61  ;;  %v3823_v60 = vmul.f32 %v11861_v50, %v3822_v52  ;;  %vm12010_vm13 = vmor %vm3810_vm5, %vm3811_vm10  ;;  %v12019_v13 = vpop.f32.mrf.mxu3 }
 0x472   : > { %6240 = vpow2.f32 %v5410_v46  ;;  %v3783_v23 = vsel %vm11985_vm14, %v11800_v43, %v3779_v51  ;;  %vm3825_vm12 = vweird.f32 %v11783_v39  ;;  %v3829_v11 = vand.u32 2147483647, %v11783_v39 }
 0x473   : > { %6242 = vpow2.f32 %v5411_v17  ;;  %v3798_v29 = vsel %vm11997_vm8, %v11809_v14, %v3794_v25  ;;  %v12017_v48 = vadd.f32 %v11850_v8, %v7140_v15  ;;  %v13894_v17 = vld [vmem:[#allocation49_spill] sm:$0xff]  ;;  %v3813_v25 = vsel %vm12010_vm13, %v11817_v45, %v3809_v0  ;;  %v13896_v8 = vld [vmem:[#allocation18_spill] sm:$0xff]  ;;  %v12066_v36 = vpop.f32.mrf.mxu1 }
 0x474   : > { %6244 = vrcp.f32 %v11965_v7  ;;  %v4280_v10 = vpack.c.bf16 %v13895_v40, %v13894_v17  ;;  %v3838_v49 = vmul.f32 %v11886_v58, %v3837_v26  ;;  %v3851_v14 = vmul.f32 %v11973_v59, %v11871_v37 }
 0x475   : > { %6246 = vrcp.f32 %v11971_v4  ;;  %v12030_v33 = vpop.eup %6238  ;;  %v12033_v52 = vmul.f32 %v3773_v1, %v13896_v8  ;;  %v3824_v46 = vadd.f32 %v11861_v50, %v3823_v60  ;;  %vm3826_vm15 = vweird.f32 %v11861_v50 }
 0x476   : > { %v3831_v38 = vand.u32 2147483648, %v11783_v39  ;;  %4620 = vmatmul.bf16.gmra.mxu0 %v4280_v10  ;;  %v13898_v45 = vpack.c.bf16 %v13816_v54, %v13815_v32  ;;  %v3788_v61 = vsel %vm11935_vm6, %v11883_v41, %v3783_v23  ;;  %vm12044_vm2 = vcmp.eq.f32.partialorder %v3829_v11, 8.507059e+37  ;;  %v13903_v32 = vld [vmem:[#allocation40_spill] sm:$0xff]  ;;  %v13904_v54 = vld [vmem:[#allocation26_spill] sm:$0xff]  ;;  %vm12072_vm3 = vmor %vm3825_vm12, %vm3826_vm15  ;;  %v12089_v17 = vpop.f32.mrf.mxu2 }
 0x477   : > { %13897 = vst [vmem:[#allocation16_spill] sm:$0xff] %v12033_v52  ;;  %v3844_v0 = vand.u32 2147483647, %v11802_v24  ;;  %v13901_v26 = vpack.c.bf16 %v13851_v19, %v13850_v9  ;;  %v13902_v1 = vpack.c.bf16 %v13853_v27, %v13852_v42  ;;  %v3803_v41 = vsel %vm11953_vm9, %v11922_v28, %v3798_v29  ;;  %v12064_v19 = vpop.f32.mrf.mxu0  ;;  %v13907_v11 = vld [vmem:[#allocation47_spill] sm:$0xff] }
 0x478   : > { %4709 = vmatmul.bf16.gmra.mxu1 %v13898_v45  ;;  %v6241_v60 = vpop.eup %6240  ;;  %v3818_v18 = vsel %vm11957_vm7, %v3817_v56, %v3813_v25  ;;  %v3846_v23 = vand.u32 2147483648, %v11802_v24  ;;  %v5412_v9 = vmul.f32 -1.442695, %v12017_v48  ;;  %v3839_v28 = vadd.f32 %v11886_v58, %v3838_v49  ;;  %v13908_v10 = vld [vmem:[#allocation51_spill] sm:$0xff]  ;;  %v13909_v49 = vld [vmem:[#allocation48_spill] sm:$0xff] }
 0x479   : > { %4798 = vmatmul.bf16.gmra.mxu2 %v13901_v26  ;;  %4887 = vmatmul.bf16.gmra.mxu3 %v13902_v1  ;;  %v6243_v42 = vpop.eup %6242  ;;  %vm3841_vm4 = vweird.f32 %v11886_v58  ;;  %v3852_v34 = vsub.f32 1.0, %v3851_v14  ;;  %v3866_v56 = vmul.f32 %v12030_v33, %v11917_v31  ;;  %v12083_v29 = vmul.f32 %v3788_v61, %v13907_v11  ;;  %v12127_v51 = vpop.f32.mrf.mxu3 }
 0x47a   : > { %v12080_v55 = vpop.eup %6244  ;;  %v3828_v39 = vsel %vm12072_vm3, %v11861_v50, %v3824_v46  ;;  %v3832_v43 = vor.u32 1.1754944e-38, %v3831_v38  ;;  %vm3840_vm5 = vweird.f32 %v11802_v24  ;;  %v12094_v25 = vmul.f32 %v3803_v41, %v13908_v10 }
 0x47b   : > { %v12091_v40 = vpop.eup %6246  ;;  %v12097_v14 = vmul.f32 %v3818_v18, %v13909_v49  ;;  %vm12099_vm11 = vcmp.eq.f32.partialorder %v3844_v0, 8.507059e+37  ;;  %v12103_v45 = vadd.f32 1.0, %v6241_v60  ;;  %vm12105_vm1 = vmor %vm3840_vm5, %vm3841_vm4  ;;  %v3847_v24 = vor.u32 1.1754944e-38, %v3846_v23  ;;  %v4670_v49 = vpop.f32.mrf.mxu1 }
 0x47c   : > { %v3859_v46 = vand.u32 2147483647, %v11871_v37  ;;  %v3861_v38 = vand.u32 2147483648, %v11871_v37  ;;  %6248 = vpow2.f32 %v5412_v9  ;;  %v3833_v61 = vsel %vm12044_vm2, %v3832_v43, %v3828_v39 }
 0x47d   : > { %v3843_v0 = vsel %vm12105_vm1, %v11886_v58, %v3839_v28  ;;  %v3853_v26 = vmul.f32 %v11973_v59, %v3852_v34  ;;  %v3867_v1 = vsub.f32 1.0, %v3866_v56  ;;  %v3881_v60 = vmul.f32 %v12080_v55, %v11965_v7 }
 0x47e   : > { %v3896_v41 = vmul.f32 %v12091_v40, %v11971_v4  ;;  %v12121_v18 = vadd.f32 1.0, %v6243_v42  ;;  %v12125_v23 = vadd.f32 %v11852_v5, %v7142_v21  ;;  %vm3855_vm6 = vweird.f32 %v11871_v37 }
 0x47f   : > { %v3874_v58 = vand.u32 2147483647, %v11917_v31  ;;  %v3876_v9 = vand.u32 2147483648, %v11917_v31  ;;  %6250 = vrcp.f32 %v12103_v45  ;;  %v12134_v27 = vmul.f32 %v3833_v61, %v11604_v22  ;;  %v4581_v10 = vpop.f32.mrf.mxu0 }
 0x480   : > { %vm12136_vm9 = vcmp.eq.f32.partialorder %v3859_v46, 8.507059e+37  ;;  %v3862_v28 = vor.u32 1.1754944e-38, %v3861_v38  ;;  %vm3870_vm7 = vweird.f32 %v11917_v31  ;;  %v3848_v5 = vsel %vm12099_vm11, %v3847_v24, %v3843_v0  ;;  %v12157_v38 = vpop.f32.mrf.mxu2 }
 0x481   : > { %13914 = vst [vmem:[#allocation79_spill] sm:$0xff] %v12134_v27  ;;  %v3854_v34 = vadd.f32 %v11973_v59, %v3853_v26  ;;  %vm3856_vm0 = vweird.f32 %v11973_v59  ;;  %v3868_v56 = vmul.f32 %v12030_v33, %v3867_v1  ;;  %v3882_v39 = vsub.f32 1.0, %v3881_v60  ;;  %v13921_v60 = vld [vmem:[#allocation61_spill] sm:$0xff]  ;;  %v12191_v0 = vpop.f32.mrf.mxu3 }
 0x482   : > { %v6249_v11 = vpop.eup %6248  ;;  %v3897_v22 = vsub.f32 1.0, %v3896_v41  ;;  %6252 = vrcp.f32 %v12121_v18  ;;  %v5413_v43 = vmul.f32 -1.442695, %v12125_v23  ;;  %vm12148_vm10 = vcmp.eq.f32.partialorder %v3874_v58, 8.507059e+37  ;;  %vm12166_vm14 = vmor %vm3855_vm6, %vm3856_vm0 }
 0x483   : > { %v3877_v8 = vor.u32 1.1754944e-38, %v3876_v9  ;;  %v3891_v24 = vand.u32 2147483648, %v11965_v7  ;;  %v12155_v46 = vadd.f32 %v11873_v20, %v7150_v30  ;;  %v12160_v61 = vmul.f32 %v3848_v5, %v11628_v47  ;;  %v13922_v20 = vld [vmem:[#allocation29_spill] sm:$0xff]  ;;  %v12186_v5 = vld [vmem:[%s13003_s6] ss:$0 sm:$0xff] }
 0x484   : > { %v3889_v26 = vand.u32 2147483647, %v11965_v7  ;;  %v3904_v1 = vand.u32 2147483647, %v11971_v4  ;;  %v4284_v41 = vpack.c.bf16 %v13922_v20, %v13921_v60  ;;  %v3858_v47 = vsel %vm12166_vm14, %v11973_v59, %v3854_v34 }
 0x485   : > { %v12174_v58 = vpop.eup %6250  ;;  %v3869_v9 = vadd.f32 %v12030_v33, %v3868_v56  ;;  %vm3871_vm8 = vweird.f32 %v12030_v33  ;;  %v12181_v37 = vadd.f32 1.0, %v6249_v11  ;;  %v3883_v53 = vmul.f32 %v12080_v55, %v3882_v39 }
 0x486   : > { %vm3885_vm12 = vweird.f32 %v11965_v7  ;;  %v3898_v60 = vmul.f32 %v12091_v40, %v3897_v22  ;;  %6254 = vpow2.f32 %v5413_v43  ;;  %4625 = vmatmul.bf16.gmra.mxu0 %v4284_v41  ;;  %v13923_v59 = vpack.c.bf16 %v13857_v12, %v13856_v63  ;;  %v13925_v22 = vld [vmem:[#allocation30_spill] sm:$0xff]  ;;  %v13926_v43 = vld [vmem:[#allocation85_spill] sm:$0xff]  ;;  %vm12213_vm15 = vmor %vm3870_vm7, %vm3871_vm8 }
 0x487   : > { %v3892_v34 = vor.u32 1.1754944e-38, %v3891_v24  ;;  %vm3900_vm13 = vweird.f32 %v11971_v4  ;;  %v3906_v56 = vand.u32 2147483648, %v11971_v4  ;;  %v5414_v11 = vmul.f32 -1.442695, %v12155_v46  ;;  %v13935_v24 = vld [vmem:[#allocation22_spill] sm:$0xff] }
 0x488   : > { %4714 = vmatmul.bf16.gmra.mxu1 %v13923_v59  ;;  %v13924_v39 = vpack.c.bf16 %v13866_v35, %v13865_v16  ;;  %v13927_v20 = vpack.c.bf16 %v13925_v22, %v13926_v43  ;;  %v12205_v41 = vpop.eup %6252  ;;  %v3863_v63 = vsel %vm12136_vm9, %v3862_v28, %v3858_v47  ;;  %vm12217_vm2 = vcmp.eq.f32.partialorder %v3889_v26, 8.507059e+37  ;;  %v13934_v28 = vld [vmem:[#allocation23_spill] sm:$0xff]  ;;  %v4583_v22 = vpop.f32.mrf.mxu0 }
 0x489   : > { %vm12221_vm3 = vcmp.eq.f32.partialorder %v3904_v1, 8.507059e+37  ;;  %v3911_v42 = vmul.f32 %v12174_v58, %v12103_v45  ;;  %v12229_v47 = vadd.f32 %v13935_v24, %v13934_v28  ;;  %v3873_v31 = vsel %vm12213_vm15, %v12030_v33, %v3869_v9  ;;  %v4672_v43 = vpop.f32.mrf.mxu1  ;;  %v4761_v12 = vpop.f32.mrf.mxu2 }
 0x48a   : > { %4803 = vmatmul.bf16.gmra.mxu2 %v13924_v39  ;;  %4892 = vmatmul.bf16.gmra.mxu3 %v13927_v20  ;;  %vm3886_vm4 = vweird.f32 %v12080_v55  ;;  %6256 = vrcp.f32 %v12181_v37  ;;  %v4582_v26 = vadd.f32 %v12186_v5, %v4581_v10  ;;  %v3884_v1 = vadd.f32 %v12080_v55, %v3883_v53  ;;  %v13937_v20 = vld [vmem:[#allocation21_spill] sm:$0xff] }
 0x48b   : > { %13936 = vst [vmem:[#allocation41_spill] sm:$0xff] %v12229_v47  ;;  %v3899_v59 = vadd.f32 %v12091_v40, %v3898_v60  ;;  %vm3901_vm5 = vweird.f32 %v12091_v40  ;;  %v3921_v39 = vand.u32 2147483648, %v12103_v45  ;;  %v12242_v24 = vmul.f32 %v3863_v63, %v13937_v20  ;;  %vm12252_vm11 = vmor %vm3885_vm12, %vm3886_vm4 }
 0x48c   : > { %v3907_v33 = vor.u32 1.1754944e-38, %v3906_v56  ;;  %v3926_v9 = vmul.f32 %v12205_v41, %v12121_v18  ;;  %6258 = vpow2.f32 %v5414_v11  ;;  %v6255_v10 = vpop.eup %6254  ;;  %v3878_v53 = vsel %vm12148_vm10, %v3877_v8, %v3873_v31  ;;  %vm12262_vm1 = vmor %vm3900_vm13, %vm3901_vm5 }
 0x48d   : > { %v3912_v63 = vsub.f32 1.0, %v3911_v42  ;;  %v3936_v56 = vand.u32 2147483648, %v12121_v18  ;;  %v5415_v20 = vmul.f32 -1.442695, %v12229_v47  ;;  %v3919_v8 = vand.u32 2147483647, %v12103_v45  ;;  %v4850_v47 = vpop.f32.mrf.mxu3 }
 0x48e   : > { %v3934_v7 = vand.u32 2147483647, %v12121_v18  ;;  %v4671_v11 = vadd.f32 %v4670_v49, %v4582_v26  ;;  %v4584_v31 = vadd.f32 %v12186_v5, %v4583_v22  ;;  %v3888_v42 = vsel %vm12252_vm11, %v12080_v55, %v3884_v1  ;;  %v13943_v26 = vld [vmem:[#allocation67_spill] sm:$0xff] }
 0x48f   : > { %v3903_v27 = vsel %vm12262_vm1, %v12091_v40, %v3899_v59  ;;  %vm3915_vm6 = vweird.f32 %v12103_v45  ;;  %v12276_v4 = vor.u32 1.1754944e-38, %v3921_v39  ;;  %v12280_v52 = vadd.f32 %v11940_v2, %v7140_v15 }
 0x490   : > { %v12282_v49 = vpop.eup %6256  ;;  %v12285_v22 = vmul.f32 %v3878_v53, %v13943_v26  ;;  %v3927_v60 = vsub.f32 1.0, %v3926_v9  ;;  %v12287_v55 = vadd.f32 1.0, %v6255_v10  ;;  %v4760_v1 = vadd.f32 %v12157_v38, %v4671_v11  ;;  %v4586_v50 = vpop.f32.mrf.mxu0  ;;  %v13953_v9 = vld [vmem:[#allocation24_spill] sm:$0xff] }
 0x491   : > { %13942 = vst [vmem:[#allocation80_spill] sm:$0xff] %v12280_v52  ;;  %v3913_v40 = vmul.f32 %v12174_v58, %v3912_v63  ;;  %vm3916_vm9 = vweird.f32 %v12174_v58  ;;  %v12292_v59 = vor.u32 1.1754944e-38, %v3936_v56  ;;  %6260 = vpow2.f32 %v5415_v20  ;;  %v4675_v35 = vpop.f32.mrf.mxu1 }
 0x492   : > { %v6259_v2 = vpop.eup %6258  ;;  %v3893_v39 = vsel %vm12217_vm2, %v3892_v34, %v3888_v42  ;;  %v3908_v53 = vsel %vm12221_vm3, %v3907_v33, %v3903_v27  ;;  %vm3930_vm7 = vweird.f32 %v12121_v18  ;;  %v4673_v10 = vadd.f32 %v4672_v43, %v4584_v31  ;;  %v4764_v33 = vpop.f32.mrf.mxu2  ;;  %v13948_v42 = vld [vmem:[#allocation25_spill] sm:$0xff]  ;;  %vm12339_vm8 = vmor %vm3915_vm6, %vm3916_vm9 }
 0x493   : > { %v3941_v38 = vmul.f32 %v12282_v49, %v12181_v37  ;;  %v3951_v63 = vand.u32 2147483648, %v12181_v37  ;;  %v5416_v56 = vmul.f32 -1.442695, %v12280_v52  ;;  %v4849_v20 = vadd.f32 %v12191_v0, %v4760_v1  ;;  %v13949_v1 = vld [vmem:[#allocation73_spill] sm:$0xff] }
 0x494   : > { %vm12305_vm0 = vcmp.eq.f32.partialorder %v3919_v8, 8.507059e+37  ;;  %v3928_v27 = vmul.f32 %v12205_v41, %v3927_v60  ;;  %6262 = vrcp.f32 %v12287_v55  ;;  %v4762_v16 = vadd.f32 %v4761_v12, %v4673_v10  ;;  %v13947_v8 = vld [vmem:[#allocation35_spill] sm:$0xff]  ;;  %v6315_v34 = vld [vmem:[%s6745_s18 + $0x10] sm:$0xff] }
 0x495   : > { %v4587_v43 = vadd.f32 %v12186_v5, %v4586_v50  ;;  %v3914_v11 = vadd.f32 %v12174_v58, %v3913_v40  ;;  %v12313_v31 = vadd.f32 1.0, %v6259_v2  ;;  %v12317_v0 = vadd.f32 %v11942_v44, %v7142_v21 }
 0x496   : > { %v4288_v26 = vpack.c.bf16 %v13948_v42, %v13947_v8  ;;  %v12322_v60 = vmul.f32 %v3893_v39, %v13949_v1  ;;  %vm12324_vm10 = vcmp.eq.f32.partialorder %v3934_v7, 8.507059e+37  ;;  %v4928_v10 = vmul.f32 0.5, %v4849_v20  ;;  %v4853_v8 = vpop.f32.mrf.mxu3  ;;  %v13954_v42 = vld [vmem:[#allocation42_spill] sm:$0xff]  ;;  %v13955_v39 = vld [vmem:[#allocation31_spill] sm:$0xff]  ;;  %v13959_v20 = vld [vmem:[#allocation32_spill] sm:$0xff] }
 0x497   : > { %13946 = vst [vmem:[#allocation77_spill] sm:$0xff] %v12317_v0  ;;  %v4851_v50 = vadd.f32 %v4850_v47, %v4762_v16  ;;  %v4676_v40 = vadd.f32 %v4675_v35, %v4587_v43  ;;  %v6261_v2 = vpop.eup %6260  ;;  %v12329_v52 = vmul.f32 %v3908_v53, %v13953_v9  ;;  %vm3931_vm14 = vweird.f32 %v12205_v41  ;;  %v6313_v53 = vld [vmem:[%s6745_s18] sm:$0xff] }
 0x498   : > { %13950 = vst [vmem:[#allocation17_spill] sm:$0xff] %v12322_v60  ;;  %v3942_v44 = vsub.f32 1.0, %v3941_v38  ;;  %6264 = vpow2.f32 %v5416_v56  ;;  %4630 = vmatmul.bf16.gmra.mxu0 %v4288_v26  ;;  %v13956_v1 = vpack.c.bf16 %v13954_v42, %v13955_v39  ;;  %v3929_v7 = vadd.f32 %v12205_v41, %v3928_v27  ;;  %vm12375_vm13 = vmor %vm3930_vm7, %vm3931_vm14  ;;  %v13967_v42 = vld [vmem:[#allocation44_spill] sm:$0xff]  ;;  %v13968_v39 = vld [vmem:[#allocation46_spill] sm:$0xff] }
 0x499   : > { %v4960_v9 = vadd.f32 %v6313_v53, %v4928_v10  ;;  %v4929_v38 = vmul.f32 0.5, %v4851_v50  ;;  %v4765_v56 = vadd.f32 %v4764_v33, %v4676_v40  ;;  %v13960_v35 = vpack.c.bf16 %v11274_v6, %v13959_v20 }
 0x49a   : > { %4719 = vmatmul.bf16.gmra.mxu1 %v13956_v1  ;;  %v13961_v16 = vpack.c.bf16 %v13904_v54, %v13903_v32  ;;  %v3918_v45 = vsel %vm12339_vm8, %v12174_v58, %v3914_v11  ;;  %vm3945_vm12 = vweird.f32 %v12181_v37  ;;  %v12355_v27 = vor.u32 1.1754944e-38, %v3951_v63  ;;  %v12359_v33 = vpop.eup %6262  ;;  %v6314_v32 = vld [vmem:[%s6745_s18 + $0x8] sm:$0xff]  ;;  %v13962_v11 = vld [vmem:[#allocation27_spill] sm:$0xff]  ;;  %v4766_v53 = vpop.f32.mrf.mxu2 }
 0x49b   : > { %4808 = vmatmul.bf16.gmra.mxu2 %v13960_v35  ;;  %6266 = vrcp.f32 %v12313_v31  ;;  %v5417_v43 = vmul.f32 -1.442695, %v12317_v0  ;;  %v12361_v6 = vadd.f32 1.0, %v6261_v2  ;;  %4992 = vst [vmem:[%s12365_s30] sm:$0xff] %v4960_v9  ;;  %v4961_v54 = vadd.f32 %v6314_v32, %v4929_v38  ;;  %v13963_v63 = vld [vmem:[#allocation45_spill] sm:$0xff]  ;;  %v4588_v2 = vpop.f32.mrf.mxu0  ;;  %v13969_v9 = vld [vmem:[#allocation39_spill] sm:$0xff]  ;;  %v13970_v38 = vld [vmem:[#allocation50_spill] sm:$0xff] }
 0x49c   : > { %4897 = vmatmul.bf16.gmra.mxu3 %v13961_v16  ;;  %v4854_v58 = vadd.f32 %v4853_v8, %v4765_v56  ;;  %v4293_v26 = vpack.c.bf16 %v13963_v63, %v13962_v11  ;;  %v3943_v50 = vmul.f32 %v12282_v49, %v3942_v44  ;;  %vm3946_vm15 = vweird.f32 %v12282_v49  ;;  %v4677_v8 = vpop.f32.mrf.mxu1  ;;  %v13985_v11 = vld [vmem:[#allocation59_spill] sm:$0xff] }
 0x49d   : > { %v12383_v40 = vadd.f32 %v11967_v57, %v7150_v30  ;;  %v4294_v1 = vpack.c.bf16 %v13968_v39, %v13967_v42  ;;  %v3933_v18 = vsel %vm12375_vm13, %v12205_v41, %v3929_v7  ;;  %4993 = vst [vmem:[%s12365_s30 + $0x8] sm:$0xff] %v4961_v54  ;;  %v4589_v44 = vadd.f32 %v12186_v5, %v4588_v2  ;;  %vm12449_vm3 = vmor %vm3945_vm12, %vm3946_vm15  ;;  %v6320_v0 = vld [vmem:[%s6745_s18 + $0x38] sm:$0xff] }
 0x49e   : > { %v4930_v47 = vmul.f32 0.5, %v4854_v58  ;;  %v6265_v57 = vpop.eup %6264  ;;  %v3923_v20 = vsel %vm12305_vm0, %v12276_v4, %v3918_v45  ;;  %v3956_v35 = vmul.f32 %v12359_v33, %v12287_v55  ;;  %6268 = vpow2.f32 %v5417_v43  ;;  %v4855_v2 = vpop.f32.mrf.mxu3 }
 0x49f   : > { %13966 = vst [vmem:[#allocation37_spill] sm:$0xff] %v12383_v40  ;;  %v12401_v41 = vadd.f32 %v12019_v13, %v13934_v28  ;;  %v13972_v7 = vand.u32 2147483647, %v12181_v37  ;;  %6270 = vrcp.f32 %v12361_v6  ;;  %v12412_v4 = vadd.f32 %v12064_v19, %v7140_v15 }
 0x4a0   : > { %v4962_v45 = vadd.f32 %v6315_v34, %v4930_v47  ;;  %v4678_v43 = vadd.f32 %v4677_v8, %v4589_v44  ;;  %v3938_v13 = vsel %vm12324_vm10, %v12292_v59, %v3933_v18  ;;  %v3944_v54 = vadd.f32 %v12282_v49, %v3943_v50  ;;  %v13975_v59 = vld [vmem:[#allocation56_spill] sm:$0xff] }
 0x4a1   : > { %13971 = vst [vmem:[#allocation68_spill] sm:$0xff] %v12401_v41  ;;  %vm12405_vm2 = vcmp.eq.f32.partialorder %v13972_v7, 8.507059e+37  ;;  %v12415_v32 = vpop.eup %6266  ;;  %v5418_v58 = vmul.f32 -1.442695, %v12383_v40  ;;  %v12424_v10 = vadd.f32 %v12066_v36, %v7142_v21  ;;  %v3964_v15 = vand.u32 2147483647, %v12287_v55 }
 0x4a2   : > { %v12427_v19 = vadd.f32 1.0, %v6265_v57  ;;  %v12431_v8 = vadd.f32 %v12089_v17, %v7150_v30  ;;  %4994 = vst [vmem:[%s12365_s30 + $0x10] sm:$0xff] %v4962_v45  ;;  %v4767_v12 = vadd.f32 %v4766_v53, %v4678_v43  ;;  %v12435_v18 = vmul.f32 %v3923_v20, %v13975_v59  ;;  %v4769_v45 = vpop.f32.mrf.mxu2  ;;  %v6316_v59 = vld [vmem:[%s6745_s18 + $0x18] sm:$0xff] }
 0x4a3   : > { %v3957_v50 = vsub.f32 1.0, %v3956_v35  ;;  %v5419_v47 = vmul.f32 -1.442695, %v12401_v41  ;;  %v12440_v21 = vadd.f32 %v12127_v51, %v13934_v28  ;;  %v12443_v36 = vmul.f32 %v3938_v13, %v11910_v3  ;;  %v4591_v28 = vpop.f32.mrf.mxu0  ;;  %v14011_v40 = vld [vmem:[#allocation79_spill] sm:$0xff] }
 0x4a4   : > { %v3966_v17 = vand.u32 2147483648, %v12287_v55  ;;  %v5420_v44 = vmul.f32 -1.442695, %v12412_v4  ;;  %v4856_v53 = vadd.f32 %v4855_v2, %v4767_v12  ;;  %v6269_v57 = vpop.eup %6268  ;;  %v3948_v51 = vsel %vm12449_vm3, %v12282_v49, %v3944_v54  ;;  %v4680_v20 = vpop.f32.mrf.mxu1  ;;  %v13979_v54 = vld [vmem:[#allocation43_spill] sm:$0xff] }
 0x4a5   : > { %13976 = vst [vmem:[#allocation64_spill] sm:$0xff] %v12440_v21  ;;  %v3971_v3 = vmul.f32 %v12415_v32, %v12313_v31  ;;  %6272 = vpow2.f32 %v5418_v58  ;;  %v5421_v37 = vmul.f32 -1.442695, %v12424_v10  ;;  %v12461_v35 = vpop.eup %6270  ;;  %vm3960_vm4 = vweird.f32 %v12287_v55  ;;  %v13980_v58 = vld [vmem:[#allocation19_spill] sm:$0xff] }
 0x4a6   : > { %6274 = vrcp.f32 %v12427_v19  ;;  %v5422_v7 = vmul.f32 -1.442695, %v12431_v8  ;;  %v4931_v34 = vmul.f32 0.5, %v4856_v53  ;;  %v4592_v49 = vadd.f32 %v12186_v5, %v4591_v28 }
 0x4a7   : > { %v3958_v43 = vmul.f32 %v12359_v33, %v3957_v50  ;;  %6276 = vpow2.f32 %v5419_v47  ;;  %v5423_v13 = vmul.f32 -1.442695, %v12440_v21  ;;  %v4292_v2 = vpack.c.bf16 %v13980_v58, %v13979_v54  ;;  %v4858_v47 = vpop.f32.mrf.mxu3 }
 0x4a8   : > { %v12471_v12 = vadd.f32 1.0, %v6269_v57  ;;  %6278 = vpow2.f32 %v5420_v44  ;;  %v4963_v30 = vadd.f32 %v6316_v59, %v4931_v34  ;;  %v4681_v56 = vadd.f32 %v4680_v20, %v4592_v49  ;;  %v13984_v57 = vld [vmem:[#allocation58_spill] sm:$0xff]  ;;  %v13988_v20 = vld [vmem:[#allocation55_spill] sm:$0xff] }
 0x4a9   : > { %v3953_v53 = vsel %vm12405_vm2, %v12355_v27, %v3948_v51  ;;  %v3972_v28 = vsub.f32 1.0, %v3971_v3  ;;  %v3986_v50 = vmul.f32 %v12461_v35, %v12361_v6  ;;  %6280 = vpow2.f32 %v5421_v37  ;;  %4635 = vmatmul.bf16.gmra.mxu0 %v4292_v2  ;;  %v13986_v51 = vld [vmem:[#allocation62_spill] sm:$0xff]  ;;  %v13987_v3 = vld [vmem:[#allocation60_spill] sm:$0xff] }
 0x4aa   : > { %4724 = vmatmul.bf16.gmra.mxu1 %v4293_v26  ;;  %vm3961_vm5 = vweird.f32 %v12359_v33  ;;  %vm12483_vm11 = vcmp.eq.f32.partialorder %v3964_v15, 8.507059e+37  ;;  %6282 = vpow2.f32 %v5422_v7  ;;  %4995 = vst [vmem:[%s12365_s30 + $0x18] sm:$0xff] %v4963_v30  ;;  %v4770_v27 = vadd.f32 %v4769_v45, %v4681_v56  ;;  %v4771_v30 = vpop.f32.mrf.mxu2 }
 0x4ab   : > { %4813 = vmatmul.bf16.gmra.mxu2 %v4294_v1  ;;  %v13983_v16 = vpack.c.bf16 %v13970_v38, %v13969_v9  ;;  %v6273_v26 = vpop.eup %6272  ;;  %v3981_v15 = vand.u32 2147483648, %v12313_v31  ;;  %6284 = vpow2.f32 %v5423_v13  ;;  %v3959_v42 = vadd.f32 %v12359_v33, %v3958_v43  ;;  %v4593_v45 = vpop.f32.mrf.mxu0  ;;  %vm12518_vm6 = vmor %vm3960_vm4, %vm3961_vm5 }
 0x4ac   : > { %v12501_v7 = vpop.eup %6274  ;;  %v3979_v39 = vand.u32 2147483647, %v12313_v31  ;;  %6286 = vrcp.f32 %v12471_v12  ;;  %v4859_v1 = vadd.f32 %v4858_v47, %v4770_v27  ;;  %v3967_v38 = vor.u32 1.1754944e-38, %v3966_v17  ;;  %v4682_v13 = vpop.f32.mrf.mxu1 }
 0x4ad   : > { %4902 = vmatmul.bf16.gmra.mxu3 %v13983_v16  ;;  %v6277_v9 = vpop.eup %6276  ;;  %v3973_v34 = vmul.f32 %v12415_v32, %v3972_v28  ;;  %vm3975_vm1 = vweird.f32 %v12313_v31  ;;  %v3987_v49 = vsub.f32 1.0, %v3986_v50  ;;  %v12509_v58 = vmul.f32 %v3953_v53, %v12017_v48 }
 0x4ae   : > { %v6279_v54 = vpop.eup %6278  ;;  %v12511_v43 = vadd.f32 1.0, %v6273_v26  ;;  %v4932_v2 = vmul.f32 0.5, %v4859_v1  ;;  %v4594_v59 = vadd.f32 %v12186_v5, %v4593_v45  ;;  %v3982_v28 = vor.u32 1.1754944e-38, %v3981_v15  ;;  %v6317_v26 = vld [vmem:[%s6745_s18 + $0x20] sm:$0xff] }
 0x4af   : > { %13989 = vst [vmem:[#allocation69_spill] sm:$0xff] %v12509_v58  ;;  %v6281_v47 = vpop.eup %6280  ;;  %vm3990_vm9 = vweird.f32 %v12361_v6  ;;  %v3994_v48 = vand.u32 2147483647, %v12361_v6  ;;  %v3996_v53 = vand.u32 2147483648, %v12361_v6  ;;  %v3963_v27 = vsel %vm12518_vm6, %v12359_v33, %v3959_v42  ;;  %v4860_v33 = vpop.f32.mrf.mxu3 }
 0x4b0   : > { %v6283_v50 = vpop.eup %6282  ;;  %vm12528_vm7 = vcmp.eq.f32.partialorder %v3979_v39, 8.507059e+37  ;;  %v12532_v55 = vadd.f32 1.0, %v6277_v9  ;;  %v4964_v15 = vadd.f32 %v6317_v26, %v4932_v2  ;;  %v4683_v1 = vadd.f32 %v4682_v13, %v4594_v59 }
 0x4b1   : > { %v6285_v45 = vpop.eup %6284  ;;  %v3974_v56 = vadd.f32 %v12415_v32, %v3973_v34  ;;  %vm3976_vm0 = vweird.f32 %v12415_v32  ;;  %v3988_v37 = vmul.f32 %v12461_v35, %v3987_v49  ;;  %v12538_v63 = vadd.f32 1.0, %v6279_v54 }
 0x4b2   : > { %v12540_v42 = vpop.eup %6286  ;;  %v4001_v39 = vmul.f32 %v12501_v7, %v12427_v19  ;;  %6288 = vrcp.f32 %v12511_v43  ;;  %v12545_v9 = vadd.f32 1.0, %v6281_v47  ;;  %4996 = vst [vmem:[%s12365_s30 + $0x20] sm:$0xff] %v4964_v15  ;;  %v4772_v13 = vadd.f32 %v4771_v30, %v4683_v1  ;;  %vm12555_vm10 = vmor %vm3975_vm1, %vm3976_vm0  ;;  %v4774_v15 = vpop.f32.mrf.mxu2 }
 0x4b3   : > { %v3968_v34 = vsel %vm12483_vm11, %v3967_v38, %v3963_v27  ;;  %v3997_v2 = vor.u32 1.1754944e-38, %v3996_v53  ;;  %v4011_v49 = vand.u32 2147483648, %v12427_v19  ;;  %v12551_v54 = vadd.f32 1.0, %v6283_v50 }
 0x4b4   : > { %vm3991_vm14 = vweird.f32 %v12461_v35  ;;  %vm12560_vm8 = vcmp.eq.f32.partialorder %v3994_v48, 8.507059e+37  ;;  %6290 = vrcp.f32 %v12532_v55  ;;  %v12565_v44 = vadd.f32 1.0, %v6285_v45  ;;  %v4596_v48 = vpop.f32.mrf.mxu0  ;;  %v4685_v53 = vpop.f32.mrf.mxu1 }
 0x4b5   : > { %v4861_v38 = vadd.f32 %v4860_v33, %v4772_v13  ;;  %v3978_v30 = vsel %vm12555_vm10, %v12415_v32, %v3974_v56  ;;  %v3989_v31 = vadd.f32 %v12461_v35, %v3988_v37  ;;  %v4016_v17 = vmul.f32 %v12540_v42, %v12471_v12  ;;  %v13998_v37 = vld [vmem:[#allocation52_spill] sm:$0xff]  ;;  %v13999_v56 = vld [vmem:[#allocation34_spill] sm:$0xff]  ;;  %vm12589_vm12 = vmor %vm3990_vm9, %vm3991_vm14 }
 0x4b6   : > { %6292 = vrcp.f32 %v12538_v63  ;;  %v4002_v50 = vsub.f32 1.0, %v4001_v39  ;;  %v4597_v26 = vadd.f32 %v12186_v5, %v4596_v48  ;;  %v12577_v1 = vmul.f32 %v3968_v34, %v12125_v23  ;;  %v6318_v13 = vld [vmem:[%s6745_s18 + $0x28] sm:$0xff] }
 0x4b7   : > { %6294 = vrcp.f32 %v12545_v9  ;;  %v4933_v27 = vmul.f32 0.5, %v4861_v38  ;;  %v4296_v45 = vpack.c.bf16 %v13999_v56, %v13998_v37  ;;  %vm4005_vm13 = vweird.f32 %v12427_v19  ;;  %v4863_v56 = vpop.f32.mrf.mxu3 }
 0x4b8   : > { %6296 = vrcp.f32 %v12551_v54  ;;  %v12583_v33 = vpop.eup %6288  ;;  %v4026_v23 = vand.u32 2147483648, %v12471_v12  ;;  %v4686_v59 = vadd.f32 %v4685_v53, %v4597_v26  ;;  %v3983_v38 = vsel %vm12528_vm7, %v3982_v28, %v3978_v30 }
 0x4b9   : > { %6298 = vrcp.f32 %v12565_v44  ;;  %v4965_v34 = vadd.f32 %v6318_v13, %v4933_v27  ;;  %v3993_v6 = vsel %vm12589_vm12, %v12461_v35, %v3989_v31  ;;  %v12602_v48 = vor.u32 1.1754944e-38, %v4011_v49  ;;  %4640 = vmatmul.bf16.gmra.mxu0 %v4296_v45 }
 0x4ba   : > { %v4017_v37 = vsub.f32 1.0, %v4016_v17  ;;  %v14002_v32 = vpack.c.bf16 %v13985_v11, %v13984_v57  ;;  %v12607_v41 = vpop.eup %6290  ;;  %v4003_v53 = vmul.f32 %v12501_v7, %v4002_v50  ;;  %v4775_v16 = vadd.f32 %v4774_v15, %v4686_v59  ;;  %v4776_v47 = vpop.f32.mrf.mxu2 }
 0x4bb   : > { %4997 = vst [vmem:[%s12365_s30 + $0x28] sm:$0xff] %v4965_v34  ;;  %v14003_v28 = vpack.c.bf16 %v13987_v3, %v13986_v51  ;;  %v14004_v35 = vpack.c.bf16 %v11976_v62, %v13988_v20  ;;  %vm4020_vm15 = vweird.f32 %v12471_v12  ;;  %v4031_v57 = vmul.f32 %v12583_v33, %v12511_v43 }
 0x4bc   : > { %4729 = vmatmul.bf16.gmra.mxu1 %v14002_v32  ;;  %v12619_v30 = vpop.eup %6292  ;;  %v4041_v11 = vand.u32 2147483648, %v12511_v43  ;;  %vm4006_vm2 = vweird.f32 %v12501_v7  ;;  %v12633_v31 = vor.u32 1.1754944e-38, %v4026_v23  ;;  %v4864_v17 = vadd.f32 %v4863_v56, %v4775_v16  ;;  %v4598_v45 = vpop.f32.mrf.mxu0 }
 0x4bd   : > { %4818 = vmatmul.bf16.gmra.mxu2 %v14003_v28  ;;  %4907 = vmatmul.bf16.gmra.mxu3 %v14004_v35  ;;  %v12629_v62 = vpop.eup %6294  ;;  %v12638_v27 = vmul.f32 %v3983_v38, %v12155_v46  ;;  %v3998_v26 = vsel %vm12560_vm8, %v3997_v2, %v3993_v6  ;;  %v4018_v15 = vmul.f32 %v12540_v42, %v4017_v37  ;;  %v4687_v39 = vpop.f32.mrf.mxu1  ;;  %vm4021_vm3 = vweird.f32 %v12540_v42  ;;  %v14005_v35 = vld [vmem:[#allocation41_spill] sm:$0xff]  ;;  %vm12668_vm4 = vmor %vm4005_vm13, %vm4006_vm2 }
 0x4be   : > { %v12635_v50 = vpop.eup %6296  ;;  %v12647_v23 = vadd.f32 %v12501_v7, %v4003_v53  ;;  %v4046_v34 = vmul.f32 %v12607_v41, %v12532_v55  ;;  %v4934_v46 = vmul.f32 0.5, %v4864_v17  ;;  %v4599_v59 = vadd.f32 %v12186_v5, %v4598_v45  ;;  %v6319_v53 = vld [vmem:[%s6745_s18 + $0x30] sm:$0xff]  ;;  %vm12695_vm1 = vmor %vm4020_vm15, %vm4021_vm3 }
 0x4bf   : > { %v12644_v13 = vpop.eup %6298  ;;  %v4032_v2 = vsub.f32 1.0, %v4031_v57  ;;  %v12653_v38 = vor.u32 1.1754944e-38, %v4041_v11  ;;  %v4056_v6 = vand.u32 2147483648, %v12532_v55  ;;  %v4061_v37 = vmul.f32 %v12619_v30, %v12538_v63 }
 0x4c0   : > { %v4076_v56 = vmul.f32 %v12629_v62, %v12545_v9  ;;  %v4966_v16 = vadd.f32 %v6319_v53, %v4934_v46  ;;  %v4688_v28 = vadd.f32 %v4687_v39, %v4599_v59  ;;  %v12662_v17 = vmul.f32 %v3998_v26, %v14005_v35  ;;  %v4865_v46 = vpop.f32.mrf.mxu3 }
 0x4c1   : > { %v12673_v11 = vadd.f32 %v12540_v42, %v4018_v15  ;;  %v4091_v45 = vmul.f32 %v12635_v50, %v12551_v54  ;;  %v4106_v39 = vmul.f32 %v12644_v13, %v12565_v44  ;;  %v4047_v59 = vsub.f32 1.0, %v4046_v34 }
 0x4c2   : > { %4998 = vst [vmem:[%s12365_s30 + $0x30] sm:$0xff] %v4966_v16  ;;  %v4777_v35 = vadd.f32 %v4776_v47, %v4688_v28  ;;  %v4033_v15 = vmul.f32 %v12583_v33, %v4032_v2  ;;  %vm4035_vm5 = vweird.f32 %v12511_v43  ;;  %vm4036_vm11 = vweird.f32 %v12583_v33 }
 0x4c3   : > { %v12688_v32 = vor.u32 1.1754944e-38, %v4056_v6  ;;  %v4071_v20 = vand.u32 2147483648, %v12538_v63  ;;  %v4062_v16 = vsub.f32 1.0, %v4061_v37  ;;  %vm4065_vm6 = vweird.f32 %v12538_v63  ;;  %vm12765_vm15 = vmor %vm4035_vm5, %vm4036_vm11 }
 0x4c4   : > { %v4077_v47 = vsub.f32 1.0, %v4076_v56  ;;  %v4866_v2 = vadd.f32 %v4865_v46, %v4777_v35  ;;  %v4069_v28 = vand.u32 2147483647, %v12538_v63  ;;  %v4092_v26 = vsub.f32 1.0, %v4091_v45  ;;  %v4601_v3 = vpop.f32.mrf.mxu0  ;;  %v4779_v46 = vpop.f32.mrf.mxu2  ;;  %v14010_v45 = vld [vmem:[#allocation16_spill] sm:$0xff] }
 0x4c5   : > { %v4107_v53 = vsub.f32 1.0, %v4106_v39  ;;  %v4690_v51 = vpop.f32.mrf.mxu1  ;;  %v4048_v49 = vmul.f32 %v12607_v41, %v4047_v59  ;;  %v4602_v56 = vadd.f32 %v12186_v5, %v4601_v3  ;;  %v12709_v35 = vadd.f32 %v12583_v33, %v4033_v15 }
 0x4c6   : > { %v4935_v37 = vmul.f32 0.5, %v4866_v2  ;;  %vm4066_vm7 = vweird.f32 %v12619_v30  ;;  %v12712_v6 = vor.u32 1.1754944e-38, %v4071_v20  ;;  %v4300_v39 = vpack.c.bf16 %v14011_v40, %v14010_v45 }
 0x4c7   : > { %v4063_v59 = vmul.f32 %v12619_v30, %v4062_v16  ;;  %v4078_v2 = vmul.f32 %v12629_v62, %v4077_v47  ;;  %v4691_v58 = vadd.f32 %v4690_v51, %v4602_v56  ;;  %vm4080_vm10 = vweird.f32 %v12545_v9  ;;  %vm12782_vm5 = vmor %vm4065_vm6, %vm4066_vm7 }
 0x4c8   : > { %v4967_v3 = vadd.f32 %v6320_v0, %v4935_v37  ;;  %v4084_v15 = vand.u32 2147483647, %v12545_v9  ;;  %v4093_v20 = vmul.f32 %v12635_v50, %v4092_v26  ;;  %v4108_v60 = vmul.f32 %v12644_v13, %v4107_v53  ;;  %v4868_v21 = vpop.f32.mrf.mxu3 }
 0x4c9   : > { %4645 = vmatmul.bf16.gmra.mxu0 %v4300_v39  ;;  %v14012_v40 = vpack.c.bf16 %v12160_v61, %v12083_v29  ;;  %v12728_v16 = vadd.f32 %v12607_v41, %v4048_v49  ;;  %vm12730_vm14 = vcmp.eq.f32.partialorder %v4069_v28, 8.507059e+37  ;;  %v4780_v51 = vadd.f32 %v4779_v46, %v4691_v58  ;;  %v14045_v28 = vld [vmem:[#allocation69_spill] sm:$0xff] }
 0x4ca   : > { %4999 = vst [vmem:[%s12365_s30 + $0x38] sm:$0xff] %v4967_v3  ;;  %v14015_v26 = vpack.c.bf16 %v12242_v24, %v12094_v25  ;;  %v14016_v53 = vpack.c.bf16 %v12285_v22, %v12097_v14  ;;  %v4305_v29 = vpack.c.bf16 %v12577_v1, %v12329_v52  ;;  %vm4081_vm8 = vweird.f32 %v12629_v62 }
 0x4cb   : > { %v4086_v61 = vand.u32 2147483648, %v12545_v9  ;;  %v4306_v49 = vpack.c.bf16 %v12638_v27, %v12435_v18  ;;  %v4307_v58 = vpack.c.bf16 %v12662_v17, %v12443_v36  ;;  %v14017_v25 = vand.u32 2147483647, %v12427_v19  ;;  %vm12794_vm9 = vmor %vm4080_vm10, %vm4081_vm8 }
 0x4cc   : > { %4734 = vmatmul.bf16.gmra.mxu1 %v14012_v40  ;;  %v14020_v14 = vand.u32 2147483647, %v12471_v12  ;;  %v14025_v19 = vand.u32 2147483647, %v12511_v43  ;;  %v4064_v12 = vadd.f32 %v12619_v30, %v4063_v59  ;;  %v4079_v37 = vadd.f32 %v12629_v62, %v4078_v2  ;;  %v4603_v39 = vpop.f32.mrf.mxu0 }
 0x4cd   : > { %4823 = vmatmul.bf16.gmra.mxu2 %v14015_v26  ;;  %4912 = vmatmul.bf16.gmra.mxu3 %v14016_v53  ;;  %vm12751_vm12 = vcmp.eq.f32.partialorder %v14017_v25, 8.507059e+37  ;;  %vm4096_vm3 = vweird.f32 %v12635_v50  ;;  %v4869_v56 = vadd.f32 %v4868_v21, %v4780_v51  ;;  %v4094_v43 = vadd.f32 %v12635_v50, %v4093_v20  ;;  %v4692_v59 = vpop.f32.mrf.mxu1  ;;  %v4781_v20 = vpop.f32.mrf.mxu2  ;;  %v14046_v21 = vld [vmem:[#allocation80_spill] sm:$0xff] }
 0x4ce   : > { %vm12757_vm13 = vcmp.eq.f32.partialorder %v14020_v14, 8.507059e+37  ;;  %vm12771_vm2 = vcmp.eq.f32.partialorder %v14025_v19, 8.507059e+37  ;;  %vm4095_vm11 = vweird.f32 %v12551_v54  ;;  %v4109_v45 = vadd.f32 %v12644_v13, %v4108_v60 }
 0x4cf   : > { %vm4111_vm0 = vweird.f32 %v12644_v13  ;;  %v4101_v63 = vand.u32 2147483648, %v12551_v54  ;;  %v4116_v2 = vand.u32 2147483648, %v12565_v44  ;;  %v4936_v3 = vmul.f32 0.5, %v4869_v56  ;;  %vm12807_vm6 = vmor %vm4095_vm11, %vm4096_vm3 }
 0x4d0   : > { %v4604_v60 = vadd.f32 %v12186_v5, %v4603_v39  ;;  %v4038_v40 = vsel %vm12765_vm15, %v12583_v33, %v12709_v35  ;;  %v4099_v51 = vand.u32 2147483647, %v12551_v54  ;;  %vm4110_vm7 = vweird.f32 %v12565_v44  ;;  %v6321_v54 = vld [vmem:[%s6745_s18 + $0x40] sm:$0xff]  ;;  %v4870_v19 = vpop.f32.mrf.mxu3 }
 0x4d1   : > { %v4114_v26 = vand.u32 2147483647, %v12565_v44  ;;  %v4068_v53 = vsel %vm12782_vm5, %v12619_v30, %v4064_v12  ;;  %v4083_v33 = vsel %vm12794_vm9, %v12629_v62, %v4079_v37  ;;  %vm12822_vm10 = vmor %vm4110_vm7, %vm4111_vm0  ;;  %v4968_v25 = vadd.f32 %v6321_v54, %v4936_v3  ;;  %v6322_v3 = vld [vmem:[%s6745_s18 + $0x48] sm:$0xff]  ;;  %v6323_v44 = vld [vmem:[%s6745_s18 + $0x50] sm:$0xff] }
 0x4d2   : > { %v4693_v14 = vadd.f32 %v4692_v59, %v4604_v60  ;;  %vm14036_vm8 = vweird.f32 %v12607_v41  ;;  %vm14037_vm15 = vweird.f32 %v12532_v55  ;;  %vm4085_vm5 = vcmp.eq.f32.partialorder %v4084_v15, 8.507059e+37  ;;  %v14044_v59 = vld [vmem:[#allocation17_spill] sm:$0xff] }
 0x4d3   : > { %vm12831_vm3 = vmor %vm14037_vm15, %vm14036_vm8  ;;  %v4087_v30 = vor.u32 1.1754944e-38, %v4086_v61  ;;  %v4098_v62 = vsel %vm12807_vm6, %v12635_v50, %v4094_v43  ;;  %v4113_v47 = vsel %vm12822_vm10, %v12644_v13, %v4109_v45  ;;  %v4102_v37 = vor.u32 1.1754944e-38, %v4101_v63  ;;  %5000 = vst [vmem:[%s12365_s30 + $0x40] sm:$0xff] %v4968_v25  ;;  %v14047_v63 = vld [vmem:[#allocation77_spill] sm:$0xff] }
 0x4d4   : > { %v4053_v12 = vsel %vm12831_vm3, %v12607_v41, %v12728_v16  ;;  %v4117_v56 = vor.u32 1.1754944e-38, %v4116_v2  ;;  %v4782_v46 = vadd.f32 %v4781_v20, %v4693_v14  ;;  %v4073_v15 = vsel %vm12730_vm14, %v12712_v6, %v4068_v53 }
 0x4d5   : > { %v4088_v61 = vsel %vm4085_vm5, %v4087_v30, %v4083_v33  ;;  %vm4100_vm9 = vcmp.eq.f32.partialorder %v4099_v51, 8.507059e+37  ;;  %vm4115_vm0 = vcmp.eq.f32.partialorder %v4114_v26, 8.507059e+37  ;;  %v14040_v50 = vand.u32 2147483647, %v12532_v55  ;;  %v4695_v0 = vpop.f32.mrf.mxu1 }
 0x4d6   : > { %v4103_v13 = vsel %vm4100_vm9, %v4102_v37, %v4098_v62  ;;  %v4118_v43 = vsel %vm4115_vm0, %v4117_v56, %v4113_v47  ;;  %v4871_v45 = vadd.f32 %v4870_v19, %v4782_v46  ;;  %v14041_v41 = vsel %vm12668_vm4, %v12501_v7, %v12647_v23  ;;  %v4606_v23 = vpop.f32.mrf.mxu0 }
 0x4d7   : > { %vm4055_vm11 = vcmp.eq.f32.partialorder %v14040_v50, 8.507059e+37  ;;  %v4013_v16 = vsel %vm12751_vm12, %v12602_v48, %v14041_v41  ;;  %v14042_v6 = vsel %vm12695_vm1, %v12540_v42, %v12673_v11  ;;  %v4043_v57 = vsel %vm12771_vm2, %v12653_v38, %v4038_v40  ;;  %v4784_v11 = vpop.f32.mrf.mxu2  ;;  %v14049_v40 = vld [vmem:[#allocation68_spill] sm:$0xff] }
 0x4d8   : > { %v4028_v55 = vsel %vm12757_vm13, %v12633_v31, %v14042_v6  ;;  %v4058_v7 = vsel %vm4055_vm11, %v12688_v32, %v4053_v12  ;;  %v4244_v48 = vmul.f32 %v4073_v15, %v12412_v4  ;;  %v4245_v34 = vmul.f32 %v4088_v61, %v12424_v10  ;;  %v14043_v31 = vld [vmem:[#allocation64_spill] sm:$0xff]  ;;  %v14048_v10 = vld [vmem:[#allocation37_spill] sm:$0xff]  ;;  %v4873_v51 = vpop.f32.mrf.mxu3  ;;  %v6324_v12 = vld [vmem:[%s6745_s18 + $0x58] sm:$0xff] }
 0x4d9   : > { %v4937_v24 = vmul.f32 0.5, %v4871_v45  ;;  %v4607_v42 = vadd.f32 %v12186_v5, %v4606_v23  ;;  %v4246_v22 = vmul.f32 %v4103_v13, %v12431_v8  ;;  %v4247_v39 = vmul.f32 %v4118_v43, %v14043_v31 }
 0x4da   : > { %v4304_v38 = vpack.c.bf16 %v14045_v28, %v14044_v59  ;;  %v4240_v32 = vmul.f32 %v4013_v16, %v14046_v21  ;;  %v4241_v2 = vmul.f32 %v4028_v55, %v14047_v63  ;;  %v4242_v20 = vmul.f32 %v4043_v57, %v14048_v10  ;;  %v6325_v16 = vld [vmem:[%s6745_s18 + $0x60] sm:$0xff] }
 0x4db   : > { %v4969_v4 = vadd.f32 %v6322_v3, %v4937_v24  ;;  %v4696_v60 = vadd.f32 %v4695_v0, %v4607_v42  ;;  %v4243_v9 = vmul.f32 %v4058_v7, %v14049_v40  ;;  %v12908_v63 = vld [vmem:[%s13003_s6] ss:$0 sm:$0xff]  ;;  %v6328_v3 = vld [vmem:[%s6745_s18 + $0x70] sm:$0xff] }
 0x4dc   : > { %4650 = vmatmul.bf16.gmra.mxu0 %v4304_v38  ;;  %4739 = vmatmul.bf16.gmra.mxu1 %v4305_v29  ;;  %v4308_v26 = vpack.c.bf16 %v4244_v48, %v4240_v32  ;;  %v4309_v53 = vpack.c.bf16 %v4245_v34, %v4241_v2  ;;  %v4310_v33 = vpack.c.bf16 %v4246_v22, %v4242_v20 }
 0x4dd   : > { %5001 = vst [vmem:[%s12365_s30 + $0x48] sm:$0xff] %v4969_v4  ;;  %v4785_v8 = vadd.f32 %v4784_v11, %v4696_v60  ;;  %4828 = vmatmul.bf16.gmra.mxu2 %v4306_v49  ;;  %4917 = vmatmul.bf16.gmra.mxu3 %v4307_v58  ;;  %v4311_v35 = vpack.c.bf16 %v4247_v39, %v4243_v9  ;;  %v4697_v52 = vpop.f32.mrf.mxu1  ;;  %v6326_v11 = vld [vmem:[%s6745_s18 + $0x68] sm:$0xff] }
 0x4de   : > { %v4608_v25 = vpop.f32.mrf.mxu0 }
 0x4df   : > { %v4874_v54 = vadd.f32 %v4873_v51, %v4785_v8  ;;  %v4609_v29 = vadd.f32 %v12186_v5, %v4608_v25  ;;  %v4786_v14 = vpop.f32.mrf.mxu2 }
 0x4e0   : > { %v4875_v49 = vpop.f32.mrf.mxu3 }
 0x4e1   : > { %v4938_v1 = vmul.f32 0.5, %v4874_v54  ;;  %v4698_v27 = vadd.f32 %v4697_v52, %v4609_v29 }
 0x4e3   : > { %v4970_v18 = vadd.f32 %v6323_v44, %v4938_v1  ;;  %v4787_v36 = vadd.f32 %v4786_v14, %v4698_v27 }
 0x4e5   : > { %5002 = vst [vmem:[%s12365_s30 + $0x50] sm:$0xff] %v4970_v18  ;;  %v4876_v17 = vadd.f32 %v4875_v49, %v4787_v36  ;;  %v4700_v30 = vpop.f32.mrf.mxu1  ;;  %v6330_v49 = vld [vmem:[%s6745_s18 + $0x80] sm:$0xff] }
 0x4e6   : > { %v4611_v58 = vpop.f32.mrf.mxu0 }
 0x4e7   : > { %v4939_v62 = vmul.f32 0.5, %v4876_v17  ;;  %v4612_v47 = vadd.f32 %v12186_v5, %v4611_v58  ;;  %v4789_v19 = vpop.f32.mrf.mxu2 }
 0x4e8   : > { %v4878_v46 = vpop.f32.mrf.mxu3 }
 0x4e9   : > { %v4971_v37 = vadd.f32 %v6324_v12, %v4939_v62  ;;  %v4701_v56 = vadd.f32 %v4700_v30, %v4612_v47 }
 0x4eb   : > { %5003 = vst [vmem:[%s12365_s30 + $0x58] sm:$0xff] %v4971_v37  ;;  %v4790_v15 = vadd.f32 %v4789_v19, %v4701_v56 }
 0x4ec   : > { %4655 = vmatmul.bf16.gmra.mxu0 %v4308_v26  ;;  %4744 = vmatmul.bf16.gmra.mxu1 %v4309_v53 }
 0x4ed   : > { %4833 = vmatmul.bf16.gmra.mxu2 %v4310_v33  ;;  %4922 = vmatmul.bf16.gmra.mxu3 %v4311_v35  ;;  %v4879_v61 = vadd.f32 %v4878_v46, %v4790_v15  ;;  %v4702_v13 = vpop.f32.mrf.mxu1  ;;  %v6329_v33 = vld [vmem:[%s6745_s18 + $0x78] sm:$0xff]  ;;  %v6331_v46 = vld [vmem:[%s6745_s18 + $0x88] sm:$0xff] }
 0x4ee   : > { %v4613_v50 = vpop.f32.mrf.mxu0 }
 0x4ef   : > { %v4940_v43 = vmul.f32 0.5, %v4879_v61  ;;  %v4614_v45 = vadd.f32 %v12186_v5, %v4613_v50  ;;  %v4791_v41 = vpop.f32.mrf.mxu2 }
 0x4f0   : > { %v4880_v57 = vpop.f32.mrf.mxu3 }
 0x4f1   : > { %v4972_v6 = vadd.f32 %v6325_v16, %v4940_v43  ;;  %v4703_v55 = vadd.f32 %v4702_v13, %v4614_v45 }
 0x4f3   : > { %5004 = vst [vmem:[%s12365_s30 + $0x60] sm:$0xff] %v4972_v6  ;;  %v4792_v7 = vadd.f32 %v4791_v41, %v4703_v55 }
 0x4f5   : > { %v4881_v23 = vadd.f32 %v4880_v57, %v4792_v7  ;;  %v4705_v48 = vpop.f32.mrf.mxu1  ;;  %v6332_v57 = vld [vmem:[%s6745_s18 + $0x90] sm:$0xff] }
 0x4f6   : > { %v4616_v0 = vpop.f32.mrf.mxu0 }
 0x4f7   : > { %v4941_v34 = vmul.f32 0.5, %v4881_v23  ;;  %v4617_v24 = vadd.f32 %v12186_v5, %v4616_v0  ;;  %v4794_v42 = vpop.f32.mrf.mxu2 }
 0x4f8   : > { %v4883_v39 = vpop.f32.mrf.mxu3 }
 0x4f9   : > { %v4973_v22 = vadd.f32 %v6326_v11, %v4941_v34  ;;  %v4706_v31 = vadd.f32 %v4705_v48, %v4617_v24 }
 0x4fb   : > { %5005 = vst [vmem:[%s12365_s30 + $0x68] sm:$0xff] %v4973_v22  ;;  %v4795_v59 = vadd.f32 %v4794_v42, %v4706_v31 }
 0x4fd   : > { %v4884_v28 = vadd.f32 %v4883_v39, %v4795_v59  ;;  %v4707_v21 = vpop.f32.mrf.mxu1  ;;  %v6333_v39 = vld [vmem:[%s6745_s18 + $0x98] sm:$0xff] }
 0x4fe   : > { %v4618_v38 = vpop.f32.mrf.mxu0 }
 0x4ff   : > { %v4942_v32 = vmul.f32 0.5, %v4884_v28  ;;  %v4619_v5 = vadd.f32 %v12908_v63, %v4618_v38  ;;  %v4796_v2 = vpop.f32.mrf.mxu2 }
 0x500   : > { %v4885_v10 = vpop.f32.mrf.mxu3 }
 0x501   : > { %v4974_v4 = vadd.f32 %v6328_v3, %v4942_v32  ;;  %v4708_v60 = vadd.f32 %v4707_v21, %v4619_v5 }
 0x503   : > { %5006 = vst [vmem:[%s12365_s30 + $0x70] sm:$0xff] %v4974_v4  ;;  %v4797_v20 = vadd.f32 %v4796_v2, %v4708_v60 }
 0x505   : > { %v4886_v40 = vadd.f32 %v4885_v10, %v4797_v20  ;;  %v4710_v51 = vpop.f32.mrf.mxu1  ;;  %v6334_v10 = vld [vmem:[%s6745_s18 + $0xa0] sm:$0xff] }
 0x506   : > { %v4621_v9 = vpop.f32.mrf.mxu0 }
 0x507   : > { %v4943_v8 = vmul.f32 0.5, %v4886_v40  ;;  %v4622_v26 = vadd.f32 %v12908_v63, %v4621_v9  ;;  %v4799_v53 = vpop.f32.mrf.mxu2 }
 0x508   : > { %v4888_v25 = vpop.f32.mrf.mxu3 }
 0x509   : > { %v4975_v35 = vadd.f32 %v6329_v33, %v4943_v8  ;;  %v4711_v54 = vadd.f32 %v4710_v51, %v4622_v26 }
 0x50b   : > { %5007 = vst [vmem:[%s12365_s30 + $0x78] sm:$0xff] %v4975_v35  ;;  %v4800_v52 = vadd.f32 %v4799_v53, %v4711_v54 }
 0x50d   : > { %v4889_v1 = vadd.f32 %v4888_v25, %v4800_v52  ;;  %v4712_v14 = vpop.f32.mrf.mxu1  ;;  %v6335_v25 = vld [vmem:[%s6745_s18 + $0xa8] sm:$0xff] }
 0x50e   : > { %v4623_v29 = vpop.f32.mrf.mxu0 }
 0x50f   : > { %v4944_v44 = vmul.f32 0.5, %v4889_v1  ;;  %v4624_v18 = vadd.f32 %v12908_v63, %v4623_v29  ;;  %v4801_v27 = vpop.f32.mrf.mxu2 }
 0x510   : > { %v4890_v58 = vpop.f32.mrf.mxu3 }
 0x511   : > { %v4976_v36 = vadd.f32 %v6330_v49, %v4944_v44  ;;  %v4713_v17 = vadd.f32 %v4712_v14, %v4624_v18 }
 0x513   : > { %5008 = vst [vmem:[%s12365_s30 + $0x80] sm:$0xff] %v4976_v36  ;;  %v4802_v30 = vadd.f32 %v4801_v27, %v4713_v17 }
 0x515   : > { %v4891_v62 = vadd.f32 %v4890_v58, %v4802_v30  ;;  %v4715_v19 = vpop.f32.mrf.mxu1  ;;  %v6336_v58 = vld [vmem:[%s6745_s18 + $0xb0] sm:$0xff] }
 0x516   : > { %v4626_v47 = vpop.f32.mrf.mxu0 }
 0x517   : > { %v4945_v12 = vmul.f32 0.5, %v4891_v62  ;;  %v4627_v37 = vadd.f32 %v12908_v63, %v4626_v47  ;;  %v4804_v56 = vpop.f32.mrf.mxu2 }
 0x518   : > { %v4893_v50 = vpop.f32.mrf.mxu3 }
 0x519   : > { %v4977_v15 = vadd.f32 %v6331_v46, %v4945_v12  ;;  %v4716_v61 = vadd.f32 %v4715_v19, %v4627_v37 }
 0x51b   : > { %5009 = vst [vmem:[%s12365_s30 + $0x88] sm:$0xff] %v4977_v15  ;;  %v4805_v13 = vadd.f32 %v4804_v56, %v4716_v61 }
 0x51d   : > { %v4894_v43 = vadd.f32 %v4893_v50, %v4805_v13  ;;  %v4717_v41 = vpop.f32.mrf.mxu1  ;;  %v6337_v50 = vld [vmem:[%s6745_s18 + $0xb8] sm:$0xff] }
 0x51e   : > { %v4628_v45 = vpop.f32.mrf.mxu0 }
 0x51f   : > { %v4946_v16 = vmul.f32 0.5, %v4894_v43  ;;  %v4629_v6 = vadd.f32 %v12908_v63, %v4628_v45  ;;  %v4806_v55 = vpop.f32.mrf.mxu2 }
 0x520   : > { %v4895_v0 = vpop.f32.mrf.mxu3 }
 0x521   : > { %v4978_v7 = vadd.f32 %v6332_v57, %v4946_v16  ;;  %v4718_v23 = vadd.f32 %v4717_v41, %v4629_v6 }
 0x523   : > { %5010 = vst [vmem:[%s12365_s30 + $0x90] sm:$0xff] %v4978_v7  ;;  %v4807_v48 = vadd.f32 %v4806_v55, %v4718_v23 }
 0x525   : > { %v4896_v34 = vadd.f32 %v4895_v0, %v4807_v48  ;;  %v4720_v42 = vpop.f32.mrf.mxu1  ;;  %v6338_v0 = vld [vmem:[%s6745_s18 + $0xc0] sm:$0xff] }
 0x526   : > { %v4631_v24 = vpop.f32.mrf.mxu0 }
 0x527   : > { %v4947_v11 = vmul.f32 0.5, %v4896_v34  ;;  %v4632_v22 = vadd.f32 %v12908_v63, %v4631_v24  ;;  %v4809_v31 = vpop.f32.mrf.mxu2 }
 0x528   : > { %v4898_v38 = vpop.f32.mrf.mxu3 }
 0x529   : > { %v4979_v59 = vadd.f32 %v6333_v39, %v4947_v11  ;;  %v4721_v28 = vadd.f32 %v4720_v42, %v4632_v22 }
 0x52b   : > { %5011 = vst [vmem:[%s12365_s30 + $0x98] sm:$0xff] %v4979_v59  ;;  %v4810_v21 = vadd.f32 %v4809_v31, %v4721_v28 }
 0x52d   : > { %v4899_v32 = vadd.f32 %v4898_v38, %v4810_v21  ;;  %v4722_v2 = vpop.f32.mrf.mxu1  ;;  %v6339_v38 = vld [vmem:[%s6745_s18 + $0xc8] sm:$0xff] }
 0x52e   : > { %v4633_v5 = vpop.f32.mrf.mxu0 }
 0x52f   : > { %v4948_v3 = vmul.f32 0.5, %v4899_v32  ;;  %v4634_v4 = vadd.f32 %v12908_v63, %v4633_v5  ;;  %v4811_v60 = vpop.f32.mrf.mxu2 }
 0x530   : > { %v4900_v9 = vpop.f32.mrf.mxu3 }
 0x531   : > { %v4980_v20 = vadd.f32 %v6334_v10, %v4948_v3  ;;  %v4723_v40 = vadd.f32 %v4722_v2, %v4634_v4 }
 0x533   : > { %5012 = vst [vmem:[%s12365_s30 + $0xa0] sm:$0xff] %v4980_v20  ;;  %v4812_v51 = vadd.f32 %v4811_v60, %v4723_v40 }
 0x535   : > { %v4901_v8 = vadd.f32 %v4900_v9, %v4812_v51  ;;  %v4725_v53 = vpop.f32.mrf.mxu1  ;;  %v6340_v9 = vld [vmem:[%s6745_s18 + $0xd0] sm:$0xff] }
 0x536   : > { %v4636_v26 = vpop.f32.mrf.mxu0 }
 0x537   : > { %v4949_v33 = vmul.f32 0.5, %v4901_v8  ;;  %v4637_v35 = vadd.f32 %v12908_v63, %v4636_v26  ;;  %v4814_v54 = vpop.f32.mrf.mxu2 }
 0x538   : > { %v4903_v29 = vpop.f32.mrf.mxu3 }
 0x539   : > { %v4981_v52 = vadd.f32 %v6335_v25, %v4949_v33  ;;  %v4726_v1 = vadd.f32 %v4725_v53, %v4637_v35 }
 0x53b   : > { %5013 = vst [vmem:[%s12365_s30 + $0xa8] sm:$0xff] %v4981_v52  ;;  %v4815_v14 = vadd.f32 %v4814_v54, %v4726_v1 }
 0x53d   : > { %v4904_v44 = vadd.f32 %v4903_v29, %v4815_v14  ;;  %v4727_v27 = vpop.f32.mrf.mxu1  ;;  %v6341_v29 = vld [vmem:[%s6745_s18 + $0xd8] sm:$0xff] }
 0x53e   : > { %v4638_v18 = vpop.f32.mrf.mxu0 }
 0x53f   : > { %v4950_v49 = vmul.f32 0.5, %v4904_v44  ;;  %v4639_v36 = vadd.f32 %v12908_v63, %v4638_v18  ;;  %v4816_v17 = vpop.f32.mrf.mxu2 }
 0x540   : > { %v4905_v47 = vpop.f32.mrf.mxu3 }
 0x541   : > { %v4982_v30 = vadd.f32 %v6336_v58, %v4950_v49  ;;  %v4728_v62 = vadd.f32 %v4727_v27, %v4639_v36 }
 0x543   : > { %5014 = vst [vmem:[%s12365_s30 + $0xb0] sm:$0xff] %v4982_v30  ;;  %v4817_v19 = vadd.f32 %v4816_v17, %v4728_v62 }
 0x545   : > { %v4906_v12 = vadd.f32 %v4905_v47, %v4817_v19  ;;  %v4730_v56 = vpop.f32.mrf.mxu1  ;;  %v6342_v47 = vld [vmem:[%s6745_s18 + $0xe0] sm:$0xff] }
 0x546   : > { %v4641_v37 = vpop.f32.mrf.mxu0 }
 0x547   : > { %v4951_v46 = vmul.f32 0.5, %v4906_v12  ;;  %v4642_v15 = vadd.f32 %v12908_v63, %v4641_v37  ;;  %v4819_v61 = vpop.f32.mrf.mxu2 }
 0x548   : > { %v4908_v45 = vpop.f32.mrf.mxu3 }
 0x549   : > { %v4983_v13 = vadd.f32 %v6337_v50, %v4951_v46  ;;  %v4731_v43 = vadd.f32 %v4730_v56, %v4642_v15 }
 0x54b   : > { %5015 = vst [vmem:[%s12365_s30 + $0xb8] sm:$0xff] %v4983_v13  ;;  %v4820_v41 = vadd.f32 %v4819_v61, %v4731_v43 }
 0x54d   : > { %v4909_v16 = vadd.f32 %v4908_v45, %v4820_v41  ;;  %v4732_v55 = vpop.f32.mrf.mxu1  ;;  %v6343_v45 = vld [vmem:[%s6745_s18 + $0xe8] sm:$0xff] }
 0x54e   : > { %v4643_v6 = vpop.f32.mrf.mxu0 }
 0x54f   : > { %v4952_v57 = vmul.f32 0.5, %v4909_v16  ;;  %v4644_v7 = vadd.f32 %v12908_v63, %v4643_v6  ;;  %v4821_v23 = vpop.f32.mrf.mxu2 }
 0x550   : > { %v4910_v24 = vpop.f32.mrf.mxu3 }
 0x551   : > { %v4984_v48 = vadd.f32 %v6338_v0, %v4952_v57  ;;  %v4733_v34 = vadd.f32 %v4732_v55, %v4644_v7 }
 0x553   : > { %5016 = vst [vmem:[%s12365_s30 + $0xc0] sm:$0xff] %v4984_v48  ;;  %v4822_v42 = vadd.f32 %v4821_v23, %v4733_v34 }
 0x555   : > { %v4911_v11 = vadd.f32 %v4910_v24, %v4822_v42  ;;  %v4735_v31 = vpop.f32.mrf.mxu1  ;;  %v6344_v24 = vld [vmem:[%s6745_s18 + $0xf0] sm:$0xff] }
 0x556   : > { %v4646_v22 = vpop.f32.mrf.mxu0 }
 0x557   : > { %v4953_v39 = vmul.f32 0.5, %v4911_v11  ;;  %v4647_v59 = vadd.f32 %v12908_v63, %v4646_v22  ;;  %v4824_v28 = vpop.f32.mrf.mxu2 }
 0x558   : > { %v4913_v5 = vpop.f32.mrf.mxu3 }
 0x559   : > { %v4985_v21 = vadd.f32 %v6339_v38, %v4953_v39  ;;  %v4736_v32 = vadd.f32 %v4735_v31, %v4647_v59  ;;  %v6345_v59 = vld [vmem:[%s6745_s18 + $0xf8] sm:$0xff] }
 0x55b   : > { %5017 = vst [vmem:[%s12365_s30 + $0xc8] sm:$0xff] %v4985_v21  ;;  %v4825_v2 = vadd.f32 %v4824_v28, %v4736_v32 }
 0x55d   : > { %v4914_v3 = vadd.f32 %v4913_v5, %v4825_v2  ;;  %v4737_v60 = vpop.f32.mrf.mxu1 }
 0x55e   : > { %v4648_v4 = vpop.f32.mrf.mxu0 }
 0x55f   : > { %v4954_v10 = vmul.f32 0.5, %v4914_v3  ;;  %v4649_v20 = vadd.f32 %v12908_v63, %v4648_v4  ;;  %v4826_v40 = vpop.f32.mrf.mxu2 }
 0x560   : > { %v4915_v26 = vpop.f32.mrf.mxu3 }
 0x561   : > { %v4986_v51 = vadd.f32 %v6340_v9, %v4954_v10  ;;  %v4738_v8 = vadd.f32 %v4737_v60, %v4649_v20 }
 0x563   : > { %5018 = vst [vmem:[%s12365_s30 + $0xd0] sm:$0xff] %v4986_v51  ;;  %v4827_v53 = vadd.f32 %v4826_v40, %v4738_v8 }
 0x565   : > { %v4916_v33 = vadd.f32 %v4915_v26, %v4827_v53  ;;  %v4740_v54 = vpop.f32.mrf.mxu1 }
 0x566   : > { %v4651_v35 = vpop.f32.mrf.mxu0 }
 0x567   : > { %v4955_v25 = vmul.f32 0.5, %v4916_v33  ;;  %v4652_v52 = vadd.f32 %v12908_v63, %v4651_v35  ;;  %v4829_v1 = vpop.f32.mrf.mxu2 }
 0x568   : > { %v4918_v18 = vpop.f32.mrf.mxu3 }
 0x569   : > { %v4987_v14 = vadd.f32 %v6341_v29, %v4955_v25  ;;  %v4741_v44 = vadd.f32 %v4740_v54, %v4652_v52 }
 0x56b   : > { %5019 = vst [vmem:[%s12365_s30 + $0xd8] sm:$0xff] %v4987_v14  ;;  %v4830_v27 = vadd.f32 %v4829_v1, %v4741_v44 }
 0x56d   : > { %v4919_v49 = vadd.f32 %v4918_v18, %v4830_v27  ;;  %v4742_v17 = vpop.f32.mrf.mxu1 }
 0x56e   : > { %v4653_v36 = vpop.f32.mrf.mxu0 }
 0x56f   : > { %v4956_v58 = vmul.f32 0.5, %v4919_v49  ;;  %v4654_v30 = vadd.f32 %v12908_v63, %v4653_v36  ;;  %v4831_v62 = vpop.f32.mrf.mxu2 }
 0x570   : > { %v4920_v37 = vpop.f32.mrf.mxu3 }
 0x571   : > { %v4988_v19 = vadd.f32 %v6342_v47, %v4956_v58  ;;  %v4743_v12 = vadd.f32 %v4742_v17, %v4654_v30 }
 0x573   : > { %5020 = vst [vmem:[%s12365_s30 + $0xe0] sm:$0xff] %v4988_v19  ;;  %v4832_v56 = vadd.f32 %v4831_v62, %v4743_v12 }
 0x575   : > { %v4921_v46 = vadd.f32 %v4920_v37, %v4832_v56  ;;  %v4745_v61 = vpop.f32.mrf.mxu1 }
 0x576   : > { %v4656_v15 = vpop.f32.mrf.mxu0 }
 0x577   : > { %v4957_v50 = vmul.f32 0.5, %v4921_v46  ;;  %v4657_v13 = vadd.f32 %v12908_v63, %v4656_v15  ;;  %v4834_v43 = vpop.f32.mrf.mxu2 }
 0x578   : > { %v4923_v6 = vpop.f32.mrf.mxu3 }
 0x579   : > { %v4989_v41 = vadd.f32 %v6343_v45, %v4957_v50  ;;  %v4746_v16 = vadd.f32 %v4745_v61, %v4657_v13 }
 0x57b   : > { %5021 = vst [vmem:[%s12365_s30 + $0xe8] sm:$0xff] %v4989_v41  ;;  %v4835_v55 = vadd.f32 %v4834_v43, %v4746_v16 }
 0x57d   : > { %v4924_v57 = vadd.f32 %v4923_v6, %v4835_v55  ;;  %v4747_v48 = vpop.f32.mrf.mxu1 }
 0x57e   : > { %v4658_v7 = vpop.f32.mrf.mxu0 }
 0x57f   : > { %v4958_v23 = vmul.f32 0.5, %v4924_v57  ;;  %v4659_v0 = vadd.f32 %v12908_v63, %v4658_v7  ;;  %v4836_v34 = vpop.f32.mrf.mxu2 }
 0x580   : > { %v4925_v31 = vpop.f32.mrf.mxu3 }
 0x581   : > { %v4990_v42 = vadd.f32 %v6344_v24, %v4958_v23  ;;  %v4748_v11 = vadd.f32 %v4747_v48, %v4659_v0 }
 0x583   : > { %5022 = vst [vmem:[%s12365_s30 + $0xf0] sm:$0xff] %v4990_v42  ;;  %v4837_v22 = vadd.f32 %v4836_v34, %v4748_v11 }
 0x585   : > { %v4926_v39 = vadd.f32 %v4925_v31, %v4837_v22 }
 0x587   : > { %v4959_v63 = vmul.f32 0.5, %v4926_v39 }
 0x589   : > { %v4991_v28 = vadd.f32 %v6345_v59, %v4959_v63 }
 0x58b   : > { %5023 = vst [vmem:[%s12365_s30 + $0xf8] sm:$0xff] %v4991_v28 }
 0x58c   : > { %6523 = shalt.err (!%p6520_p11)
}
 0x58d   : > { %s6583_s13 = smov 128   ;;  %s6584_s18 = smov 8  }
 0x58e   : > { %5641 = dma.vmem_to_hbm [thread:$0]  (%p6712_p5), %s5038_s15, 4096, %s5040_s16, %s5025_s28, %s6583_s13, %s6583_s13, %s6584_s18  }
 0x58f PF: > { %s5054_s30 = sand.u32 1, %s6558_s24   ;;  %p14050_p12 = scmp.ge.s32.totalorder %s6570_s27, 2 }
 0x590   : > { %s5055_s19 = scalar_lea.sflag [#allocation4], %s5054_s30 }
 0x591   : > { %p5661_p13 = pnand %p14050_p12, %p6660_p6 }
 0x593   : > { %p5662_p0 = pneg %p5661_p13 }
 0x595   : > { %6553 = dma.done.wait (%p5662_p0), %s5055_s19, 4096  }
 0x596   : > { %6555 = vsyncadd (%p5662_p0), %s5055_s19, 4294963200  ;;  %p22_p3 = scmp.ge.s32.totalorder %s6699_s22, 4   ;;  %s14051_s24 = smov %s6562_s25 }
 0x597   : > { %s14052_s25 = smov %s6566_s26  ;;  %s14053_s26 = smov %s6708_s21 }
 0x598   : > { %s14054_s27 = smov %s6699_s22  ;;  %24 = sbr.rel (!%p22_p3) target bundleno = 9 (0x9), region = 109 }
 0x59d   :  { %5061 = vsyncpa [#allocation3], 1 }
 0x59e   :  { %5063 = vsyncpa [#allocation3 + $0x1], 1 }
 0x59f   :  { %5064 = vsyncpa [#allocation6], 1 }
 0x5a0   :  { %5065 = vsyncpa [#allocation9], 1 }
 0x5a1   :  { %5066 = vsyncpa [#allocation4], 1 }
 0x5a2   :  { %5068 = vsyncpa [#allocation4 + $0x1], 1 }

</bundles_post_ra>
